<compile_context>
chip_gen: v7x
topology: tpu7x:2x2x1
jax: 0.10.0
libtpu: 0.0.40
codegen_flags: <defaults>
</compile_context>

<pallas_src>
import numpy as np
import jax
import jax.numpy as jnp
from jax.experimental import pallas as pl
from jax.experimental.pallas import tpu as pltpu

# ---- Module hyperparameters --------------------------------------------------
MAX_LEN = 16            # max_len (sequence length)
WV_DIM = 300            # embedding_dim (hard-coded 300 in the module)
CLASS_NUM = 4
CNN_CHANNEL = 64
POOL_LEFT_DIM = 3
EMBEDDING_NUM = 50
BATCH = 2
BN_EPS = 1e-5

PAD_LEFT = 2            # largest one-sided torch padding (conv_5gram)
LP = 21                 # per-sample rows: 2 left zeros + 16 tokens + 3 right zeros
KMAX = 5                # fused conv tap window
BLOCK_TAIL_PAD = 16     # extra zero rows per block: tap slices stay in bounds
FC_PAD = 128            # lane-dense logits width (real classes = 4)
SPB_CAP = 48            # default samples per block -> r = 48*21 = 1008 conv rows

# (param prefix, kernel_size, torch_pad, fused tap offset = PAD_LEFT - pad, L_out)
BRANCH_DEFS = (
    ("conv1", 1, 0, 2, MAX_LEN),
    ("conv2", 2, 1, 1, MAX_LEN + 1),
    ("conv3", 3, 1, 1, MAX_LEN),
    ("conv5", 5, 2, 0, MAX_LEN),
)
NUM_BRANCH = len(BRANCH_DEFS)
CONV_OUT = NUM_BRANCH * CNN_CHANNEL             # 256 fused conv output lanes
POOL_OUT = POOL_LEFT_DIM * CONV_OUT             # 768 pooled feature lanes


# ---- Kernel ------------------------------------------------------------------
def _make_kernel(r):
    def kernel(x_ref, wf_ref, scale_ref, shift_ref, wt_ref, sum_ref,
               wfc_ref, bfc_ref, out_ref):
        # Fused conv: 5 (r, 300) x (300, 256) bf16 MXU matmuls, f32 accumulation.
        acc = jnp.dot(x_ref[0:r, :], wf_ref[0],
                      preferred_element_type=jnp.float32)
        for k in range(1, KMAX):
            acc = acc + jnp.dot(x_ref[k:k + r, :], wf_ref[k],
                                preferred_element_type=jnp.float32)

        # Eval BatchNorm (conv bias folded into shift) + ReLU.
        act = jnp.maximum(acc * scale_ref[...] + shift_ref[...], 0.0)
        act_bf = act.astype(jnp.bfloat16)

        srows = sum_ref[...]                       # (spb, r) 0/1 bf16
        spb = srows.shape[0]

        # AdaptiveAvgPool1d(3) + Linear, one pool bin at a time (keeps the live
        # intermediate at (r, 256) instead of a (r, 768) f32 concat).
        logits = jnp.zeros((spb, FC_PAD), jnp.float32)
        for p in range(POOL_LEFT_DIM):
            w_p = act_bf * wt_ref[p]                               # (r, 256) bf16
            pooled = jnp.dot(srows, w_p,
                             preferred_element_type=jnp.float32)   # (spb, 256) f32
            logits = logits + jnp.dot(pooled, wfc_ref[p],
                                      preferred_element_type=jnp.float32)

        # Lane-dense (spb, 128) store; dropout = identity in eval.
        out_ref[...] = (logits + bfc_ref[...]).astype(out_ref.dtype)
    return kernel


# ---- Static structural weights (built once on host) --------------------------
def _pool_bins(lout):
    # PyTorch AdaptiveAvgPool1d bin boundaries.
    return [((p * lout) // POOL_LEFT_DIM, -(-((p + 1) * lout) // POOL_LEFT_DIM))
            for p in range(POOL_LEFT_DIM)]


def _build_pool_mask(spb, r):
    """(3, r, 256) exact 0/1 mask: [p, s*LP+t, br*64:(br+1)*64] = 1 iff time t
    of branch br is in adaptive-pool bin p (per sample).  1/bin_width is folded
    into the fc weight, so the mask is exact in bf16 and masks all junk rows."""
    m = np.zeros((POOL_LEFT_DIM, r, CONV_OUT), np.float32)
    for s in range(spb):
        for br, (_n, _k, _p, _t, lout) in enumerate(BRANCH_DEFS):
            c0 = br * CNN_CHANNEL
            for p, (t0, t1) in enumerate(_pool_bins(lout)):
                m[p, s * LP + t0:s * LP + t1, c0:c0 + CNN_CHANNEL] = 1.0
    return m


def _build_row_sum(spb, r):
    """(spb, r) 0/1 block row-sum matrix (1 over each sample's rows)."""
    m = np.zeros((spb, r), np.float32)
    for s in range(spb):
        m[s, s * LP:(s + 1) * LP] = 1.0
    return m


def _fold_params(params):
    # Fused conv weight (5, 300, 256): branch br -> lanes [br*64, (br+1)*64).
    wf = jnp.zeros((KMAX, WV_DIM, CONV_OUT), jnp.float32)
    for br, (name, ksize, _pad, tap0, _lout) in enumerate(BRANCH_DEFS):
        w = jnp.transpose(params[name + "_w"], (2, 1, 0))      # (K, Cin, Cout)
        wf = wf.at[tap0:tap0 + ksize, :,
                   br * CNN_CHANNEL:(br + 1) * CNN_CHANNEL].set(w)

    # Eval BatchNorm folded together with the per-branch conv biases.
    scale = params["bn_gamma"] / jnp.sqrt(params["bn_var"] + BN_EPS)   # (64,)
    shift = params["bn_beta"] - params["bn_mean"] * scale
    scale256 = jnp.tile(scale, NUM_BRANCH).reshape(1, CONV_OUT)
    shift256 = jnp.concatenate(
        [shift + params[name + "_b"] * scale for (name, *_r) in BRANCH_DEFS]
    ).reshape(1, CONV_OUT)

    # fc weight rearranged to the pooled-feature layout p*256 + br*64 + c
    # (PyTorch flatten order of new_x.view is c*12 + br*3 + p), with the
    # 1/bin_width pooling factors folded in and the class dim padded to 128.
    fw = params["fc_w"].reshape(CLASS_NUM, CNN_CHANNEL, NUM_BRANCH, POOL_LEFT_DIM)
    wfc = jnp.transpose(fw, (3, 2, 1, 0)).reshape(POOL_OUT, CLASS_NUM)
    inv_w = np.zeros((POOL_OUT, 1), np.float32)
    for br, (_n, _k, _p, _t, lout) in enumerate(BRANCH_DEFS):
        for p, (t0, t1) in enumerate(_pool_bins(lout)):
            c0 = p * CONV_OUT + br * CNN_CHANNEL
            inv_w[c0:c0 + CNN_CHANNEL] = 1.0 / (t1 - t0)
    wfc = wfc * jnp.asarray(inv_w)
    wfc = jnp.pad(wfc, ((0, 0), (0, FC_PAD - CLASS_NUM)))
    wfc = wfc.reshape(POOL_LEFT_DIM, CONV_OUT, FC_PAD)                 # (3,256,128)
    bfc = jnp.pad(params["fc_b"], (0, FC_PAD - CLASS_NUM)).reshape(1, FC_PAD)
    return wf.astype(jnp.bfloat16), scale256, shift256, wfc, bfc


# ---- Wrapper -----------------------------------------------------------------
def _round_up(x, m):
    return -(-x // m) * m


def textcnn_forward(token_ids, params, samples_per_block=None):
    b_sz = token_ids.shape[0]
    # Block sizing: large blocks (r ~ 1K rows) amortize the ~0.35us/step grid
    # overhead; keep >= 2 blocks when the batch allows (v7x has 2 TensorCores);
    # spb is a multiple of 16 so r = spb*21 stays tile-aligned for bf16.
    if samples_per_block is None:
        spb = min(SPB_CAP, _round_up(b_sz, 16))
        if b_sz > 16 and _round_up(b_sz, spb) == spb:   # would be a single block
            spb = max(16, _round_up(-(-b_sz // 2), 16))
    else:
        spb = max(16, _round_up(samples_per_block, 16))
    nblk = -(-b_sz // spb)
    bp = nblk * spb
    r = spb * LP                       # conv rows per block (multiple of 16)
    rx = r + BLOCK_TAIL_PAD            # x rows per block (tap slices in bounds)

    wf, scale, shift, wfc, bfc = _fold_params(params)
    wt = jnp.asarray(_build_pool_mask(spb, r), dtype=jnp.bfloat16)
    sm = jnp.asarray(_build_row_sum(spb, r), dtype=jnp.bfloat16)

    # Embedding gather + per-sample zero padding (plain-JAX glue, done in bf16).
    # TODO(synk): move gather in-kernel (scalar-prefetched ids + manual DMA from
    #             an HBM-resident table) to cut input HBM bytes a further ~2x.
    emb = params["embedding"].astype(jnp.bfloat16)[token_ids]          # (B,16,300)
    xp = jnp.pad(emb, ((0, bp - b_sz),
                       (PAD_LEFT, LP - PAD_LEFT - MAX_LEN), (0, 0)))   # (bp,21,300)
    xp = xp.reshape(nblk, r, WV_DIM)
    xp = jnp.pad(xp, ((0, 0), (0, BLOCK_TAIL_PAD), (0, 0)))            # (nblk,rx,300)
    xp = xp.reshape(nblk * rx, WV_DIM)

    def const_spec(arr):
        zeros = (0,) * arr.ndim
        return pl.BlockSpec(arr.shape, lambda b, _z=zeros: _z)

    out = pl.pallas_call(
        _make_kernel(r),
        out_shape=jax.ShapeDtypeStruct((nblk * spb, FC_PAD), jnp.float32),
        grid_spec=pltpu.PrefetchScalarGridSpec(
            num_scalar_prefetch=0,
            grid=(nblk,),
            in_specs=[pl.BlockSpec((rx, WV_DIM), lambda b: (b, 0)),
                      const_spec(wf), const_spec(scale), const_spec(shift),
                      const_spec(wt), const_spec(sm), const_spec(wfc),
                      const_spec(bfc)],
            out_specs=pl.BlockSpec((spb, FC_PAD), lambda b: (b, 0)),
        ),
        compiler_params=pltpu.CompilerParams(
            dimension_semantics=("parallel",),
            vmem_limit_bytes=32 * 1024 * 1024),
    )(xp, wf, scale, shift, wt, sm, wfc, bfc)
    return out[:b_sz, :CLASS_NUM]


# ---- Pure-JAX reference (torch semantics, independent of the fused layout) ----
def textcnn_reference(token_ids, params):
    emb = params["embedding"][token_ids]                               # (B, L, D)
    scale = params["bn_gamma"] / jnp.sqrt(params["bn_var"] + BN_EPS)
    shift = params["bn_beta"] - params["bn_mean"] * scale
    feats = []
    for (name, ksize, pad, _tap, lout) in BRANCH_DEFS:
        w = params[name + "_w"]                                        # (Co, Ci, K)
        x = jnp.pad(emb, ((0, 0), (pad, pad), (0, 0)))
        conv = sum(jnp.einsum("bti,oi->bto", x[:, k:k + lout, :], w[:, :, k])
                   for k in range(ksize)) + params[name + "_b"]
        act = jnp.maximum(conv * scale + shift, 0.0)                   # (B, lout, C)
        pooled = [jnp.mean(act[:, t0:t1, :], axis=1) for (t0, t1) in _pool_bins(lout)]
        feats.append(jnp.stack(pooled, axis=1))                        # (B, P, C)
    newx = jnp.stack(feats, axis=1)                                    # (B, BR, P, C)
    newx = jnp.transpose(newx, (0, 3, 1, 2)).reshape(token_ids.shape[0], -1)
    return newx @ params["fc_w"].T + params["fc_b"]


# ---- Parameters ----------------------------------------------------------------
def init_params(key):
    ks = jax.random.split(key, 11)

    def rnd(k, shape, scl=0.1):
        return scl * jax.random.normal(k, shape, dtype=jnp.float32)

    emb = rnd(ks[0], (EMBEDDING_NUM, WV_DIM), 1.0).at[0].set(0.0)  # padding_idx=0
    return {
        "embedding": emb,
        "conv1_w": rnd(ks[1], (CNN_CHANNEL, WV_DIM, 1)),   # torch (Cout, Cin, K)
        "conv1_b": rnd(ks[2], (CNN_CHANNEL,)),
        "conv2_w": rnd(ks[3], (CNN_CHANNEL, WV_DIM, 2)),
        "conv2_b": rnd(ks[4], (CNN_CHANNEL,)),
        "conv3_w": rnd(ks[5], (CNN_CHANNEL, WV_DIM, 3)),
        "conv3_b": rnd(ks[6], (CNN_CHANNEL,)),
        "conv5_w": rnd(ks[7], (CNN_CHANNEL, WV_DIM, 5)),
        "conv5_b": rnd(ks[8], (CNN_CHANNEL,)),
        "bn_gamma": jnp.ones((CNN_CHANNEL,), jnp.float32),
        "bn_beta": jnp.zeros((CNN_CHANNEL,), jnp.float32),
        "bn_mean": jnp.zeros((CNN_CHANNEL,), jnp.float32),
        "bn_var": jnp.ones((CNN_CHANNEL,), jnp.float32),
        "fc_w": rnd(ks[9], (CLASS_NUM, CNN_CHANNEL * NUM_BRANCH * POOL_LEFT_DIM)),
        "fc_b": rnd(ks[10], (CLASS_NUM,)),
    }


if __name__ == "__main__":
    key = jax.random.PRNGKey(0)
    pkey, xkey = jax.random.split(key)
    params = init_params(pkey)
    x_ids = jax.random.randint(xkey, (BATCH, MAX_LEN), 0, EMBEDDING_NUM,
                               dtype=jnp.int32)

    logits = textcnn_forward(x_ids, params)
    jax.block_until_ready(logits)
    assert logits.shape == (BATCH, CLASS_NUM)
    assert bool(jnp.all(jnp.isfinite(logits)))

    ref = textcnn_reference(x_ids, params)
    # Tightened vs the previous 1e-1; atol guards near-zero logits given the
    # bf16 conv/pool inputs (f32 accumulation and f32 fc keep rel error ~1%).
    np.testing.assert_allclose(np.asarray(logits), np.asarray(ref),
                               rtol=2e-2, atol=5e-2)
    print("KERNEL_OK")
</pallas_src>

<mosaic_0001>
module attributes {stable_mosaic.version = 11 : i64} {
  func.func @kernel(%arg0: i32, %arg1: memref<352x300xbf16, #tpu.memory_space<vmem>>, %arg2: memref<5x300x256xbf16, #tpu.memory_space<vmem>>, %arg3: memref<1x256xf32, #tpu.memory_space<vmem>>, %arg4: memref<1x256xf32, #tpu.memory_space<vmem>>, %arg5: memref<3x336x256xbf16, #tpu.memory_space<vmem>>, %arg6: memref<16x336xbf16, #tpu.memory_space<vmem>>, %arg7: memref<3x256x128xf32, #tpu.memory_space<vmem>>, %arg8: memref<1x128xf32, #tpu.memory_space<vmem>>, %arg9: memref<16x128xf32, #tpu.memory_space<vmem>>) attributes {dimension_semantics = [#tpu.dimension_semantics<parallel>], iteration_bounds = array<i64: 1>, scalar_prefetch = 0 : i64, scratch_operands = 0 : i64, tpu.core_type = #tpu.core_type<tc>, window_params = [{transform_indices = @transform_0, window_bounds = array<i64: 352, 300>}, {pipeline_mode = #tpu.pipeline_mode<synchronous>, transform_indices = @transform_1, window_bounds = array<i64: 5, 300, 256>}, {pipeline_mode = #tpu.pipeline_mode<synchronous>, transform_indices = @transform_2, window_bounds = array<i64: 1, 256>}, {pipeline_mode = #tpu.pipeline_mode<synchronous>, transform_indices = @transform_3, window_bounds = array<i64: 1, 256>}, {pipeline_mode = #tpu.pipeline_mode<synchronous>, transform_indices = @transform_4, window_bounds = array<i64: 3, 336, 256>}, {pipeline_mode = #tpu.pipeline_mode<synchronous>, transform_indices = @transform_5, window_bounds = array<i64: 16, 336>}, {pipeline_mode = #tpu.pipeline_mode<synchronous>, transform_indices = @transform_6, window_bounds = array<i64: 3, 256, 128>}, {pipeline_mode = #tpu.pipeline_mode<synchronous>, transform_indices = @transform_7, window_bounds = array<i64: 1, 128>}, {transform_indices = @transform_8, window_bounds = array<i64: 16, 128>}]} {
    %c0 = arith.constant 0 : index
    %c0_0 = arith.constant 0 : index
    %0 = vector.load %arg1[%c0, %c0_0] : memref<352x300xbf16, #tpu.memory_space<vmem>>, vector<336x300xbf16>
    %c0_1 = arith.constant 0 : index
    %c0_2 = arith.constant 0 : index
    %c0_3 = arith.constant 0 : index
    %1 = vector.load %arg2[%c0_1, %c0_2, %c0_3] : memref<5x300x256xbf16, #tpu.memory_space<vmem>>, vector<1x300x256xbf16>
    %2 = vector.shape_cast %1 : vector<1x300x256xbf16> to vector<300x256xbf16>
    %cst = arith.constant dense<0.000000e+00> : vector<336x256xf32>
    %3 = tpu.matmul %0, %2, %cst {dimension_numbers = #tpu.dot_dimension_numbers<[1], [0], [0], [1], [0, 0, 1, 1], [], []>} : vector<336x300xbf16>, vector<300x256xbf16>, vector<336x256xf32> -> vector<336x256xf32>
    %c1 = arith.constant 1 : index
    %c0_4 = arith.constant 0 : index
    %4 = vector.load %arg1[%c1, %c0_4] : memref<352x300xbf16, #tpu.memory_space<vmem>>, vector<336x300xbf16>
    %c1_5 = arith.constant 1 : index
    %c0_6 = arith.constant 0 : index
    %c0_7 = arith.constant 0 : index
    %5 = vector.load %arg2[%c1_5, %c0_6, %c0_7] : memref<5x300x256xbf16, #tpu.memory_space<vmem>>, vector<1x300x256xbf16>
    %6 = vector.shape_cast %5 : vector<1x300x256xbf16> to vector<300x256xbf16>
    %cst_8 = arith.constant dense<0.000000e+00> : vector<336x256xf32>
    %7 = tpu.matmul %4, %6, %cst_8 {dimension_numbers = #tpu.dot_dimension_numbers<[1], [0], [0], [1], [0, 0, 1, 1], [], []>} : vector<336x300xbf16>, vector<300x256xbf16>, vector<336x256xf32> -> vector<336x256xf32>
    %8 = arith.addf %3, %7 : vector<336x256xf32>
    %c2 = arith.constant 2 : index
    %c0_9 = arith.constant 0 : index
    %9 = vector.load %arg1[%c2, %c0_9] : memref<352x300xbf16, #tpu.memory_space<vmem>>, vector<336x300xbf16>
    %c2_10 = arith.constant 2 : index
    %c0_11 = arith.constant 0 : index
    %c0_12 = arith.constant 0 : index
    %10 = vector.load %arg2[%c2_10, %c0_11, %c0_12] : memref<5x300x256xbf16, #tpu.memory_space<vmem>>, vector<1x300x256xbf16>
    %11 = vector.shape_cast %10 : vector<1x300x256xbf16> to vector<300x256xbf16>
    %cst_13 = arith.constant dense<0.000000e+00> : vector<336x256xf32>
    %12 = tpu.matmul %9, %11, %cst_13 {dimension_numbers = #tpu.dot_dimension_numbers<[1], [0], [0], [1], [0, 0, 1, 1], [], []>} : vector<336x300xbf16>, vector<300x256xbf16>, vector<336x256xf32> -> vector<336x256xf32>
    %13 = arith.addf %8, %12 : vector<336x256xf32>
    %c3 = arith.constant 3 : index
    %c0_14 = arith.constant 0 : index
    %14 = vector.load %arg1[%c3, %c0_14] : memref<352x300xbf16, #tpu.memory_space<vmem>>, vector<336x300xbf16>
    %c3_15 = arith.constant 3 : index
    %c0_16 = arith.constant 0 : index
    %c0_17 = arith.constant 0 : index
    %15 = vector.load %arg2[%c3_15, %c0_16, %c0_17] : memref<5x300x256xbf16, #tpu.memory_space<vmem>>, vector<1x300x256xbf16>
    %16 = vector.shape_cast %15 : vector<1x300x256xbf16> to vector<300x256xbf16>
    %cst_18 = arith.constant dense<0.000000e+00> : vector<336x256xf32>
    %17 = tpu.matmul %14, %16, %cst_18 {dimension_numbers = #tpu.dot_dimension_numbers<[1], [0], [0], [1], [0, 0, 1, 1], [], []>} : vector<336x300xbf16>, vector<300x256xbf16>, vector<336x256xf32> -> vector<336x256xf32>
    %18 = arith.addf %13, %17 : vector<336x256xf32>
    %c4 = arith.constant 4 : index
    %c0_19 = arith.constant 0 : index
    %19 = vector.load %arg1[%c4, %c0_19] : memref<352x300xbf16, #tpu.memory_space<vmem>>, vector<336x300xbf16>
    %c4_20 = arith.constant 4 : index
    %c0_21 = arith.constant 0 : index
    %c0_22 = arith.constant 0 : index
    %20 = vector.load %arg2[%c4_20, %c0_21, %c0_22] : memref<5x300x256xbf16, #tpu.memory_space<vmem>>, vector<1x300x256xbf16>
    %21 = vector.shape_cast %20 : vector<1x300x256xbf16> to vector<300x256xbf16>
    %cst_23 = arith.constant dense<0.000000e+00> : vector<336x256xf32>
    %22 = tpu.matmul %19, %21, %cst_23 {dimension_numbers = #tpu.dot_dimension_numbers<[1], [0], [0], [1], [0, 0, 1, 1], [], []>} : vector<336x300xbf16>, vector<300x256xbf16>, vector<336x256xf32> -> vector<336x256xf32>
    %23 = arith.addf %18, %22 : vector<336x256xf32>
    %c0_24 = arith.constant 0 : index
    %c0_25 = arith.constant 0 : index
    %24 = vector.load %arg3[%c0_24, %c0_25] : memref<1x256xf32, #tpu.memory_space<vmem>>, vector<1x256xf32>
    %25 = vector.broadcast %24 : vector<1x256xf32> to vector<336x256xf32>
    %26 = arith.mulf %23, %25 : vector<336x256xf32>
    %c0_26 = arith.constant 0 : index
    %c0_27 = arith.constant 0 : index
    %27 = vector.load %arg4[%c0_26, %c0_27] : memref<1x256xf32, #tpu.memory_space<vmem>>, vector<1x256xf32>
    %28 = vector.broadcast %27 : vector<1x256xf32> to vector<336x256xf32>
    %29 = arith.addf %26, %28 : vector<336x256xf32>
    %cst_28 = arith.constant 0.000000e+00 : f32
    %30 = vector.broadcast %cst_28 : f32 to vector<336x256xf32>
    %31 = arith.maximumf %29, %30 : vector<336x256xf32>
    %32 = arith.truncf %31 : vector<336x256xf32> to vector<336x256xbf16>
    %c0_29 = arith.constant 0 : index
    %c0_30 = arith.constant 0 : index
    %33 = vector.load %arg6[%c0_29, %c0_30] : memref<16x336xbf16, #tpu.memory_space<vmem>>, vector<16x336xbf16>
    %cst_31 = arith.constant 0.000000e+00 : f32
    %34 = vector.broadcast %cst_31 : f32 to vector<16x128xf32>
    %c0_32 = arith.constant 0 : index
    %c0_33 = arith.constant 0 : index
    %c0_34 = arith.constant 0 : index
    %35 = vector.load %arg5[%c0_32, %c0_33, %c0_34] : memref<3x336x256xbf16, #tpu.memory_space<vmem>>, vector<1x336x256xbf16>
    %36 = vector.shape_cast %35 : vector<1x336x256xbf16> to vector<336x256xbf16>
    %37 = arith.mulf %32, %36 : vector<336x256xbf16>
    %cst_35 = arith.constant dense<0.000000e+00> : vector<16x256xf32>
    %38 = tpu.matmul %33, %37, %cst_35 {dimension_numbers = #tpu.dot_dimension_numbers<[1], [0], [0], [1], [0, 0, 1, 1], [], []>} : vector<16x336xbf16>, vector<336x256xbf16>, vector<16x256xf32> -> vector<16x256xf32>
    %c0_36 = arith.constant 0 : index
    %c0_37 = arith.constant 0 : index
    %c0_38 = arith.constant 0 : index
    %39 = vector.load %arg7[%c0_36, %c0_37, %c0_38] : memref<3x256x128xf32, #tpu.memory_space<vmem>>, vector<1x256x128xf32>
    %40 = vector.shape_cast %39 : vector<1x256x128xf32> to vector<256x128xf32>
    %cst_39 = arith.constant dense<0.000000e+00> : vector<16x128xf32>
    %41 = tpu.matmul %38, %40, %cst_39 {dimension_numbers = #tpu.dot_dimension_numbers<[1], [0], [0], [1], [0, 0, 1, 1], [], []>} : vector<16x256xf32>, vector<256x128xf32>, vector<16x128xf32> -> vector<16x128xf32>
    %42 = arith.addf %34, %41 : vector<16x128xf32>
    %c1_40 = arith.constant 1 : index
    %c0_41 = arith.constant 0 : index
    %c0_42 = arith.constant 0 : index
    %43 = vector.load %arg5[%c1_40, %c0_41, %c0_42] : memref<3x336x256xbf16, #tpu.memory_space<vmem>>, vector<1x336x256xbf16>
    %44 = vector.shape_cast %43 : vector<1x336x256xbf16> to vector<336x256xbf16>
    %45 = arith.mulf %32, %44 : vector<336x256xbf16>
    %cst_43 = arith.constant dense<0.000000e+00> : vector<16x256xf32>
    %46 = tpu.matmul %33, %45, %cst_43 {dimension_numbers = #tpu.dot_dimension_numbers<[1], [0], [0], [1], [0, 0, 1, 1], [], []>} : vector<16x336xbf16>, vector<336x256xbf16>, vector<16x256xf32> -> vector<16x256xf32>
    %c1_44 = arith.constant 1 : index
    %c0_45 = arith.constant 0 : index
    %c0_46 = arith.constant 0 : index
    %47 = vector.load %arg7[%c1_44, %c0_45, %c0_46] : memref<3x256x128xf32, #tpu.memory_space<vmem>>, vector<1x256x128xf32>
    %48 = vector.shape_cast %47 : vector<1x256x128xf32> to vector<256x128xf32>
    %cst_47 = arith.constant dense<0.000000e+00> : vector<16x128xf32>
    %49 = tpu.matmul %46, %48, %cst_47 {dimension_numbers = #tpu.dot_dimension_numbers<[1], [0], [0], [1], [0, 0, 1, 1], [], []>} : vector<16x256xf32>, vector<256x128xf32>, vector<16x128xf32> -> vector<16x128xf32>
    %50 = arith.addf %42, %49 : vector<16x128xf32>
    %c2_48 = arith.constant 2 : index
    %c0_49 = arith.constant 0 : index
    %c0_50 = arith.constant 0 : index
    %51 = vector.load %arg5[%c2_48, %c0_49, %c0_50] : memref<3x336x256xbf16, #tpu.memory_space<vmem>>, vector<1x336x256xbf16>
    %52 = vector.shape_cast %51 : vector<1x336x256xbf16> to vector<336x256xbf16>
    %53 = arith.mulf %32, %52 : vector<336x256xbf16>
    %cst_51 = arith.constant dense<0.000000e+00> : vector<16x256xf32>
    %54 = tpu.matmul %33, %53, %cst_51 {dimension_numbers = #tpu.dot_dimension_numbers<[1], [0], [0], [1], [0, 0, 1, 1], [], []>} : vector<16x336xbf16>, vector<336x256xbf16>, vector<16x256xf32> -> vector<16x256xf32>
    %c2_52 = arith.constant 2 : index
    %c0_53 = arith.constant 0 : index
    %c0_54 = arith.constant 0 : index
    %55 = vector.load %arg7[%c2_52, %c0_53, %c0_54] : memref<3x256x128xf32, #tpu.memory_space<vmem>>, vector<1x256x128xf32>
    %56 = vector.shape_cast %55 : vector<1x256x128xf32> to vector<256x128xf32>
    %cst_55 = arith.constant dense<0.000000e+00> : vector<16x128xf32>
    %57 = tpu.matmul %54, %56, %cst_55 {dimension_numbers = #tpu.dot_dimension_numbers<[1], [0], [0], [1], [0, 0, 1, 1], [], []>} : vector<16x256xf32>, vector<256x128xf32>, vector<16x128xf32> -> vector<16x128xf32>
    %58 = arith.addf %50, %57 : vector<16x128xf32>
    %c0_56 = arith.constant 0 : index
    %c0_57 = arith.constant 0 : index
    %59 = vector.load %arg8[%c0_56, %c0_57] : memref<1x128xf32, #tpu.memory_space<vmem>>, vector<1x128xf32>
    %60 = vector.broadcast %59 : vector<1x128xf32> to vector<16x128xf32>
    %61 = arith.addf %58, %60 : vector<16x128xf32>
    %c0_58 = arith.constant 0 : index
    %c0_59 = arith.constant 0 : index
    %62 = vector.load %arg9[%c0_58, %c0_59] : memref<16x128xf32, #tpu.memory_space<vmem>>, vector<16x128xf32>
    tpu.vector_store %arg9[%c0_58, %c0_59], %61 {strides = array<i32>} : memref<16x128xf32, #tpu.memory_space<vmem>>, vector<16x128xf32>,
    return
  }
  func.func @transform_0(%arg0: i32) -> (i32, i32) {
    %c0_i32 = arith.constant 0 : i32
    %c0_i32_0 = arith.constant 0 : i32
    return %arg0, %c0_i32 : i32, i32
  }
  func.func @transform_1(%arg0: i32) -> (i32, i32, i32) {
    %c0_i32 = arith.constant 0 : i32
    %c0_i32_0 = arith.constant 0 : i32
    %c0_i32_1 = arith.constant 0 : i32
    %c0_i32_2 = arith.constant 0 : i32
    return %c0_i32, %c0_i32_0, %c0_i32_1 : i32, i32, i32
  }
  func.func @transform_2(%arg0: i32) -> (i32, i32) {
    %c0_i32 = arith.constant 0 : i32
    %c0_i32_0 = arith.constant 0 : i32
    %c0_i32_1 = arith.constant 0 : i32
    return %c0_i32, %c0_i32_0 : i32, i32
  }
  func.func @transform_3(%arg0: i32) -> (i32, i32) {
    %c0_i32 = arith.constant 0 : i32
    %c0_i32_0 = arith.constant 0 : i32
    %c0_i32_1 = arith.constant 0 : i32
    return %c0_i32, %c0_i32_0 : i32, i32
  }
  func.func @transform_4(%arg0: i32) -> (i32, i32, i32) {
    %c0_i32 = arith.constant 0 : i32
    %c0_i32_0 = arith.constant 0 : i32
    %c0_i32_1 = arith.constant 0 : i32
    %c0_i32_2 = arith.constant 0 : i32
    return %c0_i32, %c0_i32_0, %c0_i32_1 : i32, i32, i32
  }
  func.func @transform_5(%arg0: i32) -> (i32, i32) {
    %c0_i32 = arith.constant 0 : i32
    %c0_i32_0 = arith.constant 0 : i32
    %c0_i32_1 = arith.constant 0 : i32
    return %c0_i32, %c0_i32_0 : i32, i32
  }
  func.func @transform_6(%arg0: i32) -> (i32, i32, i32) {
    %c0_i32 = arith.constant 0 : i32
    %c0_i32_0 = arith.constant 0 : i32
    %c0_i32_1 = arith.constant 0 : i32
    %c0_i32_2 = arith.constant 0 : i32
    return %c0_i32, %c0_i32_0, %c0_i32_1 : i32, i32, i32
  }
  func.func @transform_7(%arg0: i32) -> (i32, i32) {
    %c0_i32 = arith.constant 0 : i32
    %c0_i32_0 = arith.constant 0 : i32
    %c0_i32_1 = arith.constant 0 : i32
    return %c0_i32, %c0_i32_0 : i32, i32
  }
  func.func @transform_8(%arg0: i32) -> (i32, i32) {
    %c0_i32 = arith.constant 0 : i32
    %c0_i32_0 = arith.constant 0 : i32
    return %arg0, %c0_i32 : i32, i32
  }
}

</mosaic_0001>

<bundles_post_ra>
// kernel: tpu_custom_call.1
= control target key start
LH: loop header
LB: loop body
LE: loop exit
PB: predicated region body
PF: predicated region fallthrough
CT: control target
= control target key end

     0   :  { %13 = vsyncpa [#allocation3], 0  ;;  %s13671_s0 = inlined_call_operand.vmem [shape: bf16[352,300], index: 0, kind: input, shape index: {}]   ;;  %s13672_s1 = inlined_call_operand.hbm [shape: bf16[5,300,256], index: 1, kind: input, shape index: {}]   ;;  %s13673_s2 = inlined_call_operand.vmem [shape: f32[1,256], index: 2, kind: input, shape index: {}]   ;;  %s13674_s3 = inlined_call_operand.vmem [shape: f32[1,256], index: 3, kind: input, shape index: {}]   ;;  %s13675_s4 = inlined_call_operand.hbm [shape: bf16[3,336,256], index: 4, kind: input, shape index: {}]   ;;  %s13676_s5 = inlined_call_operand.vmem [shape: bf16[16,336], index: 5, kind: input, shape index: {}]   ;;  %s13677_s6 = inlined_call_operand.vmem [shape: f32[3,256,128], index: 6, kind: input, shape index: {}]   ;;  %s13678_s7 = inlined_call_operand.vmem [shape: f32[1,128], index: 7, kind: input, shape index: {}]   ;;  %s13679_s8 = inlined_call_operand.hbm [shape: f32[16,128], index: 8, kind: output, shape index: {}]  }
   0x1   :  { %14 = vsyncpa [#allocation6], 0 }
   0x2   :  { %15 = vsyncpa [#allocation4], 0  ;;  %s10058_s27 = smov [#allocation2]   ;;  %s9986_s9 = scalar_lea.hbm %s13672_s1, 24320 }
   0x3   :  { %s23_s28 = sshll.u32 %s10058_s27, 4  ;;  %p9987_p0 = scmp.ne.s32.totalorder %s13672_s1, %s9986_s9  ;;  %s24_s28 = int_to_ptr.vmem [resolvable:$true] %s23_s28 }
   0x4   :  { %p9990_p1 = scmp.lt.u32.totalorder %s9986_s9, %s13672_s1 }
   0x6   :  { %p9992_p2 = pnand %p9990_p1, %p9987_p0 }
   0x8   :  { %9995 = shalt.err (!%p9992_p2)
}
   0x9   :  { %s9996_s14 = scalar_lea.vmem %s24_s28, 24320  ;;  %p10001_p4 = scmp.lt.s32.totalorder %s24_s28, %s24_s28 }
   0xa   :  { %p9997_p3 = scmp.ne.s32.totalorder %s24_s28, %s9996_s14  ;;  %p10002_p5 = scmp.lt.s32.totalorder %s9996_s14, %s9996_s14 }
   0xc   :  { %p10003_p6 = por %p10002_p5, %p10001_p4 }
   0xe   :  { %p10004_p7 = pnand %p10003_p6, %p9997_p3 }
  0x10   :  { %10007 = shalt.err (!%p10004_p7)
}
  0x11   :  { %s10059_s15 = smov 128   ;;  %s10060_s16 = smov 8  }
  0x12   :  { %29 = dma.hbm_to_vmem [thread:$0]  %s13672_s1, 24320, %s24_s28, [#allocation3], %s10059_s15, %s10059_s15, %s10060_s16  }
  0x13   :  { %s10061_s19 = smov [#allocation5]   ;;  %s10008_s23 = scalar_lea.hbm %s13675_s4, 16128 }
  0x14   :  { %s39_s20 = sshll.u32 %s10061_s19, 4  ;;  %p10009_p8 = scmp.ne.s32.totalorder %s13675_s4, %s10008_s23  ;;  %s40_s20 = int_to_ptr.vmem [resolvable:$true] %s39_s20 }
  0x15   :  { %p10012_p9 = scmp.lt.u32.totalorder %s10008_s23, %s13675_s4 }
  0x17   :  { %p10014_p10 = pnand %p10012_p9, %p10009_p8 }
  0x19   :  { %10017 = shalt.err (!%p10014_p10)
}
  0x1a   :  { %s10018_s29 = scalar_lea.vmem %s40_s20, 16128  ;;  %p10023_p12 = scmp.lt.s32.totalorder %s40_s20, %s40_s20 }
  0x1b   :  { %p10019_p11 = scmp.ne.s32.totalorder %s40_s20, %s10018_s29  ;;  %p10024_p13 = scmp.lt.s32.totalorder %s10018_s29, %s10018_s29 }
  0x1d   :  { %p10025_p0 = por %p10024_p13, %p10023_p12 }
  0x1f   :  { %p10026_p1 = pnand %p10025_p0, %p10019_p11 }
  0x21   :  { %10029 = shalt.err (!%p10026_p1)
}
  0x22   :  { %45 = dma.hbm_to_vmem [thread:$0]  %s13675_s4, 16128, %s40_s20, [#allocation6], %s10059_s15, %s10059_s15, %s10060_s16  }
  0x23   :  { %10052 = dma.done.wait [#allocation3], 24320  }
  0x24   :  { %10053 = vsyncadd [#allocation3], 4294942976 }
  0x25   :  { %10054 = dma.done.wait [#allocation6], 16128  }
  0x26   :  { %10055 = vsyncadd [#allocation6], 4294951168  ;;  %v13752_v0 = vmov 0   ;;  %v9286_v1 = vld [vmem:[#allocation2 + $0x134] ss:$8 sps:$4 sm:$0xff]   ;;  %vm1314_vm0 = vcmask 1045504  }
  0x27   :  { %2360 = vmatprep.mubr.bf16.mxu0 %v13752_v0  ;;  %v9288_v2 = vld [vmem:[#allocation2 + $0x104] ss:$8 sps:$4 sm:$0xff]   ;;  %1321 = vmatprep.subr.bf16.mxu1 %v9286_v1  ;;  %v9290_v3 = vld [vmem:[#allocation2 + $0x130] ss:$8 sps:$4 sm:$0xff]   ;;  %v9291_v4 = vld [vmem:[#allocation2 + $0x100] ss:$8 sps:$4 sm:$0xff]  }
  0x28   :  { %2328 = vmatprep.subr.bf16.mxu0 %v9288_v2  ;;  %v9292_v5 = vld [vmem:[#allocation2 + $0x144] ss:$8 sps:$4 sm:$0xff]   ;;  %1322 = vmatpush1.bf16.msra.mxu1 %v9290_v3  ;;  %v9294_v6 = vld [vmem:[#allocation2 + $0x114] ss:$8 sps:$4 sm:$0xff]   ;;  %v9296_v7 = vld [vmem:[#allocation2 + $0x140] ss:$8 sps:$4 sm:$0xff]  }
  0x29   :  { %2329 = vmatpush1.bf16.msra.mxu0 %v9291_v4  ;;  %1323 = vmatprep.subr.bf16.mxu1 %v9292_v5  ;;  %v9297_v8 = vld [vmem:[#allocation2 + $0x110] ss:$8 sps:$4 sm:$0xff]   ;;  %v9298_v9 = vld [vmem:[#allocation2 + $0x154] ss:$8 sps:$4 sm:$0xff]   ;;  %v9304_v13 = vld [vmem:[#allocation2 + $0x164] ss:$8 sps:$4 sm:$0xff]  }
  0x2a   :  { %2330 = vmatprep.subr.bf16.mxu0 %v9294_v6  ;;  %v9300_v10 = vld [vmem:[#allocation2 + $0x124] ss:$8 sps:$4 sm:$0x3f]   ;;  %v9302_v11 = vld [vmem:[#allocation2 + $0x150] ss:$8 sps:$4 sm:$0xff]   ;;  %vm1250_vm1 = vcmask 359424  }
  0x2b   :  { %v9303_v12 = vld [vmem:[#allocation2 + $0x120] ss:$8 sps:$4 sm:$0x3f]   ;;  %v62_v15 = vld [vmem:[%s13671_s0 + $0x14] sm:$0xf]  ;;  %v61_v36 = vld [vmem:[%s13671_s0 + $0xc] sm:$0xff] }
  0x2c   :  { %1324 = vmatpush1.bf16.msra.mxu1 %v9296_v7  ;;  %v60_v14 = vld [vmem:[%s13671_s0 + $0x8] sm:$0xf]  ;;  %v2080_v16 = vsel %vm1314_vm0, %v9303_v12, 0  ;;  %v9310_v19 = vld [vmem:[#allocation2 + $0x174] ss:$8 sps:$4 sm:$0xff]   ;;  %v59_v35 = vld [vmem:[%s13671_s0] sm:$0xff] }
  0x2d   :  { %2331 = vmatpush1.bf16.msra.mxu0 %v9297_v8  ;;  %1325 = vmatprep.subr.bf16.mxu1 %v9298_v9  ;;  %v10148_v17 = vcombine.low %v60_v14, %v62_v15  ;;  %v9309_v18 = vld [vmem:[#allocation2 + $0x160] ss:$8 sps:$4 sm:$0xff]   ;;  %v9312_v20 = vld [vmem:[#allocation2 + $0x170] ss:$8 sps:$4 sm:$0xff]   ;;  %v9313_v21 = vld [vmem:[#allocation2 + $0x184] ss:$8 sps:$4 sm:$0xff]   ;;  %v10172_v38 = vcombine.high %v59_v35, %v61_v36  ;;  %v10192_v56 = vcombine.low %v59_v35, %v61_v36 }
  0x2e   :  { %7878 = vmatprep.subr.msk.bf16.mxu0 %vm1314_vm0, %v9300_v10  ;;  %v9315_v22 = vld [vmem:[%s13671_s0 + $0x20] ss:$12 sps:$4 sm:$0xff]   ;;  %v9317_v24 = vld [vmem:[#allocation2 + $0x194] ss:$8 sps:$4 sm:$0xff]   ;;  %v9319_v27 = vld [vmem:[#allocation2 + $0x190] ss:$8 sps:$4 sm:$0xff]  }
  0x2f   :  { %v9316_v23 = vld [vmem:[#allocation2 + $0x180] ss:$8 sps:$4 sm:$0xff]   ;;  %v9329_v25 = vld [vmem:[#allocation2 + $0x364] ss:$8 sps:$4 sm:$0xff]   ;;  %v9324_v31 = vld [vmem:[#allocation2 + $0x1b4] ss:$8 sps:$4 sm:$0xff]  }
  0x30   :  { %1326 = vmatpush1.bf16.msra.mxu1 %v9302_v11  ;;  %v9327_v26 = vld [vmem:[#allocation2 + $0x360] ss:$8 sps:$4 sm:$0xff]   ;;  %v9320_v28 = vld [vmem:[#allocation2 + $0x1a4] ss:$8 sps:$4 sm:$0xff]   ;;  %v9326_v32 = vld [vmem:[#allocation2 + $0x1b0] ss:$8 sps:$4 sm:$0xff]  }
  0x31   :  { %2333 = vmatpush1.bf16.msra.mxu0 %v2080_v16  ;;  %1327 = vmatprep.subr.bf16.mxu1 %v9304_v13  ;;  %v9322_v29 = vld [vmem:[%s13671_s0 + $0x38] ss:$12 sps:$4 sm:$0xff]   ;;  %v9323_v30 = vld [vmem:[#allocation2 + $0x1a0] ss:$8 sps:$4 sm:$0xff]   ;;  %v9332_v34 = vld [vmem:[%s13671_s0 + $0x50] ss:$12 sps:$4 sm:$0xff]  }
  0x32   :  { %3292 = vmatprep.subr.bf16.mxu0 %v9329_v25  ;;  %v9330_v33 = vld [vmem:[#allocation2 + $0x1c4] ss:$8 sps:$4 sm:$0xff]   ;;  %v9333_v37 = vld [vmem:[#allocation2 + $0x1c0] ss:$8 sps:$4 sm:$0xff]   ;;  %v9334_v40 = vld [vmem:[#allocation2 + $0x1d4] ss:$8 sps:$4 sm:$0xff]  }
  0x33   :  { %v10177_v39 = vld [vmem:[%s13671_s0 + $0x1c] ss:$12 sps:$4 sm:$0xff]   ;;  %v517_v41 = vshrl.u32 %v10172_v38, 16  ;;  %v519_v42 = vshll.u32 %v10172_v38, 16  ;;  %v9336_v46 = vld [vmem:[#allocation2 + $0x1d0] ss:$8 sps:$4 sm:$0xff]  }
  0x34   :  { %7879 = vmatmul.mubr.msk.bf16.vlgmr.msra.gmra.mrb[0].mxu0 %vm1250_vm1, %v10148_v17  ;;  %1328 = vmatpush1.bf16.msra.mxu1 %v9309_v18  ;;  %v13740_v43 = vshll.u32 %v10177_v39, 16  ;;  %vm503_vm2 = vsmask.f32 7424  ;;  %v9337_v47 = vld [vmem:[#allocation2 + $0x1e4] ss:$8 sps:$4 sm:$0xff]   ;;  %v507_v62 = vshll.u32 %v10192_v56, 16 }
  0x35   :  { %2370 = vmatprep.mubr.bf16.mxu0 %v13752_v0  ;;  %1329 = vmatprep.subr.bf16.mxu1 %v9310_v19  ;;  %v521_v44 = vrot.slane %v519_v42, 1  ;;  %v9339_v49 = vld [vmem:[%s13671_s0 + $0x68] ss:$12 sps:$4 sm:$0xff]   ;;  %v9372_v53 = vld [vmem:[#allocation2 + $0x370] ss:$8 sps:$4 sm:$0xff]   ;;  %v505_v2 = vshrl.u32 %v10192_v56, 16 }
  0x36   :  { %3293 = vmatpush1.bf16.msra.mxu0 %v9327_v26  ;;  %v526_v45 = vrot.slane %v13740_v43, 1  ;;  %v9340_v51 = vld [vmem:[#allocation2 + $0x1e0] ss:$8 sps:$4 sm:$0xff]   ;;  %v9341_v52 = vld [vmem:[#allocation2 + $0x1f4] ss:$8 sps:$4 sm:$0xff]   ;;  %v509_v3 = vrot.slane %v507_v62, 1 }
  0x37   :  { %v522_v48 = vor.u32 %v521_v44, %v517_v41  ;;  %v9374_v54 = vld [vmem:[#allocation2 + $0x374] ss:$8 sps:$4 sm:$0xff]   ;;  %v9343_v55 = vld [vmem:[#allocation2 + $0x1f0] ss:$8 sps:$4 sm:$0xff]   ;;  %v9344_v57 = vld [vmem:[#allocation2 + $0x204] ss:$8 sps:$4 sm:$0xff]  }
  0x38   :  { %1330 = vmatpush1.bf16.msra.mxu1 %v9312_v20  ;;  %3294 = vmatprep.subr.bf16.mxu0 %v9374_v54  ;;  %v9346_v58 = vld [vmem:[%s13671_s0 + $0x80] ss:$12 sps:$4 sm:$0xff]   ;;  %v9348_v60 = vld [vmem:[#allocation2 + $0x214] ss:$8 sps:$4 sm:$0xff]   ;;  %v10200_v61 = vld [vmem:[%s13671_s0 + $0x18] ss:$12 sps:$4 sm:$0xff]   ;;  %v510_v10 = vor.u32 %v509_v3, %v505_v2 }
  0x39   :  { %1331 = vmatprep.subr.bf16.mxu1 %v9313_v21  ;;  %v527_v50 = vsel %vm503_vm2, %v522_v48, %v526_v45  ;;  %v9347_v59 = vld [vmem:[#allocation2 + $0x200] ss:$8 sps:$4 sm:$0xff]   ;;  %v9350_v1 = vld [vmem:[#allocation2 + $0x210] ss:$8 sps:$4 sm:$0xff]   ;;  %v13743_v4 = vshll.u32 %v10200_v61, 16  ;;  %v13741_v6 = vshrl.u32 %v10177_v39, 16 }
  0x3a   :  { %1353 = vmatprep.mubr.bf16.mxu1 %v527_v50  ;;  %3295 = vmatpush1.bf16.msra.mxu0 %v9372_v53  ;;  %v10206_v63 = vld [vmem:[%s13671_s0 + $0x34] ss:$12 sps:$4 sm:$0xff]   ;;  %v9351_v5 = vld [vmem:[#allocation2 + $0x224] ss:$8 sps:$4 sm:$0xff]   ;;  %v10222_v12 = vld [vmem:[%s13671_s0 + $0x30] ss:$12 sps:$4 sm:$0xff]  }
  0x3b   :  { %v13734_v7 = vshll.u32 %v10206_v63, 16  ;;  %v9353_v8 = vld [vmem:[%s13671_s0 + $0x98] ss:$12 sps:$4 sm:$0xff]   ;;  %v9354_v9 = vld [vmem:[#allocation2 + $0x220] ss:$8 sps:$4 sm:$0xff]   ;;  %v514_v11 = vrot.slane %v13743_v4, 1  ;;  %v550_v13 = vor.u32 %v13741_v6, %v526_v45 }
  0x3c   :  { %7880 = vmatmul.mubr.msk.bf16.gmra.mrb[4].mxu0 %vm1250_vm1, %v9315_v22  ;;  %1332 = vmatpush1.bf16.msra.mxu1 %v9316_v23  ;;  %v10231_v15 = vld [vmem:[%s13671_s0 + $0x4c] ss:$12 sps:$4 sm:$0xff]   ;;  %v13742_v18 = vshrl.u32 %v10200_v61, 16  ;;  %v13732_v19 = vshll.u32 %v10222_v12, 16  ;;  %v13735_v21 = vshrl.u32 %v10206_v63, 16  ;;  %vm2620_vm3 = vcmask 1046528  }
  0x3d   :  { %2380 = vmatprep.mubr.bf16.mxu0 %v13752_v0  ;;  %1333 = vmatprep.subr.bf16.mxu1 %v9317_v24  ;;  %v554_v14 = vrot.slane %v13734_v7, 1  ;;  %v515_v16 = vsel %vm503_vm2, %v510_v10, %v514_v11  ;;  %v13730_v22 = vshll.u32 %v10231_v15, 16  ;;  %v9360_v23 = vld [vmem:[%s13671_s0 + $0xb0] ss:$12 sps:$4 sm:$0xff]   ;;  %v10247_v24 = vld [vmem:[%s13671_s0 + $0x48] ss:$12 sps:$4 sm:$0xff]  }
  0x3e   :  { %v542_v25 = vor.u32 %v13742_v18, %v514_v11  ;;  %v546_v26 = vrot.slane %v13732_v19, 1  ;;  %v13731_v36 = vshrl.u32 %v10231_v15, 16  ;;  %v9364_v41 = vld [vmem:[%s13671_s0 + $0xc8] ss:$12 sps:$4 sm:$0xff]   ;;  %v10278_v42 = vld [vmem:[%s13671_s0 + $0x60] ss:$12 sps:$4 sm:$0xff]  }
  0x3f   :  { %v555_v20 = vsel %vm503_vm2, %v550_v13, %v554_v14  ;;  %v10291_v48 = vld [vmem:[%s13671_s0 + $0x7c] ss:$12 sps:$4 sm:$0xff]   ;;  %v13729_v50 = vshrl.u32 %v10247_v24, 16  ;;  %v13721_v3 = vshrl.u32 %v10278_v42, 16  ;;  %v9375_v13 = vld [vmem:[%s13671_s0 + $0xf8] ss:$12 sps:$4 sm:$0xff]  }
  0x40   :  { %1334 = vmatpush1.bf16.msra.mxu1 %v9319_v27  ;;  %v10256_v27 = vld [vmem:[%s13671_s0 + $0x64] ss:$12 sps:$4 sm:$0xff]   ;;  %v13710_v54 = vshll.u32 %v10291_v48, 16  ;;  %v9433_v11 = vld [vmem:[#allocation2 + $0x394] ss:$8 sps:$4 sm:$0xff]   ;;  %vm6508_vm5 = vcmask 654336  }
  0x41   :  { %1335 = vmatprep.subr.bf16.mxu1 %v9320_v28  ;;  %v574_v28 = vor.u32 %v13735_v21, %v554_v14  ;;  %v13723_v53 = vshrl.u32 %v10256_v27, 16  ;;  %v9453_v7 = vld [vmem:[#allocation2 + $0x3b4] ss:$8 sps:$4 sm:$0xff]   ;;  %v9457_v18 = vld [vmem:[#allocation2 + $0x3c0] ss:$8 sps:$4 sm:$0xff]  }
  0x42   :  { %v626_v62 = vrot.slane %v13710_v54, 1  ;;  %v9462_v4 = vld [vmem:[#allocation2 + $0x3d4] ss:$8 sps:$4 sm:$0xff]   ;;  %vm3668_vm4 = vsmask.f32 6400 }
  0x44   :  { %7881 = vmatmul.mubr.msk.bf16.gmra.mrb[8].mxu0 %vm1250_vm1, %v9322_v29  ;;  %1336 = vmatpush1.bf16.msra.mxu1 %v9323_v30  ;;  %v578_v29 = vrot.slane %v13730_v22, 1  ;;  %v9403_v30 = vld [vmem:[#allocation2 + $0x384] ss:$8 sps:$4 sm:$0x3f]  }
  0x45   :  { %2390 = vmatprep.mubr.bf16.mxu0 %v13752_v0  ;;  %1337 = vmatprep.subr.bf16.mxu1 %v9324_v31  ;;  %v547_v31 = vsel %vm503_vm2, %v542_v25, %v546_v26 }
  0x46   :  { %7941 = vmatprep.subr.msk.bf16.mxu0 %vm1314_vm0, %v9403_v30  ;;  %v579_v35 = vsel %vm503_vm2, %v574_v28, %v578_v29 }
  0x48   :  { %1338 = vmatpush1.bf16.msra.mxu1 %v9326_v32  ;;  %v13733_v32 = vshrl.u32 %v10222_v12, 16 }
  0x49   :  { %1339 = vmatprep.subr.bf16.mxu1 %v9330_v33  ;;  %v13724_v33 = vshll.u32 %v10247_v24, 16 }
  0x4a   :  { %v566_v44 = vor.u32 %v13733_v32, %v546_v26  ;;  %v10349_v26 = vld [vmem:[%s13671_s0 + $0xac] ss:$12 sps:$4 sm:$0xff]   ;;  %v9437_v32 = vld [vmem:[#allocation2 + $0x3a0] ss:$8 sps:$4 sm:$0xff]  }
  0x4b   :  { %v570_v45 = vrot.slane %v13724_v33, 1  ;;  %v10649_v33 = vld [vmem:[%s13671_s0 + $0x19c] ss:$12 sps:$4 sm:$0xff]  }
  0x4c   :  { %7882 = vmatmul.mubr.msk.bf16.gmra.mrb[12].mxu0 %vm1250_vm1, %v9332_v34  ;;  %1340 = vmatpush1.bf16.msra.mxu1 %v9333_v37  ;;  %v9406_v34 = vld [vmem:[#allocation2 + $0x380] ss:$8 sps:$4 sm:$0x3f]   ;;  %v13722_v37 = vshll.u32 %v10256_v27, 16  ;;  %13857 = vst [vmem:[#allocation13_spill] sm:$0xff] %v10649_v33 }
  0x4d   :  { %2400 = vmatprep.mubr.bf16.mxu0 %v13752_v0  ;;  %1341 = vmatprep.subr.bf16.mxu1 %v9334_v40  ;;  %v3044_v40 = vsel %vm1314_vm0, %v9406_v34, 0  ;;  %v9445_v34 = vld [vmem:[#allocation2 + $0x234] ss:$8 sps:$4 sm:$0xff]  }
  0x4e   :  { %3297 = vmatpush1.bf16.msra.mxu0 %v3044_v40 }
  0x4f   :  { %4259 = vmatprep.subr.bf16.mxu0 %v9433_v11 }
  0x50   :  { %1342 = vmatpush1.bf16.msra.mxu1 %v9336_v46  ;;  %v598_v46 = vor.u32 %v13731_v36, %v578_v29 }
  0x51   :  { %1343 = vmatprep.subr.bf16.mxu1 %v9337_v47  ;;  %v602_v47 = vrot.slane %v13722_v37, 1 }
  0x54   :  { %7883 = vmatmul.mubr.msk.bf16.gmra.mrb[16].mxu0 %vm1250_vm1, %v9339_v49  ;;  %1344 = vmatpush1.bf16.msra.mxu1 %v9340_v51  ;;  %v571_v49 = vsel %vm503_vm2, %v566_v44, %v570_v45  ;;  %v13720_v51 = vshll.u32 %v10278_v42, 16  ;;  %v9450_v44 = vld [vmem:[#allocation2 + $0x244] ss:$8 sps:$4 sm:$0xff]  }
  0x55   :  { %2410 = vmatprep.mubr.bf16.mxu0 %v13752_v0  ;;  %1345 = vmatprep.subr.bf16.mxu1 %v9341_v52  ;;  %v603_v52 = vsel %vm503_vm2, %v598_v46, %v602_v47  ;;  %v10365_v46 = vld [vmem:[%s13671_s0 + $0xa8] ss:$12 sps:$4 sm:$0xff]  }
  0x56   :  { %v13684_v11 = vshll.u32 %v10365_v46, 16 }
  0x58   :  { %1346 = vmatpush1.bf16.msra.mxu1 %v9343_v55  ;;  %v9368_v55 = vld [vmem:[%s13671_s0 + $0xe0] ss:$12 sps:$4 sm:$0xff]  }
  0x59   :  { %1347 = vmatprep.subr.bf16.mxu1 %v9344_v57  ;;  %v590_v57 = vor.u32 %v13729_v50, %v570_v45  ;;  %v9379_v45 = vld [vmem:[%s13671_s0 + $0x110] ss:$12 sps:$4 sm:$0xff]   ;;  %v9439_v50 = vld [vmem:[#allocation2 + $0x3a4] ss:$8 sps:$4 sm:$0xff]  }
  0x5c   :  { %7884 = vmatmul.mubr.msk.bf16.gmra.mrb[20].mxu0 %vm1250_vm1, %v9346_v58  ;;  %1348 = vmatpush1.bf16.msra.mxu1 %v9347_v59  ;;  %v594_v58 = vrot.slane %v13720_v51, 1  ;;  %v10311_v59 = vld [vmem:[%s13671_s0 + $0x78] ss:$12 sps:$4 sm:$0xff]  }
  0x5d   :  { %2420 = vmatprep.mubr.bf16.mxu0 %v13752_v0  ;;  %1349 = vmatprep.subr.bf16.mxu1 %v9348_v60  ;;  %v622_v60 = vor.u32 %v13723_v53, %v602_v47  ;;  %v13709_v28 = vshrl.u32 %v10311_v59, 16  ;;  %v10370_v47 = vld [vmem:[%s13671_s0 + $0xc4] ss:$12 sps:$4 sm:$0xff]  }
  0x5e   :  { %v595_v2 = vsel %vm503_vm2, %v590_v57, %v594_v58  ;;  %v614_v14 = vor.u32 %v13721_v3, %v594_v58 }
  0x60   :  { %1350 = vmatpush1.bf16.msra.mxu1 %v9350_v1  ;;  %v10320_v1 = vld [vmem:[%s13671_s0 + $0x94] ss:$12 sps:$4 sm:$0xff]  }
  0x61   :  { %1351 = vmatprep.subr.bf16.mxu1 %v9351_v5  ;;  %v13704_v5 = vshll.u32 %v10311_v59, 16  ;;  %v13702_v10 = vshll.u32 %v10320_v1, 16  ;;  %v13703_v40 = vshrl.u32 %v10320_v1, 16 }
  0x63   :  { %v650_v25 = vrot.slane %v13702_v10, 1 }
  0x64   :  { %7885 = vmatmul.mubr.msk.bf16.gmra.mrb[24].mxu0 %vm1250_vm1, %v9353_v8  ;;  %1352 = vmatpush1.bf16.msra.mxu1 %v9354_v9  ;;  %v627_v8 = vsel %vm503_vm2, %v622_v60, %v626_v62  ;;  %v13715_v9 = vshrl.u32 %v10291_v48, 16  ;;  %v9454_v60 = vld [vmem:[#allocation2 + $0x254] ss:$8 sps:$4 sm:$0x3f]  }
  0x65   :  { %2430 = vmatprep.mubr.bf16.mxu0 %v13752_v0  ;;  %1564 = vmatprep.subr.bf16.mxu1 %v9445_v34  ;;  %v670_v57 = vor.u32 %v13703_v40, %v650_v25  ;;  %v666_v34 = vrot.slane %v13684_v11, 1 }
  0x67   :  { %1354 = vmatmul.mubr.bf16.vlgmr.msra.gmra.mrb[0].mxu1 %v515_v16  ;;  %v618_v16 = vrot.slane %v13704_v5, 1 }
  0x68   :  { %1363 = vmatprep.mubr.bf16.mxu1 %v555_v20  ;;  %v10340_v20 = vld [vmem:[%s13671_s0 + $0x90] ss:$12 sps:$4 sm:$0xff]  }
  0x69   :  { %v619_v29 = vsel %vm503_vm2, %v614_v14, %v618_v16  ;;  %v13692_v30 = vshll.u32 %v10340_v20, 16 }
  0x6c   :  { %7886 = vmatmul.mubr.msk.bf16.gmra.mrb[28].mxu0 %vm1250_vm1, %v9360_v23  ;;  %v646_v23 = vor.u32 %v13715_v9, %v626_v62  ;;  %v9456_v62 = vld [vmem:[#allocation2 + $0x250] ss:$8 sps:$4 sm:$0x3f]  }
  0x6d   :  { %2440 = vmatprep.mubr.bf16.mxu0 %v13752_v0 }
  0x6f   :  { %1364 = vmatmul.mubr.bf16.gmra.mrb[4].mxu1 %v547_v31  ;;  %v9443_v31 = vld [vmem:[#allocation2 + $0x230] ss:$8 sps:$4 sm:$0xff]  }
  0x70   :  { %1373 = vmatprep.mubr.bf16.mxu1 %v579_v35  ;;  %v651_v35 = vsel %vm503_vm2, %v646_v23, %v650_v25  ;;  %1565 = vmatpush1.bf16.msra.mxu1 %v9443_v31  ;;  %v13680_v23 = vshll.u32 %v10370_v47, 16  ;;  %v1316_v25 = vsel %vm1314_vm0, %v9456_v62, 0 }
  0x71   :  { %1566 = vmatprep.subr.bf16.mxu1 %v9450_v44 }
  0x72   :  { %v698_v44 = vrot.slane %v13680_v23, 1 }
  0x74   :  { %7887 = vmatmul.mubr.msk.bf16.gmra.mrb[32].mxu0 %vm1250_vm1, %v9364_v41  ;;  %v13686_v41 = vshll.u32 %v10349_v26, 16 }
  0x75   :  { %2450 = vmatprep.mubr.bf16.mxu0 %v13752_v0 }
  0x76   :  { %v674_v58 = vrot.slane %v13686_v41, 1 }
  0x77   :  { %1374 = vmatmul.mubr.bf16.gmra.mrb[8].mxu1 %v571_v49  ;;  %v9448_v49 = vld [vmem:[#allocation2 + $0x240] ss:$8 sps:$4 sm:$0xff]  }
  0x78   :  { %1383 = vmatprep.mubr.bf16.mxu1 %v603_v52  ;;  %v638_v52 = vor.u32 %v13709_v28, %v618_v16  ;;  %1567 = vmatpush1.bf16.msra.mxu1 %v9448_v49  ;;  %v675_v14 = vsel %vm503_vm2, %v670_v57, %v674_v58  ;;  %v13691_v16 = vshrl.u32 %v10349_v26, 16  ;;  %v9387_v57 = vld [vmem:[%s13671_s0 + $0x140] ss:$12 sps:$4 sm:$0xff]  }
  0x79   :  { %7818 = vmatprep.subr.msk.bf16.mxu1 %vm1314_vm0, %v9454_v60  ;;  %v13683_v60 = vshrl.u32 %v10370_v47, 16 }
  0x7c   :  { %7888 = vmatmul.mubr.msk.bf16.gmra.mrb[36].mxu0 %vm1250_vm1, %v9368_v55  ;;  %v642_v55 = vrot.slane %v13692_v30, 1  ;;  %1569 = vmatpush1.bf16.msra.mxu1 %v1316_v25 }
  0x7d   :  { %2460 = vmatprep.mubr.bf16.mxu0 %v13752_v0 }
  0x7f   :  { %1384 = vmatmul.mubr.bf16.gmra.mrb[12].mxu1 %v595_v2  ;;  %v643_v2 = vsel %vm503_vm2, %v638_v52, %v642_v55  ;;  %v13685_v52 = vshrl.u32 %v10365_v46, 16 }
  0x80   :  { %1393 = vmatprep.mubr.bf16.mxu1 %v627_v8  ;;  %v13697_v8 = vshrl.u32 %v10340_v20, 16 }
  0x82   :  { %v662_v31 = vor.u32 %v13697_v8, %v642_v55  ;;  %v10525_v8 = vld [vmem:[%s13671_s0 + $0x13c] ss:$12 sps:$4 sm:$0xff]  }
  0x84   :  { %7889 = vmatmul.mubr.msk.bf16.gmra.mrb[40].mxu0 %vm1250_vm1, %v9375_v13  ;;  %v9383_v13 = vld [vmem:[%s13671_s0 + $0x128] ss:$12 sps:$4 sm:$0xff]   ;;  %v667_v49 = vsel %vm503_vm2, %v662_v31, %v666_v34  ;;  %v718_v31 = vor.u32 %v13683_v60, %v698_v44 }
  0x85   :  { %2470 = vmatprep.mubr.bf16.mxu0 %v13752_v0 }
  0x87   :  { %1394 = vmatmul.mubr.bf16.gmra.mrb[16].mxu1 %v619_v29  ;;  %v10396_v29 = vld [vmem:[%s13671_s0 + $0xc0] ss:$12 sps:$4 sm:$0xff]  }
  0x88   :  { %1403 = vmatprep.mubr.bf16.mxu1 %v651_v35  ;;  %v694_v35 = vor.u32 %v13691_v16, %v674_v58  ;;  %v13681_v55 = vshll.u32 %v10396_v29, 16 }
  0x8a   :  { %v699_v58 = vsel %vm503_vm2, %v694_v35, %v698_v44  ;;  %v690_v25 = vrot.slane %v13681_v55, 1 }
  0x8c   :  { %7890 = vmatmul.mubr.msk.bf16.gmra.mrb[44].mxu0 %vm1250_vm1, %v9379_v45  ;;  %v10409_v45 = vld [vmem:[%s13671_s0 + $0xdc] ss:$12 sps:$4 sm:$0xff]  }
  0x8d   :  { %2480 = vmatprep.mubr.bf16.mxu0 %v13752_v0  ;;  %v13682_v62 = vshll.u32 %v10409_v45, 16  ;;  %v13689_v44 = vshrl.u32 %v10409_v45, 16 }
  0x8f   :  { %1404 = vmatmul.mubr.bf16.gmra.mrb[20].mxu1 %v643_v2  ;;  %v10425_v2 = vld [vmem:[%s13671_s0 + $0xd8] ss:$12 sps:$4 sm:$0xff]   ;;  %v722_v35 = vrot.slane %v13682_v62, 1 }
  0x90   :  { %1413 = vmatprep.mubr.bf16.mxu1 %v675_v14  ;;  %v686_v14 = vor.u32 %v13685_v52, %v666_v34  ;;  %v13687_v23 = vshll.u32 %v10425_v2, 16  ;;  %v9391_v34 = vld [vmem:[%s13671_s0 + $0x158] ss:$12 sps:$4 sm:$0xff]  }
  0x91   :  { %v723_v55 = vsel %vm503_vm2, %v718_v31, %v722_v35  ;;  %v742_v11 = vor.u32 %v13689_v44, %v722_v35 }
  0x92   :  { %v714_v31 = vrot.slane %v13687_v23, 1 }
  0x94   :  { %7891 = vmatmul.mubr.msk.bf16.gmra.mrb[48].mxu0 %vm1250_vm1, %v9383_v13  ;;  %v10430_v13 = vld [vmem:[%s13671_s0 + $0xf4] ss:$12 sps:$4 sm:$0xff]  }
  0x95   :  { %2490 = vmatprep.mubr.bf16.mxu0 %v13752_v0  ;;  %v13688_v62 = vshll.u32 %v10430_v13, 16  ;;  %v13695_v35 = vshrl.u32 %v10430_v13, 16 }
  0x97   :  { %1414 = vmatmul.mubr.bf16.gmra.mrb[24].mxu1 %v667_v49  ;;  %v691_v49 = vsel %vm503_vm2, %v686_v14, %v690_v25  ;;  %v10459_v14 = vld [vmem:[%s13671_s0 + $0x10c] ss:$12 sps:$4 sm:$0xff]   ;;  %v746_v52 = vrot.slane %v13688_v62, 1 }
  0x98   :  { %1423 = vmatprep.mubr.bf16.mxu1 %v699_v58  ;;  %v13690_v58 = vshrl.u32 %v10396_v29, 16  ;;  %v13694_v62 = vshll.u32 %v10459_v14, 16 }
  0x99   :  { %v747_v23 = vsel %vm503_vm2, %v742_v11, %v746_v52 }
  0x9a   :  { %v710_v60 = vor.u32 %v13690_v58, %v690_v25  ;;  %v9395_v25 = vld [vmem:[%s13671_s0 + $0x170] ss:$12 sps:$4 sm:$0xff]   ;;  %v770_v58 = vrot.slane %v13694_v62, 1 }
  0x9c   :  { %7892 = vmatmul.mubr.msk.bf16.gmra.mrb[52].mxu0 %vm1250_vm1, %v9387_v57  ;;  %v10454_v57 = vld [vmem:[%s13671_s0 + $0xf0] ss:$12 sps:$4 sm:$0xff]  }
  0x9d   :  { %2500 = vmatprep.mubr.bf16.mxu0 %v13752_v0  ;;  %v13693_v41 = vshll.u32 %v10454_v57, 16 }
  0x9f   :  { %1424 = vmatmul.mubr.bf16.gmra.mrb[28].mxu1 %v691_v49  ;;  %v715_v49 = vsel %vm503_vm2, %v710_v60, %v714_v31  ;;  %v10483_v60 = vld [vmem:[%s13671_s0 + $0x108] ss:$12 sps:$4 sm:$0xff]   ;;  %v738_v11 = vrot.slane %v13693_v41, 1 }
  0xa0   :  { %1433 = vmatprep.mubr.bf16.mxu1 %v723_v55  ;;  %v13696_v55 = vshrl.u32 %v10425_v2, 16  ;;  %v13699_v30 = vshll.u32 %v10483_v60, 16 }
  0xa2   :  { %v734_v44 = vor.u32 %v13696_v55, %v714_v31  ;;  %v9399_v31 = vld [vmem:[%s13671_s0 + $0x188] ss:$12 sps:$4 sm:$0xff]  }
  0xa4   :  { %7893 = vmatmul.mubr.msk.bf16.gmra.mrb[56].mxu0 %vm1250_vm1, %v9391_v34  ;;  %v10488_v34 = vld [vmem:[%s13671_s0 + $0x124] ss:$12 sps:$4 sm:$0xff]   ;;  %v739_v16 = vsel %vm503_vm2, %v734_v44, %v738_v11  ;;  %v10512_v44 = vld [vmem:[%s13671_s0 + $0x120] ss:$12 sps:$4 sm:$0xff]  }
  0xa5   :  { %2510 = vmatprep.mubr.bf16.mxu0 %v13752_v0  ;;  %v13698_v62 = vshll.u32 %v10488_v34, 16 }
  0xa7   :  { %1434 = vmatmul.mubr.bf16.gmra.mrb[32].mxu1 %v715_v49  ;;  %v766_v49 = vor.u32 %v13695_v35, %v746_v52  ;;  %v13700_v52 = vshrl.u32 %v10459_v14, 16  ;;  %v762_v35 = vrot.slane %v13699_v30, 1  ;;  %v794_v55 = vrot.slane %v13698_v62, 1 }
  0xa8   :  { %1443 = vmatprep.mubr.bf16.mxu1 %v747_v23  ;;  %v13701_v23 = vshrl.u32 %v10454_v57, 16  ;;  %v13707_v30 = vshrl.u32 %v10488_v34, 16 }
  0xa9   :  { %v771_v41 = vsel %vm503_vm2, %v766_v49, %v770_v58  ;;  %v790_v49 = vor.u32 %v13700_v52, %v770_v58  ;;  %v9405_v58 = vld [vmem:[%s13671_s0 + $0x1a0] ss:$12 sps:$4 sm:$0xff]   ;;  %v13706_v52 = vshll.u32 %v10525_v8, 16 }
  0xaa   :  { %v814_v10 = vor.u32 %v13707_v30, %v794_v55 }
  0xab   :  { %v795_v62 = vsel %vm503_vm2, %v790_v49, %v794_v55  ;;  %v818_v40 = vrot.slane %v13706_v52, 1  ;;  %v13714_v55 = vshrl.u32 %v10525_v8, 16 }
  0xac   :  { %7894 = vmatmul.mubr.msk.bf16.gmra.mrb[60].mxu0 %vm1250_vm1, %v9395_v25  ;;  %v758_v25 = vor.u32 %v13701_v23, %v738_v11  ;;  %v13705_v11 = vshll.u32 %v10512_v44, 16 }
  0xad   :  { %2520 = vmatprep.mubr.bf16.mxu0 %v13752_v0 }
  0xae   :  { %v786_v49 = vrot.slane %v13705_v11, 1  ;;  %v819_v11 = vsel %vm503_vm2, %v814_v10, %v818_v40 }
  0xaf   :  { %1444 = vmatmul.mubr.bf16.gmra.mrb[36].mxu1 %v739_v16  ;;  %v13708_v16 = vshrl.u32 %v10483_v60, 16 }
  0xb0   :  { %1453 = vmatprep.mubr.bf16.mxu1 %v771_v41  ;;  %v763_v41 = vsel %vm503_vm2, %v758_v25, %v762_v35  ;;  %v10546_v25 = vld [vmem:[%s13671_s0 + $0x154] ss:$12 sps:$4 sm:$0xff]  }
  0xb1   :  { %v782_v23 = vor.u32 %v13708_v16, %v762_v35  ;;  %v9410_v35 = vld [vmem:[%s13671_s0 + $0x1b8] ss:$12 sps:$4 sm:$0xff]   ;;  %v13713_v52 = vshll.u32 %v10546_v25, 16  ;;  %v838_v16 = vor.u32 %v13714_v55, %v818_v40  ;;  %v9414_v40 = vld [vmem:[%s13671_s0 + $0x1d0] ss:$12 sps:$4 sm:$0xff]  }
  0xb3   :  { %v842_v28 = vrot.slane %v13713_v52, 1 }
  0xb4   :  { %7895 = vmatmul.mubr.msk.bf16.gmra.mrb[64].mxu0 %vm1250_vm1, %v9399_v31  ;;  %v10541_v31 = vld [vmem:[%s13671_s0 + $0x138] ss:$12 sps:$4 sm:$0xff]  }
  0xb5   :  { %2530 = vmatprep.mubr.bf16.mxu0 %v13752_v0  ;;  %v13711_v5 = vshll.u32 %v10541_v31, 16 }
  0xb7   :  { %1454 = vmatmul.mubr.bf16.gmra.mrb[40].mxu1 %v763_v41  ;;  %v787_v41 = vsel %vm503_vm2, %v782_v23, %v786_v49  ;;  %v10570_v23 = vld [vmem:[%s13671_s0 + $0x150] ss:$12 sps:$4 sm:$0xff]   ;;  %v810_v10 = vrot.slane %v13711_v5, 1  ;;  %v13718_v5 = vshrl.u32 %v10546_v25, 16 }
  0xb8   :  { %1463 = vmatprep.mubr.bf16.mxu1 %v795_v62  ;;  %v13712_v62 = vshrl.u32 %v10512_v44, 16  ;;  %v13716_v54 = vshll.u32 %v10570_v23, 16 }
  0xb9   :  { %v862_v55 = vor.u32 %v13718_v5, %v842_v28 }
  0xba   :  { %v806_v30 = vor.u32 %v13712_v62, %v786_v49  ;;  %v843_v49 = vsel %vm503_vm2, %v838_v16, %v842_v28  ;;  %v834_v52 = vrot.slane %v13716_v54, 1  ;;  %v9418_v28 = vld [vmem:[%s13671_s0 + $0x1e8] ss:$12 sps:$4 sm:$0xff]  }
  0xbc   :  { %7896 = vmatmul.mubr.msk.bf16.gmra.mrb[68].mxu0 %vm1250_vm1, %v9405_v58  ;;  %v10575_v58 = vld [vmem:[%s13671_s0 + $0x16c] ss:$12 sps:$4 sm:$0xff]  }
  0xbd   :  { %2540 = vmatprep.mubr.bf16.mxu0 %v13752_v0  ;;  %v13717_v62 = vshll.u32 %v10575_v58, 16  ;;  %v13727_v5 = vshrl.u32 %v10575_v58, 16 }
  0xbf   :  { %1464 = vmatmul.mubr.bf16.gmra.mrb[44].mxu1 %v787_v41  ;;  %v811_v41 = vsel %vm503_vm2, %v806_v30, %v810_v10  ;;  %v10599_v30 = vld [vmem:[%s13671_s0 + $0x168] ss:$12 sps:$4 sm:$0xff]   ;;  %v866_v9 = vrot.slane %v13717_v62, 1 }
  0xc0   :  { %1473 = vmatprep.mubr.bf16.mxu1 %v819_v11  ;;  %v13719_v11 = vshrl.u32 %v10541_v31, 16  ;;  %v13726_v54 = vshll.u32 %v10599_v30, 16 }
  0xc1   :  { %v867_v62 = vsel %vm503_vm2, %v862_v55, %v866_v9  ;;  %v886_v37 = vor.u32 %v13727_v5, %v866_v9  ;;  %v10658_v9 = vld [vmem:[%s13671_s0 + $0x20] ss:$12 sps:$4 sm:$0xff]   ;;  %v9431_v5 = vld [vmem:[#allocation2 + $0x390] ss:$8 sps:$4 sm:$0xff]  }
  0xc2   :  { %v830_v16 = vor.u32 %v13719_v11, %v810_v10  ;;  %v13728_v10 = vshrl.u32 %v10570_v23, 16  ;;  %v858_v3 = vrot.slane %v13726_v54, 1  ;;  %v10669_v54 = vld [vmem:[%s13671_s0 + $0x198] ss:$12 sps:$4 sm:$0xff]  }
  0xc3   :  { %13858 = vst [vmem:[#allocation14_spill] sm:$0xff] %v10669_v54 }
  0xc4   :  { %7897 = vmatmul.mubr.msk.bf16.gmra.mrb[72].mxu0 %vm1250_vm1, %v9410_v35  ;;  %v10604_v35 = vld [vmem:[%s13671_s0 + $0x184] ss:$12 sps:$4 sm:$0xff]   ;;  %v854_v55 = vor.u32 %v13728_v10, %v834_v52  ;;  %v10674_v10 = vld [vmem:[%s13671_s0 + $0x1b4] ss:$12 sps:$4 sm:$0xff]  }
  0xc5   :  { %2550 = vmatprep.mubr.bf16.mxu0 %v13752_v0  ;;  %v13725_v11 = vshll.u32 %v10604_v35, 16  ;;  %13859 = vst [vmem:[#allocation15_spill] sm:$0xff] %v10674_v10 }
  0xc7   :  { %1474 = vmatmul.mubr.bf16.gmra.mrb[48].mxu1 %v811_v41  ;;  %v2572_v41 = vld [vmem:[%s13671_s0 + $0x8] sm:$0xe]  ;;  %v890_v53 = vrot.slane %v13725_v11, 1  ;;  %v13738_v11 = vshrl.u32 %v10604_v35, 16 }
  0xc8   :  { %1483 = vmatprep.mubr.bf16.mxu1 %v843_v49  ;;  %v835_v49 = vsel %vm503_vm2, %v830_v16, %v834_v52  ;;  %v9859_v16 = vld [vmem:[%s13671_s0 + $0x14] sm:$0xf]  ;;  %v859_v52 = vsel %vm503_vm2, %v854_v55, %v858_v3  ;;  %v13736_v55 = vshll.u32 %v10649_v33, 16 }
  0xc9   :  { %v10636_v51 = vcombine.low %v2572_v41, %v9859_v16  ;;  %v2628_v41 = vrot.slane %v10658_v9, 1  ;;  %v910_v19 = vor.u32 %v13738_v11, %v890_v53  ;;  %v9451_v11 = vld [vmem:[#allocation2 + $0x3b0] ss:$8 sps:$4 sm:$0xff]  }
  0xcb   :  { %13856 = vst [vmem:[#allocation12_spill] sm:$0xff] %v10636_v51 }
  0xcc   :  { %7898 = vmatmul.mubr.msk.bf16.gmra.mrb[76].mxu0 %vm1250_vm1, %v9414_v40  ;;  %v10631_v40 = vld [vmem:[%s13671_s0 + $0x180] ss:$12 sps:$4 sm:$0xff]  }
  0xcd   :  { %2560 = vmatprep.mubr.bf16.mxu0 %v13752_v0  ;;  %13855 = vst [vmem:[#allocation11_spill] sm:$0xff] %v10631_v40  ;;  %v13737_v16 = vshll.u32 %v10631_v40, 16 }
  0xcf   :  { %1484 = vmatmul.mubr.bf16.gmra.mrb[52].mxu1 %v835_v49  ;;  %v13739_v49 = vshrl.u32 %v10599_v30, 16  ;;  %v882_v36 = vrot.slane %v13737_v16, 1  ;;  %v10702_v16 = vld [vmem:[%s13671_s0 + $0x1b0] ss:$12 sps:$4 sm:$0xff]  }
  0xd0   :  { %1493 = vmatprep.mubr.bf16.mxu1 %v867_v62  ;;  %v2627_v62 = vrot.slane %v10636_v51, 1  ;;  %13860 = vst [vmem:[#allocation16_spill] sm:$0xff] %v10702_v16 }
  0xd2   :  { %v2629_v22 = vsel %vm2620_vm3, %v2627_v62, %v2628_v41 }
  0xd4   :  { %7899 = vmatmul.mubr.msk.bf16.gmra.mrb[80].mxu0 %vm1250_vm1, %v9418_v28  ;;  %v891_v28 = vsel %vm503_vm2, %v886_v37, %v890_v53  ;;  %v878_v37 = vor.u32 %v13739_v49, %v858_v3  ;;  %v10691_v3 = vld [vmem:[%s13671_s0 + $0x38] ss:$12 sps:$4 sm:$0xff]   ;;  %v13751_v53 = vshrl.u32 %v10631_v40, 16 }
  0xd5   :  { %3324 = vmatprep.mubr.bf16.mxu0 %v13752_v0  ;;  %v2634_v62 = vrot.slane %v10691_v3, 1  ;;  %v10707_v49 = vld [vmem:[%s13671_s0 + $0x1cc] ss:$12 sps:$4 sm:$0xff]  }
  0xd6   :  { %v883_v21 = vsel %vm503_vm2, %v878_v37, %v882_v36  ;;  %v13744_v37 = vshll.u32 %v10674_v10, 16  ;;  %13861 = vst [vmem:[#allocation17_spill] sm:$0xff] %v10707_v49  ;;  %v902_v43 = vor.u32 %v13751_v53, %v882_v36  ;;  %v10724_v36 = vld [vmem:[%s13671_s0 + $0x50] ss:$12 sps:$4 sm:$0xff]  }
  0xd7   :  { %1494 = vmatmul.mubr.bf16.gmra.mrb[56].mxu1 %v859_v52  ;;  %v914_v52 = vrot.slane %v13736_v55, 1  ;;  %v13746_v55 = vshrl.u32 %v10649_v33, 16  ;;  %13862 = vst [vmem:[#allocation18_spill] sm:$0xff] %v10724_v36  ;;  %v181_v53 = vld [vmem:[%s13671_s0 + $0x1f8] sm:$0x11] }
  0xd8   :  { %1503 = vmatprep.mubr.bf16.mxu1 %v891_v28  ;;  %v13745_v28 = vshll.u32 %v10669_v54, 16  ;;  %v10803_v40 = vcombine.low %v181_v53, %v181_v53 }
  0xd9   :  { %v934_v6 = vor.u32 %v13746_v55, %v914_v52 }
  0xda   :  { %13869 = vst [vmem:[#allocation23_spill] sm:$0xff] %v10803_v40 }
  0xdc   :  { %7942 = vmatmul.mubr.msk.bf16.vlgmr.msra.gmra.mrb[84].mxu0 %vm1250_vm1, %v2629_v22  ;;  %v915_v22 = vsel %vm503_vm2, %v910_v19, %v914_v52  ;;  %v2635_v19 = vsel %vm2620_vm3, %v2628_v41, %v2634_v62  ;;  %v13750_v52 = vshrl.u32 %v10669_v54, 16 }
  0xdd   :  { %3334 = vmatprep.mubr.bf16.mxu0 %v13752_v0  ;;  %4260 = vmatpush1.bf16.msra.mxu0 %v9431_v5  ;;  %v9459_v5 = vld [vmem:[#allocation2 + $0x3c4] ss:$8 sps:$4 sm:$0xff]  }
  0xde   :  { %4261 = vmatprep.subr.bf16.mxu0 %v9439_v50  ;;  %v906_v50 = vrot.slane %v13745_v28, 1 }
  0xdf   :  { %1504 = vmatmul.mubr.bf16.gmra.mrb[60].mxu1 %v883_v21  ;;  %v938_v21 = vrot.slane %v13744_v37, 1 }
  0xe0   :  { %1513 = vmatprep.mubr.bf16.mxu1 %v915_v22  ;;  %v907_v41 = vsel %vm503_vm2, %v902_v43, %v906_v50  ;;  %v13748_v22 = vshll.u32 %v10702_v16, 16  ;;  %v13747_v43 = vshll.u32 %v10707_v49, 16  ;;  %v926_v28 = vor.u32 %v13750_v52, %v906_v50  ;;  %v10749_v50 = vld [vmem:[%s13671_s0 + $0x1e4] ss:$12 sps:$4 sm:$0xff]   ;;  %v9468_v52 = vld [vmem:[#allocation2 + $0x3f4] ss:$8 sps:$4 sm:$0xff]  }
  0xe1   :  { %4262 = vmatpush1.bf16.msra.mxu0 %v9437_v32  ;;  %v2640_v32 = vrot.slane %v10724_v36, 1 }
  0xe2   :  { %4263 = vmatprep.subr.bf16.mxu0 %v9453_v7  ;;  %v939_v7 = vsel %vm503_vm2, %v934_v6, %v938_v21  ;;  %v930_v55 = vrot.slane %v13748_v22, 1  ;;  %v9460_v6 = vld [vmem:[#allocation2 + $0x3d0] ss:$8 sps:$4 sm:$0xff]  }
  0xe3   :  { %v2641_v37 = vsel %vm2620_vm3, %v2634_v62, %v2640_v32  ;;  %v962_v62 = vrot.slane %v13747_v43, 1  ;;  %v13757_v43 = vshrl.u32 %v10702_v16, 16  ;;  %v9474_v16 = vld [vmem:[#allocation2 + $0x414] ss:$8 sps:$4 sm:$0xff]  }
  0xe4   :  { %7943 = vmatmul.mubr.msk.bf16.gmra.mrb[88].mxu0 %vm1250_vm1, %v2635_v19  ;;  %v13749_v19 = vshrl.u32 %v10674_v10, 16  ;;  %v9489_v10 = vld [vmem:[#allocation2 + $0x4] ss:$8 sps:$4 sm:$0xff]  }
  0xe5   :  { %3344 = vmatprep.mubr.bf16.mxu0 %v13752_v0  ;;  %4264 = vmatpush1.bf16.msra.mxu0 %v9451_v11  ;;  %v10740_v11 = vld [vmem:[%s13671_s0 + $0x1c8] ss:$12 sps:$4 sm:$0xff]  }
  0xe6   :  { %4265 = vmatprep.subr.bf16.mxu0 %v9459_v5  ;;  %13863 = vst [vmem:[#allocation19_spill] sm:$0xff] %v10740_v11  ;;  %v958_v5 = vor.u32 %v13749_v19, %v938_v21  ;;  %v13756_v22 = vshll.u32 %v10740_v11, 16  ;;  %2085 = vmatprep.subr.bf16.mxu1 %v9489_v10  ;;  %v13870_v10 = vshll.u32 %v10200_v61, 16 }
  0xe7   :  { %1514 = vmatmul.mubr.bf16.gmra.mrb[64].mxu1 %v907_v41  ;;  %v9465_v41 = vld [vmem:[#allocation2 + $0x3e4] ss:$8 sps:$4 sm:$0xff]  }
  0xe8   :  { %1523 = vmatprep.mubr.bf16.mxu1 %v939_v7  ;;  %v931_v7 = vsel %vm503_vm2, %v926_v28, %v930_v55  ;;  %v963_v19 = vsel %vm503_vm2, %v958_v5, %v962_v62  ;;  %v954_v5 = vrot.slane %v13756_v22, 1  ;;  %v10776_v28 = vld [vmem:[%s13671_s0 + $0x1e0] ss:$12 sps:$4 sm:$0xff]  }
  0xe9   :  { %4266 = vmatpush1.bf16.msra.mxu0 %v9457_v18  ;;  %v10757_v18 = vld [vmem:[%s13671_s0 + $0x68] ss:$12 sps:$4 sm:$0xff]  }
  0xea   :  { %4267 = vmatprep.subr.bf16.mxu0 %v9462_v4  ;;  %13864 = vst [vmem:[#allocation20_spill] sm:$0xff] %v10757_v18  ;;  %v2646_v21 = vrot.slane %v10757_v18, 1  ;;  %v9463_v4 = vld [vmem:[#allocation2 + $0x3e0] ss:$8 sps:$4 sm:$0xff]  }
  0xec   :  { %7944 = vmatmul.mubr.msk.bf16.gmra.mrb[92].mxu0 %vm1250_vm1, %v2641_v37  ;;  %v13758_v37 = vshrl.u32 %v10707_v49, 16 }
  0xed   :  { %3354 = vmatprep.mubr.bf16.mxu0 %v13752_v0  ;;  %4268 = vmatpush1.bf16.msra.mxu0 %v9460_v6  ;;  %v2647_v0 = vsel %vm2620_vm3, %v2640_v32, %v2646_v21  ;;  %v950_v6 = vor.u32 %v13757_v43, %v930_v55  ;;  %v9471_v55 = vld [vmem:[#allocation2 + $0x404] ss:$8 sps:$4 sm:$0xff]   ;;  %v13867_v43 = vmov 0  }
  0xee   :  { %4269 = vmatprep.subr.bf16.mxu0 %v9465_v41  ;;  %v9466_v41 = vld [vmem:[#allocation2 + $0x3f0] ss:$8 sps:$4 sm:$0xff]   ;;  %v982_v51 = vor.u32 %v13758_v37, %v962_v62  ;;  %v13776_v37 = vshrl.u32 %v10740_v11, 16 }
  0xef   :  { %1524 = vmatmul.mubr.bf16.gmra.mrb[68].mxu1 %v931_v7  ;;  %v13865_v7 = vshll.u32 %v10749_v50, 16  ;;  %v955_v22 = vsel %vm503_vm2, %v950_v6, %v954_v5 }
  0xf0   :  { %1533 = vmatprep.mubr.bf16.mxu1 %v963_v19  ;;  %v10782_v19 = vcombine.high %v181_v53, %v181_v53  ;;  %v974_v33 = vor.u32 %v13776_v37, %v954_v5  ;;  %v10817_v53 = vld [vmem:[%s13671_s0 + $0x98] ss:$12 sps:$4 sm:$0xff]  }
  0xf1   :  { %4270 = vmatpush1.bf16.msra.mxu0 %v9463_v4  ;;  %v986_v32 = vrot.slane %v13865_v7, 1  ;;  %v10790_v4 = vld [vmem:[%s13671_s0 + $0x80] ss:$12 sps:$4 sm:$0xff]   ;;  %v13774_v7 = vshll.u32 %v10776_v28, 16  ;;  %13872 = vst [vmem:[#allocation24_spill] sm:$0xff] %v10817_v53 }
  0xf2   :  { %13866 = vst [vmem:[#allocation21_spill] sm:$0xff] %v10782_v19  ;;  %4271 = vmatprep.subr.bf16.mxu0 %v9468_v52  ;;  %13868 = vst [vmem:[#allocation22_spill] sm:$0xff] %v10790_v4  ;;  %v2652_v62 = vrot.slane %v10790_v4, 1  ;;  %v9469_v52 = vld [vmem:[#allocation2 + $0x400] ss:$8 sps:$4 sm:$0xff]   ;;  %v1008_v6 = vshll.u32 %v10782_v19, 16 }
  0xf3   :  { %v987_v49 = vsel %vm503_vm2, %v982_v51, %v986_v32  ;;  %v9472_v51 = vld [vmem:[#allocation2 + $0x410] ss:$8 sps:$4 sm:$0xff]  }
  0xf4   :  { %7945 = vmatmul.mubr.msk.bf16.gmra.mrb[96].mxu0 %vm1250_vm1, %v2647_v0  ;;  %v13775_v0 = vshrl.u32 %v10749_v50, 16  ;;  %v2653_v54 = vsel %vm2620_vm3, %v2646_v21, %v2652_v62  ;;  %v1010_v19 = vrot.slane %v1008_v6, 1  ;;  %v3678_v21 = vrot.slane %v13870_v10, 2 }
  0xf5   :  { %3364 = vmatprep.mubr.bf16.mxu0 %v13867_v43  ;;  %4272 = vmatpush1.bf16.msra.mxu0 %v9466_v41  ;;  %v978_v41 = vrot.slane %v13774_v7, 1 }
  0xf6   :  { %4273 = vmatprep.subr.bf16.mxu0 %v9471_v55  ;;  %v1006_v55 = vor.u32 %v13775_v0, %v986_v32  ;;  %v13778_v32 = vshrl.u32 %v10776_v28, 16  ;;  %v9478_v0 = vld [vmem:[#allocation2 + $0x430] ss:$8 sps:$4 sm:$0xff]  }
  0xf7   :  { %1534 = vmatmul.mubr.bf16.gmra.mrb[72].mxu1 %v955_v22  ;;  %v9477_v22 = vld [vmem:[#allocation2 + $0x424] ss:$8 sps:$4 sm:$0xff]   ;;  %v979_v5 = vsel %vm503_vm2, %v974_v33, %v978_v41  ;;  %v531_v33 = vshll.u32 %v10148_v17, 16 }
  0xf8   :  { %1543 = vmatprep.mubr.bf16.mxu1 %v987_v49  ;;  %v13871_v49 = vshrl.u32 %v10200_v61, 16  ;;  %v9475_v61 = vld [vmem:[#allocation2 + $0x420] ss:$8 sps:$4 sm:$0xff]   ;;  %v1011_v6 = vsel %vm503_vm2, %v1006_v55, %v1010_v19  ;;  %v529_v19 = vshrl.u32 %v10148_v17, 16  ;;  %v9486_v17 = vld [vmem:[#allocation2 + $0x454] ss:$8 sps:$4 sm:$0xff]  }
  0xf9   :  { %4274 = vmatpush1.bf16.msra.mxu0 %v9469_v52  ;;  %v1000_v52 = vshll.u32 %v10803_v40, 16  ;;  %v533_v55 = vrot.slane %v531_v33, 1 }
  0xfa   :  { %4275 = vmatprep.subr.bf16.mxu0 %v9474_v16  ;;  %v3677_v11 = vrot.slane %v13871_v49, 1  ;;  %v2658_v16 = vrot.slane %v10817_v53, 1  ;;  %v998_v49 = vor.u32 %v13778_v32, %v978_v41 }
  0xfb   :  { %v1002_v7 = vrot.slane %v1000_v52, 1 }
  0xfc   :  { %7946 = vmatmul.mubr.msk.bf16.gmra.mrb[100].mxu0 %vm1250_vm1, %v2653_v54  ;;  %v9480_v54 = vld [vmem:[#allocation2 + $0x434] ss:$8 sps:$4 sm:$0xff]   ;;  %v2659_v10 = vsel %vm2620_vm3, %v2652_v62, %v2658_v16  ;;  %v10827_v37 = vor.u32 %v3678_v21, %v3677_v11  ;;  %v13777_v11 = vshll.u32 %v10658_v9, 16  ;;  %v9481_v21 = vld [vmem:[#allocation2 + $0x440] ss:$8 sps:$4 sm:$0xff]  }
  0xfd   :  { %3374 = vmatprep.mubr.bf16.mxu0 %v13867_v43  ;;  %4276 = vmatpush1.bf16.msra.mxu0 %v9472_v51  ;;  %v9483_v51 = vld [vmem:[#allocation2 + $0x444] ss:$8 sps:$4 sm:$0xff]   ;;  %v10836_v62 = vld [vmem:[%s13671_s0 + $0xb0] ss:$12 sps:$4 sm:$0xff]  }
  0xfe   :  { %4277 = vmatprep.subr.bf16.mxu0 %v9477_v22  ;;  %v1003_v22 = vsel %vm503_vm2, %v998_v49, %v1002_v7  ;;  %13873 = vst [vmem:[#allocation25_spill] sm:$0xff] %v10836_v62  ;;  %v2664_v41 = vrot.slane %v10836_v62, 1 }
  0xff   :  { %1544 = vmatmul.mubr.bf16.gmra.mrb[76].mxu1 %v979_v5 }
 0x100   :  { %1553 = vmatprep.mubr.bf16.mxu1 %v1011_v6  ;;  %v534_v6 = vor.u32 %v533_v55, %v529_v19  ;;  %v13781_v19 = vshrl.u32 %v10658_v9, 16  ;;  %v13780_v55 = vshll.u32 %v10691_v3, 16 }
 0x101   :  { %4278 = vmatpush1.bf16.msra.mxu0 %v9475_v61  ;;  %v2665_v61 = vsel %vm2620_vm3, %v2658_v16, %v2664_v41  ;;  %v10858_v16 = vld [vmem:[%s13671_s0 + $0xc8] ss:$12 sps:$4 sm:$0xff]  }
 0x102   :  { %4279 = vmatprep.subr.bf16.mxu0 %v9480_v54  ;;  %v538_v54 = vrot.slane %v13777_v11, 1  ;;  %13878 = vst [vmem:[#allocation30_spill] sm:$0xff] %v10858_v16 }
 0x104   :  { %7947 = vmatmul.mubr.msk.bf16.gmra.mrb[104].mxu0 %vm1250_vm1, %v2659_v10  ;;  %v9492_v10 = vld [vmem:[#allocation2 + $0x464] ss:$8 sps:$4 sm:$0xff]   ;;  %v539_v49 = vsel %vm503_vm2, %v534_v6, %v538_v54  ;;  %v9499_v6 = vld [vmem:[#allocation2 + $0x474] ss:$8 sps:$4 sm:$0xff]  }
 0x105   :  { %3384 = vmatprep.mubr.bf16.mxu0 %v13867_v43  ;;  %4280 = vmatpush1.bf16.msra.mxu0 %v9478_v0  ;;  %v9484_v0 = vld [vmem:[#allocation2 + $0x450] ss:$8 sps:$4 sm:$0xff]  }
 0x106   :  { %4281 = vmatprep.subr.bf16.mxu0 %v9483_v51  ;;  %v2670_v51 = vrot.slane %v10858_v16, 1 }
 0x107   :  { %v10840_v5 = vpop.f32.mrb[0].mxu0  ;;  %1554 = vmatmul.mubr.bf16.gmra.mrb[80].mxu1 %v1003_v22  ;;  %v9487_v22 = vld [vmem:[#allocation2] ss:$8 sps:$4 sm:$0xff]  }
 0x108   :  { %13874 = vst [vmem:[#allocation26_spill] sm:$0xff] %v10840_v5  ;;  %v10842_v52 = vpop.f32.mrb[1].mxu0  ;;  %1596 = vmatprep.mubr.bf16.mxu1 %v13867_v43  ;;  %v2671_v40 = vsel %vm2620_vm3, %v2664_v41, %v2670_v51 }
 0x109   :  { %13875 = vst [vmem:[#allocation27_spill] sm:$0xff] %v10842_v52  ;;  %v10844_v7 = vpop.f32.mrb[2].mxu0  ;;  %4282 = vmatpush1.bf16.msra.mxu0 %v9481_v21  ;;  %v9490_v21 = vld [vmem:[#allocation2 + $0x460] ss:$8 sps:$4 sm:$0xff]  }
 0x10a   :  { %13876 = vst [vmem:[#allocation28_spill] sm:$0xff] %v10844_v7  ;;  %v10850_v33 = vpop.f32.mrb[3].mxu0  ;;  %4283 = vmatprep.subr.bf16.mxu0 %v9486_v17  ;;  %v9495_v17 = vld [vmem:[#allocation2 + $0x14] ss:$8 sps:$4 sm:$0xff]  }
 0x10b   :  { %13877 = vst [vmem:[#allocation29_spill] sm:$0xff] %v10850_v33  ;;  %v9493_v33 = vld [vmem:[#allocation2 + $0x10] ss:$8 sps:$4 sm:$0xff]  }
 0x10c   :  { %7948 = vmatmul.mubr.msk.bf16.gmra.mrb[108].mxu0 %vm1250_vm1, %v2665_v61 }
 0x10d   :  { %3394 = vmatprep.mubr.bf16.mxu0 %v13867_v43  ;;  %4284 = vmatpush1.bf16.msra.mxu0 %v9484_v0  ;;  %v558_v0 = vor.u32 %v13781_v19, %v538_v54  ;;  %v10884_v54 = vld [vmem:[%s13671_s0 + $0xe0] ss:$12 sps:$4 sm:$0xff]  }
 0x10e   :  { %4285 = vmatprep.subr.bf16.mxu0 %v9492_v10  ;;  %v562_v10 = vrot.slane %v13780_v55, 1  ;;  %13883 = vst [vmem:[#allocation35_spill] sm:$0xff] %v10884_v54  ;;  %v9510_v55 = vld [vmem:[#allocation2 + $0x34] ss:$8 sps:$4 sm:$0xff]  }
 0x10f   :  { %v10863_v61 = vpop.f32.mrb[4].mxu0  ;;  %7819 = vmatmul.mubr.msk.bf16.vlgmr.msra.gmra.mrb[0].mxu1 %vm1250_vm1, %v539_v49  ;;  %v9497_v49 = vld [vmem:[#allocation2 + $0x470] ss:$8 sps:$4 sm:$0xff]  }
 0x110   :  { %13879 = vst [vmem:[#allocation31_spill] sm:$0xff] %v10863_v61  ;;  %v10866_v11 = vpop.f32.mrb[5].mxu0  ;;  %1606 = vmatprep.mubr.bf16.mxu1 %v13867_v43  ;;  %2086 = vmatpush1.bf16.msra.mxu1 %v9487_v22  ;;  %v563_v41 = vsel %vm503_vm2, %v558_v0, %v562_v10  ;;  %v2676_v22 = vrot.slane %v10884_v54, 1 }
 0x111   :  { %13880 = vst [vmem:[#allocation32_spill] sm:$0xff] %v10866_v11  ;;  %v10868_v32 = vpop.f32.mrb[6].mxu0  ;;  %4286 = vmatpush1.bf16.msra.mxu0 %v9490_v21  ;;  %2087 = vmatprep.subr.bf16.mxu1 %v9495_v17  ;;  %v9502_v11 = vld [vmem:[#allocation2 + $0x24] ss:$8 sps:$4 sm:$0xff]   ;;  %v13783_v21 = vshrl.u32 %v10691_v3, 16  ;;  %v13782_v17 = vshll.u32 %v10724_v36, 16 }
 0x112   :  { %13881 = vst [vmem:[#allocation33_spill] sm:$0xff] %v10868_v32  ;;  %v10876_v61 = vpop.f32.mrb[7].mxu0  ;;  %4287 = vmatprep.subr.bf16.mxu0 %v9499_v6  ;;  %v9505_v32 = vld [vmem:[#allocation2 + $0x484] ss:$8 sps:$4 sm:$0xff]   ;;  %v9500_v6 = vld [vmem:[#allocation2 + $0x20] ss:$8 sps:$4 sm:$0xff]   ;;  %v2677_v7 = vsel %vm2620_vm3, %v2670_v51, %v2676_v22 }
 0x113   :  { %13882 = vst [vmem:[#allocation34_spill] sm:$0xff] %v10876_v61 }
 0x114   :  { %7949 = vmatmul.mubr.msk.bf16.gmra.mrb[112].mxu0 %vm1250_vm1, %v2671_v40  ;;  %2088 = vmatpush1.bf16.msra.mxu1 %v9493_v33  ;;  %v9503_v40 = vld [vmem:[#allocation2 + $0x480] ss:$8 sps:$4 sm:$0xff]   ;;  %v582_v33 = vor.u32 %v13783_v21, %v562_v10  ;;  %v10910_v10 = vld [vmem:[%s13671_s0 + $0xf8] ss:$12 sps:$4 sm:$0xff]  }
 0x115   :  { %3404 = vmatprep.mubr.bf16.mxu0 %v13867_v43  ;;  %4288 = vmatpush1.bf16.msra.mxu0 %v9497_v49  ;;  %v9508_v49 = vld [vmem:[#allocation2 + $0x30] ss:$8 sps:$4 sm:$0xff]   ;;  %13888 = vst [vmem:[#allocation40_spill] sm:$0xff] %v10910_v10 }
 0x116   :  { %2089 = vmatprep.subr.bf16.mxu1 %v9502_v11  ;;  %4289 = vmatprep.subr.bf16.mxu0 %v9505_v32  ;;  %v586_v11 = vrot.slane %v13782_v17, 1  ;;  %v9513_v32 = vld [vmem:[#allocation2 + $0x44] ss:$8 sps:$4 sm:$0xff]   ;;  %v13785_v17 = vshrl.u32 %v10724_v36, 16 }
 0x117   :  { %v10889_v0 = vpop.f32.mrb[8].mxu0  ;;  %7820 = vmatmul.mubr.msk.bf16.gmra.mrb[4].mxu1 %vm1250_vm1, %v563_v41  ;;  %v9528_v41 = vld [vmem:[#allocation2 + $0x494] ss:$8 sps:$4 sm:$0xff]  }
 0x118   :  { %13884 = vst [vmem:[#allocation36_spill] sm:$0xff] %v10889_v0  ;;  %v10892_v19 = vpop.f32.mrb[9].mxu0  ;;  %1616 = vmatprep.mubr.bf16.mxu1 %v13867_v43  ;;  %2090 = vmatpush1.bf16.msra.mxu1 %v9500_v6  ;;  %v587_v51 = vsel %vm503_vm2, %v582_v33, %v586_v11  ;;  %v2682_v6 = vrot.slane %v10910_v10, 1 }
 0x119   :  { %13885 = vst [vmem:[#allocation37_spill] sm:$0xff] %v10892_v19  ;;  %v10894_v61 = vpop.f32.mrb[10].mxu0  ;;  %4290 = vmatpush1.bf16.msra.mxu0 %v9503_v40  ;;  %2091 = vmatprep.subr.bf16.mxu1 %v9510_v55  ;;  %v13784_v55 = vshll.u32 %v10757_v18, 16  ;;  %v9511_v40 = vld [vmem:[#allocation2 + $0x40] ss:$8 sps:$4 sm:$0xff]  }
 0x11a   :  { %13886 = vst [vmem:[#allocation38_spill] sm:$0xff] %v10894_v61  ;;  %v10902_v0 = vpop.f32.mrb[11].mxu0  ;;  %4502 = vmatprep.subr.bf16.mxu0 %v9528_v41  ;;  %v606_v61 = vor.u32 %v13785_v17, %v586_v11  ;;  %v9522_v17 = vld [vmem:[#allocation2 + $0x74] ss:$8 sps:$4 sm:$0xff]  }
 0x11b   :  { %13887 = vst [vmem:[#allocation39_spill] sm:$0xff] %v10902_v0  ;;  %v2683_v0 = vsel %vm2620_vm3, %v2676_v22, %v2682_v6  ;;  %v10936_v22 = vld [vmem:[%s13671_s0 + $0x110] ss:$12 sps:$4 sm:$0xff]  }
 0x11c   :  { %7950 = vmatmul.mubr.msk.bf16.gmra.mrb[116].mxu0 %vm1250_vm1, %v2677_v7  ;;  %2092 = vmatpush1.bf16.msra.mxu1 %v9508_v49  ;;  %v9516_v7 = vld [vmem:[#allocation2 + $0x54] ss:$8 sps:$4 sm:$0xff]   ;;  %v610_v49 = vrot.slane %v13784_v55, 1  ;;  %13893 = vst [vmem:[#allocation45_spill] sm:$0xff] %v10936_v22  ;;  %v2688_v11 = vrot.slane %v10936_v22, 1  ;;  %v13786_v55 = vshll.u32 %v10790_v4, 16 }
 0x11d   :  { %3414 = vmatprep.mubr.bf16.mxu0 %v13867_v43  ;;  %2093 = vmatprep.subr.bf16.mxu1 %v9513_v32  ;;  %v9514_v32 = vld [vmem:[#allocation2 + $0x50] ss:$8 sps:$4 sm:$0xff]  }
 0x11f   :  { %v10915_v41 = vpop.f32.mrb[12].mxu0  ;;  %7821 = vmatmul.mubr.msk.bf16.gmra.mrb[8].mxu1 %vm1250_vm1, %v587_v51  ;;  %v9519_v51 = vld [vmem:[#allocation2 + $0x64] ss:$8 sps:$4 sm:$0xff]  }
 0x120   :  { %13889 = vst [vmem:[#allocation41_spill] sm:$0xff] %v10915_v41  ;;  %v10918_v33 = vpop.f32.mrb[13].mxu0  ;;  %1626 = vmatprep.mubr.bf16.mxu1 %v13867_v43  ;;  %2094 = vmatpush1.bf16.msra.mxu1 %v9511_v40  ;;  %v13787_v40 = vshrl.u32 %v10757_v18, 16 }
 0x121   :  { %13890 = vst [vmem:[#allocation42_spill] sm:$0xff] %v10918_v33  ;;  %v10920_v21 = vpop.f32.mrb[14].mxu0  ;;  %2095 = vmatprep.subr.bf16.mxu1 %v9516_v7  ;;  %v9517_v7 = vld [vmem:[#allocation2 + $0x60] ss:$8 sps:$4 sm:$0xff]   ;;  %v2689_v33 = vsel %vm2620_vm3, %v2682_v6, %v2688_v11 }
 0x122   :  { %13891 = vst [vmem:[#allocation43_spill] sm:$0xff] %v10920_v21  ;;  %v10928_v19 = vpop.f32.mrb[15].mxu0  ;;  %v611_v21 = vsel %vm503_vm2, %v606_v61, %v610_v49  ;;  %v630_v41 = vor.u32 %v13787_v40, %v610_v49  ;;  %v10962_v6 = vld [vmem:[%s13671_s0 + $0x128] ss:$12 sps:$4 sm:$0xff]  }
 0x123   :  { %13892 = vst [vmem:[#allocation44_spill] sm:$0xff] %v10928_v19  ;;  %13898 = vst [vmem:[#allocation50_spill] sm:$0xff] %v10962_v6  ;;  %v2694_v49 = vrot.slane %v10962_v6, 1  ;;  %v9531_v40 = vld [vmem:[#allocation2 + $0x94] ss:$8 sps:$4 sm:$0xff]  }
 0x124   :  { %7951 = vmatmul.mubr.msk.bf16.gmra.mrb[120].mxu0 %vm1250_vm1, %v2683_v0  ;;  %2096 = vmatpush1.bf16.msra.mxu1 %v9514_v32  ;;  %v634_v32 = vrot.slane %v13786_v55, 1  ;;  %v13788_v55 = vshll.u32 %v10817_v53, 16 }
 0x125   :  { %3424 = vmatprep.mubr.bf16.mxu0 %v13867_v43  ;;  %2097 = vmatprep.subr.bf16.mxu1 %v9519_v51  ;;  %v9520_v51 = vld [vmem:[#allocation2 + $0x70] ss:$8 sps:$4 sm:$0xff]  }
 0x127   :  { %v10941_v0 = vpop.f32.mrb[16].mxu0  ;;  %7822 = vmatmul.mubr.msk.bf16.gmra.mrb[12].mxu1 %vm1250_vm1, %v611_v21  ;;  %v9525_v21 = vld [vmem:[#allocation2 + $0x84] ss:$8 sps:$4 sm:$0xff]  }
 0x128   :  { %13894 = vst [vmem:[#allocation46_spill] sm:$0xff] %v10941_v0  ;;  %v10944_v61 = vpop.f32.mrb[17].mxu0  ;;  %1636 = vmatprep.mubr.bf16.mxu1 %v13867_v43  ;;  %2098 = vmatpush1.bf16.msra.mxu1 %v9517_v7  ;;  %v13789_v7 = vshrl.u32 %v10790_v4, 16 }
 0x129   :  { %13895 = vst [vmem:[#allocation47_spill] sm:$0xff] %v10944_v61  ;;  %v10946_v19 = vpop.f32.mrb[18].mxu0  ;;  %2099 = vmatprep.subr.bf16.mxu1 %v9522_v17  ;;  %v9523_v17 = vld [vmem:[#allocation2 + $0x80] ss:$8 sps:$4 sm:$0xff]   ;;  %v2695_v61 = vsel %vm2620_vm3, %v2688_v11, %v2694_v49 }
 0x12a   :  { %13896 = vst [vmem:[#allocation48_spill] sm:$0xff] %v10946_v19  ;;  %v10954_v52 = vpop.f32.mrb[19].mxu0  ;;  %v635_v19 = vsel %vm503_vm2, %v630_v41, %v634_v32  ;;  %v654_v0 = vor.u32 %v13789_v7, %v634_v32  ;;  %v10988_v11 = vld [vmem:[%s13671_s0 + $0x140] ss:$12 sps:$4 sm:$0xff]   ;;  %v9537_v7 = vld [vmem:[#allocation2 + $0xb4] ss:$8 sps:$4 sm:$0xff]  }
 0x12b   :  { %13897 = vst [vmem:[#allocation49_spill] sm:$0xff] %v10954_v52  ;;  %13903 = vst [vmem:[#allocation55_spill] sm:$0xff] %v10988_v11  ;;  %v2700_v32 = vrot.slane %v10988_v11, 1 }
 0x12c   :  { %7952 = vmatmul.mubr.msk.bf16.gmra.mrb[124].mxu0 %vm1250_vm1, %v2689_v33  ;;  %2100 = vmatpush1.bf16.msra.mxu1 %v9520_v51  ;;  %v658_v51 = vrot.slane %v13788_v55, 1  ;;  %v13792_v55 = vshll.u32 %v10836_v62, 16 }
 0x12d   :  { %3434 = vmatprep.mubr.bf16.mxu0 %v13867_v43  ;;  %2101 = vmatprep.subr.bf16.mxu1 %v9525_v21  ;;  %v9529_v21 = vld [vmem:[#allocation2 + $0x90] ss:$8 sps:$4 sm:$0xff]  }
 0x12f   :  { %v10967_v33 = vpop.f32.mrb[20].mxu0  ;;  %7823 = vmatmul.mubr.msk.bf16.gmra.mrb[16].mxu1 %vm1250_vm1, %v635_v19  ;;  %v9534_v19 = vld [vmem:[#allocation2 + $0xa4] ss:$8 sps:$4 sm:$0xff]  }
 0x130   :  { %13899 = vst [vmem:[#allocation51_spill] sm:$0xff] %v10967_v33  ;;  %v10970_v41 = vpop.f32.mrb[21].mxu0  ;;  %1646 = vmatprep.mubr.bf16.mxu1 %v13867_v43  ;;  %2102 = vmatpush1.bf16.msra.mxu1 %v9523_v17  ;;  %v13793_v17 = vshrl.u32 %v10817_v53, 16 }
 0x131   :  { %13900 = vst [vmem:[#allocation52_spill] sm:$0xff] %v10970_v41  ;;  %v10972_v52 = vpop.f32.mrb[22].mxu0  ;;  %2103 = vmatprep.subr.bf16.mxu1 %v9531_v40  ;;  %v9532_v40 = vld [vmem:[#allocation2 + $0xa0] ss:$8 sps:$4 sm:$0xff]   ;;  %v2701_v41 = vsel %vm2620_vm3, %v2694_v49, %v2700_v32  ;;  %v11014_v49 = vld [vmem:[%s13671_s0 + $0x158] ss:$12 sps:$4 sm:$0xff]  }
 0x132   :  { %13901 = vst [vmem:[#allocation53_spill] sm:$0xff] %v10972_v52  ;;  %v10980_v5 = vpop.f32.mrb[23].mxu0  ;;  %v659_v52 = vsel %vm503_vm2, %v654_v0, %v658_v51  ;;  %v678_v33 = vor.u32 %v13793_v17, %v658_v51  ;;  %v2706_v51 = vrot.slane %v11014_v49, 1  ;;  %v9543_v17 = vld [vmem:[#allocation2 + $0xd4] ss:$8 sps:$4 sm:$0xff]  }
 0x133   :  { %13902 = vst [vmem:[#allocation54_spill] sm:$0xff] %v10980_v5 }
 0x134   :  { %7953 = vmatmul.mubr.msk.bf16.gmra.mrb[128].mxu0 %vm1250_vm1, %v2695_v61  ;;  %2104 = vmatpush1.bf16.msra.mxu1 %v9529_v21  ;;  %v682_v21 = vrot.slane %v13792_v55, 1  ;;  %v13796_v55 = vshll.u32 %v10858_v16, 16 }
 0x135   :  { %3444 = vmatprep.mubr.bf16.mxu0 %v13867_v43  ;;  %2105 = vmatprep.subr.bf16.mxu1 %v9534_v19  ;;  %v9535_v19 = vld [vmem:[#allocation2 + $0xb0] ss:$8 sps:$4 sm:$0xff]  }
 0x137   :  { %v10993_v61 = vpop.f32.mrb[24].mxu0  ;;  %7824 = vmatmul.mubr.msk.bf16.gmra.mrb[20].mxu1 %vm1250_vm1, %v659_v52  ;;  %v9540_v52 = vld [vmem:[#allocation2 + $0xc4] ss:$8 sps:$4 sm:$0xff]  }
 0x138   :  { %13904 = vst [vmem:[#allocation56_spill] sm:$0xff] %v10993_v61  ;;  %v10996_v0 = vpop.f32.mrb[25].mxu0  ;;  %1656 = vmatprep.mubr.bf16.mxu1 %v13867_v43  ;;  %2106 = vmatpush1.bf16.msra.mxu1 %v9532_v40  ;;  %v13797_v40 = vshrl.u32 %v10836_v62, 16 }
 0x139   :  { %13905 = vst [vmem:[#allocation57_spill] sm:$0xff] %v10996_v0  ;;  %v10998_v5 = vpop.f32.mrb[26].mxu0  ;;  %2107 = vmatprep.subr.bf16.mxu1 %v9537_v7  ;;  %v9538_v7 = vld [vmem:[#allocation2 + $0xc0] ss:$8 sps:$4 sm:$0xff]   ;;  %v2707_v0 = vsel %vm2620_vm3, %v2700_v32, %v2706_v51  ;;  %v11040_v32 = vld [vmem:[%s13671_s0 + $0x170] ss:$12 sps:$4 sm:$0xff]  }
 0x13a   :  { %13906 = vst [vmem:[#allocation58_spill] sm:$0xff] %v10998_v5  ;;  %v11006_v4 = vpop.f32.mrb[27].mxu0  ;;  %v683_v5 = vsel %vm503_vm2, %v678_v33, %v682_v21  ;;  %v702_v61 = vor.u32 %v13797_v40, %v682_v21  ;;  %v2712_v21 = vrot.slane %v11040_v32, 1  ;;  %v9549_v40 = vld [vmem:[#allocation2 + $0xf4] ss:$8 sps:$4 sm:$0xff]  }
 0x13b   :  { %13907 = vst [vmem:[#allocation59_spill] sm:$0xff] %v11006_v4 }
 0x13c   :  { %7954 = vmatmul.mubr.msk.bf16.gmra.mrb[132].mxu0 %vm1250_vm1, %v2701_v41  ;;  %2108 = vmatpush1.bf16.msra.mxu1 %v9535_v19  ;;  %v706_v19 = vrot.slane %v13796_v55, 1  ;;  %v13800_v55 = vshll.u32 %v10884_v54, 16 }
 0x13d   :  { %3454 = vmatprep.mubr.bf16.mxu0 %v13867_v43  ;;  %2109 = vmatprep.subr.bf16.mxu1 %v9540_v52  ;;  %v9541_v52 = vld [vmem:[#allocation2 + $0xd0] ss:$8 sps:$4 sm:$0xff]  }
 0x13f   :  { %v11019_v41 = vpop.f32.mrb[28].mxu0  ;;  %7825 = vmatmul.mubr.msk.bf16.gmra.mrb[24].mxu1 %vm1250_vm1, %v683_v5  ;;  %v9546_v5 = vld [vmem:[#allocation2 + $0xe4] ss:$8 sps:$4 sm:$0xff]  }
 0x140   :  { %13908 = vst [vmem:[#allocation60_spill] sm:$0xff] %v11019_v41  ;;  %v11022_v33 = vpop.f32.mrb[29].mxu0  ;;  %1666 = vmatprep.mubr.bf16.mxu1 %v13867_v43  ;;  %2110 = vmatpush1.bf16.msra.mxu1 %v9538_v7  ;;  %v13801_v7 = vshrl.u32 %v10858_v16, 16  ;;  %v11197_v16 = vld [vmem:[%s13671_s0 + $0x200] ss:$0 sps:$4 sm:$0x11]  }
 0x141   :  { %13909 = vst [vmem:[#allocation61_spill] sm:$0xff] %v11022_v33  ;;  %v11024_v4 = vpop.f32.mrb[30].mxu0  ;;  %2111 = vmatprep.subr.bf16.mxu1 %v9543_v17  ;;  %v9544_v17 = vld [vmem:[#allocation2 + $0xe0] ss:$8 sps:$4 sm:$0xff]   ;;  %v2713_v33 = vsel %vm2620_vm3, %v2706_v51, %v2712_v21 }
 0x142   :  { %13910 = vst [vmem:[#allocation62_spill] sm:$0xff] %v11024_v4  ;;  %v11032_v53 = vpop.f32.mrb[31].mxu0  ;;  %v707_v4 = vsel %vm503_vm2, %v702_v61, %v706_v19  ;;  %v726_v41 = vor.u32 %v13801_v7, %v706_v19  ;;  %v11066_v51 = vld [vmem:[%s13671_s0 + $0x188] ss:$12 sps:$4 sm:$0xff]  }
 0x143   :  { %13911 = vst [vmem:[#allocation63_spill] sm:$0xff] %v11032_v53  ;;  %v2718_v19 = vrot.slane %v11066_v51, 1 }
 0x144   :  { %7955 = vmatmul.mubr.msk.bf16.gmra.mrb[136].mxu0 %vm1250_vm1, %v2707_v0  ;;  %2112 = vmatpush1.bf16.msra.mxu1 %v9541_v52  ;;  %v730_v52 = vrot.slane %v13800_v55, 1  ;;  %v13802_v55 = vshrl.u32 %v10884_v54, 16 }
 0x145   :  { %3464 = vmatprep.mubr.bf16.mxu0 %v13867_v43  ;;  %2113 = vmatprep.subr.bf16.mxu1 %v9546_v5  ;;  %v9547_v5 = vld [vmem:[#allocation2 + $0xf0] ss:$8 sps:$4 sm:$0xff]  }
 0x147   :  { %v11045_v0 = vpop.f32.mrb[32].mxu0  ;;  %7826 = vmatmul.mubr.msk.bf16.gmra.mrb[28].mxu1 %vm1250_vm1, %v707_v4  ;;  %v731_v4 = vsel %vm503_vm2, %v726_v41, %v730_v52 }
 0x148   :  { %13912 = vst [vmem:[#allocation64_spill] sm:$0xff] %v11045_v0  ;;  %v11048_v61 = vpop.f32.mrb[33].mxu0  ;;  %1676 = vmatprep.mubr.bf16.mxu1 %v13867_v43  ;;  %2114 = vmatpush1.bf16.msra.mxu1 %v9544_v17  ;;  %v13803_v17 = vshll.u32 %v10910_v10, 16 }
 0x149   :  { %13913 = vst [vmem:[#allocation65_spill] sm:$0xff] %v11048_v61  ;;  %v11050_v53 = vpop.f32.mrb[34].mxu0  ;;  %2115 = vmatprep.subr.bf16.mxu1 %v9549_v40 }
 0x14a   :  { %13914 = vst [vmem:[#allocation66_spill] sm:$0xff] %v11050_v53  ;;  %v11058_v62 = vpop.f32.mrb[35].mxu0  ;;  %v754_v53 = vrot.slane %v13803_v17, 1 }
 0x14b   :  { %13915 = vst [vmem:[#allocation67_spill] sm:$0xff] %v11058_v62  ;;  %v750_v62 = vor.u32 %v13802_v55, %v730_v52  ;;  %v13804_v52 = vshrl.u32 %v10910_v10, 16  ;;  %v13805_v55 = vshll.u32 %v10936_v22, 16 }
 0x14c   :  { %7956 = vmatmul.mubr.msk.bf16.gmra.mrb[140].mxu0 %vm1250_vm1, %v2713_v33  ;;  %2116 = vmatpush1.bf16.msra.mxu1 %v9547_v5  ;;  %v2719_v33 = vsel %vm2620_vm3, %v2712_v21, %v2718_v19  ;;  %v11092_v21 = vld [vmem:[%s13671_s0 + $0x1a0] ss:$12 sps:$4 sm:$0xff]  }
 0x14d   :  { %3474 = vmatprep.mubr.bf16.mxu0 %v13867_v43  ;;  %v755_v5 = vsel %vm503_vm2, %v750_v62, %v754_v53 }
 0x14f   :  { %v11071_v7 = vpop.f32.mrb[36].mxu0  ;;  %7827 = vmatmul.mubr.msk.bf16.gmra.mrb[32].mxu1 %vm1250_vm1, %v731_v4  ;;  %v2724_v4 = vrot.slane %v11092_v21, 1 }
 0x150   :  { %13916 = vst [vmem:[#allocation68_spill] sm:$0xff] %v11071_v7  ;;  %v11074_v40 = vpop.f32.mrb[37].mxu0  ;;  %1686 = vmatprep.mubr.bf16.mxu1 %v13867_v43 }
 0x151   :  { %13917 = vst [vmem:[#allocation69_spill] sm:$0xff] %v11074_v40  ;;  %v11076_v41 = vpop.f32.mrb[38].mxu0  ;;  %v778_v40 = vrot.slane %v13805_v55, 1 }
 0x152   :  { %13918 = vst [vmem:[#allocation70_spill] sm:$0xff] %v11076_v41  ;;  %v11084_v61 = vpop.f32.mrb[39].mxu0  ;;  %v774_v41 = vor.u32 %v13804_v52, %v754_v53  ;;  %v13806_v53 = vshrl.u32 %v10936_v22, 16  ;;  %v13807_v52 = vshll.u32 %v10962_v6, 16 }
 0x153   :  { %13919 = vst [vmem:[#allocation71_spill] sm:$0xff] %v11084_v61  ;;  %v2725_v61 = vsel %vm2620_vm3, %v2718_v19, %v2724_v4  ;;  %v11118_v19 = vld [vmem:[%s13671_s0 + $0x1b8] ss:$12 sps:$4 sm:$0xff]  }
 0x154   :  { %7957 = vmatmul.mubr.msk.bf16.gmra.mrb[144].mxu0 %vm1250_vm1, %v2719_v33 }
 0x155   :  { %3484 = vmatprep.mubr.bf16.mxu0 %v13867_v43 }
 0x157   :  { %v11097_v17 = vpop.f32.mrb[40].mxu0  ;;  %7828 = vmatmul.mubr.msk.bf16.gmra.mrb[36].mxu1 %vm1250_vm1, %v755_v5  ;;  %v779_v5 = vsel %vm503_vm2, %v774_v41, %v778_v40 }
 0x158   :  { %13920 = vst [vmem:[#allocation72_spill] sm:$0xff] %v11097_v17  ;;  %v11100_v33 = vpop.f32.mrb[41].mxu0  ;;  %1696 = vmatprep.mubr.bf16.mxu1 %v13867_v43  ;;  %v802_v17 = vrot.slane %v13807_v52, 1 }
 0x159   :  { %13921 = vst [vmem:[#allocation73_spill] sm:$0xff] %v11100_v33  ;;  %v11102_v62 = vpop.f32.mrb[42].mxu0  ;;  %v798_v33 = vor.u32 %v13806_v53, %v778_v40  ;;  %v13813_v40 = vshrl.u32 %v10962_v6, 16  ;;  %v13812_v53 = vshll.u32 %v10988_v11, 16  ;;  %v13935_v6 = vshll.u32 %v11014_v49, 16 }
 0x15a   :  { %13922 = vst [vmem:[#allocation74_spill] sm:$0xff] %v11102_v62  ;;  %v11110_v7 = vpop.f32.mrb[43].mxu0  ;;  %v2730_v62 = vrot.slane %v11118_v19, 1 }
 0x15b   :  { %13923 = vst [vmem:[#allocation75_spill] sm:$0xff] %v11110_v7  ;;  %v850_v54 = vrot.slane %v13935_v6, 1 }
 0x15c   :  { %7958 = vmatmul.mubr.msk.bf16.gmra.mrb[148].mxu0 %vm1250_vm1, %v2725_v61  ;;  %v2731_v7 = vsel %vm2620_vm3, %v2724_v4, %v2730_v62  ;;  %v11144_v4 = vld [vmem:[%s13671_s0 + $0x1d0] ss:$12 sps:$4 sm:$0xff]  }
 0x15d   :  { %3494 = vmatprep.mubr.bf16.mxu0 %v13867_v43 }
 0x15f   :  { %v11123_v55 = vpop.f32.mrb[44].mxu0  ;;  %7829 = vmatmul.mubr.msk.bf16.gmra.mrb[40].mxu1 %vm1250_vm1, %v779_v5  ;;  %v803_v5 = vsel %vm503_vm2, %v798_v33, %v802_v17 }
 0x160   :  { %13924 = vst [vmem:[#allocation76_spill] sm:$0xff] %v11123_v55  ;;  %v11126_v61 = vpop.f32.mrb[45].mxu0  ;;  %1706 = vmatprep.mubr.bf16.mxu1 %v13867_v43  ;;  %v822_v55 = vor.u32 %v13813_v40, %v802_v17  ;;  %v11180_v17 = vld [vmem:[%s13671_s0 + $0x1e8] ss:$12 sps:$4 sm:$0xff]  }
 0x161   :  { %13925 = vst [vmem:[#allocation77_spill] sm:$0xff] %v11126_v61  ;;  %v11128_v41 = vpop.f32.mrb[46].mxu0 }
 0x162   :  { %13926 = vst [vmem:[#allocation78_spill] sm:$0xff] %v11128_v41  ;;  %v11136_v0 = vpop.f32.mrb[47].mxu0  ;;  %v2736_v41 = vrot.slane %v11144_v4, 1 }
 0x163   :  { %13927 = vst [vmem:[#allocation79_spill] sm:$0xff] %v11136_v0 }
 0x164   :  { %7959 = vmatmul.mubr.msk.bf16.gmra.mrb[152].mxu0 %vm1250_vm1, %v2731_v7  ;;  %v2571_v7 = vld [vmem:[%s13671_s0] sm:$0xee]  ;;  %v2737_v61 = vsel %vm2620_vm3, %v2730_v62, %v2736_v41  ;;  %v13823_v62 = vshrl.u32 %v10988_v11, 16  ;;  %v13940_v11 = vshll.u32 %v10177_v39, 16 }
 0x165   :  { %3504 = vmatprep.mubr.bf16.mxu0 %v13867_v43 }
 0x166   :  { %v3690_v36 = vrot.slane %v13940_v11, 2 }
 0x167   :  { %v11149_v52 = vpop.f32.mrb[48].mxu0  ;;  %7830 = vmatmul.mubr.msk.bf16.gmra.mrb[44].mxu1 %vm1250_vm1, %v803_v5  ;;  %v9879_v5 = vld [vmem:[%s13671_s0 + $0xc] sm:$0xff] }
 0x168   :  { %13928 = vst [vmem:[#allocation80_spill] sm:$0xff] %v11149_v52  ;;  %v11155_v33 = vpop.f32.mrb[49].mxu0  ;;  %1716 = vmatprep.mubr.bf16.mxu1 %v13867_v43  ;;  %v826_v52 = vrot.slane %v13812_v53, 1  ;;  %v11170_v10 = vcombine.high %v2571_v7, %v9879_v5  ;;  %v2742_v53 = vrot.slane %v11180_v17, 1 }
 0x169   :  { %13929 = vst [vmem:[#allocation81_spill] sm:$0xff] %v11155_v33  ;;  %v11157_v0 = vpop.f32.mrb[50].mxu0 }
 0x16a   :  { %13930 = vst [vmem:[#allocation82_spill] sm:$0xff] %v11157_v0  ;;  %v11165_v22 = vpop.f32.mrb[51].mxu0  ;;  %13932 = vst [vmem:[#allocation84_spill] sm:$0xff] %v11170_v10  ;;  %v827_v33 = vsel %vm503_vm2, %v822_v55, %v826_v52  ;;  %v3682_v40 = vshrl.u32 %v11170_v10, 16  ;;  %v846_v55 = vor.u32 %v13823_v62, %v826_v52  ;;  %v13939_v62 = vshrl.u32 %v10177_v39, 16 }
 0x16b   :  { %13931 = vst [vmem:[#allocation83_spill] sm:$0xff] %v11165_v22  ;;  %v3685_v22 = vshll.u32 %v11170_v10, 16  ;;  %v2743_v10 = vsel %vm2620_vm3, %v2736_v41, %v2742_v53  ;;  %v2748_v41 = vrot.slane %v11197_v16, 1 }
 0x16c   :  { %7960 = vmatmul.mubr.msk.bf16.gmra.mrb[156].mxu0 %vm1250_vm1, %v2737_v61  ;;  %v3689_v6 = vrot.slane %v13939_v62, 1 }
 0x16d   :  { %3514 = vmatprep.mubr.bf16.mxu0 %v13867_v43  ;;  %v3687_v52 = vrot.slane %v3685_v22, 2  ;;  %v2749_v11 = vsel %vm2620_vm3, %v2742_v53, %v2748_v41  ;;  %v13947_v53 = vshll.u32 %v10206_v63, 16 }
 0x16f   :  { %v11185_v61 = vpop.f32.mrb[52].mxu0  ;;  %7831 = vmatmul.mubr.msk.bf16.gmra.mrb[48].mxu1 %vm1250_vm1, %v827_v33  ;;  %v11203_v33 = vcombine.low %v2571_v7, %v9879_v5  ;;  %v13829_v7 = vshrl.u32 %v11014_v49, 16  ;;  %v3710_v41 = vrot.slane %v13947_v53, 2 }
 0x170   :  { %13933 = vst [vmem:[#allocation85_spill] sm:$0xff] %v11185_v61  ;;  %v11188_v0 = vpop.f32.mrb[53].mxu0  ;;  %1726 = vmatprep.mubr.bf16.mxu1 %v13867_v43  ;;  %v3684_v61 = vrot.slane %v3682_v40, 1 }
 0x171   :  { %13934 = vst [vmem:[#allocation86_spill] sm:$0xff] %v11188_v0  ;;  %v11199_v18 = vpop.f32.mrb[54].mxu0  ;;  %13937 = vst [vmem:[#allocation88_spill] sm:$0xff] %v11203_v33  ;;  %v3670_v22 = vshrl.u32 %v11203_v33, 16  ;;  %v3673_v40 = vshll.u32 %v11203_v33, 16  ;;  %v870_v5 = vor.u32 %v13829_v7, %v850_v54  ;;  %v13944_v33 = vshll.u32 %v11040_v32, 16 }
 0x172   :  { %13936 = vst [vmem:[#allocation87_spill] sm:$0xff] %v11199_v18  ;;  %v11205_v0 = vpop.f32.mrb[55].mxu0  ;;  %v851_v18 = vsel %vm503_vm2, %v846_v55, %v850_v54  ;;  %v3688_v62 = vor.u32 %v3687_v52, %v3684_v61 }
 0x173   :  { %13938 = vst [vmem:[#allocation89_spill] sm:$0xff] %v11205_v0  ;;  %v3691_v0 = vor.u32 %v3690_v36, %v3689_v6  ;;  %v874_v61 = vrot.slane %v13944_v33, 1  ;;  %v3672_v36 = vrot.slane %v3670_v22, 1  ;;  %v3675_v52 = vrot.slane %v3673_v40, 2 }
 0x174   :  { %7961 = vmatmul.mubr.msk.bf16.gmra.mrb[160].mxu0 %vm1250_vm1, %v2743_v10  ;;  %v13831_v33 = vshrl.u32 %v11040_v32, 16  ;;  %v13830_v22 = vshll.u32 %v11066_v51, 16 }
 0x175   :  { %3524 = vmatprep.mubr.bf16.mxu0 %v13867_v43  ;;  %v3676_v54 = vor.u32 %v3675_v52, %v3672_v36  ;;  %v9526_v52 = vld [vmem:[#allocation2 + $0x490] ss:$8 sps:$4 sm:$0xff]  }
 0x177   :  { %v11219_v39 = vpop.f32.mrb[56].mxu0  ;;  %7832 = vmatmul.mubr.msk.bf16.gmra.mrb[52].mxu1 %vm1250_vm1, %v851_v18  ;;  %v3692_v18 = vsel %vm3668_vm4, %v3688_v62, %v3691_v0  ;;  %v3680_v36 = vsel %vm3668_vm4, %v3676_v54, %v10827_v37  ;;  %v9552_v54 = vld [vmem:[#allocation2 + $0x4a4] ss:$8 sps:$4 sm:$0xff]  }
 0x178   :  { %13941 = vst [vmem:[#allocation90_spill] sm:$0xff] %v11219_v39  ;;  %v11222_v10 = vpop.f32.mrb[57].mxu0  ;;  %1736 = vmatprep.mubr.bf16.mxu1 %v13867_v43 }
 0x179   :  { %13942 = vst [vmem:[#allocation91_spill] sm:$0xff] %v11222_v10  ;;  %v11225_v55 = vpop.f32.mrb[58].mxu0  ;;  %v13946_v10 = vshrl.u32 %v10206_v63, 16  ;;  %v13950_v63 = vshrl.u32 %v10222_v12, 16 }
 0x17a   :  { %13943 = vst [vmem:[#allocation92_spill] sm:$0xff] %v11225_v55  ;;  %v11232_v6 = vpop.f32.mrb[59].mxu0  ;;  %v875_v55 = vsel %vm503_vm2, %v870_v5, %v874_v61 }
 0x17b   :  { %13945 = vst [vmem:[#allocation93_spill] sm:$0xff] %v11232_v6  ;;  %v3709_v39 = vrot.slane %v13946_v10, 1  ;;  %v3705_v10 = vrot.slane %v13950_v63, 1 }
 0x17c   :  { %7962 = vmatmul.mubr.msk.bf16.gmra.mrb[164].mxu0 %vm1250_vm1, %v2749_v11  ;;  %v13951_v11 = vshll.u32 %v10222_v12, 16  ;;  %v13954_v12 = vshrl.u32 %v10231_v15, 16 }
 0x17d   :  { %4291 = vmatprep.mubr.bf16.mxu0 %v3692_v18  ;;  %v3711_v40 = vor.u32 %v3710_v41, %v3709_v39  ;;  %v894_v39 = vor.u32 %v13831_v33, %v874_v61  ;;  %v13833_v61 = vshrl.u32 %v11066_v51, 16  ;;  %v9550_v33 = vld [vmem:[#allocation2 + $0x4a0] ss:$8 sps:$4 sm:$0xff]  }
 0x17e   :  { %v3706_v53 = vrot.slane %v13951_v11, 2  ;;  %v3721_v63 = vrot.slane %v13954_v12, 1  ;;  %v13955_v11 = vshll.u32 %v10231_v15, 16 }
 0x17f   :  { %v11243_v7 = vpop.f32.mrb[60].mxu0  ;;  %7833 = vmatmul.mubr.msk.bf16.gmra.mrb[56].mxu1 %vm1250_vm1, %v875_v55  ;;  %v898_v55 = vrot.slane %v13830_v22, 1  ;;  %v3712_v41 = vsel %vm3668_vm4, %v3691_v0, %v3711_v40  ;;  %v13832_v22 = vshll.u32 %v11092_v21, 16 }
 0x180   :  { %13948 = vst [vmem:[#allocation94_spill] sm:$0xff] %v11243_v7  ;;  %v11246_v62 = vpop.f32.mrb[61].mxu0  ;;  %1746 = vmatprep.mubr.bf16.mxu1 %v13867_v43 }
 0x181   :  { %13949 = vst [vmem:[#allocation95_spill] sm:$0xff] %v11246_v62  ;;  %v11252_v5 = vpop.f32.mrb[62].mxu0  ;;  %v3707_v62 = vor.u32 %v3706_v53, %v3705_v10  ;;  %v899_v7 = vsel %vm503_vm2, %v894_v39, %v898_v55  ;;  %v9553_v53 = vld [vmem:[#allocation2 + $0x4b4] ss:$8 sps:$4 sm:$0x3f]   ;;  %v918_v39 = vor.u32 %v13833_v61, %v898_v55 }
 0x182   :  { %13952 = vst [vmem:[#allocation96_spill] sm:$0xff] %v11252_v5  ;;  %v11261_v18 = vpop.f32.mrb[63].mxu0  ;;  %v3722_v5 = vrot.slane %v13955_v11, 2  ;;  %v13962_v11 = vshrl.u32 %v10256_v27, 16 }
 0x183   :  { %13953 = vst [vmem:[#allocation97_spill] sm:$0xff] %v11261_v18  ;;  %v3708_v10 = vsel %vm3668_vm4, %v10827_v37, %v3707_v62 }
 0x184   :  { %4292 = vmatmul.mubr.bf16.vlgmr.msra.gmra.mrb[84].mxu0 %v3680_v36  ;;  %v3723_v18 = vor.u32 %v3722_v5, %v3721_v63  ;;  %v922_v5 = vrot.slane %v13832_v22, 1  ;;  %v9555_v22 = vld [vmem:[#allocation2 + $0x4b0] ss:$8 sps:$4 sm:$0x3f]  }
 0x185   :  { %4301 = vmatprep.mubr.bf16.mxu0 %v3712_v41  ;;  %4503 = vmatpush1.bf16.msra.mxu0 %v9526_v52  ;;  %v13959_v52 = vshrl.u32 %v10247_v24, 16 }
 0x186   :  { %4504 = vmatprep.subr.bf16.mxu0 %v9552_v54  ;;  %v3724_v37 = vsel %vm3668_vm4, %v3711_v40, %v3723_v18  ;;  %v3733_v54 = vrot.slane %v13962_v11, 1  ;;  %v4254_v40 = vsel %vm1314_vm0, %v9555_v22, 0 }
 0x187   :  { %v11271_v0 = vpop.f32.mrb[64].mxu0  ;;  %7834 = vmatmul.mubr.msk.bf16.gmra.mrb[60].mxu1 %vm1250_vm1, %v899_v7  ;;  %v3717_v41 = vrot.slane %v13959_v52, 1  ;;  %v13960_v7 = vshll.u32 %v10247_v24, 16  ;;  %v923_v52 = vsel %vm503_vm2, %v918_v39, %v922_v5 }
 0x188   :  { %13956 = vst [vmem:[#allocation98_spill] sm:$0xff] %v11271_v0  ;;  %v11274_v15 = vpop.f32.mrb[65].mxu0  ;;  %1756 = vmatprep.mubr.bf16.mxu1 %v13867_v43  ;;  %v9642_v0 = vld [vmem:[#allocation2 + $0x580] ss:$8 sps:$4 sm:$0xff]  }
 0x189   :  { %13957 = vst [vmem:[#allocation99_spill] sm:$0xff] %v11274_v15  ;;  %v11278_v36 = vpop.f32.mrb[66].mxu0  ;;  %v3718_v12 = vrot.slane %v13960_v7, 2  ;;  %4505 = vmatpush1.bf16.msra.mxu0 %v9550_v33  ;;  %v13835_v33 = vshrl.u32 %v11092_v21, 16  ;;  %v13834_v7 = vshll.u32 %v11118_v19, 16 }
 0x18a   :  { %13958 = vst [vmem:[#allocation100_spill] sm:$0xff] %v11278_v36  ;;  %v11289_v63 = vpop.f32.mrb[67].mxu0  ;;  %v13963_v36 = vshll.u32 %v10256_v27, 16  ;;  %8004 = vmatprep.subr.msk.bf16.mxu0 %vm1314_vm0, %v9553_v53  ;;  %v9644_v15 = vld [vmem:[#allocation2 + $0x584] ss:$8 sps:$4 sm:$0xff]  }
 0x18b   :  { %13961 = vst [vmem:[#allocation101_spill] sm:$0xff] %v11289_v63  ;;  %v3719_v24 = vor.u32 %v3718_v12, %v3717_v41  ;;  %v942_v22 = vor.u32 %v13835_v33, %v922_v5  ;;  %v13837_v5 = vshrl.u32 %v11118_v19, 16 }
 0x18c   :  { %v3734_v55 = vrot.slane %v13963_v36, 2  ;;  %4302 = vmatmul.mubr.bf16.gmra.mrb[88].mxu0 %v3708_v10  ;;  %v13966_v10 = vshrl.u32 %v10278_v42, 16  ;;  %v13967_v36 = vshll.u32 %v10278_v42, 16 }
 0x18d   :  { %4311 = vmatprep.mubr.bf16.mxu0 %v3724_v37  ;;  %4507 = vmatpush1.bf16.msra.mxu0 %v4254_v40  ;;  %v3720_v12 = vsel %vm3668_vm4, %v3707_v62, %v3719_v24  ;;  %v946_v37 = vrot.slane %v13834_v7, 1 }
 0x18e   :  { %v3735_v61 = vor.u32 %v3734_v55, %v3733_v54  ;;  %v3729_v53 = vrot.slane %v13966_v10, 1  ;;  %v3730_v39 = vrot.slane %v13967_v36, 2  ;;  %v13970_v55 = vshrl.u32 %v10291_v48, 16 }
 0x18f   :  { %v11301_v63 = vpop.f32.mrb[68].mxu0  ;;  %7835 = vmatmul.mubr.msk.bf16.gmra.mrb[64].mxu1 %vm1250_vm1, %v923_v52  ;;  %v13971_v52 = vshll.u32 %v10291_v48, 16  ;;  %v947_v10 = vsel %vm503_vm2, %v942_v22, %v946_v37  ;;  %v13836_v36 = vshll.u32 %v11144_v4, 16 }
 0x190   :  { %13964 = vst [vmem:[#allocation102_spill] sm:$0xff] %v11301_v63  ;;  %v11304_v27 = vpop.f32.mrb[69].mxu0  ;;  %1766 = vmatprep.mubr.bf16.mxu1 %v13867_v43  ;;  %v3736_v54 = vsel %vm3668_vm4, %v3723_v18, %v3735_v61  ;;  %v3745_v42 = vrot.slane %v13970_v55, 1  ;;  %v3731_v62 = vor.u32 %v3730_v39, %v3729_v53  ;;  %v966_v53 = vor.u32 %v13837_v5, %v946_v37  ;;  %v9558_v5 = vld [vmem:[#allocation2 + $0x264] ss:$8 sps:$4 sm:$0xff]  }
 0x191   :  { %13965 = vst [vmem:[#allocation103_spill] sm:$0xff] %v11304_v27  ;;  %v11310_v41 = vpop.f32.mrb[70].mxu0  ;;  %v3746_v40 = vrot.slane %v13971_v52, 2  ;;  %v970_v39 = vrot.slane %v13836_v36, 1  ;;  %3049 = vmatprep.subr.bf16.mxu1 %v9558_v5  ;;  %v13987_v5 = vshll.u32 %v10349_v26, 16 }
 0x192   :  { %13968 = vst [vmem:[#allocation104_spill] sm:$0xff] %v11310_v41  ;;  %v11318_v11 = vpop.f32.mrb[71].mxu0  ;;  %v3732_v55 = vsel %vm3668_vm4, %v3719_v24, %v3731_v62  ;;  %v9638_v41 = vld [vmem:[#allocation2 + $0x564] ss:$8 sps:$4 sm:$0xff]  }
 0x193   :  { %13969 = vst [vmem:[#allocation105_spill] sm:$0xff] %v11318_v11  ;;  %v3747_v7 = vor.u32 %v3746_v40, %v3745_v42  ;;  %v13978_v40 = vshrl.u32 %v10320_v1, 16  ;;  %v971_v37 = vsel %vm503_vm2, %v966_v53, %v970_v39  ;;  %v9633_v11 = vld [vmem:[#allocation2 + $0x550] ss:$8 sps:$4 sm:$0xff]  }
 0x194   :  { %4312 = vmatmul.mubr.bf16.gmra.mrb[92].mxu0 %v3720_v12  ;;  %v13975_v12 = vshrl.u32 %v10311_v59, 16 }
 0x195   :  { %4321 = vmatprep.mubr.bf16.mxu0 %v3736_v54  ;;  %v13976_v54 = vshll.u32 %v10311_v59, 16  ;;  %v3748_v24 = vsel %vm3668_vm4, %v3735_v61, %v3747_v7  ;;  %v13839_v59 = vshll.u32 %v11180_v17, 16 }
 0x196   :  { %v3741_v22 = vrot.slane %v13975_v12, 1  ;;  %v13838_v12 = vshrl.u32 %v11144_v4, 16 }
 0x197   :  { %v11328_v33 = vpop.f32.mrb[72].mxu0  ;;  %7836 = vmatmul.mubr.msk.bf16.gmra.mrb[68].mxu1 %vm1250_vm1, %v947_v10  ;;  %v3742_v42 = vrot.slane %v13976_v54, 2  ;;  %v3757_v10 = vrot.slane %v13978_v40, 1 }
 0x198   :  { %13972 = vst [vmem:[#allocation106_spill] sm:$0xff] %v11328_v33  ;;  %v11331_v18 = vpop.f32.mrb[73].mxu0  ;;  %1776 = vmatprep.mubr.bf16.mxu1 %v13867_v43  ;;  %v9632_v33 = vld [vmem:[#allocation2 + $0x544] ss:$8 sps:$4 sm:$0xff]  }
 0x199   :  { %13973 = vst [vmem:[#allocation107_spill] sm:$0xff] %v11331_v18  ;;  %v11334_v48 = vpop.f32.mrb[74].mxu0  ;;  %v3743_v36 = vor.u32 %v3742_v42, %v3741_v22 }
 0x19a   :  { %13974 = vst [vmem:[#allocation108_spill] sm:$0xff] %v11334_v48  ;;  %v11345_v52 = vpop.f32.mrb[75].mxu0  ;;  %v13979_v48 = vshll.u32 %v10320_v1, 16  ;;  %v13982_v1 = vshrl.u32 %v10340_v20, 16 }
 0x19b   :  { %13977 = vst [vmem:[#allocation109_spill] sm:$0xff] %v11345_v52  ;;  %v3744_v42 = vsel %vm3668_vm4, %v3731_v62, %v3743_v36 }
 0x19c   :  { %v3758_v18 = vrot.slane %v13979_v48, 2  ;;  %4322 = vmatmul.mubr.bf16.gmra.mrb[96].mxu0 %v3732_v55  ;;  %v3753_v48 = vrot.slane %v13982_v1, 1  ;;  %v13983_v55 = vshll.u32 %v10340_v20, 16  ;;  %v13986_v20 = vshrl.u32 %v10349_v26, 16 }
 0x19d   :  { %4331 = vmatprep.mubr.bf16.mxu0 %v3748_v24  ;;  %v994_v24 = vrot.slane %v13839_v59, 1  ;;  %v3770_v1 = vrot.slane %v13987_v5, 2 }
 0x19e   :  { %v3759_v54 = vor.u32 %v3758_v18, %v3757_v10  ;;  %v3754_v53 = vrot.slane %v13983_v55, 2  ;;  %v990_v18 = vor.u32 %v13838_v12, %v970_v39  ;;  %v13840_v39 = vshrl.u32 %v11180_v17, 16 }
 0x19f   :  { %v11355_v52 = vpop.f32.mrb[76].mxu0  ;;  %7837 = vmatmul.mubr.msk.bf16.gmra.mrb[72].mxu1 %vm1250_vm1, %v971_v37  ;;  %v3769_v37 = vrot.slane %v13986_v20, 1  ;;  %v1016_v12 = vshll.u32 %v11197_v16, 16 }
 0x1a0   :  { %13980 = vst [vmem:[#allocation110_spill] sm:$0xff] %v11355_v52  ;;  %v11358_v61 = vpop.f32.mrb[77].mxu0  ;;  %1786 = vmatprep.mubr.bf16.mxu1 %v13867_v43  ;;  %v3760_v10 = vsel %vm3668_vm4, %v3747_v7, %v3759_v54  ;;  %v3755_v62 = vor.u32 %v3754_v53, %v3753_v48  ;;  %v995_v55 = vsel %vm503_vm2, %v990_v18, %v994_v24  ;;  %v13992_v18 = vshll.u32 %v10365_v46, 16  ;;  %v9627_v52 = vld [vmem:[#allocation2 + $0x530] ss:$8 sps:$4 sm:$0xff]  }
 0x1a1   :  { %13981 = vst [vmem:[#allocation111_spill] sm:$0xff] %v11358_v61  ;;  %v11364_v22 = vpop.f32.mrb[78].mxu0  ;;  %v3771_v59 = vor.u32 %v3770_v1, %v3769_v37  ;;  %v1014_v48 = vor.u32 %v13840_v39, %v994_v24  ;;  %v1018_v53 = vrot.slane %v1016_v12, 1  ;;  %v9626_v61 = vld [vmem:[#allocation2 + $0x524] ss:$8 sps:$4 sm:$0xff]  }
 0x1a2   :  { %13984 = vst [vmem:[#allocation112_spill] sm:$0xff] %v11364_v22  ;;  %v11372_v40 = vpop.f32.mrb[79].mxu0  ;;  %v3756_v20 = vsel %vm3668_vm4, %v3743_v36, %v3755_v62  ;;  %v13994_v36 = vshrl.u32 %v10370_v47, 16 }
 0x1a3   :  { %13985 = vst [vmem:[#allocation113_spill] sm:$0xff] %v11372_v40  ;;  %v3772_v5 = vsel %vm3668_vm4, %v3759_v54, %v3771_v59  ;;  %v1019_v24 = vsel %vm503_vm2, %v1014_v48, %v1018_v53  ;;  %v13996_v54 = vshrl.u32 %v10396_v29, 16  ;;  %v13999_v53 = vshll.u32 %v10409_v45, 16  ;;  %v9621_v40 = vld [vmem:[#allocation2 + $0x510] ss:$8 sps:$4 sm:$0xff]  }
 0x1a4   :  { %4332 = vmatmul.mubr.bf16.gmra.mrb[100].mxu0 %v3744_v42  ;;  %v13991_v42 = vshrl.u32 %v10365_v46, 16  ;;  %v3781_v1 = vrot.slane %v13994_v36, 1 }
 0x1a5   :  { %4341 = vmatprep.mubr.bf16.mxu0 %v3760_v10  ;;  %v3766_v10 = vrot.slane %v13992_v18, 2  ;;  %v13997_v18 = vshll.u32 %v10396_v29, 16  ;;  %v11422_v29 = vld [vmem:[%s13671_s0 + $0x1c] ss:$12 sps:$4 sm:$0xff]  }
 0x1a6   :  { %v3765_v16 = vrot.slane %v13991_v42, 1  ;;  %v3777_v42 = vrot.slane %v13996_v54, 1  ;;  %v14003_v54 = vshll.u32 %v10430_v13, 16  ;;  %v2625_v63 = vrot.slane %v11422_v29, 1 }
 0x1a7   :  { %v11382_v22 = vpop.f32.mrb[80].mxu0  ;;  %7838 = vmatmul.mubr.msk.bf16.gmra.mrb[76].mxu1 %vm1250_vm1, %v995_v55  ;;  %v13995_v55 = vshll.u32 %v10370_v47, 16  ;;  %v3778_v36 = vrot.slane %v13997_v18, 2  ;;  %v9566_v18 = vld [vmem:[#allocation2 + $0x284] ss:$8 sps:$4 sm:$0xff]  }
 0x1a8   :  { %13988 = vst [vmem:[#allocation114_spill] sm:$0xff] %v11382_v22  ;;  %v11385_v7 = vpop.f32.mrb[81].mxu0  ;;  %1796 = vmatprep.mubr.bf16.mxu1 %v13867_v43  ;;  %v3767_v12 = vor.u32 %v3766_v10, %v3765_v16 }
 0x1a9   :  { %13989 = vst [vmem:[#allocation115_spill] sm:$0xff] %v11385_v7  ;;  %v11388_v26 = vpop.f32.mrb[82].mxu0  ;;  %v3779_v16 = vor.u32 %v3778_v36, %v3777_v42  ;;  %v3806_v42 = vrot.slane %v14003_v54, 2  ;;  %v9575_v54 = vld [vmem:[#allocation2 + $0x2b4] ss:$8 sps:$4 sm:$0xff]  }
 0x1aa   :  { %13990 = vst [vmem:[#allocation116_spill] sm:$0xff] %v11388_v26  ;;  %v11397_v37 = vpop.f32.mrb[83].mxu0  ;;  %v3782_v26 = vrot.slane %v13995_v55, 2  ;;  %v3768_v46 = vsel %vm3668_vm4, %v3755_v62, %v3767_v12  ;;  %v9556_v62 = vld [vmem:[#allocation2 + $0x260] ss:$8 sps:$4 sm:$0xff]  }
 0x1ab   :  { %13993 = vst [vmem:[#allocation117_spill] sm:$0xff] %v11397_v37 }
 0x1ac   :  { %4342 = vmatmul.mubr.bf16.gmra.mrb[104].mxu0 %v3756_v20  ;;  %v3783_v39 = vor.u32 %v3782_v26, %v3781_v1  ;;  %v13998_v20 = vshrl.u32 %v10409_v45, 16  ;;  %v3794_v26 = vrot.slane %v13999_v53, 2  ;;  %v14000_v45 = vshrl.u32 %v10425_v2, 16  ;;  %v11444_v53 = vld [vmem:[%s13671_s0 + $0x34] ss:$12 sps:$4 sm:$0xff]  }
 0x1ad   :  { %4351 = vmatprep.mubr.bf16.mxu0 %v3772_v5  ;;  %v3780_v5 = vsel %vm3668_vm4, %v3767_v12, %v3779_v16  ;;  %v14001_v1 = vshll.u32 %v10425_v2, 16  ;;  %v9569_v2 = vld [vmem:[#allocation2 + $0x294] ss:$8 sps:$4 sm:$0xff]   ;;  %v2632_v6 = vrot.slane %v11444_v53, 1 }
 0x1ae   :  { %v3784_v47 = vsel %vm3668_vm4, %v3771_v59, %v3783_v39  ;;  %v3793_v48 = vrot.slane %v13998_v20, 1  ;;  %v3789_v59 = vrot.slane %v14000_v45, 1  ;;  %v9567_v45 = vld [vmem:[#allocation2 + $0x290] ss:$8 sps:$4 sm:$0xff]  }
 0x1af   :  { %7839 = vmatmul.mubr.msk.bf16.gmra.mrb[80].mxu1 %vm1250_vm1, %v1019_v24  ;;  %v3790_v55 = vrot.slane %v14001_v1, 2  ;;  %v9560_v24 = vld [vmem:[#allocation2 + $0x270] ss:$8 sps:$4 sm:$0xff]   ;;  %v14006_v1 = vshrl.u32 %v10459_v14, 16 }
 0x1b0   :  { %2117 = vmatprep.mubr.bf16.mxu1 %v10172_v38  ;;  %v3795_v10 = vor.u32 %v3794_v26, %v3793_v48  ;;  %v9562_v38 = vld [vmem:[#allocation2 + $0x274] ss:$8 sps:$4 sm:$0xff]   ;;  %v9587_v48 = vld [vmem:[#allocation2 + $0x4c4] ss:$8 sps:$4 sm:$0xff]   ;;  %v14004_v26 = vshrl.u32 %v10454_v57, 16 }
 0x1b1   :  { %v3791_v36 = vor.u32 %v3790_v55, %v3789_v59  ;;  %v14007_v55 = vshll.u32 %v10459_v14, 16  ;;  %5307 = vmatprep.subr.bf16.mxu0 %v9587_v48 }
 0x1b4   :  { %4352 = vmatmul.mubr.bf16.gmra.mrb[108].mxu0 %v3768_v46  ;;  %v3796_v46 = vsel %vm3668_vm4, %v3783_v39, %v3795_v10  ;;  %v11437_v39 = vld [vmem:[%s13671_s0 + $0x18] ss:$12 sps:$4 sm:$0xff]  }
 0x1b5   :  { %4361 = vmatprep.mubr.bf16.mxu0 %v3784_v47  ;;  %v9564_v47 = vld [vmem:[#allocation2 + $0x280] ss:$8 sps:$4 sm:$0xff]  }
 0x1b7   :  { %2118 = vmatmul.mubr.bf16.vlgmr.msra.gmra.mrb[0].mxu1 %v10192_v56  ;;  %v14002_v56 = vshrl.u32 %v10430_v13, 16  ;;  %v3792_v13 = vsel %vm3668_vm4, %v3779_v16, %v3791_v36  ;;  %v3817_v16 = vrot.slane %v14006_v1, 1  ;;  %v9576_v1 = vld [vmem:[#allocation2 + $0x2c0] ss:$8 sps:$4 sm:$0xff]  }
 0x1b8   :  { %2127 = vmatprep.mubr.bf16.mxu1 %v11422_v29  ;;  %3050 = vmatpush1.bf16.msra.mxu1 %v9556_v62  ;;  %v3801_v62 = vrot.slane %v14004_v26, 1 }
 0x1b9   :  { %v3805_v12 = vrot.slane %v14002_v56, 1  ;;  %3051 = vmatprep.subr.bf16.mxu1 %v9562_v38  ;;  %v14005_v38 = vshll.u32 %v10454_v57, 16 }
 0x1bb   :  { %v3807_v20 = vor.u32 %v3806_v42, %v3805_v12  ;;  %v9570_v12 = vld [vmem:[#allocation2 + $0x2a0] ss:$8 sps:$4 sm:$0xff]   ;;  %v11466_v42 = vld [vmem:[%s13671_s0 + $0x4c] ss:$12 sps:$4 sm:$0xff]  }
 0x1bc   :  { %4362 = vmatmul.mubr.bf16.gmra.mrb[112].mxu0 %v3780_v5  ;;  %3052 = vmatpush1.bf16.msra.mxu1 %v9560_v24  ;;  %v3802_v5 = vrot.slane %v14005_v38, 2  ;;  %v3818_v24 = vrot.slane %v14007_v55, 2  ;;  %v14011_v38 = vshll.u32 %v10488_v34, 16  ;;  %v11488_v55 = vld [vmem:[%s13671_s0 + $0x64] ss:$12 sps:$4 sm:$0xff]  }
 0x1bd   :  { %4371 = vmatprep.mubr.bf16.mxu0 %v3796_v46  ;;  %3053 = vmatprep.subr.bf16.mxu1 %v9566_v18  ;;  %v3808_v59 = vsel %vm3668_vm4, %v3795_v10, %v3807_v20  ;;  %v9572_v46 = vld [vmem:[#allocation2 + $0x2a4] ss:$8 sps:$4 sm:$0xff]   ;;  %v11459_v10 = vld [vmem:[%s13671_s0 + $0x30] ss:$12 sps:$4 sm:$0xff]   ;;  %v14008_v18 = vshrl.u32 %v10483_v60, 16 }
 0x1be   :  { %v3803_v56 = vor.u32 %v3802_v5, %v3801_v62  ;;  %v3819_v57 = vor.u32 %v3818_v24, %v3817_v16  ;;  %v14010_v62 = vshrl.u32 %v10488_v34, 16  ;;  %v3830_v5 = vrot.slane %v14011_v38, 2  ;;  %v11510_v38 = vld [vmem:[%s13671_s0 + $0x7c] ss:$12 sps:$4 sm:$0xff]  }
 0x1bf   :  { %2128 = vmatmul.mubr.bf16.gmra.mrb[4].mxu1 %v11437_v39  ;;  %v14012_v24 = vshrl.u32 %v10512_v44, 16 }
 0x1c0   :  { %2137 = vmatprep.mubr.bf16.mxu1 %v11444_v53  ;;  %3054 = vmatpush1.bf16.msra.mxu1 %v9564_v47  ;;  %v3804_v14 = vsel %vm3668_vm4, %v3791_v36, %v3803_v56  ;;  %v3813_v47 = vrot.slane %v14008_v18, 1  ;;  %v3820_v26 = vsel %vm3668_vm4, %v3807_v20, %v3819_v57  ;;  %v3829_v36 = vrot.slane %v14010_v62, 1  ;;  %v11481_v20 = vld [vmem:[%s13671_s0 + $0x48] ss:$12 sps:$4 sm:$0xff]  }
 0x1c1   :  { %3055 = vmatprep.subr.bf16.mxu1 %v9569_v2  ;;  %v14009_v2 = vshll.u32 %v10483_v60, 16  ;;  %v9581_v60 = vld [vmem:[#allocation2 + $0x2d4] ss:$8 sps:$4 sm:$0xff]   ;;  %v9582_v62 = vld [vmem:[#allocation2 + $0x2e0] ss:$8 sps:$4 sm:$0xff]  }
 0x1c2   :  { %v3831_v16 = vor.u32 %v3830_v5, %v3829_v36  ;;  %v14016_v5 = vshrl.u32 %v10541_v31, 16  ;;  %v14081_v53 = vld [vmem:[#allocation35_spill] sm:$0xff] }
 0x1c3   :  { %v3814_v48 = vrot.slane %v14009_v2, 2  ;;  %v14015_v2 = vshll.u32 %v10525_v8, 16 }
 0x1c4   :  { %4372 = vmatmul.mubr.bf16.gmra.mrb[116].mxu0 %v3792_v13  ;;  %3056 = vmatpush1.bf16.msra.mxu1 %v9567_v45  ;;  %v9573_v13 = vld [vmem:[#allocation2 + $0x2b0] ss:$8 sps:$4 sm:$0xff]   ;;  %v9578_v45 = vld [vmem:[#allocation2 + $0x2c4] ss:$8 sps:$4 sm:$0xff]   ;;  %v3832_v18 = vsel %vm3668_vm4, %v3819_v57, %v3831_v16 }
 0x1c5   :  { %4381 = vmatprep.mubr.bf16.mxu0 %v3808_v59  ;;  %3057 = vmatprep.subr.bf16.mxu1 %v9572_v46  ;;  %v3815_v59 = vor.u32 %v3814_v48, %v3813_v47  ;;  %v3825_v46 = vrot.slane %v14012_v24, 1  ;;  %v14014_v47 = vshrl.u32 %v10525_v8, 16  ;;  %v3842_v48 = vrot.slane %v14015_v2, 2  ;;  %v11503_v57 = vld [vmem:[%s13671_s0 + $0x60] ss:$12 sps:$4 sm:$0xff]  }
 0x1c6   :  { %v11532_v2 = vld [vmem:[%s13671_s0 + $0x94] ss:$12 sps:$4 sm:$0xff]  }
 0x1c7   :  { %2138 = vmatmul.mubr.bf16.gmra.mrb[8].mxu1 %v11459_v10  ;;  %v3816_v34 = vsel %vm3668_vm4, %v3803_v56, %v3815_v59  ;;  %v3841_v56 = vrot.slane %v14014_v47, 1  ;;  %v9591_v47 = vld [vmem:[#allocation2 + $0x300] ss:$8 sps:$4 sm:$0xff]  }
 0x1c8   :  { %2147 = vmatprep.mubr.bf16.mxu1 %v11466_v42  ;;  %3058 = vmatpush1.bf16.msra.mxu1 %v9570_v12  ;;  %v14013_v12 = vshll.u32 %v10512_v44, 16  ;;  %v9590_v44 = vld [vmem:[#allocation2 + $0x2f4] ss:$8 sps:$4 sm:$0xff]  }
 0x1c9   :  { %3059 = vmatprep.subr.bf16.mxu1 %v9575_v54  ;;  %v3843_v36 = vor.u32 %v3842_v48, %v3841_v56  ;;  %v14020_v48 = vshrl.u32 %v10570_v23, 16 }
 0x1ca   :  { %v3826_v54 = vrot.slane %v14013_v12, 2  ;;  %v14019_v12 = vshll.u32 %v10546_v25, 16 }
 0x1cb   :  { %v3844_v24 = vsel %vm3668_vm4, %v3831_v16, %v3843_v36  ;;  %v11525_v16 = vld [vmem:[%s13671_s0 + $0x78] ss:$12 sps:$4 sm:$0xff]  }
 0x1cc   :  { %4382 = vmatmul.mubr.bf16.gmra.mrb[120].mxu0 %v3804_v14  ;;  %3060 = vmatpush1.bf16.msra.mxu1 %v9573_v13  ;;  %v9579_v14 = vld [vmem:[#allocation2 + $0x2d0] ss:$8 sps:$4 sm:$0xff]   ;;  %v9584_v13 = vld [vmem:[#allocation2 + $0x2e4] ss:$8 sps:$4 sm:$0xff]  }
 0x1cd   :  { %4391 = vmatprep.mubr.bf16.mxu0 %v3820_v26  ;;  %3061 = vmatprep.subr.bf16.mxu1 %v9578_v45  ;;  %v3827_v26 = vor.u32 %v3826_v54, %v3825_v46  ;;  %v3837_v45 = vrot.slane %v14016_v5, 1  ;;  %v14018_v46 = vshrl.u32 %v10546_v25, 16  ;;  %v3854_v54 = vrot.slane %v14019_v12, 2  ;;  %v11554_v12 = vld [vmem:[%s13671_s0 + $0xac] ss:$12 sps:$4 sm:$0xff]  }
 0x1cf   :  { %2148 = vmatmul.mubr.bf16.gmra.mrb[12].mxu1 %v11481_v20  ;;  %v3828_v8 = vsel %vm3668_vm4, %v3815_v59, %v3827_v26  ;;  %v3853_v59 = vrot.slane %v14018_v46, 1  ;;  %v9600_v46 = vld [vmem:[#allocation2 + $0x320] ss:$8 sps:$4 sm:$0xff]  }
 0x1d0   :  { %2157 = vmatprep.mubr.bf16.mxu1 %v11488_v55  ;;  %3062 = vmatpush1.bf16.msra.mxu1 %v9576_v1  ;;  %v14017_v1 = vshll.u32 %v10541_v31, 16  ;;  %v9596_v31 = vld [vmem:[#allocation2 + $0x314] ss:$8 sps:$4 sm:$0xff]  }
 0x1d1   :  { %3063 = vmatprep.subr.bf16.mxu1 %v9581_v60  ;;  %v3855_v56 = vor.u32 %v3854_v54, %v3853_v59  ;;  %v14024_v54 = vshrl.u32 %v10599_v30, 16 }
 0x1d2   :  { %v3838_v60 = vrot.slane %v14017_v1, 2  ;;  %v14023_v1 = vshll.u32 %v10575_v58, 16 }
 0x1d3   :  { %v3856_v5 = vsel %vm3668_vm4, %v3843_v36, %v3855_v56  ;;  %v11547_v36 = vld [vmem:[%s13671_s0 + $0x90] ss:$12 sps:$4 sm:$0xff]  }
 0x1d4   :  { %4392 = vmatmul.mubr.bf16.gmra.mrb[124].mxu0 %v3816_v34  ;;  %3064 = vmatpush1.bf16.msra.mxu1 %v9579_v14  ;;  %v9588_v34 = vld [vmem:[#allocation2 + $0x2f0] ss:$8 sps:$4 sm:$0xff]   ;;  %v9593_v14 = vld [vmem:[#allocation2 + $0x304] ss:$8 sps:$4 sm:$0xff]  }
 0x1d5   :  { %4401 = vmatprep.mubr.bf16.mxu0 %v3832_v18  ;;  %3065 = vmatprep.subr.bf16.mxu1 %v9584_v13  ;;  %v3839_v18 = vor.u32 %v3838_v60, %v3837_v45  ;;  %v3849_v13 = vrot.slane %v14020_v48, 1  ;;  %v14022_v45 = vshrl.u32 %v10575_v58, 16  ;;  %v3866_v60 = vrot.slane %v14023_v1, 2  ;;  %v11576_v1 = vld [vmem:[%s13671_s0 + $0xc4] ss:$12 sps:$4 sm:$0xff]  }
 0x1d7   :  { %2158 = vmatmul.mubr.bf16.gmra.mrb[16].mxu1 %v11503_v57  ;;  %v3840_v25 = vsel %vm3668_vm4, %v3827_v26, %v3839_v18  ;;  %v3865_v26 = vrot.slane %v14022_v45, 1  ;;  %v9606_v45 = vld [vmem:[#allocation2 + $0x340] ss:$8 sps:$4 sm:$0xff]  }
 0x1d8   :  { %2167 = vmatprep.mubr.bf16.mxu1 %v11510_v38  ;;  %3066 = vmatpush1.bf16.msra.mxu1 %v9582_v62  ;;  %v14021_v62 = vshll.u32 %v10570_v23, 16  ;;  %v9605_v23 = vld [vmem:[#allocation2 + $0x334] ss:$8 sps:$4 sm:$0xff]  }
 0x1d9   :  { %3067 = vmatprep.subr.bf16.mxu1 %v9590_v44  ;;  %v3867_v59 = vor.u32 %v3866_v60, %v3865_v26  ;;  %v14028_v60 = vld [vmem:[#allocation11_spill] sm:$0xff] }
 0x1da   :  { %v3850_v44 = vrot.slane %v14021_v62, 2  ;;  %v14027_v62 = vshll.u32 %v10604_v35, 16 }
 0x1db   :  { %v3868_v48 = vsel %vm3668_vm4, %v3855_v56, %v3867_v59  ;;  %v11569_v56 = vld [vmem:[%s13671_s0 + $0xa8] ss:$12 sps:$4 sm:$0xff]  }
 0x1dc   :  { %4402 = vmatmul.mubr.bf16.gmra.mrb[128].mxu0 %v3828_v8  ;;  %3068 = vmatpush1.bf16.msra.mxu1 %v9588_v34  ;;  %v9594_v8 = vld [vmem:[#allocation2 + $0x310] ss:$8 sps:$4 sm:$0xff]   ;;  %v9602_v34 = vld [vmem:[#allocation2 + $0x324] ss:$8 sps:$4 sm:$0xff]  }
 0x1dd   :  { %4411 = vmatprep.mubr.bf16.mxu0 %v3844_v24  ;;  %3069 = vmatprep.subr.bf16.mxu1 %v9593_v14  ;;  %v3851_v24 = vor.u32 %v3850_v44, %v3849_v13  ;;  %v3861_v14 = vrot.slane %v14024_v54, 1  ;;  %v14026_v13 = vshrl.u32 %v10604_v35, 16  ;;  %v3878_v44 = vrot.slane %v14027_v62, 2  ;;  %v9612_v54 = vld [vmem:[#allocation2 + $0x350] ss:$8 sps:$4 sm:$0xff]  }
 0x1de   :  { %v11591_v62 = vld [vmem:[%s13671_s0 + $0xc0] ss:$12 sps:$4 sm:$0xff]  }
 0x1df   :  { %2168 = vmatmul.mubr.bf16.gmra.mrb[20].mxu1 %v11525_v16  ;;  %v3852_v58 = vsel %vm3668_vm4, %v3839_v18, %v3851_v24  ;;  %v3877_v18 = vrot.slane %v14026_v13, 1 }
 0x1e0   :  { %2177 = vmatprep.mubr.bf16.mxu1 %v11532_v2  ;;  %3070 = vmatpush1.bf16.msra.mxu1 %v9591_v47  ;;  %v14025_v47 = vshll.u32 %v10599_v30, 16  ;;  %v9614_v30 = vld [vmem:[#allocation2 + $0x354] ss:$8 sps:$4 sm:$0xff]  }
 0x1e1   :  { %3071 = vmatprep.subr.bf16.mxu1 %v9596_v31  ;;  %v3879_v26 = vor.u32 %v3878_v44, %v3877_v18  ;;  %v11598_v44 = vld [vmem:[%s13671_s0 + $0xdc] ss:$12 sps:$4 sm:$0xff]  }
 0x1e2   :  { %v3862_v31 = vrot.slane %v14025_v47, 2  ;;  %v14031_v47 = vld [vmem:[#allocation13_spill] sm:$0xff] }
 0x1e4   :  { %4412 = vmatmul.mubr.bf16.gmra.mrb[132].mxu0 %v3840_v25  ;;  %3072 = vmatpush1.bf16.msra.mxu1 %v9594_v8  ;;  %v9603_v25 = vld [vmem:[#allocation2 + $0x330] ss:$8 sps:$4 sm:$0xff]   ;;  %v9608_v8 = vld [vmem:[#allocation2 + $0x344] ss:$8 sps:$4 sm:$0xff]  }
 0x1e5   :  { %4421 = vmatprep.mubr.bf16.mxu0 %v3856_v5  ;;  %3073 = vmatprep.subr.bf16.mxu1 %v9602_v34  ;;  %v3863_v5 = vor.u32 %v3862_v31, %v3861_v14  ;;  %v14029_v34 = vshrl.u32 %v14028_v60, 16  ;;  %v3880_v14 = vsel %vm3668_vm4, %v3867_v59, %v3879_v26  ;;  %v14032_v31 = vshrl.u32 %v14031_v47, 16 }
 0x1e7   :  { %2178 = vmatmul.mubr.bf16.gmra.mrb[24].mxu1 %v11547_v36  ;;  %v3864_v35 = vsel %vm3668_vm4, %v3851_v24, %v3863_v5  ;;  %v3889_v24 = vrot.slane %v14032_v31, 1  ;;  %v11613_v31 = vld [vmem:[%s13671_s0 + $0xd8] ss:$12 sps:$4 sm:$0xff]  }
 0x1e8   :  { %2187 = vmatprep.mubr.bf16.mxu1 %v11554_v12  ;;  %3074 = vmatpush1.bf16.msra.mxu1 %v9600_v46  ;;  %v3873_v46 = vrot.slane %v14029_v34, 1 }
 0x1e9   :  { %3075 = vmatprep.subr.bf16.mxu1 %v9605_v23  ;;  %v14030_v23 = vshll.u32 %v14028_v60, 16 }
 0x1ec   :  { %4422 = vmatmul.mubr.bf16.gmra.mrb[136].mxu0 %v3852_v58  ;;  %3076 = vmatpush1.bf16.msra.mxu1 %v9603_v25  ;;  %v3874_v58 = vrot.slane %v14030_v23, 2  ;;  %v14033_v25 = vshll.u32 %v14031_v47, 16 }
 0x1ed   :  { %4431 = vmatprep.mubr.bf16.mxu0 %v3868_v48  ;;  %3077 = vmatprep.subr.bf16.mxu1 %v9608_v8  ;;  %v14034_v8 = vld [vmem:[#allocation14_spill] sm:$0xff] }
 0x1ee   :  { %v3890_v48 = vrot.slane %v14033_v25, 2  ;;  %v3875_v13 = vor.u32 %v3874_v58, %v3873_v46  ;;  %v14037_v46 = vld [vmem:[#allocation15_spill] sm:$0xff]  ;;  %v14040_v25 = vld [vmem:[#allocation16_spill] sm:$0xff] }
 0x1ef   :  { %2188 = vmatmul.mubr.bf16.gmra.mrb[28].mxu1 %v11569_v56  ;;  %v14038_v23 = vshrl.u32 %v14037_v46, 16 }
 0x1f0   :  { %2197 = vmatprep.mubr.bf16.mxu1 %v11576_v1  ;;  %3078 = vmatpush1.bf16.msra.mxu1 %v9606_v45  ;;  %v3891_v18 = vor.u32 %v3890_v48, %v3889_v24  ;;  %v3876_v59 = vsel %vm3668_vm4, %v3863_v5, %v3875_v13  ;;  %v14035_v45 = vshrl.u32 %v14034_v8, 16  ;;  %v14039_v5 = vshll.u32 %v14037_v46, 16 }
 0x1f1   :  { %3079 = vmatprep.subr.bf16.mxu1 %v9614_v30  ;;  %v3901_v58 = vrot.slane %v14038_v23, 1  ;;  %v14041_v48 = vshrl.u32 %v14040_v25, 16 }
 0x1f2   :  { %v3885_v30 = vrot.slane %v14035_v45, 1  ;;  %v3892_v34 = vsel %vm3668_vm4, %v3879_v26, %v3891_v18  ;;  %v11620_v26 = vld [vmem:[%s13671_s0 + $0xf4] ss:$12 sps:$4 sm:$0xff]  }
 0x1f4   :  { %4432 = vmatmul.mubr.bf16.gmra.mrb[140].mxu0 %v3864_v35  ;;  %3080 = vmatpush1.bf16.msra.mxu1 %v9612_v54  ;;  %v14036_v35 = vshll.u32 %v14034_v8, 16  ;;  %v3902_v54 = vrot.slane %v14039_v5, 2  ;;  %v14042_v8 = vshll.u32 %v14040_v25, 16  ;;  %v3619_v5 = vld [vmem:[%s13671_s0 + $0x1f8] sm:$0x33]  ;;  %v14046_v25 = vld [vmem:[#allocation19_spill] sm:$0xff] }
 0x1f5   :  { %4441 = vmatprep.mubr.bf16.mxu0 %v3880_v14 }
 0x1f6   :  { %v3886_v60 = vrot.slane %v14036_v35, 2  ;;  %v3903_v47 = vor.u32 %v3902_v54, %v3901_v58  ;;  %v3898_v45 = vrot.slane %v14042_v8, 2  ;;  %v14043_v35 = vld [vmem:[#allocation17_spill] sm:$0xff]  ;;  %v11638_v54 = vld [vmem:[%s13671_s0 + $0xf0] ss:$12 sps:$4 sm:$0xff]   ;;  %v14048_v8 = vshll.u32 %v14046_v25, 16 }
 0x1f7   :  { %2198 = vmatmul.mubr.bf16.gmra.mrb[32].mxu1 %v11591_v62 }
 0x1f8   :  { %2207 = vmatprep.mubr.bf16.mxu1 %v11598_v44  ;;  %v3887_v14 = vor.u32 %v3886_v60, %v3885_v30  ;;  %v3904_v30 = vsel %vm3668_vm4, %v3891_v18, %v3903_v47  ;;  %v14044_v60 = vshrl.u32 %v14043_v35, 16 }
 0x1fa   :  { %v3888_v24 = vsel %vm3668_vm4, %v3875_v13, %v3887_v14  ;;  %v14045_v13 = vshll.u32 %v14043_v35, 16  ;;  %v14049_v35 = vshrl.u32 %v10749_v50, 16 }
 0x1fc   :  { %4442 = vmatmul.mubr.bf16.gmra.mrb[144].mxu0 %v3876_v59  ;;  %v3897_v59 = vrot.slane %v14041_v48, 1  ;;  %v3914_v46 = vrot.slane %v14045_v13, 2  ;;  %v14047_v48 = vshrl.u32 %v14046_v25, 16  ;;  %v11657_v13 = vcombine.high %v3619_v5, %v3619_v5 }
 0x1fd   :  { %4451 = vmatprep.mubr.bf16.mxu0 %v3892_v34  ;;  %v3913_v34 = vrot.slane %v14044_v60, 1  ;;  %v3925_v60 = vrot.slane %v14049_v35, 1  ;;  %v14052_v25 = vshrl.u32 %v10776_v28, 16 }
 0x1fe   :  { %v3899_v23 = vor.u32 %v3898_v45, %v3897_v59  ;;  %v3909_v59 = vrot.slane %v14047_v48, 1  ;;  %v3910_v45 = vrot.slane %v14048_v8, 2  ;;  %14051 = vst [vmem:[#allocation11_spill] sm:$0xff] %v11657_v13  ;;  %v3943_v7 = vshrl.u32 %v11657_v13, 16 }
 0x1ff   :  { %2208 = vmatmul.mubr.bf16.gmra.mrb[36].mxu1 %v11613_v31  ;;  %v3915_v58 = vor.u32 %v3914_v46, %v3913_v34  ;;  %v3946_v48 = vshll.u32 %v11657_v13, 16  ;;  %v14053_v8 = vshll.u32 %v10776_v28, 16 }
 0x200   :  { %2217 = vmatprep.mubr.bf16.mxu1 %v11620_v26  ;;  %v3900_v18 = vsel %vm3668_vm4, %v3887_v14, %v3899_v23  ;;  %v14050_v14 = vshll.u32 %v10749_v50, 16  ;;  %v3911_v46 = vor.u32 %v3910_v45, %v3909_v59  ;;  %v3921_v59 = vrot.slane %v14052_v25, 1  ;;  %v11686_v25 = vld [vmem:[%s13671_s0 + $0x120] ss:$12 sps:$4 sm:$0xff]  }
 0x201   :  { %v3922_v45 = vrot.slane %v14053_v8, 2 }
 0x202   :  { %v3926_v34 = vrot.slane %v14050_v14, 2  ;;  %v3912_v50 = vsel %vm3668_vm4, %v3899_v23, %v3911_v46  ;;  %v3948_v14 = vrot.slane %v3946_v48, 2 }
 0x203   :  { %v3923_v23 = vor.u32 %v3922_v45, %v3921_v59  ;;  %v14055_v59 = vld [vmem:[#allocation12_spill] sm:$0xff] }
 0x204   :  { %4452 = vmatmul.mubr.bf16.gmra.mrb[148].mxu0 %v3888_v24  ;;  %v11645_v24 = vld [vmem:[%s13671_s0 + $0x10c] ss:$12 sps:$4 sm:$0xff]   ;;  %v3927_v37 = vor.u32 %v3926_v34, %v3925_v60  ;;  %v3945_v60 = vrot.slane %v3943_v7, 1  ;;  %v11693_v7 = vld [vmem:[%s13671_s0 + $0x13c] ss:$12 sps:$4 sm:$0xff]   ;;  %v3694_v8 = vshrl.u32 %v14055_v59, 16 }
 0x205   :  { %4461 = vmatprep.mubr.bf16.mxu0 %v3904_v30  ;;  %v3916_v30 = vsel %vm3668_vm4, %v3903_v47, %v3915_v58  ;;  %v11664_v47 = vld [vmem:[%s13671_s0 + $0x108] ss:$12 sps:$4 sm:$0xff]   ;;  %v3924_v28 = vsel %vm3668_vm4, %v3911_v46, %v3923_v23  ;;  %v3697_v45 = vshll.u32 %v14055_v59, 16  ;;  %v14056_v46 = vshrl.u32 %v10658_v9, 16 }
 0x206   :  { %v3928_v35 = vsel %vm3668_vm4, %v3915_v58, %v3927_v37  ;;  %v3949_v22 = vor.u32 %v3948_v14, %v3945_v60  ;;  %v11704_v60 = vld [vmem:[%s13671_s0 + $0x138] ss:$12 sps:$4 sm:$0xff]  }
 0x207   :  { %2218 = vmatmul.mubr.bf16.gmra.mrb[40].mxu1 %v11638_v54  ;;  %v3699_v14 = vrot.slane %v3697_v45, 2 }
 0x208   :  { %2227 = vmatprep.mubr.bf16.mxu1 %v11645_v24  ;;  %v3950_v48 = vsel %vm3668_vm4, %v3927_v37, %v3949_v22  ;;  %v11711_v22 = vld [vmem:[%s13671_s0 + $0x154] ss:$12 sps:$4 sm:$0xff]   ;;  %v3696_v37 = vrot.slane %v3694_v8, 1  ;;  %v14059_v8 = vshll.u32 %v10691_v3, 16 }
 0x20a   :  { %v3714_v45 = vrot.slane %v14059_v8, 2 }
 0x20c   :  { %4462 = vmatmul.mubr.bf16.gmra.mrb[152].mxu0 %v3900_v18  ;;  %v11671_v18 = vld [vmem:[%s13671_s0 + $0x124] ss:$12 sps:$4 sm:$0xff]  }
 0x20d   :  { %4471 = vmatprep.mubr.bf16.mxu0 %v3916_v30  ;;  %v11678_v30 = vcombine.low %v3619_v5, %v3619_v5 }
 0x20f   :  { %2228 = vmatmul.mubr.bf16.gmra.mrb[44].mxu1 %v11664_v47  ;;  %14054 = vst [vmem:[#allocation13_spill] sm:$0xff] %v11678_v30  ;;  %v3934_v34 = vshrl.u32 %v11678_v30, 16  ;;  %v3937_v13 = vshll.u32 %v11678_v30, 16  ;;  %v9620_v30 = vld [vmem:[#allocation2 + $0x504] ss:$8 sps:$4 sm:$0xff]  }
 0x210   :  { %2237 = vmatprep.mubr.bf16.mxu1 %v11671_v18 }
 0x211   :  { %v3936_v58 = vrot.slane %v3934_v34, 1  ;;  %v3939_v5 = vrot.slane %v3937_v13, 2  ;;  %v14057_v34 = vshll.u32 %v10658_v9, 16  ;;  %v14058_v9 = vshrl.u32 %v10691_v3, 16 }
 0x213   :  { %v3713_v59 = vrot.slane %v14058_v9, 1 }
 0x214   :  { %4472 = vmatmul.mubr.bf16.gmra.mrb[156].mxu0 %v3912_v50  ;;  %v3940_v50 = vor.u32 %v3939_v5, %v3936_v58  ;;  %v3700_v58 = vor.u32 %v3699_v14, %v3696_v37  ;;  %v9597_v37 = vld [vmem:[#allocation2 + $0x4d0] ss:$8 sps:$4 sm:$0xff]   ;;  %v9611_v14 = vld [vmem:[#allocation2 + $0x4e4] ss:$8 sps:$4 sm:$0xff]  }
 0x215   :  { %4481 = vmatprep.mubr.bf16.mxu0 %v3928_v35  ;;  %v3701_v35 = vrot.slane %v14056_v46, 1  ;;  %v9585_v46 = vld [vmem:[#allocation2 + $0x4c0] ss:$8 sps:$4 sm:$0xff]  }
 0x216   :  { %v3941_v13 = vsel %vm3668_vm4, %v3923_v23, %v3940_v50  ;;  %v11720_v23 = vld [vmem:[%s13671_s0 + $0x150] ss:$12 sps:$4 sm:$0xff]   ;;  %v11727_v50 = vld [vmem:[%s13671_s0 + $0x16c] ss:$12 sps:$4 sm:$0xff]  }
 0x217   :  { %2238 = vmatmul.mubr.bf16.gmra.mrb[48].mxu1 %v11686_v25 }
 0x218   :  { %2247 = vmatprep.mubr.bf16.mxu1 %v11693_v7 }
 0x21c   :  { %4482 = vmatmul.mubr.bf16.gmra.mrb[160].mxu0 %v3924_v28  ;;  %v3702_v28 = vrot.slane %v14057_v34, 2  ;;  %v11739_v34 = vld [vmem:[%s13671_s0 + $0x168] ss:$12 sps:$4 sm:$0xff]  }
 0x21d   :  { %4491 = vmatprep.mubr.bf16.mxu0 %v3950_v48 }
 0x21e   :  { %v3703_v5 = vor.u32 %v3702_v28, %v3701_v35  ;;  %v9599_v35 = vld [vmem:[#allocation2 + $0x4d4] ss:$8 sps:$4 sm:$0xff]   ;;  %v11746_v28 = vld [vmem:[%s13671_s0 + $0x184] ss:$12 sps:$4 sm:$0xff]  }
 0x21f   :  { %2248 = vmatmul.mubr.bf16.gmra.mrb[52].mxu1 %v11704_v60 }
 0x220   :  { %2257 = vmatprep.mubr.bf16.mxu1 %v11711_v22  ;;  %v3704_v48 = vsel %vm3668_vm4, %v3700_v58, %v3703_v5  ;;  %v14060_v58 = vld [vmem:[#allocation18_spill] sm:$0xff] }
 0x224   :  { %4492 = vmatmul.mubr.bf16.gmra.mrb[164].mxu0 %v3941_v13  ;;  %v3715_v13 = vor.u32 %v3714_v45, %v3713_v59  ;;  %v14062_v59 = vshll.u32 %v14060_v58, 16  ;;  %v9609_v45 = vld [vmem:[#allocation2 + $0x4e0] ss:$8 sps:$4 sm:$0xff]  }
 0x225   :  { %4534 = vmatprep.mubr.bf16.mxu0 %v13867_v43 }
 0x226   :  { %v3716_v3 = vsel %vm3668_vm4, %v3703_v5, %v3715_v13  ;;  %v3726_v8 = vrot.slane %v14062_v59, 2 }
 0x227   :  { %2258 = vmatmul.mubr.bf16.gmra.mrb[56].mxu1 %v11720_v23 }
 0x228   :  { %2267 = vmatprep.mubr.bf16.mxu1 %v11727_v50 }
 0x22c   :  { %8005 = vmatmul.mubr.msk.bf16.vlgmr.msra.gmra.mrb[84].mxu0 %vm1250_vm1, %v3704_v48  ;;  %v14061_v48 = vshrl.u32 %v14060_v58, 16 }
 0x22d   :  { %4544 = vmatprep.mubr.bf16.mxu0 %v13867_v43  ;;  %5308 = vmatpush1.bf16.msra.mxu0 %v9585_v46  ;;  %v9617_v46 = vld [vmem:[#allocation2 + $0x4f4] ss:$8 sps:$4 sm:$0xff]  }
 0x22e   :  { %5309 = vmatprep.subr.bf16.mxu0 %v9599_v35  ;;  %v3725_v9 = vrot.slane %v14061_v48, 1  ;;  %v9615_v35 = vld [vmem:[#allocation2 + $0x4f0] ss:$8 sps:$4 sm:$0xff]   ;;  %v11758_v48 = vld [vmem:[%s13671_s0 + $0x180] ss:$12 sps:$4 sm:$0xff]  }
 0x22f   :  { %2268 = vmatmul.mubr.bf16.gmra.mrb[60].mxu1 %v11739_v34 }
 0x230   :  { %2277 = vmatprep.mubr.bf16.mxu1 %v11746_v28  ;;  %v3727_v5 = vor.u32 %v3726_v8, %v3725_v9 }
 0x231   :  { %5310 = vmatpush1.bf16.msra.mxu0 %v9597_v37 }
 0x232   :  { %5311 = vmatprep.subr.bf16.mxu0 %v9611_v14  ;;  %v3728_v37 = vsel %vm3668_vm4, %v3715_v13, %v3727_v5  ;;  %v11765_v14 = vld [vmem:[%s13671_s0 + $0x19c] ss:$12 sps:$4 sm:$0xff]  }
 0x234   :  { %8006 = vmatmul.mubr.msk.bf16.gmra.mrb[88].mxu0 %vm1250_vm1, %v3716_v3  ;;  %v14063_v3 = vld [vmem:[#allocation20_spill] sm:$0xff] }
 0x235   :  { %4554 = vmatprep.mubr.bf16.mxu0 %v13867_v43  ;;  %5312 = vmatpush1.bf16.msra.mxu0 %v9609_v45  ;;  %v14064_v58 = vshrl.u32 %v14063_v3, 16  ;;  %v14065_v59 = vshll.u32 %v14063_v3, 16  ;;  %v9618_v45 = vld [vmem:[#allocation2 + $0x500] ss:$8 sps:$4 sm:$0xff]  }
 0x236   :  { %5313 = vmatprep.subr.bf16.mxu0 %v9617_v46  ;;  %v9623_v46 = vld [vmem:[#allocation2 + $0x514] ss:$8 sps:$4 sm:$0xff]  }
 0x237   :  { %2278 = vmatmul.mubr.bf16.gmra.mrb[64].mxu1 %v11758_v48  ;;  %v3737_v9 = vrot.slane %v14064_v58, 1  ;;  %v3738_v8 = vrot.slane %v14065_v59, 2  ;;  %v11777_v58 = vld [vmem:[%s13671_s0 + $0x198] ss:$12 sps:$4 sm:$0xff]  }
 0x238   :  { %2287 = vmatprep.mubr.bf16.mxu1 %v11765_v14 }
 0x239   :  { %5314 = vmatpush1.bf16.msra.mxu0 %v9615_v35  ;;  %v3739_v13 = vor.u32 %v3738_v8, %v3737_v9 }
 0x23a   :  { %5315 = vmatprep.subr.bf16.mxu0 %v9620_v30  ;;  %v11784_v30 = vld [vmem:[%s13671_s0 + $0x1b4] ss:$12 sps:$4 sm:$0xff]  }
 0x23b   :  { %v3740_v35 = vsel %vm3668_vm4, %v3727_v5, %v3739_v13 }
 0x23c   :  { %8007 = vmatmul.mubr.msk.bf16.gmra.mrb[92].mxu0 %vm1250_vm1, %v3728_v37  ;;  %v14066_v37 = vld [vmem:[#allocation22_spill] sm:$0xff] }
 0x23d   :  { %4564 = vmatprep.mubr.bf16.mxu0 %v13867_v43  ;;  %5316 = vmatpush1.bf16.msra.mxu0 %v9618_v45  ;;  %v14067_v3 = vshrl.u32 %v14066_v37, 16  ;;  %v14068_v59 = vshll.u32 %v14066_v37, 16  ;;  %v9624_v45 = vld [vmem:[#allocation2 + $0x520] ss:$8 sps:$4 sm:$0xff]  }
 0x23e   :  { %5317 = vmatprep.subr.bf16.mxu0 %v9623_v46  ;;  %v9629_v46 = vld [vmem:[#allocation2 + $0x534] ss:$8 sps:$4 sm:$0xff]  }
 0x23f   :  { %2288 = vmatmul.mubr.bf16.gmra.mrb[68].mxu1 %v11777_v58  ;;  %v3749_v9 = vrot.slane %v14067_v3, 1  ;;  %v3750_v8 = vrot.slane %v14068_v59, 2  ;;  %v11796_v3 = vld [vmem:[%s13671_s0 + $0x1b0] ss:$12 sps:$4 sm:$0xff]  }
 0x240   :  { %2297 = vmatprep.mubr.bf16.mxu1 %v11784_v30 }
 0x241   :  { %5318 = vmatpush1.bf16.msra.mxu0 %v9621_v40  ;;  %v3751_v5 = vor.u32 %v3750_v8, %v3749_v9 }
 0x242   :  { %5319 = vmatprep.subr.bf16.mxu0 %v9626_v61  ;;  %v11803_v61 = vld [vmem:[%s13671_s0 + $0x1cc] ss:$12 sps:$4 sm:$0xff]  }
 0x243   :  { %v3752_v40 = vsel %vm3668_vm4, %v3739_v13, %v3751_v5 }
 0x244   :  { %8008 = vmatmul.mubr.msk.bf16.gmra.mrb[96].mxu0 %vm1250_vm1, %v3740_v35  ;;  %v14069_v35 = vld [vmem:[#allocation24_spill] sm:$0xff] }
 0x245   :  { %4574 = vmatprep.mubr.bf16.mxu0 %v13867_v43  ;;  %5320 = vmatpush1.bf16.msra.mxu0 %v9624_v45  ;;  %v14070_v37 = vshrl.u32 %v14069_v35, 16  ;;  %v14071_v59 = vshll.u32 %v14069_v35, 16  ;;  %v9630_v45 = vld [vmem:[#allocation2 + $0x540] ss:$8 sps:$4 sm:$0xff]  }
 0x246   :  { %5321 = vmatprep.subr.bf16.mxu0 %v9629_v46  ;;  %v9635_v46 = vld [vmem:[#allocation2 + $0x554] ss:$8 sps:$4 sm:$0xff]  }
 0x247   :  { %2298 = vmatmul.mubr.bf16.gmra.mrb[72].mxu1 %v11796_v3  ;;  %v3761_v9 = vrot.slane %v14070_v37, 1  ;;  %v3762_v8 = vrot.slane %v14071_v59, 2  ;;  %v11815_v37 = vld [vmem:[%s13671_s0 + $0x1c8] ss:$12 sps:$4 sm:$0xff]  }
 0x248   :  { %2307 = vmatprep.mubr.bf16.mxu1 %v11803_v61 }
 0x249   :  { %5322 = vmatpush1.bf16.msra.mxu0 %v9627_v52  ;;  %v3763_v13 = vor.u32 %v3762_v8, %v3761_v9  ;;  %v14072_v52 = vld [vmem:[#allocation25_spill] sm:$0xff] }
 0x24a   :  { %5323 = vmatprep.subr.bf16.mxu0 %v9632_v33  ;;  %v14073_v35 = vshrl.u32 %v14072_v52, 16  ;;  %v14074_v59 = vshll.u32 %v14072_v52, 16  ;;  %v11826_v9 = vld [vmem:[%s13671_s0 + $0x1e4] ss:$12 sps:$4 sm:$0xff]   ;;  %v9636_v8 = vld [vmem:[#allocation2 + $0x560] ss:$8 sps:$4 sm:$0xff]  }
 0x24b   :  { %v3764_v27 = vsel %vm3668_vm4, %v3751_v5, %v3763_v13  ;;  %14075 = vst [vmem:[#allocation14_spill] sm:$0xff] %v11826_v9  ;;  %v9639_v5 = vld [vmem:[#allocation2 + $0x570] ss:$8 sps:$4 sm:$0xff]  }
 0x24c   :  { %8009 = vmatmul.mubr.msk.bf16.gmra.mrb[100].mxu0 %vm1250_vm1, %v3752_v40  ;;  %v3773_v33 = vrot.slane %v14073_v35, 1  ;;  %v3774_v40 = vrot.slane %v14074_v59, 2  ;;  %v9641_v35 = vld [vmem:[#allocation2 + $0x574] ss:$8 sps:$4 sm:$0xff]  }
 0x24d   :  { %4584 = vmatprep.mubr.bf16.mxu0 %v13867_v43  ;;  %5324 = vmatpush1.bf16.msra.mxu0 %v9630_v45  ;;  %v14076_v45 = vld [vmem:[#allocation84_spill] sm:$0xff] }
 0x24e   :  { %5325 = vmatprep.subr.bf16.mxu0 %v9635_v46  ;;  %v2624_v46 = vrot.slane %v14076_v45, 1  ;;  %v3775_v52 = vor.u32 %v3774_v40, %v3773_v33  ;;  %v2622_v33 = vrot.slane %v11437_v39, 1  ;;  %v14078_v40 = vld [vmem:[#allocation30_spill] sm:$0xff]  ;;  %v9645_v39 = vld [vmem:[#allocation2 + $0x590] ss:$8 sps:$4 sm:$0xff]  }
 0x24f   :  { %2308 = vmatmul.mubr.bf16.gmra.mrb[76].mxu1 %v11815_v37 }
 0x250   :  { %2317 = vmatprep.mubr.bf16.mxu1 %v11826_v9  ;;  %v2626_v59 = vsel %vm2620_vm3, %v2624_v46, %v2625_v63  ;;  %v14080_v46 = vshll.u32 %v14078_v40, 16  ;;  %v9647_v9 = vld [vmem:[#allocation2 + $0x594] ss:$8 sps:$4 sm:$0xff]  }
 0x251   :  { %5326 = vmatpush1.bf16.msra.mxu0 %v9633_v11  ;;  %v11837_v11 = vld [vmem:[%s13671_s0 + $0x1e0] ss:$12 sps:$4 sm:$0xff]  }
 0x252   :  { %5327 = vmatprep.subr.bf16.mxu0 %v9638_v41  ;;  %v3776_v41 = vsel %vm3668_vm4, %v3763_v13, %v3775_v52 }
 0x254   :  { %8010 = vmatmul.mubr.msk.bf16.gmra.mrb[104].mxu0 %vm1250_vm1, %v3764_v27  ;;  %v14077_v27 = vld [vmem:[#allocation88_spill] sm:$0xff] }
 0x255   :  { %4594 = vmatprep.mubr.bf16.mxu0 %v13867_v43  ;;  %5328 = vmatpush1.bf16.msra.mxu0 %v9636_v8  ;;  %v2621_v29 = vrot.slane %v14077_v27, 1  ;;  %v14079_v8 = vshrl.u32 %v14078_v40, 16  ;;  %v2633_v27 = vsel %vm2620_vm3, %v2625_v63, %v2632_v6  ;;  %v9651_v40 = vld [vmem:[#allocation2 + $0x5a4] ss:$8 sps:$4 sm:$0xff]   ;;  %v9654_v63 = vld [vmem:[#allocation2 + $0x5b4] ss:$8 sps:$4 sm:$0xff]  }
 0x256   :  { %5329 = vmatprep.subr.bf16.mxu0 %v9641_v35  ;;  %v3786_v35 = vrot.slane %v14080_v46, 2 }
 0x257   :  { %2318 = vmatmul.mubr.bf16.gmra.mrb[80].mxu1 %v11837_v11  ;;  %v3785_v45 = vrot.slane %v14079_v8, 1  ;;  %v2623_v13 = vsel %vm2620_vm3, %v2621_v29, %v2622_v33  ;;  %v14082_v8 = vshrl.u32 %v14081_v53, 16  ;;  %v14083_v29 = vshll.u32 %v14081_v53, 16 }
 0x258   :  { %3081 = vmatprep.mubr.bf16.mxu1 %v2626_v59  ;;  %v2644_v53 = vrot.slane %v11488_v55, 1 }
 0x259   :  { %5330 = vmatpush1.bf16.msra.mxu0 %v9639_v5  ;;  %v3787_v59 = vor.u32 %v3786_v35, %v3785_v45  ;;  %v3798_v46 = vrot.slane %v14083_v29, 2  ;;  %v9649_v45 = vld [vmem:[#allocation2 + $0x5a0] ss:$8 sps:$4 sm:$0xff]   ;;  %v2642_v29 = vrot.slane %v11503_v57, 1 }
 0x25a   :  { %5331 = vmatprep.subr.bf16.mxu0 %v9644_v15  ;;  %v2630_v15 = vrot.slane %v11459_v10, 1  ;;  %v9652_v10 = vld [vmem:[#allocation2 + $0x5b0] ss:$8 sps:$4 sm:$0xff]  }
 0x25b   :  { %v3788_v5 = vsel %vm3668_vm4, %v3775_v52, %v3787_v59 }
 0x25c   :  { %8011 = vmatmul.mubr.msk.bf16.gmra.mrb[108].mxu0 %vm1250_vm1, %v3776_v41  ;;  %v3797_v41 = vrot.slane %v14082_v8, 1  ;;  %v9659_v8 = vld [vmem:[#allocation2 + $0x5c4] ss:$8 sps:$4 sm:$0xff]  }
 0x25d   :  { %4604 = vmatprep.mubr.bf16.mxu0 %v13867_v43  ;;  %5332 = vmatpush1.bf16.msra.mxu0 %v9642_v0  ;;  %v2638_v0 = vrot.slane %v11466_v42, 1  ;;  %v2636_v42 = vrot.slane %v11481_v20, 1 }
 0x25e   :  { %5333 = vmatprep.subr.bf16.mxu0 %v9647_v9  ;;  %v2631_v9 = vsel %vm2620_vm3, %v2622_v33, %v2630_v15  ;;  %v3799_v52 = vor.u32 %v3798_v46, %v3797_v41  ;;  %v14087_v46 = vld [vmem:[#allocation45_spill] sm:$0xff] }
 0x25f   :  { %3082 = vmatmul.mubr.bf16.vlgmr.msra.gmra.mrb[84].mxu1 %v2623_v13  ;;  %v2639_v35 = vsel %vm2620_vm3, %v2632_v6, %v2638_v0  ;;  %v2637_v6 = vsel %vm2620_vm3, %v2630_v15, %v2636_v42  ;;  %v2645_v41 = vsel %vm2620_vm3, %v2638_v0, %v2644_v53  ;;  %v2650_v15 = vrot.slane %v11510_v38, 1 }
 0x260   :  { %3091 = vmatprep.mubr.bf16.mxu1 %v2633_v27  ;;  %v3800_v13 = vsel %vm3668_vm4, %v3787_v59, %v3799_v52 }
 0x261   :  { %5334 = vmatpush1.bf16.msra.mxu0 %v9645_v39  ;;  %v14084_v39 = vld [vmem:[#allocation40_spill] sm:$0xff] }
 0x262   :  { %5335 = vmatprep.subr.bf16.mxu0 %v9651_v40  ;;  %v14085_v27 = vshrl.u32 %v14084_v39, 16 }
 0x264   :  { %8012 = vmatmul.mubr.msk.bf16.gmra.mrb[112].mxu0 %vm1250_vm1, %v3788_v5  ;;  %v3809_v40 = vrot.slane %v14085_v27, 1  ;;  %v14086_v5 = vshll.u32 %v14084_v39, 16 }
 0x265   :  { %4614 = vmatprep.mubr.bf16.mxu0 %v13867_v43  ;;  %5336 = vmatpush1.bf16.msra.mxu0 %v9649_v45  ;;  %v14088_v45 = vshrl.u32 %v14087_v46, 16 }
 0x266   :  { %5337 = vmatprep.subr.bf16.mxu0 %v9654_v63  ;;  %v3810_v33 = vrot.slane %v14086_v5, 2  ;;  %v14089_v63 = vshll.u32 %v14087_v46, 16  ;;  %v2656_v5 = vrot.slane %v11532_v2, 1  ;;  %v2662_v46 = vrot.slane %v11554_v12, 1 }
 0x267   :  { %3092 = vmatmul.mubr.bf16.gmra.mrb[88].mxu1 %v2631_v9  ;;  %v3821_v55 = vrot.slane %v14088_v45, 1  ;;  %v14097_v12 = vshll.u32 %v11014_v49, 16 }
 0x268   :  { %3101 = vmatprep.mubr.bf16.mxu1 %v2639_v35  ;;  %v3811_v59 = vor.u32 %v3810_v33, %v3809_v40  ;;  %v3822_v9 = vrot.slane %v14089_v63, 2  ;;  %v2648_v35 = vrot.slane %v11525_v16, 1  ;;  %v2660_v63 = vrot.slane %v11569_v56, 1 }
 0x269   :  { %5338 = vmatpush1.bf16.msra.mxu0 %v9652_v10  ;;  %v2643_v10 = vsel %vm2620_vm3, %v2636_v42, %v2642_v29 }
 0x26a   :  { %5550 = vmatprep.subr.bf16.mxu0 %v9659_v8  ;;  %v3812_v20 = vsel %vm3668_vm4, %v3799_v52, %v3811_v59  ;;  %v3823_v0 = vor.u32 %v3822_v9, %v3821_v55  ;;  %v2651_v52 = vsel %vm2620_vm3, %v2644_v53, %v2650_v15  ;;  %v2649_v42 = vsel %vm2620_vm3, %v2642_v29, %v2648_v35 }
 0x26b   :  { %v2657_v53 = vsel %vm2620_vm3, %v2650_v15, %v2656_v5  ;;  %v2654_v8 = vrot.slane %v11547_v36, 1  ;;  %v2663_v55 = vsel %vm2620_vm3, %v2656_v5, %v2662_v46  ;;  %v14096_v9 = vshrl.u32 %v11014_v49, 16  ;;  %v14100_v49 = vld [vmem:[#allocation28_spill] sm:$0xff] }
 0x26c   :  { %8013 = vmatmul.mubr.msk.bf16.gmra.mrb[116].mxu0 %vm1250_vm1, %v3800_v13  ;;  %v3824_v57 = vsel %vm3668_vm4, %v3811_v59, %v3823_v0  ;;  %v14090_v13 = vld [vmem:[#allocation50_spill] sm:$0xff] }
 0x26d   :  { %4624 = vmatprep.mubr.bf16.mxu0 %v13867_v43  ;;  %v14091_v39 = vshrl.u32 %v14090_v13, 16  ;;  %v14092_v38 = vshll.u32 %v14090_v13, 16  ;;  %v2655_v29 = vsel %vm2620_vm3, %v2648_v35, %v2654_v8  ;;  %v3857_v15 = vrot.slane %v14096_v9, 1  ;;  %v14105_v9 = vld [vmem:[#allocation32_spill] sm:$0xff] }
 0x26e   :  { %v2661_v56 = vsel %vm2620_vm3, %v2654_v8, %v2660_v63  ;;  %v14102_v8 = vshrl.u32 %v11040_v32, 16 }
 0x26f   :  { %3102 = vmatmul.mubr.bf16.gmra.mrb[92].mxu1 %v2637_v6  ;;  %v3833_v27 = vrot.slane %v14091_v39, 1  ;;  %v3834_v40 = vrot.slane %v14092_v38, 2  ;;  %v14093_v6 = vld [vmem:[#allocation55_spill] sm:$0xff] }
 0x270   :  { %3111 = vmatprep.mubr.bf16.mxu1 %v2645_v41  ;;  %v14094_v59 = vshrl.u32 %v14093_v6, 16  ;;  %v14095_v2 = vshll.u32 %v14093_v6, 16  ;;  %v14099_v39 = vld [vmem:[#allocation27_spill] sm:$0xff]  ;;  %v2666_v6 = vrot.slane %v11591_v62, 1 }
 0x271   :  { %v3835_v33 = vor.u32 %v3834_v40, %v3833_v27 }
 0x272   :  { %v3845_v41 = vrot.slane %v14094_v59, 1  ;;  %v3869_v59 = vrot.slane %v14102_v8, 1  ;;  %v2667_v62 = vsel %vm2620_vm3, %v2660_v63, %v2666_v6  ;;  %v14108_v63 = vshrl.u32 %v11066_v51, 16 }
 0x273   :  { %v3836_v16 = vsel %vm3668_vm4, %v3823_v0, %v3835_v33  ;;  %v2668_v0 = vrot.slane %v11576_v1, 1 }
 0x274   :  { %8014 = vmatmul.mubr.msk.bf16.gmra.mrb[120].mxu0 %vm1250_vm1, %v3812_v20  ;;  %v3846_v20 = vrot.slane %v14095_v2, 2 }
 0x275   :  { %4634 = vmatprep.mubr.bf16.mxu0 %v13867_v43 }
 0x276   :  { %v3847_v45 = vor.u32 %v3846_v20, %v3845_v41  ;;  %v14103_v41 = vshll.u32 %v11040_v32, 16  ;;  %v2674_v20 = vrot.slane %v11598_v44, 1  ;;  %v14106_v32 = vld [vmem:[#allocation33_spill] sm:$0xff] }
 0x277   :  { %3112 = vmatmul.mubr.bf16.gmra.mrb[96].mxu1 %v2643_v10  ;;  %v3858_v10 = vrot.slane %v14097_v12, 2 }
 0x278   :  { %3121 = vmatprep.mubr.bf16.mxu1 %v2651_v52  ;;  %v3848_v36 = vsel %vm3668_vm4, %v3835_v33, %v3847_v45  ;;  %v14101_v33 = vld [vmem:[#allocation29_spill] sm:$0xff]  ;;  %v3870_v2 = vrot.slane %v14103_v41, 2 }
 0x279   :  { %v3859_v40 = vor.u32 %v3858_v10, %v3857_v15 }
 0x27a   :  { %v3871_v12 = vor.u32 %v3870_v2, %v3869_v59  ;;  %v14111_v59 = vld [vmem:[#allocation37_spill] sm:$0xff] }
 0x27c   :  { %8015 = vmatmul.mubr.msk.bf16.gmra.mrb[124].mxu0 %vm1250_vm1, %v3824_v57  ;;  %v14098_v57 = vld [vmem:[#allocation26_spill] sm:$0xff] }
 0x27d   :  { %4644 = vmatprep.mubr.bf16.mxu0 %v13867_v43 }
 0x27f   :  { %3122 = vmatmul.mubr.bf16.gmra.mrb[100].mxu1 %v2649_v42  ;;  %v2669_v42 = vsel %vm2620_vm3, %v2662_v46, %v2668_v0 }
 0x280   :  { %3131 = vmatprep.mubr.bf16.mxu1 %v2657_v53 }
 0x284   :  { %8016 = vmatmul.mubr.msk.bf16.gmra.mrb[128].mxu0 %vm1250_vm1, %v3836_v16  ;;  %v3860_v16 = vsel %vm3668_vm4, %v3847_v45, %v3859_v40 }
 0x285   :  { %4654 = vmatprep.mubr.bf16.mxu0 %v13867_v43 }
 0x287   :  { %3132 = vmatmul.mubr.bf16.gmra.mrb[104].mxu1 %v2655_v29 }
 0x288   :  { %3141 = vmatprep.mubr.bf16.mxu1 %v2663_v55  ;;  %v14104_v55 = vld [vmem:[#allocation31_spill] sm:$0xff] }
 0x28a   :  { %v2119_v52 = vpop.f32.mrb[0].mxu1 }
 0x28b   :  { %v11915_v35 = vadd.f32 %v14098_v57, %v2119_v52  ;;  %v2121_v13 = vpop.f32.mrb[1].mxu1  ;;  %v2675_v52 = vsel %vm2620_vm3, %v2668_v0, %v2674_v20  ;;  %v14107_v57 = vld [vmem:[#allocation34_spill] sm:$0xff] }
 0x28c   :  { %8017 = vmatmul.mubr.msk.bf16.gmra.mrb[132].mxu0 %vm1250_vm1, %v3848_v36  ;;  %v11919_v27 = vadd.f32 %v14099_v39, %v2121_v13  ;;  %v2123_v38 = vpop.f32.mrb[2].mxu1  ;;  %v3872_v39 = vsel %vm3668_vm4, %v3859_v40, %v3871_v12 }
 0x28d   :  { %4664 = vmatprep.mubr.bf16.mxu0 %v13867_v43  ;;  %v11924_v5 = vadd.f32 %v14100_v49, %v2123_v38  ;;  %v2125_v1 = vpop.f32.mrb[3].mxu1  ;;  %v2672_v38 = vrot.slane %v11613_v31, 1  ;;  %v14109_v49 = vshll.u32 %v11066_v51, 16  ;;  %v14112_v51 = vld [vmem:[#allocation38_spill] sm:$0xff] }
 0x28e   :  { %v11928_v53 = vadd.f32 %v14101_v33, %v2125_v1 }
 0x28f   :  { %3142 = vmatmul.mubr.bf16.gmra.mrb[108].mxu1 %v2661_v56  ;;  %v3881_v56 = vrot.slane %v14108_v63, 1  ;;  %v3882_v1 = vrot.slane %v14109_v49, 2  ;;  %v2673_v31 = vsel %vm2620_vm3, %v2666_v6, %v2672_v38  ;;  %v14114_v6 = vshrl.u32 %v11092_v21, 16  ;;  %v14116_v63 = vld [vmem:[#allocation41_spill] sm:$0xff]  ;;  %v14117_v49 = vld [vmem:[#allocation42_spill] sm:$0xff] }
 0x290   :  { %3151 = vmatprep.mubr.bf16.mxu1 %v2669_v42  ;;  %v2680_v42 = vrot.slane %v11620_v26, 1 }
 0x291   :  { %v3883_v2 = vor.u32 %v3882_v1, %v3881_v56 }
 0x292   :  { %v2129_v29 = vpop.f32.mrb[4].mxu1 }
 0x293   :  { %v11938_v46 = vadd.f32 %v14104_v55, %v2129_v29  ;;  %v2131_v36 = vpop.f32.mrb[5].mxu1  ;;  %v2681_v55 = vsel %vm2620_vm3, %v2674_v20, %v2680_v42 }
 0x294   :  { %8018 = vmatmul.mubr.msk.bf16.gmra.mrb[136].mxu0 %vm1250_vm1, %v3860_v16  ;;  %v11942_v45 = vadd.f32 %v14105_v9, %v2131_v36  ;;  %v2133_v15 = vpop.f32.mrb[6].mxu1  ;;  %v14110_v16 = vld [vmem:[#allocation36_spill] sm:$0xff]  ;;  %v14113_v36 = vld [vmem:[#allocation39_spill] sm:$0xff] }
 0x295   :  { %4674 = vmatprep.mubr.bf16.mxu0 %v13867_v43  ;;  %v11947_v10 = vadd.f32 %v14106_v32, %v2133_v15  ;;  %v2135_v44 = vpop.f32.mrb[7].mxu1  ;;  %v3884_v15 = vsel %vm3668_vm4, %v3871_v12, %v3883_v2  ;;  %v3893_v32 = vrot.slane %v14114_v6, 1 }
 0x296   :  { %v11951_v13 = vadd.f32 %v14107_v57, %v2135_v44  ;;  %v14115_v44 = vshll.u32 %v11092_v21, 16  ;;  %v2686_v57 = vrot.slane %v11645_v24, 1  ;;  %v14118_v21 = vld [vmem:[#allocation43_spill] sm:$0xff] }
 0x297   :  { %3152 = vmatmul.mubr.bf16.gmra.mrb[112].mxu1 %v2667_v62  ;;  %v2678_v62 = vrot.slane %v11638_v54, 1 }
 0x298   :  { %3161 = vmatprep.mubr.bf16.mxu1 %v2675_v52  ;;  %v3894_v52 = vrot.slane %v14115_v44, 2 }
 0x299   :  { %v2679_v54 = vsel %vm2620_vm3, %v2672_v38, %v2678_v62  ;;  %v14120_v38 = vshrl.u32 %v11118_v19, 16 }
 0x29a   :  { %v2139_v33 = vpop.f32.mrb[8].mxu1 }
 0x29b   :  { %v11961_v0 = vadd.f32 %v14110_v16, %v2139_v33  ;;  %v2141_v8 = vpop.f32.mrb[9].mxu1  ;;  %v3895_v33 = vor.u32 %v3894_v52, %v3893_v32  ;;  %v14122_v32 = vld [vmem:[#allocation46_spill] sm:$0xff]  ;;  %v14123_v52 = vld [vmem:[#allocation47_spill] sm:$0xff] }
 0x29c   :  { %8019 = vmatmul.mubr.msk.bf16.gmra.mrb[140].mxu0 %vm1250_vm1, %v3872_v39  ;;  %v11965_v40 = vadd.f32 %v14111_v59, %v2141_v8  ;;  %v2143_v41 = vpop.f32.mrb[10].mxu1  ;;  %v2687_v8 = vsel %vm2620_vm3, %v2680_v42, %v2686_v57  ;;  %v14119_v59 = vld [vmem:[#allocation44_spill] sm:$0xff] }
 0x29d   :  { %4684 = vmatprep.mubr.bf16.mxu0 %v13867_v43  ;;  %v11970_v29 = vadd.f32 %v14112_v51, %v2143_v41  ;;  %v2145_v26 = vpop.f32.mrb[11].mxu1  ;;  %v2684_v51 = vrot.slane %v11664_v47, 1 }
 0x29e   :  { %v11974_v9 = vadd.f32 %v14113_v36, %v2145_v26  ;;  %v3905_v26 = vrot.slane %v14120_v38, 1  ;;  %v2698_v38 = vrot.slane %v11693_v7, 1 }
 0x29f   :  { %3162 = vmatmul.mubr.bf16.gmra.mrb[116].mxu1 %v2673_v31  ;;  %v3896_v31 = vsel %vm3668_vm4, %v3883_v2, %v3895_v33  ;;  %v2685_v47 = vsel %vm2620_vm3, %v2678_v62, %v2684_v51  ;;  %v14126_v62 = vshrl.u32 %v11144_v4, 16 }
 0x2a0   :  { %3171 = vmatprep.mubr.bf16.mxu1 %v2681_v55  ;;  %v14121_v55 = vshll.u32 %v11118_v19, 16  ;;  %v14124_v19 = vld [vmem:[#allocation48_spill] sm:$0xff] }
 0x2a2   :  { %v2149_v39 = vpop.f32.mrb[12].mxu1  ;;  %v3906_v36 = vrot.slane %v14121_v55, 2  ;;  %v14128_v55 = vld [vmem:[#allocation51_spill] sm:$0xff] }
 0x2a3   :  { %v11984_v20 = vadd.f32 %v14116_v63, %v2149_v39  ;;  %v2151_v56 = vpop.f32.mrb[13].mxu1 }
 0x2a4   :  { %8020 = vmatmul.mubr.msk.bf16.gmra.mrb[144].mxu0 %vm1250_vm1, %v3884_v15  ;;  %v11988_v12 = vadd.f32 %v14117_v49, %v2151_v56  ;;  %v2153_v1 = vpop.f32.mrb[14].mxu1  ;;  %v2692_v15 = vrot.slane %v11671_v18, 1  ;;  %v3907_v63 = vor.u32 %v3906_v36, %v3905_v26 }
 0x2a5   :  { %4694 = vmatprep.mubr.bf16.mxu0 %v13867_v43  ;;  %v11993_v16 = vadd.f32 %v14118_v21, %v2153_v1  ;;  %v2155_v24 = vpop.f32.mrb[15].mxu1  ;;  %v14125_v1 = vld [vmem:[#allocation49_spill] sm:$0xff] }
 0x2a6   :  { %v11997_v41 = vadd.f32 %v14119_v59, %v2155_v24  ;;  %v2693_v49 = vsel %vm2620_vm3, %v2686_v57, %v2692_v15  ;;  %v3908_v21 = vsel %vm3668_vm4, %v3895_v33, %v3907_v63  ;;  %v2690_v24 = vrot.slane %v11686_v25, 1 }
 0x2a7   :  { %3172 = vmatmul.mubr.bf16.gmra.mrb[120].mxu1 %v2679_v54  ;;  %v14127_v59 = vshll.u32 %v11144_v4, 16  ;;  %v14130_v4 = vld [vmem:[#allocation53_spill] sm:$0xff] }
 0x2a8   :  { %3181 = vmatprep.mubr.bf16.mxu1 %v2687_v8  ;;  %v3917_v8 = vrot.slane %v14126_v62, 1  ;;  %v2691_v25 = vsel %vm2620_vm3, %v2684_v51, %v2690_v24  ;;  %v14132_v51 = vshrl.u32 %v11180_v17, 16 }
 0x2aa   :  { %v2159_v6 = vpop.f32.mrb[16].mxu1 }
 0x2ab   :  { %v12007_v42 = vadd.f32 %v14122_v32, %v2159_v6  ;;  %v2161_v44 = vpop.f32.mrb[17].mxu1  ;;  %v14129_v6 = vld [vmem:[#allocation52_spill] sm:$0xff] }
 0x2ac   :  { %8021 = vmatmul.mubr.msk.bf16.gmra.mrb[148].mxu0 %vm1250_vm1, %v3896_v31  ;;  %v12011_v2 = vadd.f32 %v14123_v52, %v2161_v44  ;;  %v2163_v39 = vpop.f32.mrb[18].mxu1  ;;  %v3918_v31 = vrot.slane %v14127_v59, 2 }
 0x2ad   :  { %4704 = vmatprep.mubr.bf16.mxu0 %v13867_v43  ;;  %v12016_v56 = vadd.f32 %v14124_v19, %v2163_v39  ;;  %v2165_v18 = vpop.f32.mrb[19].mxu1  ;;  %v2699_v39 = vsel %vm2620_vm3, %v2692_v15, %v2698_v38  ;;  %v2704_v15 = vrot.slane %v11711_v22, 1 }
 0x2ae   :  { %v12020_v54 = vadd.f32 %v14125_v1, %v2165_v18  ;;  %v3919_v44 = vor.u32 %v3918_v31, %v3917_v8  ;;  %v2696_v18 = vrot.slane %v11704_v60, 1  ;;  %v3929_v1 = vrot.slane %v14132_v51, 1  ;;  %v9648_v8 = vld [vmem:[%s13671_s0 + $0x200] ss:$0 sps:$4 sm:$0x33]   ;;  %v14134_v31 = vld [vmem:[#allocation56_spill] sm:$0xff] }
 0x2af   :  { %3182 = vmatmul.mubr.bf16.gmra.mrb[124].mxu1 %v2685_v47  ;;  %v14131_v47 = vld [vmem:[#allocation54_spill] sm:$0xff] }
 0x2b0   :  { %3191 = vmatprep.mubr.bf16.mxu1 %v2693_v49  ;;  %v3920_v49 = vsel %vm3668_vm4, %v3907_v63, %v3919_v44  ;;  %v2697_v63 = vsel %vm2620_vm3, %v2690_v24, %v2696_v18  ;;  %v4829_v24 = vld [vmem:[%s13671_s0] sm:$0xcc] }
 0x2b2   :  { %v2169_v26 = vpop.f32.mrb[20].mxu1 }
 0x2b3   :  { %v12030_v57 = vadd.f32 %v14128_v55, %v2169_v26  ;;  %v2171_v36 = vpop.f32.mrb[21].mxu1  ;;  %v14135_v55 = vld [vmem:[#allocation57_spill] sm:$0xff] }
 0x2b4   :  { %8022 = vmatmul.mubr.msk.bf16.gmra.mrb[152].mxu0 %vm1250_vm1, %v3908_v21  ;;  %v12034_v33 = vadd.f32 %v14129_v6, %v2171_v36  ;;  %v2173_v32 = vpop.f32.mrb[22].mxu1  ;;  %v14133_v21 = vshll.u32 %v11180_v17, 16 }
 0x2b5   :  { %4714 = vmatprep.mubr.bf16.mxu0 %v13867_v43  ;;  %v12039_v52 = vadd.f32 %v14130_v4, %v2173_v32  ;;  %v2175_v7 = vpop.f32.mrb[23].mxu1  ;;  %v3952_v32 = vshrl.u32 %v9648_v8, 16  ;;  %v14136_v4 = vld [vmem:[#allocation58_spill] sm:$0xff] }
 0x2b6   :  { %v12043_v19 = vadd.f32 %v14131_v47, %v2175_v7  ;;  %v3930_v62 = vrot.slane %v14133_v21, 2  ;;  %v14137_v47 = vld [vmem:[#allocation59_spill] sm:$0xff] }
 0x2b7   :  { %3192 = vmatmul.mubr.bf16.gmra.mrb[128].mxu1 %v2691_v25  ;;  %v3955_v25 = vshll.u32 %v9648_v8, 16  ;;  %v3954_v21 = vrot.slane %v3952_v32, 1  ;;  %v2710_v8 = vrot.slane %v11727_v50, 1 }
 0x2b8   :  { %3201 = vmatprep.mubr.bf16.mxu1 %v2699_v39  ;;  %v3931_v6 = vor.u32 %v3930_v62, %v3929_v1  ;;  %v2705_v39 = vsel %vm2620_vm3, %v2698_v38, %v2704_v15  ;;  %v2702_v1 = vrot.slane %v11720_v23, 1  ;;  %v9921_v38 = vld [vmem:[%s13671_s0 + $0xc] sm:$0xff] }
 0x2b9   :  { %v3957_v62 = vrot.slane %v3955_v25, 2  ;;  %v14140_v25 = vld [vmem:[#allocation62_spill] sm:$0xff] }
 0x2ba   :  { %v2179_v59 = vpop.f32.mrb[24].mxu1  ;;  %v2703_v32 = vsel %vm2620_vm3, %v2696_v18, %v2702_v1 }
 0x2bb   :  { %v12056_v26 = vadd.f32 %v14134_v31, %v2179_v59  ;;  %v2181_v60 = vpop.f32.mrb[25].mxu1  ;;  %v8027_v59 = vcombine.high %v4829_v24, %v9921_v38  ;;  %v3958_v50 = vor.u32 %v3957_v62, %v3954_v21  ;;  %v2708_v21 = vrot.slane %v11739_v34, 1  ;;  %v9923_v34 = vld [vmem:[%s13671_s0 + $0x18] ss:$12 sps:$4 sm:$0xff]  }
 0x2bc   :  { %8023 = vmatmul.mubr.msk.bf16.gmra.mrb[156].mxu0 %vm1250_vm1, %v3920_v49  ;;  %v12061_v36 = vadd.f32 %v14135_v55, %v2181_v60  ;;  %v2183_v17 = vpop.f32.mrb[26].mxu1  ;;  %v3932_v49 = vsel %vm3668_vm4, %v3919_v44, %v3931_v6  ;;  %v14138_v60 = vld [vmem:[#allocation60_spill] sm:$0xff]  ;;  %v14139_v44 = vld [vmem:[#allocation61_spill] sm:$0xff]  ;;  %v8026_v62 = vcombine.low %v4829_v24, %v9921_v38  ;;  %v14144_v24 = vld [vmem:[#allocation66_spill] sm:$0xff] }
 0x2bd   :  { %4724 = vmatprep.mubr.bf16.mxu0 %v13867_v43  ;;  %v12065_v22 = vadd.f32 %v14136_v4, %v2183_v17  ;;  %v2185_v7 = vpop.f32.mrb[27].mxu1  ;;  %v3959_v18 = vsel %vm3668_vm4, %v3931_v6, %v3958_v50  ;;  %v2709_v6 = vsel %vm2620_vm3, %v2702_v1, %v2708_v21 }
 0x2be   :  { %v12069_v51 = vadd.f32 %v14137_v47, %v2185_v7  ;;  %v4882_v47 = vrot.slane %v8027_v59, 2  ;;  %v4879_v50 = vrot.slane %v8026_v62, 2 }
 0x2bf   :  { %3202 = vmatmul.mubr.bf16.gmra.mrb[132].mxu1 %v2697_v63 }
 0x2c0   :  { %3211 = vmatprep.mubr.bf16.mxu1 %v2705_v39  ;;  %v2711_v39 = vsel %vm2620_vm3, %v2704_v15, %v2710_v8  ;;  %v2716_v15 = vrot.slane %v11746_v28, 1  ;;  %v4880_v28 = vrot.slane %v9923_v34, 2  ;;  %v14147_v34 = vld [vmem:[#allocation68_spill] sm:$0xff] }
 0x2c2   :  { %v2189_v31 = vpop.f32.mrb[28].mxu1  ;;  %v4881_v62 = vsel %vm1314_vm0, %v4879_v50, %v4880_v28 }
 0x2c3   :  { %v12081_v55 = vadd.f32 %v14138_v60, %v2189_v31  ;;  %v2191_v17 = vpop.f32.mrb[29].mxu1  ;;  %v14141_v60 = vld [vmem:[#allocation63_spill] sm:$0xff] }
 0x2c4   :  { %8024 = vmatmul.mubr.msk.bf16.gmra.mrb[160].mxu0 %vm1250_vm1, %v3932_v49  ;;  %v12085_v63 = vadd.f32 %v14139_v44, %v2191_v17  ;;  %v2193_v23 = vpop.f32.mrb[30].mxu1  ;;  %v9922_v49 = vld [vmem:[%s13671_s0 + $0x1c] ss:$12 sps:$4 sm:$0xff]  }
 0x2c5   :  { %4734 = vmatprep.mubr.bf16.mxu0 %v13867_v43  ;;  %v12090_v4 = vadd.f32 %v14140_v25, %v2193_v23  ;;  %v2195_v7 = vpop.f32.mrb[31].mxu1  ;;  %v4883_v31 = vrot.slane %v9922_v49, 2  ;;  %v14142_v23 = vld [vmem:[#allocation64_spill] sm:$0xff] }
 0x2c6   :  { %v12097_v17 = vadd.f32 %v14141_v60, %v2195_v7  ;;  %v14143_v7 = vld [vmem:[#allocation65_spill] sm:$0xff] }
 0x2c7   :  { %3212 = vmatmul.mubr.bf16.gmra.mrb[136].mxu1 %v2703_v32  ;;  %v4884_v44 = vsel %vm1314_vm0, %v4882_v47, %v4883_v31  ;;  %v2717_v47 = vsel %vm2620_vm3, %v2710_v8, %v2716_v15  ;;  %v9662_v8 = vld [vmem:[#allocation2 + $0x5d4] ss:$8 sps:$4 sm:$0xff]  }
 0x2c8   :  { %3221 = vmatprep.mubr.bf16.mxu1 %v2711_v39 }
 0x2ca   :  { %v2199_v59 = vpop.f32.mrb[32].mxu1 }
 0x2cb   :  { %v12104_v25 = vadd.f32 %v14142_v23, %v2199_v59  ;;  %v2201_v43 = vpop.f32.mrb[33].mxu1  ;;  %v9657_v59 = vld [vmem:[#allocation2 + $0x5c0] ss:$8 sps:$4 sm:$0xff]  }
 0x2cc   :  { %8025 = vmatmul.mubr.msk.bf16.gmra.mrb[164].mxu0 %vm1250_vm1, %v3959_v18  ;;  %v12108_v49 = vadd.f32 %v14143_v7, %v2201_v43  ;;  %v2203_v32 = vpop.f32.mrb[34].mxu1  ;;  %v9924_v43 = vld [vmem:[%s13671_s0 + $0x34] ss:$12 sps:$4 sm:$0xff]   ;;  %v2722_v7 = vrot.slane %v11765_v14, 1  ;;  %v9660_v14 = vld [vmem:[#allocation2 + $0x5d0] ss:$8 sps:$4 sm:$0xff]  }
 0x2cd   :  { %5339 = vmatprep.mubr.bf16.mxu0 %v4884_v44  ;;  %v12115_v38 = vadd.f32 %v14144_v24, %v2203_v32  ;;  %v2205_v39 = vpop.f32.mrb[35].mxu1  ;;  %v4890_v60 = vrot.slane %v9924_v43, 2  ;;  %v14145_v18 = vld [vmem:[#allocation67_spill] sm:$0xff]  ;;  %v2714_v44 = vrot.slane %v11758_v48, 1 }
 0x2ce   :  { %v12122_v1 = vadd.f32 %v14145_v18, %v2205_v39  ;;  %v14148_v39 = vld [vmem:[#allocation69_spill] sm:$0xff]  ;;  %v9925_v48 = vld [vmem:[%s13671_s0 + $0x30] ss:$12 sps:$4 sm:$0xff]  }
 0x2cf   :  { %3222 = vmatmul.mubr.bf16.gmra.mrb[140].mxu1 %v2709_v6  ;;  %v4891_v23 = vsel %vm1314_vm0, %v4883_v31, %v4890_v60  ;;  %v2715_v50 = vsel %vm2620_vm3, %v2708_v21, %v2714_v44  ;;  %v4888_v31 = vrot.slane %v9925_v48, 2  ;;  %v14151_v21 = vld [vmem:[#allocation71_spill] sm:$0xff] }
 0x2d0   :  { %14146 = vst [vmem:[#allocation15_spill] sm:$0xff] %v12122_v1  ;;  %3231 = vmatprep.mubr.bf16.mxu1 %v2717_v47  ;;  %v14149_v47 = vld [vmem:[#allocation70_spill] sm:$0xff] }
 0x2d2   :  { %v2209_v32 = vpop.f32.mrb[36].mxu1 }
 0x2d3   :  { %v12129_v24 = vadd.f32 %v14147_v34, %v2209_v32  ;;  %v2211_v43 = vpop.f32.mrb[37].mxu1  ;;  %v9926_v34 = vld [vmem:[%s13671_s0 + $0x4c] ss:$12 sps:$4 sm:$0xff]  }
 0x2d4   :  { %5340 = vmatmul.mubr.bf16.vlgmr.msra.gmra.mrb[84].mxu0 %v4881_v62  ;;  %v12132_v18 = vadd.f32 %v14148_v39, %v2211_v43  ;;  %v2213_v6 = vpop.f32.mrb[38].mxu1  ;;  %v2723_v62 = vsel %vm2620_vm3, %v2716_v15, %v2722_v7  ;;  %v4896_v43 = vrot.slane %v9926_v34, 2  ;;  %v4889_v39 = vsel %vm1314_vm0, %v4880_v28, %v4888_v31 }
 0x2d5   :  { %5349 = vmatprep.mubr.bf16.mxu0 %v4891_v23  ;;  %5551 = vmatpush1.bf16.msra.mxu0 %v9657_v59  ;;  %v12139_v1 = vadd.f32 %v14149_v47, %v2213_v6  ;;  %v2215_v32 = vpop.f32.mrb[39].mxu1  ;;  %v2720_v59 = vrot.slane %v11777_v58, 1  ;;  %v2728_v15 = vrot.slane %v11784_v30, 1  ;;  %v14152_v47 = vld [vmem:[#allocation72_spill] sm:$0xff]  ;;  %v9927_v58 = vld [vmem:[%s13671_s0 + $0x48] ss:$12 sps:$4 sm:$0xff]  }
 0x2d6   :  { %5552 = vmatprep.subr.bf16.mxu0 %v9662_v8  ;;  %v12146_v23 = vadd.f32 %v14151_v21, %v2215_v32  ;;  %v4897_v6 = vsel %vm1314_vm0, %v4890_v60, %v4896_v43  ;;  %v9663_v8 = vld [vmem:[#allocation2 + $0x5e4] ss:$8 sps:$4 sm:$0x3f]   ;;  %v4894_v60 = vrot.slane %v9927_v58, 2  ;;  %v2726_v58 = vrot.slane %v11796_v3, 1 }
 0x2d7   :  { %14150 = vst [vmem:[#allocation16_spill] sm:$0xff] %v12139_v1  ;;  %3232 = vmatmul.mubr.bf16.gmra.mrb[144].mxu1 %v2715_v50  ;;  %v14153_v32 = vld [vmem:[#allocation73_spill] sm:$0xff]  ;;  %v2721_v28 = vsel %vm2620_vm3, %v2714_v44, %v2720_v59  ;;  %v14157_v44 = vld [vmem:[#allocation75_spill] sm:$0xff] }
 0x2d8   :  { %3241 = vmatprep.mubr.bf16.mxu1 %v2723_v62  ;;  %v9665_v30 = vld [vmem:[#allocation2 + $0x5e0] ss:$8 sps:$4 sm:$0x3f]  }
 0x2d9   :  { %5553 = vmatpush1.bf16.msra.mxu0 %v9660_v14  ;;  %v14155_v14 = vld [vmem:[#allocation74_spill] sm:$0xff] }
 0x2da   :  { %v2219_v48 = vpop.f32.mrb[40].mxu1  ;;  %8067 = vmatprep.subr.msk.bf16.mxu0 %vm1314_vm0, %v9663_v8  ;;  %v9929_v3 = vld [vmem:[%s13671_s0 + $0x60] ss:$12 sps:$4 sm:$0xff]  }
 0x2db   :  { %v12153_v1 = vadd.f32 %v14152_v47, %v2219_v48  ;;  %v2221_v34 = vpop.f32.mrb[41].mxu1  ;;  %v9928_v47 = vld [vmem:[%s13671_s0 + $0x64] ss:$12 sps:$4 sm:$0xff]  }
 0x2dc   :  { %5350 = vmatmul.mubr.bf16.gmra.mrb[88].mxu0 %v4889_v39  ;;  %v12156_v21 = vadd.f32 %v14153_v32, %v2221_v34  ;;  %v2223_v50 = vpop.f32.mrb[42].mxu1  ;;  %v2729_v39 = vsel %vm2620_vm3, %v2722_v7, %v2728_v15  ;;  %v4902_v34 = vrot.slane %v9928_v47, 2  ;;  %v5302_v32 = vsel %vm1314_vm0, %v9665_v30, 0  ;;  %v14158_v47 = vld [vmem:[#allocation76_spill] sm:$0xff] }
 0x2dd   :  { %5359 = vmatprep.mubr.bf16.mxu0 %v4897_v6  ;;  %v12163_v62 = vadd.f32 %v14155_v14, %v2223_v50  ;;  %v2225_v48 = vpop.f32.mrb[43].mxu1  ;;  %5555 = vmatpush1.bf16.msra.mxu0 %v5302_v32  ;;  %v4895_v50 = vsel %vm1314_vm0, %v4888_v31, %v4894_v60  ;;  %v2734_v14 = vrot.slane %v11803_v61, 1  ;;  %v2727_v30 = vsel %vm2620_vm3, %v2720_v59, %v2726_v58  ;;  %v9930_v32 = vld [vmem:[%s13671_s0 + $0x7c] ss:$12 sps:$4 sm:$0xff]  }
 0x2de   :  { %14154 = vst [vmem:[#allocation17_spill] sm:$0xff] %v12156_v21  ;;  %v12171_v6 = vadd.f32 %v14157_v44, %v2225_v48  ;;  %v4903_v7 = vsel %vm1314_vm0, %v4896_v43, %v4902_v34  ;;  %v14160_v48 = vld [vmem:[#allocation77_spill] sm:$0xff]  ;;  %v4900_v31 = vrot.slane %v9929_v3, 2  ;;  %v14162_v43 = vld [vmem:[#allocation78_spill] sm:$0xff] }
 0x2df   :  { %14156 = vst [vmem:[#allocation19_spill] sm:$0xff] %v12163_v62  ;;  %3242 = vmatmul.mubr.bf16.gmra.mrb[148].mxu1 %v2721_v28 }
 0x2e0   :  { %3251 = vmatprep.mubr.bf16.mxu1 %v2729_v39  ;;  %v4901_v59 = vsel %vm1314_vm0, %v4894_v60, %v4900_v31 }
 0x2e2   :  { %v2229_v62 = vpop.f32.mrb[44].mxu1 }
 0x2e3   :  { %v12179_v21 = vadd.f32 %v14158_v47, %v2229_v62  ;;  %v2231_v8 = vpop.f32.mrb[45].mxu1  ;;  %v2735_v62 = vsel %vm2620_vm3, %v2728_v15, %v2734_v14  ;;  %v14164_v47 = vld [vmem:[#allocation79_spill] sm:$0xff]  ;;  %v14166_v15 = vld [vmem:[#allocation80_spill] sm:$0xff] }
 0x2e4   :  { %5360 = vmatmul.mubr.bf16.gmra.mrb[92].mxu0 %v4895_v50  ;;  %v12182_v44 = vadd.f32 %v14160_v48, %v2231_v8  ;;  %v2233_v28 = vpop.f32.mrb[46].mxu1  ;;  %v4908_v50 = vrot.slane %v9930_v32, 2  ;;  %v14168_v32 = vld [vmem:[#allocation81_spill] sm:$0xff] }
 0x2e5   :  { %14159 = vst [vmem:[#allocation12_spill] sm:$0xff] %v12179_v21  ;;  %5369 = vmatprep.mubr.bf16.mxu0 %v4903_v7  ;;  %v12189_v61 = vadd.f32 %v14162_v43, %v2233_v28  ;;  %v2235_v39 = vpop.f32.mrb[47].mxu1  ;;  %v2732_v7 = vrot.slane %v11815_v37, 1  ;;  %v14165_v28 = vld [vmem:[#allocation14_spill] sm:$0xff]  ;;  %v9931_v37 = vld [vmem:[%s13671_s0 + $0x78] ss:$12 sps:$4 sm:$0xff]  }
 0x2e6   :  { %14161 = vst [vmem:[#allocation18_spill] sm:$0xff] %v12182_v44  ;;  %v12196_v8 = vadd.f32 %v14164_v47, %v2235_v39  ;;  %v4909_v48 = vsel %vm1314_vm0, %v4902_v34, %v4908_v50  ;;  %v2740_v3 = vrot.slane %v14165_v28, 1  ;;  %v4906_v60 = vrot.slane %v9931_v37, 2  ;;  %v14170_v34 = vld [vmem:[#allocation82_spill] sm:$0xff] }
 0x2e7   :  { %14163 = vst [vmem:[#allocation20_spill] sm:$0xff] %v12189_v61  ;;  %3252 = vmatmul.mubr.bf16.gmra.mrb[152].mxu1 %v2727_v30  ;;  %v2733_v30 = vsel %vm2620_vm3, %v2726_v58, %v2732_v7 }
 0x2e8   :  { %3261 = vmatprep.mubr.bf16.mxu1 %v2735_v62  ;;  %v2741_v28 = vsel %vm2620_vm3, %v2734_v14, %v2740_v3  ;;  %v4907_v58 = vsel %vm1314_vm0, %v4900_v31, %v4906_v60  ;;  %v14174_v14 = vld [vmem:[#allocation85_spill] sm:$0xff] }
 0x2ea   :  { %v2239_v43 = vpop.f32.mrb[48].mxu1 }
 0x2eb   :  { %v12203_v61 = vadd.f32 %v14166_v15, %v2239_v43  ;;  %v2241_v44 = vpop.f32.mrb[49].mxu1  ;;  %v14172_v43 = vld [vmem:[#allocation83_spill] sm:$0xff] }
 0x2ec   :  { %5370 = vmatmul.mubr.bf16.gmra.mrb[96].mxu0 %v4901_v59  ;;  %v12206_v21 = vadd.f32 %v14168_v32, %v2241_v44  ;;  %v2243_v39 = vpop.f32.mrb[50].mxu1  ;;  %v9932_v44 = vld [vmem:[%s13671_s0 + $0x94] ss:$12 sps:$4 sm:$0xff]  }
 0x2ed   :  { %14167 = vst [vmem:[#allocation22_spill] sm:$0xff] %v12203_v61  ;;  %5379 = vmatprep.mubr.bf16.mxu0 %v4909_v48  ;;  %v12213_v62 = vadd.f32 %v14170_v34, %v2243_v39  ;;  %v2245_v47 = vpop.f32.mrb[51].mxu1  ;;  %v4914_v59 = vrot.slane %v9932_v44, 2  ;;  %v2738_v48 = vrot.slane %v11837_v11, 1  ;;  %v14173_v39 = vld [vmem:[#allocation21_spill] sm:$0xff]  ;;  %v14175_v44 = vld [vmem:[#allocation86_spill] sm:$0xff] }
 0x2ee   :  { %14169 = vst [vmem:[#allocation24_spill] sm:$0xff] %v12206_v21  ;;  %v12220_v15 = vadd.f32 %v14172_v43, %v2245_v47  ;;  %v2746_v37 = vrot.slane %v14173_v39, 1  ;;  %v9933_v11 = vld [vmem:[%s13671_s0 + $0x90] ss:$12 sps:$4 sm:$0xff]  }
 0x2ef   :  { %14171 = vst [vmem:[#allocation25_spill] sm:$0xff] %v12213_v62  ;;  %3262 = vmatmul.mubr.bf16.gmra.mrb[156].mxu1 %v2733_v30  ;;  %v4915_v32 = vsel %vm1314_vm0, %v4908_v50, %v4914_v59  ;;  %v2739_v30 = vsel %vm2620_vm3, %v2732_v7, %v2738_v48  ;;  %v4912_v31 = vrot.slane %v9933_v11, 2  ;;  %v14177_v50 = vld [vmem:[#allocation87_spill] sm:$0xff] }
 0x2f0   :  { %3271 = vmatprep.mubr.bf16.mxu1 %v2741_v28  ;;  %v2747_v39 = vsel %vm2620_vm3, %v2740_v3, %v2746_v37  ;;  %v14182_v37 = vld [vmem:[#allocation91_spill] sm:$0xff] }
 0x2f1   :  { %v4913_v7 = vsel %vm1314_vm0, %v4906_v60, %v4912_v31  ;;  %v9935_v60 = vld [vmem:[%s13671_s0 + $0xa8] ss:$12 sps:$4 sm:$0xff]  }
 0x2f2   :  { %v2249_v34 = vpop.f32.mrb[52].mxu1 }
 0x2f3   :  { %v12227_v62 = vadd.f32 %v14174_v14, %v2249_v34  ;;  %v2251_v21 = vpop.f32.mrb[53].mxu1  ;;  %v14179_v34 = vld [vmem:[#allocation89_spill] sm:$0xff] }
 0x2f4   :  { %5380 = vmatmul.mubr.bf16.gmra.mrb[100].mxu0 %v4907_v58  ;;  %v12230_v61 = vadd.f32 %v14175_v44, %v2251_v21  ;;  %v2253_v47 = vpop.f32.mrb[54].mxu1  ;;  %v9934_v21 = vld [vmem:[%s13671_s0 + $0xac] ss:$12 sps:$4 sm:$0xff]  }
 0x2f5   :  { %5389 = vmatprep.mubr.bf16.mxu0 %v4915_v32  ;;  %v12237_v28 = vadd.f32 %v14177_v50, %v2253_v47  ;;  %v2255_v43 = vpop.f32.mrb[55].mxu1  ;;  %v4920_v58 = vrot.slane %v9934_v21, 2  ;;  %v14180_v32 = vld [vmem:[#allocation23_spill] sm:$0xff]  ;;  %v14181_v50 = vld [vmem:[#allocation90_spill] sm:$0xff] }
 0x2f6   :  { %14176 = vst [vmem:[#allocation84_spill] sm:$0xff] %v12230_v61  ;;  %v12244_v14 = vadd.f32 %v14179_v34, %v2255_v43  ;;  %v2744_v44 = vrot.slane %v14180_v32, 1 }
 0x2f7   :  { %14178 = vst [vmem:[#allocation88_spill] sm:$0xff] %v12237_v28  ;;  %3272 = vmatmul.mubr.bf16.gmra.mrb[160].mxu1 %v2739_v30  ;;  %v4921_v47 = vsel %vm1314_vm0, %v4914_v59, %v4920_v58  ;;  %v4918_v30 = vrot.slane %v9935_v60, 2  ;;  %v14188_v60 = vld [vmem:[#allocation95_spill] sm:$0xff] }
 0x2f8   :  { %3281 = vmatprep.mubr.bf16.mxu1 %v2747_v39  ;;  %v2745_v43 = vsel %vm2620_vm3, %v2738_v48, %v2744_v44  ;;  %v14183_v39 = vld [vmem:[#allocation92_spill] sm:$0xff] }
 0x2f9   :  { %v4919_v48 = vsel %vm1314_vm0, %v4912_v31, %v4918_v30 }
 0x2fa   :  { %v2259_v11 = vpop.f32.mrb[56].mxu1 }
 0x2fb   :  { %v12250_v28 = vadd.f32 %v14181_v50, %v2259_v11  ;;  %v2261_v3 = vpop.f32.mrb[57].mxu1  ;;  %v14185_v11 = vld [vmem:[#allocation93_spill] sm:$0xff] }
 0x2fc   :  { %5390 = vmatmul.mubr.bf16.gmra.mrb[104].mxu0 %v4913_v7  ;;  %v12253_v61 = vadd.f32 %v14182_v37, %v2261_v3  ;;  %v2263_v21 = vpop.f32.mrb[58].mxu1  ;;  %v9936_v7 = vld [vmem:[%s13671_s0 + $0xc4] ss:$12 sps:$4 sm:$0xff]   ;;  %v14186_v3 = vld [vmem:[#allocation94_spill] sm:$0xff] }
 0x2fd   :  { %5399 = vmatprep.mubr.bf16.mxu0 %v4921_v47  ;;  %v12260_v59 = vadd.f32 %v14183_v39, %v2263_v21  ;;  %v2265_v34 = vpop.f32.mrb[59].mxu1  ;;  %v4926_v32 = vrot.slane %v9936_v7, 2  ;;  %v14190_v7 = vld [vmem:[#allocation96_spill] sm:$0xff] }
 0x2fe   :  { %v12266_v50 = vadd.f32 %v14185_v11, %v2265_v34  ;;  %v9937_v34 = vld [vmem:[%s13671_s0 + $0xc0] ss:$12 sps:$4 sm:$0xff]   ;;  %v9938_v11 = vld [vmem:[%s13671_s0 + $0xdc] ss:$12 sps:$4 sm:$0xff]  }
 0x2ff   :  { %14184 = vst [vmem:[#allocation30_spill] sm:$0xff] %v12260_v59  ;;  %3282 = vmatmul.mubr.bf16.gmra.mrb[164].mxu1 %v2745_v43  ;;  %v4927_v44 = vsel %vm1314_vm0, %v4920_v58, %v4926_v32  ;;  %v4924_v43 = vrot.slane %v9937_v34, 2 }
 0x302   :  { %v2269_v47 = vpop.f32.mrb[60].mxu1 }
 0x303   :  { %v12271_v37 = vadd.f32 %v14186_v3, %v2269_v47  ;;  %v2271_v21 = vpop.f32.mrb[61].mxu1  ;;  %v4932_v47 = vrot.slane %v9938_v11, 2 }
 0x304   :  { %5400 = vmatmul.mubr.bf16.gmra.mrb[108].mxu0 %v4919_v48  ;;  %v12274_v39 = vadd.f32 %v14188_v60, %v2271_v21  ;;  %v2273_v59 = vpop.f32.mrb[62].mxu1  ;;  %v14192_v48 = vld [vmem:[#allocation97_spill] sm:$0xff]  ;;  %v4925_v21 = vsel %vm1314_vm0, %v4918_v30, %v4924_v43 }
 0x305   :  { %14187 = vst [vmem:[#allocation35_spill] sm:$0xff] %v12271_v37  ;;  %5409 = vmatprep.mubr.bf16.mxu0 %v4927_v44  ;;  %v12280_v31 = vadd.f32 %v14190_v7, %v2273_v59  ;;  %v2275_v58 = vpop.f32.mrb[63].mxu1  ;;  %v4933_v44 = vsel %vm1314_vm0, %v4926_v32, %v4932_v47  ;;  %v14196_v59 = vld [vmem:[#allocation99_spill] sm:$0xff] }
 0x306   :  { %14189 = vst [vmem:[#allocation40_spill] sm:$0xff] %v12274_v39  ;;  %v12286_v3 = vadd.f32 %v14192_v48, %v2275_v58  ;;  %v14194_v39 = vld [vmem:[#allocation98_spill] sm:$0xff]  ;;  %v9939_v58 = vld [vmem:[%s13671_s0 + $0xd8] ss:$12 sps:$4 sm:$0xff]  }
 0x307   :  { %14191 = vst [vmem:[#allocation45_spill] sm:$0xff] %v12280_v31  ;;  %v4930_v11 = vrot.slane %v9939_v58, 2  ;;  %v14198_v48 = vld [vmem:[#allocation100_spill] sm:$0xff] }
 0x308   :  { %14193 = vst [vmem:[#allocation50_spill] sm:$0xff] %v12286_v3 }
 0x30a   :  { %v2279_v60 = vpop.f32.mrb[64].mxu1 }
 0x30b   :  { %v12291_v37 = vadd.f32 %v14194_v39, %v2279_v60  ;;  %v2281_v34 = vpop.f32.mrb[65].mxu1  ;;  %v9940_v39 = vld [vmem:[%s13671_s0 + $0xf4] ss:$12 sps:$4 sm:$0xff]  }
 0x30c   :  { %5410 = vmatmul.mubr.bf16.gmra.mrb[112].mxu0 %v4925_v21  ;;  %v12294_v7 = vadd.f32 %v14196_v59, %v2281_v34  ;;  %v2283_v31 = vpop.f32.mrb[66].mxu1  ;;  %v4938_v60 = vrot.slane %v9940_v39, 2  ;;  %v14200_v21 = vld [vmem:[#allocation101_spill] sm:$0xff]  ;;  %v4931_v34 = vsel %vm1314_vm0, %v4924_v43, %v4930_v11 }
 0x30d   :  { %14195 = vst [vmem:[#allocation55_spill] sm:$0xff] %v12291_v37  ;;  %5419 = vmatprep.mubr.bf16.mxu0 %v4933_v44  ;;  %v12300_v30 = vadd.f32 %v14198_v48, %v2283_v31  ;;  %v2285_v32 = vpop.f32.mrb[67].mxu1  ;;  %v14204_v31 = vld [vmem:[#allocation103_spill] sm:$0xff] }
 0x30e   :  { %14197 = vst [vmem:[#allocation26_spill] sm:$0xff] %v12294_v7  ;;  %v12306_v37 = vadd.f32 %v14200_v21, %v2285_v32  ;;  %v4939_v44 = vsel %vm1314_vm0, %v4932_v47, %v4938_v60  ;;  %v14202_v7 = vld [vmem:[#allocation102_spill] sm:$0xff]  ;;  %v9941_v32 = vld [vmem:[%s13671_s0 + $0xf0] ss:$12 sps:$4 sm:$0xff]  }
 0x30f   :  { %14199 = vst [vmem:[#allocation27_spill] sm:$0xff] %v12300_v30  ;;  %v4936_v39 = vrot.slane %v9941_v32, 2  ;;  %v14206_v21 = vld [vmem:[#allocation104_spill] sm:$0xff] }
 0x310   :  { %14201 = vst [vmem:[#allocation28_spill] sm:$0xff] %v12306_v37 }
 0x312   :  { %v2289_v59 = vpop.f32.mrb[68].mxu1 }
 0x313   :  { %v12311_v3 = vadd.f32 %v14202_v7, %v2289_v59  ;;  %v2291_v58 = vpop.f32.mrb[69].mxu1  ;;  %v9942_v7 = vld [vmem:[%s13671_s0 + $0x10c] ss:$12 sps:$4 sm:$0xff]  }
 0x314   :  { %5420 = vmatmul.mubr.bf16.gmra.mrb[116].mxu0 %v4931_v34  ;;  %v12314_v48 = vadd.f32 %v14204_v31, %v2291_v58  ;;  %v2293_v30 = vpop.f32.mrb[70].mxu1  ;;  %v4944_v59 = vrot.slane %v9942_v7, 2  ;;  %v14208_v34 = vld [vmem:[#allocation105_spill] sm:$0xff]  ;;  %v4937_v58 = vsel %vm1314_vm0, %v4930_v11, %v4936_v39 }
 0x315   :  { %14203 = vst [vmem:[#allocation29_spill] sm:$0xff] %v12311_v3  ;;  %5429 = vmatprep.mubr.bf16.mxu0 %v4939_v44  ;;  %v12320_v43 = vadd.f32 %v14206_v21, %v2293_v30  ;;  %v2295_v47 = vpop.f32.mrb[71].mxu1  ;;  %v14212_v30 = vld [vmem:[#allocation107_spill] sm:$0xff] }
 0x316   :  { %14205 = vst [vmem:[#allocation31_spill] sm:$0xff] %v12314_v48  ;;  %v12326_v3 = vadd.f32 %v14208_v34, %v2295_v47  ;;  %v4945_v44 = vsel %vm1314_vm0, %v4938_v60, %v4944_v59  ;;  %v14210_v48 = vld [vmem:[#allocation106_spill] sm:$0xff]  ;;  %v14214_v34 = vld [vmem:[#allocation108_spill] sm:$0xff] }
 0x317   :  { %14207 = vst [vmem:[#allocation32_spill] sm:$0xff] %v12320_v43  ;;  %v9943_v47 = vld [vmem:[%s13671_s0 + $0x108] ss:$12 sps:$4 sm:$0xff]  }
 0x318   :  { %14209 = vst [vmem:[#allocation33_spill] sm:$0xff] %v12326_v3  ;;  %v4942_v7 = vrot.slane %v9943_v47, 2 }
 0x31a   :  { %v2299_v31 = vpop.f32.mrb[72].mxu1 }
 0x31b   :  { %v12331_v37 = vadd.f32 %v14210_v48, %v2299_v31  ;;  %v2301_v32 = vpop.f32.mrb[73].mxu1  ;;  %v9944_v48 = vld [vmem:[%s13671_s0 + $0x124] ss:$12 sps:$4 sm:$0xff]  }
 0x31c   :  { %5430 = vmatmul.mubr.bf16.gmra.mrb[120].mxu0 %v4937_v58  ;;  %v12334_v21 = vadd.f32 %v14212_v30, %v2301_v32  ;;  %v2303_v43 = vpop.f32.mrb[74].mxu1  ;;  %v4950_v31 = vrot.slane %v9944_v48, 2  ;;  %v14216_v58 = vld [vmem:[#allocation109_spill] sm:$0xff]  ;;  %v4943_v32 = vsel %vm1314_vm0, %v4936_v39, %v4942_v7 }
 0x31d   :  { %14211 = vst [vmem:[#allocation34_spill] sm:$0xff] %v12331_v37  ;;  %5439 = vmatprep.mubr.bf16.mxu0 %v4945_v44  ;;  %v12340_v11 = vadd.f32 %v14214_v34, %v2303_v43  ;;  %v2305_v60 = vpop.f32.mrb[75].mxu1  ;;  %v14220_v43 = vld [vmem:[#allocation111_spill] sm:$0xff] }
 0x31e   :  { %14213 = vst [vmem:[#allocation36_spill] sm:$0xff] %v12334_v21  ;;  %v12346_v37 = vadd.f32 %v14216_v58, %v2305_v60  ;;  %v4951_v44 = vsel %vm1314_vm0, %v4944_v59, %v4950_v31  ;;  %v14218_v21 = vld [vmem:[#allocation110_spill] sm:$0xff]  ;;  %v14222_v58 = vld [vmem:[#allocation112_spill] sm:$0xff] }
 0x31f   :  { %14215 = vst [vmem:[#allocation37_spill] sm:$0xff] %v12340_v11  ;;  %v9945_v60 = vld [vmem:[%s13671_s0 + $0x120] ss:$12 sps:$4 sm:$0xff]  }
 0x320   :  { %14217 = vst [vmem:[#allocation38_spill] sm:$0xff] %v12346_v37  ;;  %v4948_v48 = vrot.slane %v9945_v60, 2 }
 0x322   :  { %v2309_v30 = vpop.f32.mrb[76].mxu1 }
 0x323   :  { %v12351_v3 = vadd.f32 %v14218_v21, %v2309_v30  ;;  %v2311_v47 = vpop.f32.mrb[77].mxu1  ;;  %v9946_v21 = vld [vmem:[%s13671_s0 + $0x13c] ss:$12 sps:$4 sm:$0xff]  }
 0x324   :  { %5440 = vmatmul.mubr.bf16.gmra.mrb[124].mxu0 %v4943_v32  ;;  %v12354_v34 = vadd.f32 %v14220_v43, %v2311_v47  ;;  %v2313_v11 = vpop.f32.mrb[78].mxu1  ;;  %v4956_v30 = vrot.slane %v9946_v21, 2  ;;  %v14224_v32 = vld [vmem:[#allocation113_spill] sm:$0xff]  ;;  %v4949_v47 = vsel %vm1314_vm0, %v4942_v7, %v4948_v48 }
 0x325   :  { %14219 = vst [vmem:[#allocation39_spill] sm:$0xff] %v12351_v3  ;;  %5449 = vmatprep.mubr.bf16.mxu0 %v4951_v44  ;;  %v12360_v39 = vadd.f32 %v14222_v58, %v2313_v11  ;;  %v2315_v59 = vpop.f32.mrb[79].mxu1  ;;  %v14227_v11 = vld [vmem:[#allocation115_spill] sm:$0xff] }
 0x326   :  { %14221 = vst [vmem:[#allocation41_spill] sm:$0xff] %v12354_v34  ;;  %v12366_v3 = vadd.f32 %v14224_v32, %v2315_v59  ;;  %v4957_v44 = vsel %vm1314_vm0, %v4950_v31, %v4956_v30  ;;  %v14225_v34 = vld [vmem:[#allocation114_spill] sm:$0xff]  ;;  %v9947_v59 = vld [vmem:[%s13671_s0 + $0x138] ss:$12 sps:$4 sm:$0xff]  }
 0x327   :  { %14223 = vst [vmem:[#allocation42_spill] sm:$0xff] %v12360_v39  ;;  %v4954_v21 = vrot.slane %v9947_v59, 2  ;;  %v14229_v32 = vld [vmem:[#allocation116_spill] sm:$0xff] }
 0x32a   :  { %v2319_v43 = vpop.f32.mrb[80].mxu1 }
 0x32b   :  { %v12371_v37 = vadd.f32 %v14225_v34, %v2319_v43  ;;  %v2321_v60 = vpop.f32.mrb[81].mxu1  ;;  %v9948_v34 = vld [vmem:[%s13671_s0 + $0x154] ss:$12 sps:$4 sm:$0xff]  }
 0x32c   :  { %5450 = vmatmul.mubr.bf16.gmra.mrb[128].mxu0 %v4949_v47  ;;  %v12374_v58 = vadd.f32 %v14227_v11, %v2321_v60  ;;  %v2323_v39 = vpop.f32.mrb[82].mxu1  ;;  %v4962_v43 = vrot.slane %v9948_v34, 2  ;;  %v14230_v47 = vld [vmem:[#allocation117_spill] sm:$0xff]  ;;  %v4955_v60 = vsel %vm1314_vm0, %v4948_v48, %v4954_v21 }
 0x32d   :  { %14226 = vst [vmem:[#allocation43_spill] sm:$0xff] %v12371_v37  ;;  %5459 = vmatprep.mubr.bf16.mxu0 %v4957_v44  ;;  %v12380_v7 = vadd.f32 %v14229_v32, %v2323_v39  ;;  %v2325_v31 = vpop.f32.mrb[83].mxu1 }
 0x32e   :  { %14228 = vst [vmem:[#allocation44_spill] sm:$0xff] %v12374_v58  ;;  %v12386_v37 = vadd.f32 %v14230_v47, %v2325_v31  ;;  %v4963_v44 = vsel %vm1314_vm0, %v4956_v30, %v4962_v43  ;;  %v9949_v31 = vld [vmem:[%s13671_s0 + $0x150] ss:$12 sps:$4 sm:$0xff]  }
 0x32f   :  { %v4960_v34 = vrot.slane %v9949_v31, 2 }
 0x332   :  { %v3083_v11 = vpop.f32.mrb[84].mxu1 }
 0x333   :  { %v12391_v58 = vadd.f32 %v11915_v35, %v3083_v11  ;;  %v3085_v59 = vpop.f32.mrb[85].mxu1  ;;  %v9950_v35 = vld [vmem:[%s13671_s0 + $0x16c] ss:$12 sps:$4 sm:$0xff]  }
 0x334   :  { %5460 = vmatmul.mubr.bf16.gmra.mrb[132].mxu0 %v4955_v60  ;;  %v12394_v39 = vadd.f32 %v11919_v27, %v3085_v59  ;;  %v3087_v32 = vpop.f32.mrb[86].mxu1  ;;  %v4968_v47 = vrot.slane %v9950_v35, 2  ;;  %v4961_v27 = vsel %vm1314_vm0, %v4954_v21, %v4960_v34 }
 0x335   :  { %5469 = vmatprep.mubr.bf16.mxu0 %v4963_v44  ;;  %v12400_v48 = vadd.f32 %v11924_v5, %v3087_v32  ;;  %v3089_v30 = vpop.f32.mrb[87].mxu1 }
 0x336   :  { %v12406_v60 = vadd.f32 %v11928_v53, %v3089_v30  ;;  %v4969_v44 = vsel %vm1314_vm0, %v4962_v43, %v4968_v47  ;;  %v9951_v53 = vld [vmem:[%s13671_s0 + $0x168] ss:$12 sps:$4 sm:$0xff]  }
 0x337   :  { %v4966_v30 = vrot.slane %v9951_v53, 2 }
 0x33a   :  { %v3093_v11 = vpop.f32.mrb[88].mxu1 }
 0x33b   :  { %v12411_v59 = vadd.f32 %v11938_v46, %v3093_v11  ;;  %v3095_v31 = vpop.f32.mrb[89].mxu1  ;;  %v9952_v46 = vld [vmem:[%s13671_s0 + $0x184] ss:$12 sps:$4 sm:$0xff]  }
 0x33c   :  { %5470 = vmatmul.mubr.bf16.gmra.mrb[136].mxu0 %v4961_v27  ;;  %v12414_v5 = vadd.f32 %v11942_v45, %v3095_v31  ;;  %v3097_v32 = vpop.f32.mrb[90].mxu1  ;;  %v4974_v35 = vrot.slane %v9952_v46, 2  ;;  %v4967_v45 = vsel %vm1314_vm0, %v4960_v34, %v4966_v30 }
 0x33d   :  { %5479 = vmatprep.mubr.bf16.mxu0 %v4969_v44  ;;  %v12420_v21 = vadd.f32 %v11947_v10, %v3097_v32  ;;  %v3099_v43 = vpop.f32.mrb[91].mxu1 }
 0x33e   :  { %v12426_v27 = vadd.f32 %v11951_v13, %v3099_v43  ;;  %v4975_v44 = vsel %vm1314_vm0, %v4968_v47, %v4974_v35  ;;  %v9953_v13 = vld [vmem:[%s13671_s0 + $0x180] ss:$12 sps:$4 sm:$0xff]  }
 0x33f   :  { %v4972_v43 = vrot.slane %v9953_v13, 2 }
 0x342   :  { %v3103_v11 = vpop.f32.mrb[92].mxu1 }
 0x343   :  { %v12431_v31 = vadd.f32 %v11961_v0, %v3103_v11  ;;  %v3105_v53 = vpop.f32.mrb[93].mxu1  ;;  %v9954_v0 = vld [vmem:[%s13671_s0 + $0x19c] ss:$12 sps:$4 sm:$0xff]  }
 0x344   :  { %5480 = vmatmul.mubr.bf16.gmra.mrb[140].mxu0 %v4967_v45  ;;  %v12434_v10 = vadd.f32 %v11965_v40, %v3105_v53  ;;  %v3107_v32 = vpop.f32.mrb[94].mxu1  ;;  %v4980_v46 = vrot.slane %v9954_v0, 2  ;;  %v4973_v40 = vsel %vm1314_vm0, %v4966_v30, %v4972_v43 }
 0x345   :  { %5489 = vmatprep.mubr.bf16.mxu0 %v4975_v44  ;;  %v12440_v34 = vadd.f32 %v11970_v29, %v3107_v32  ;;  %v3109_v47 = vpop.f32.mrb[95].mxu1 }
 0x346   :  { %v12446_v45 = vadd.f32 %v11974_v9, %v3109_v47  ;;  %v4981_v44 = vsel %vm1314_vm0, %v4974_v35, %v4980_v46  ;;  %v9955_v9 = vld [vmem:[%s13671_s0 + $0x198] ss:$12 sps:$4 sm:$0xff]  }
 0x347   :  { %v4978_v47 = vrot.slane %v9955_v9, 2 }
 0x34a   :  { %v3113_v11 = vpop.f32.mrb[96].mxu1 }
 0x34b   :  { %v12451_v53 = vadd.f32 %v11984_v20, %v3113_v11  ;;  %v3115_v13 = vpop.f32.mrb[97].mxu1  ;;  %v9956_v20 = vld [vmem:[%s13671_s0 + $0x1b4] ss:$12 sps:$4 sm:$0xff]  }
 0x34c   :  { %5490 = vmatmul.mubr.bf16.gmra.mrb[144].mxu0 %v4973_v40  ;;  %v12454_v29 = vadd.f32 %v11988_v12, %v3115_v13  ;;  %v3117_v32 = vpop.f32.mrb[98].mxu1  ;;  %v4986_v0 = vrot.slane %v9956_v20, 2  ;;  %v4979_v12 = vsel %vm1314_vm0, %v4972_v43, %v4978_v47 }
 0x34d   :  { %5499 = vmatprep.mubr.bf16.mxu0 %v4981_v44  ;;  %v12460_v30 = vadd.f32 %v11993_v16, %v3117_v32  ;;  %v3119_v35 = vpop.f32.mrb[99].mxu1 }
 0x34e   :  { %v12466_v40 = vadd.f32 %v11997_v41, %v3119_v35  ;;  %v4987_v44 = vsel %vm1314_vm0, %v4980_v46, %v4986_v0  ;;  %v9957_v41 = vld [vmem:[%s13671_s0 + $0x1b0] ss:$12 sps:$4 sm:$0xff]  }
 0x34f   :  { %v4984_v35 = vrot.slane %v9957_v41, 2 }
 0x352   :  { %v3123_v11 = vpop.f32.mrb[100].mxu1 }
 0x353   :  { %v12471_v13 = vadd.f32 %v12007_v42, %v3123_v11  ;;  %v3125_v9 = vpop.f32.mrb[101].mxu1  ;;  %v9958_v42 = vld [vmem:[%s13671_s0 + $0x1cc] ss:$12 sps:$4 sm:$0xff]  }
 0x354   :  { %5500 = vmatmul.mubr.bf16.gmra.mrb[148].mxu0 %v4979_v12  ;;  %v12474_v16 = vadd.f32 %v12011_v2, %v3125_v9  ;;  %v3127_v32 = vpop.f32.mrb[102].mxu1  ;;  %v4992_v20 = vrot.slane %v9958_v42, 2  ;;  %v4985_v2 = vsel %vm1314_vm0, %v4978_v47, %v4984_v35 }
 0x355   :  { %5509 = vmatprep.mubr.bf16.mxu0 %v4987_v44  ;;  %v12480_v43 = vadd.f32 %v12016_v56, %v3127_v32  ;;  %v3129_v46 = vpop.f32.mrb[103].mxu1 }
 0x356   :  { %v12486_v12 = vadd.f32 %v12020_v54, %v3129_v46  ;;  %v4993_v44 = vsel %vm1314_vm0, %v4986_v0, %v4992_v20  ;;  %v9959_v54 = vld [vmem:[%s13671_s0 + $0x1c8] ss:$12 sps:$4 sm:$0xff]  }
 0x357   :  { %v4990_v46 = vrot.slane %v9959_v54, 2 }
 0x35a   :  { %v3133_v11 = vpop.f32.mrb[104].mxu1 }
 0x35b   :  { %v12491_v9 = vadd.f32 %v12030_v57, %v3133_v11  ;;  %v3135_v41 = vpop.f32.mrb[105].mxu1  ;;  %v9960_v57 = vld [vmem:[%s13671_s0 + $0x1e4] ss:$12 sps:$4 sm:$0xff]  }
 0x35c   :  { %5510 = vmatmul.mubr.bf16.gmra.mrb[152].mxu0 %v4985_v2  ;;  %v12494_v56 = vadd.f32 %v12034_v33, %v3135_v41  ;;  %v3137_v32 = vpop.f32.mrb[106].mxu1  ;;  %v4998_v42 = vrot.slane %v9960_v57, 2  ;;  %v4991_v33 = vsel %vm1314_vm0, %v4984_v35, %v4990_v46  ;;  %v14232_v57 = vld [vmem:[#allocation11_spill] sm:$0xff] }
 0x35d   :  { %5519 = vmatprep.mubr.bf16.mxu0 %v4993_v44  ;;  %v12500_v47 = vadd.f32 %v12039_v52, %v3137_v32  ;;  %v3139_v0 = vpop.f32.mrb[107].mxu1 }
 0x35e   :  { %v12506_v2 = vadd.f32 %v12043_v19, %v3139_v0  ;;  %v4999_v44 = vsel %vm1314_vm0, %v4992_v20, %v4998_v42  ;;  %v9961_v19 = vld [vmem:[%s13671_s0 + $0x1e0] ss:$12 sps:$4 sm:$0xff]  }
 0x35f   :  { %v4996_v0 = vrot.slane %v9961_v19, 2 }
 0x360   :  { %14231 = vst [vmem:[#allocation46_spill] sm:$0xff] %v12506_v2  ;;  %v5004_v2 = vrot.slane %v14232_v57, 2 }
 0x362   :  { %v3143_v11 = vpop.f32.mrb[108].mxu1 }
 0x363   :  { %v12511_v41 = vadd.f32 %v12056_v26, %v3143_v11  ;;  %v3145_v54 = vpop.f32.mrb[109].mxu1 }
 0x364   :  { %5520 = vmatmul.mubr.bf16.gmra.mrb[156].mxu0 %v4991_v33  ;;  %v12514_v52 = vadd.f32 %v12061_v36, %v3145_v54  ;;  %v3147_v32 = vpop.f32.mrb[110].mxu1  ;;  %v4997_v33 = vsel %vm1314_vm0, %v4990_v46, %v4996_v0  ;;  %v5005_v36 = vsel %vm1314_vm0, %v4998_v42, %v5004_v2 }
 0x365   :  { %5529 = vmatprep.mubr.bf16.mxu0 %v4999_v44  ;;  %v12520_v35 = vadd.f32 %v12065_v22, %v3147_v32  ;;  %v3149_v20 = vpop.f32.mrb[111].mxu1  ;;  %v14233_v32 = vld [vmem:[#allocation13_spill] sm:$0xff] }
 0x366   :  { %v12524_v26 = vadd.f32 %v12069_v51, %v3149_v20  ;;  %v5002_v57 = vrot.slane %v14233_v32, 2  ;;  %v4830_v51 = vld [vmem:[%s13671_s0 + $0x8] sm:$0xc]  ;;  %v9963_v32 = vld [vmem:[%s13671_s0 + $0x20] ss:$12 sps:$4 sm:$0xff]  }
 0x368   :  { %v5003_v20 = vsel %vm1314_vm0, %v4996_v0, %v5002_v57 }
 0x36a   :  { %v3153_v11 = vpop.f32.mrb[112].mxu1 }
 0x36b   :  { %v12529_v44 = vadd.f32 %v12081_v55, %v3153_v11  ;;  %v3155_v54 = vpop.f32.mrb[113].mxu1 }
 0x36c   :  { %5530 = vmatmul.mubr.bf16.gmra.mrb[160].mxu0 %v4997_v33  ;;  %v12532_v19 = vadd.f32 %v12085_v63, %v3155_v54  ;;  %v3157_v22 = vpop.f32.mrb[114].mxu1  ;;  %v9962_v63 = vld [vmem:[%s13671_s0 + $0x14] sm:$0xf] }
 0x36d   :  { %5539 = vmatprep.mubr.bf16.mxu0 %v5005_v36  ;;  %v12539_v46 = vadd.f32 %v12090_v4, %v3157_v22  ;;  %v3159_v42 = vpop.f32.mrb[115].mxu1  ;;  %v8028_v2 = vcombine.low %v4830_v51, %v9962_v63  ;;  %v4886_v51 = vrot.slane %v9963_v32, 2  ;;  %v14237_v32 = vld [vmem:[#allocation16_spill] sm:$0xff] }
 0x36e   :  { %v12542_v55 = vadd.f32 %v12097_v17, %v3159_v42  ;;  %v14234_v17 = vmov 0  }
 0x36f   :  { %v4885_v54 = vrot.slane %v8028_v2, 2 }
 0x371   :  { %v4887_v63 = vsel %vm1314_vm0, %v4885_v54, %v4886_v51 }
 0x372   :  { %v3163_v33 = vpop.f32.mrb[116].mxu1 }
 0x373   :  { %v12549_v36 = vadd.f32 %v12104_v25, %v3163_v33  ;;  %v3165_v11 = vpop.f32.mrb[117].mxu1  ;;  %v14235_v25 = vld [vmem:[#allocation15_spill] sm:$0xff] }
 0x374   :  { %5540 = vmatmul.mubr.bf16.gmra.mrb[164].mxu0 %v5003_v20  ;;  %v12552_v4 = vadd.f32 %v12108_v49, %v3165_v11  ;;  %v3167_v22 = vpop.f32.mrb[118].mxu1 }
 0x375   :  { %5582 = vmatprep.mubr.bf16.mxu0 %v14234_v17  ;;  %v12559_v0 = vadd.f32 %v12115_v38, %v3167_v22  ;;  %v3169_v57 = vpop.f32.mrb[119].mxu1  ;;  %v9964_v38 = vld [vmem:[%s13671_s0 + $0x38] ss:$12 sps:$4 sm:$0xff]  }
 0x376   :  { %v12562_v42 = vadd.f32 %v14235_v25, %v3169_v57  ;;  %v4892_v22 = vrot.slane %v9964_v38, 2 }
 0x378   :  { %v4893_v25 = vsel %vm1314_vm0, %v4886_v51, %v4892_v22 }
 0x37a   :  { %v3173_v2 = vpop.f32.mrb[120].mxu1 }
 0x37b   :  { %v12566_v49 = vadd.f32 %v12129_v24, %v3173_v2  ;;  %v3175_v20 = vpop.f32.mrb[121].mxu1 }
 0x37c   :  { %8068 = vmatmul.mubr.msk.bf16.vlgmr.msra.gmra.mrb[84].mxu0 %vm1250_vm1, %v4887_v63  ;;  %v12570_v33 = vadd.f32 %v12132_v18, %v3175_v20  ;;  %v3177_v11 = vpop.f32.mrb[122].mxu1  ;;  %v14240_v20 = vld [vmem:[#allocation17_spill] sm:$0xff] }
 0x37d   :  { %5592 = vmatprep.mubr.bf16.mxu0 %v14234_v17  ;;  %v12577_v54 = vadd.f32 %v14237_v32, %v3177_v11  ;;  %v3179_v57 = vpop.f32.mrb[123].mxu1  ;;  %v14242_v32 = vld [vmem:[#allocation19_spill] sm:$0xff] }
 0x37e   :  { %14236 = vst [vmem:[#allocation47_spill] sm:$0xff] %v12570_v33  ;;  %v12580_v24 = vadd.f32 %v12146_v23, %v3179_v57  ;;  %v9965_v23 = vld [vmem:[%s13671_s0 + $0x50] ss:$12 sps:$4 sm:$0xff]  }
 0x37f   :  { %v4898_v11 = vrot.slane %v9965_v23, 2 }
 0x380   :  { %14238 = vst [vmem:[#allocation48_spill] sm:$0xff] %v12580_v24 }
 0x382   :  { %v3183_v63 = vpop.f32.mrb[124].mxu1 }
 0x383   :  { %v12584_v18 = vadd.f32 %v12153_v1, %v3183_v63  ;;  %v3185_v2 = vpop.f32.mrb[125].mxu1 }
 0x384   :  { %8069 = vmatmul.mubr.msk.bf16.gmra.mrb[88].mxu0 %vm1250_vm1, %v4893_v25  ;;  %v12588_v33 = vadd.f32 %v14240_v20, %v3185_v2  ;;  %v3187_v38 = vpop.f32.mrb[126].mxu1  ;;  %v4899_v25 = vsel %vm1314_vm0, %v4892_v22, %v4898_v11  ;;  %v14244_v2 = vld [vmem:[#allocation12_spill] sm:$0xff] }
 0x385   :  { %14239 = vst [vmem:[#allocation49_spill] sm:$0xff] %v12584_v18  ;;  %5602 = vmatprep.mubr.bf16.mxu0 %v14234_v17  ;;  %v12595_v51 = vadd.f32 %v14242_v32, %v3187_v38  ;;  %v3189_v57 = vpop.f32.mrb[127].mxu1  ;;  %v14246_v18 = vld [vmem:[#allocation18_spill] sm:$0xff]  ;;  %v14248_v32 = vld [vmem:[#allocation20_spill] sm:$0xff] }
 0x386   :  { %14241 = vst [vmem:[#allocation51_spill] sm:$0xff] %v12588_v33  ;;  %v12598_v1 = vadd.f32 %v12171_v6, %v3189_v57  ;;  %v9966_v6 = vld [vmem:[%s13671_s0 + $0x68] ss:$12 sps:$4 sm:$0xff]  }
 0x387   :  { %v4904_v38 = vrot.slane %v9966_v6, 2 }
 0x388   :  { %14243 = vst [vmem:[#allocation52_spill] sm:$0xff] %v12598_v1 }
 0x38a   :  { %v3193_v63 = vpop.f32.mrb[128].mxu1 }
 0x38b   :  { %v12602_v20 = vadd.f32 %v14244_v2, %v3193_v63  ;;  %v3195_v33 = vpop.f32.mrb[129].mxu1 }
 0x38c   :  { %8070 = vmatmul.mubr.msk.bf16.gmra.mrb[92].mxu0 %vm1250_vm1, %v4899_v25  ;;  %v12606_v24 = vadd.f32 %v14246_v18, %v3195_v33  ;;  %v3197_v23 = vpop.f32.mrb[130].mxu1  ;;  %v4905_v25 = vsel %vm1314_vm0, %v4898_v11, %v4904_v38  ;;  %v14249_v33 = vld [vmem:[#allocation22_spill] sm:$0xff] }
 0x38d   :  { %14245 = vst [vmem:[#allocation53_spill] sm:$0xff] %v12602_v20  ;;  %5612 = vmatprep.mubr.bf16.mxu0 %v14234_v17  ;;  %v12613_v22 = vadd.f32 %v14248_v32, %v3197_v23  ;;  %v3199_v57 = vpop.f32.mrb[131].mxu1  ;;  %v14251_v20 = vld [vmem:[#allocation24_spill] sm:$0xff]  ;;  %v14253_v32 = vld [vmem:[#allocation25_spill] sm:$0xff] }
 0x38e   :  { %14247 = vst [vmem:[#allocation54_spill] sm:$0xff] %v12606_v24  ;;  %v12616_v63 = vadd.f32 %v12196_v8, %v3199_v57  ;;  %v9967_v8 = vld [vmem:[%s13671_s0 + $0x80] ss:$12 sps:$4 sm:$0xff]  }
 0x38f   :  { %v4910_v23 = vrot.slane %v9967_v8, 2 }
 0x392   :  { %v3203_v2 = vpop.f32.mrb[132].mxu1 }
 0x393   :  { %v12620_v18 = vadd.f32 %v14249_v33, %v3203_v2  ;;  %v3205_v24 = vpop.f32.mrb[133].mxu1 }
 0x394   :  { %8071 = vmatmul.mubr.msk.bf16.gmra.mrb[96].mxu0 %vm1250_vm1, %v4905_v25  ;;  %v12624_v1 = vadd.f32 %v14251_v20, %v3205_v24  ;;  %v3207_v6 = vpop.f32.mrb[134].mxu1  ;;  %v4911_v25 = vsel %vm1314_vm0, %v4904_v38, %v4910_v23 }
 0x395   :  { %14250 = vst [vmem:[#allocation56_spill] sm:$0xff] %v12620_v18  ;;  %5622 = vmatprep.mubr.bf16.mxu0 %v14234_v17  ;;  %v12631_v11 = vadd.f32 %v14253_v32, %v3207_v6  ;;  %v3209_v57 = vpop.f32.mrb[135].mxu1  ;;  %v14256_v32 = vld [vmem:[#allocation88_spill] sm:$0xff] }
 0x396   :  { %14252 = vst [vmem:[#allocation57_spill] sm:$0xff] %v12624_v1  ;;  %v12634_v2 = vadd.f32 %v12220_v15, %v3209_v57  ;;  %v14254_v1 = vld [vmem:[#allocation84_spill] sm:$0xff] }
 0x397   :  { %v9968_v15 = vld [vmem:[%s13671_s0 + $0x98] ss:$12 sps:$4 sm:$0xff]  }
 0x398   :  { %v4916_v6 = vrot.slane %v9968_v15, 2 }
 0x39a   :  { %v3213_v33 = vpop.f32.mrb[136].mxu1 }
 0x39b   :  { %v12638_v24 = vadd.f32 %v12227_v62, %v3213_v33  ;;  %v3215_v20 = vpop.f32.mrb[137].mxu1 }
 0x39c   :  { %8072 = vmatmul.mubr.msk.bf16.gmra.mrb[100].mxu0 %vm1250_vm1, %v4911_v25  ;;  %v12642_v18 = vadd.f32 %v14254_v1, %v3215_v20  ;;  %v3217_v8 = vpop.f32.mrb[138].mxu1  ;;  %v4917_v25 = vsel %vm1314_vm0, %v4910_v23, %v4916_v6 }
 0x39d   :  { %5632 = vmatprep.mubr.bf16.mxu0 %v14234_v17  ;;  %v12649_v38 = vadd.f32 %v14256_v32, %v3217_v8  ;;  %v3219_v57 = vpop.f32.mrb[139].mxu1  ;;  %v14260_v32 = vld [vmem:[#allocation30_spill] sm:$0xff] }
 0x39e   :  { %14255 = vst [vmem:[#allocation58_spill] sm:$0xff] %v12642_v18  ;;  %v12652_v62 = vadd.f32 %v12244_v14, %v3219_v57  ;;  %v9969_v14 = vld [vmem:[%s13671_s0 + $0xb0] ss:$12 sps:$4 sm:$0xff]  }
 0x39f   :  { %v4922_v8 = vrot.slane %v9969_v14, 2 }
 0x3a0   :  { %14257 = vst [vmem:[#allocation59_spill] sm:$0xff] %v12652_v62 }
 0x3a2   :  { %v3223_v33 = vpop.f32.mrb[140].mxu1 }
 0x3a3   :  { %v12656_v1 = vadd.f32 %v12250_v28, %v3223_v33  ;;  %v3225_v20 = vpop.f32.mrb[141].mxu1 }
 0x3a4   :  { %8073 = vmatmul.mubr.msk.bf16.gmra.mrb[104].mxu0 %vm1250_vm1, %v4917_v25  ;;  %v12660_v18 = vadd.f32 %v12253_v61, %v3225_v20  ;;  %v3227_v15 = vpop.f32.mrb[142].mxu1  ;;  %v4923_v25 = vsel %vm1314_vm0, %v4916_v6, %v4922_v8  ;;  %v14263_v61 = vld [vmem:[#allocation35_spill] sm:$0xff] }
 0x3a5   :  { %14258 = vst [vmem:[#allocation60_spill] sm:$0xff] %v12656_v1  ;;  %5642 = vmatprep.mubr.bf16.mxu0 %v14234_v17  ;;  %v12667_v23 = vadd.f32 %v14260_v32, %v3227_v15  ;;  %v3229_v57 = vpop.f32.mrb[143].mxu1  ;;  %v14265_v1 = vld [vmem:[#allocation40_spill] sm:$0xff]  ;;  %v14267_v32 = vld [vmem:[#allocation45_spill] sm:$0xff] }
 0x3a6   :  { %14259 = vst [vmem:[#allocation61_spill] sm:$0xff] %v12660_v18  ;;  %v12670_v28 = vadd.f32 %v12266_v50, %v3229_v57  ;;  %v9970_v50 = vld [vmem:[%s13671_s0 + $0xc8] ss:$12 sps:$4 sm:$0xff]  }
 0x3a7   :  { %14261 = vst [vmem:[#allocation62_spill] sm:$0xff] %v12667_v23  ;;  %v4928_v15 = vrot.slane %v9970_v50, 2 }
 0x3a8   :  { %14262 = vst [vmem:[#allocation63_spill] sm:$0xff] %v12670_v28  ;;  %v14273_v28 = vld [vmem:[#allocation26_spill] sm:$0xff] }
 0x3aa   :  { %v3233_v33 = vpop.f32.mrb[144].mxu1 }
 0x3ab   :  { %v12674_v20 = vadd.f32 %v14263_v61, %v3233_v33  ;;  %v3235_v18 = vpop.f32.mrb[145].mxu1  ;;  %v14269_v33 = vld [vmem:[#allocation50_spill] sm:$0xff] }
 0x3ac   :  { %8074 = vmatmul.mubr.msk.bf16.gmra.mrb[108].mxu0 %vm1250_vm1, %v4923_v25  ;;  %v12678_v62 = vadd.f32 %v14265_v1, %v3235_v18  ;;  %v3237_v14 = vpop.f32.mrb[146].mxu1  ;;  %v4929_v25 = vsel %vm1314_vm0, %v4922_v8, %v4928_v15  ;;  %v14271_v18 = vld [vmem:[#allocation55_spill] sm:$0xff] }
 0x3ad   :  { %14264 = vst [vmem:[#allocation64_spill] sm:$0xff] %v12674_v20  ;;  %5652 = vmatprep.mubr.bf16.mxu0 %v14234_v17  ;;  %v12685_v6 = vadd.f32 %v14267_v32, %v3237_v14  ;;  %v3239_v57 = vpop.f32.mrb[147].mxu1  ;;  %v9971_v14 = vld [vmem:[%s13671_s0 + $0xe0] ss:$12 sps:$4 sm:$0xff]  }
 0x3ae   :  { %14266 = vst [vmem:[#allocation65_spill] sm:$0xff] %v12678_v62  ;;  %v12688_v61 = vadd.f32 %v14269_v33, %v3239_v57  ;;  %v4934_v32 = vrot.slane %v9971_v14, 2  ;;  %v14275_v57 = vld [vmem:[#allocation27_spill] sm:$0xff] }
 0x3af   :  { %14268 = vst [vmem:[#allocation66_spill] sm:$0xff] %v12685_v6 }
 0x3b0   :  { %14270 = vst [vmem:[#allocation67_spill] sm:$0xff] %v12688_v61  ;;  %v14281_v61 = vld [vmem:[#allocation31_spill] sm:$0xff] }
 0x3b2   :  { %v3243_v20 = vpop.f32.mrb[148].mxu1 }
 0x3b3   :  { %v12692_v1 = vadd.f32 %v14271_v18, %v3243_v20  ;;  %v3245_v62 = vpop.f32.mrb[149].mxu1  ;;  %v14277_v20 = vld [vmem:[#allocation28_spill] sm:$0xff] }
 0x3b4   :  { %8075 = vmatmul.mubr.msk.bf16.gmra.mrb[112].mxu0 %vm1250_vm1, %v4929_v25  ;;  %v12696_v23 = vadd.f32 %v14273_v28, %v3245_v62  ;;  %v3247_v50 = vpop.f32.mrb[150].mxu1  ;;  %v4935_v25 = vsel %vm1314_vm0, %v4928_v15, %v4934_v32  ;;  %v14279_v62 = vld [vmem:[#allocation29_spill] sm:$0xff] }
 0x3b5   :  { %14272 = vst [vmem:[#allocation68_spill] sm:$0xff] %v12692_v1  ;;  %5662 = vmatprep.mubr.bf16.mxu0 %v14234_v17  ;;  %v12703_v8 = vadd.f32 %v14275_v57, %v3247_v50  ;;  %v3249_v33 = vpop.f32.mrb[151].mxu1  ;;  %v9972_v50 = vld [vmem:[%s13671_s0 + $0xf8] ss:$12 sps:$4 sm:$0xff]  }
 0x3b6   :  { %14274 = vst [vmem:[#allocation69_spill] sm:$0xff] %v12696_v23  ;;  %v12706_v18 = vadd.f32 %v14277_v20, %v3249_v33  ;;  %v4940_v57 = vrot.slane %v9972_v50, 2  ;;  %v14283_v33 = vld [vmem:[#allocation32_spill] sm:$0xff] }
 0x3b7   :  { %14276 = vst [vmem:[#allocation70_spill] sm:$0xff] %v12703_v8 }
 0x3b8   :  { %14278 = vst [vmem:[#allocation71_spill] sm:$0xff] %v12706_v18  ;;  %v14289_v18 = vld [vmem:[#allocation36_spill] sm:$0xff] }
 0x3ba   :  { %v3253_v1 = vpop.f32.mrb[152].mxu1 }
 0x3bb   :  { %v12710_v28 = vadd.f32 %v14279_v62, %v3253_v1  ;;  %v3255_v23 = vpop.f32.mrb[153].mxu1  ;;  %v14285_v1 = vld [vmem:[#allocation33_spill] sm:$0xff] }
 0x3bc   :  { %8076 = vmatmul.mubr.msk.bf16.gmra.mrb[116].mxu0 %vm1250_vm1, %v4935_v25  ;;  %v12714_v6 = vadd.f32 %v14281_v61, %v3255_v23  ;;  %v3257_v14 = vpop.f32.mrb[154].mxu1  ;;  %v4941_v25 = vsel %vm1314_vm0, %v4934_v32, %v4940_v57  ;;  %v14287_v23 = vld [vmem:[#allocation34_spill] sm:$0xff] }
 0x3bd   :  { %14280 = vst [vmem:[#allocation72_spill] sm:$0xff] %v12710_v28  ;;  %5672 = vmatprep.mubr.bf16.mxu0 %v14234_v17  ;;  %v12721_v15 = vadd.f32 %v14283_v33, %v3257_v14  ;;  %v3259_v20 = vpop.f32.mrb[155].mxu1  ;;  %v9973_v14 = vld [vmem:[%s13671_s0 + $0x110] ss:$12 sps:$4 sm:$0xff]  }
 0x3be   :  { %14282 = vst [vmem:[#allocation73_spill] sm:$0xff] %v12714_v6  ;;  %v12724_v62 = vadd.f32 %v14285_v1, %v3259_v20  ;;  %v4946_v33 = vrot.slane %v9973_v14, 2  ;;  %v14291_v20 = vld [vmem:[#allocation37_spill] sm:$0xff] }
 0x3bf   :  { %14284 = vst [vmem:[#allocation74_spill] sm:$0xff] %v12721_v15 }
 0x3c0   :  { %14286 = vst [vmem:[#allocation75_spill] sm:$0xff] %v12724_v62  ;;  %v14297_v62 = vld [vmem:[#allocation41_spill] sm:$0xff] }
 0x3c2   :  { %v3263_v28 = vpop.f32.mrb[156].mxu1 }
 0x3c3   :  { %v12728_v61 = vadd.f32 %v14287_v23, %v3263_v28  ;;  %v3265_v6 = vpop.f32.mrb[157].mxu1  ;;  %v14293_v28 = vld [vmem:[#allocation38_spill] sm:$0xff] }
 0x3c4   :  { %8077 = vmatmul.mubr.msk.bf16.gmra.mrb[120].mxu0 %vm1250_vm1, %v4941_v25  ;;  %v12732_v8 = vadd.f32 %v14289_v18, %v3265_v6  ;;  %v3267_v50 = vpop.f32.mrb[158].mxu1  ;;  %v4947_v25 = vsel %vm1314_vm0, %v4940_v57, %v4946_v33  ;;  %v14295_v6 = vld [vmem:[#allocation39_spill] sm:$0xff] }
 0x3c5   :  { %14288 = vst [vmem:[#allocation76_spill] sm:$0xff] %v12728_v61  ;;  %5682 = vmatprep.mubr.bf16.mxu0 %v14234_v17  ;;  %v12739_v32 = vadd.f32 %v14291_v20, %v3267_v50  ;;  %v3269_v1 = vpop.f32.mrb[159].mxu1  ;;  %v9974_v50 = vld [vmem:[%s13671_s0 + $0x128] ss:$12 sps:$4 sm:$0xff]  }
 0x3c6   :  { %14290 = vst [vmem:[#allocation77_spill] sm:$0xff] %v12732_v8  ;;  %v12742_v23 = vadd.f32 %v14293_v28, %v3269_v1  ;;  %v4952_v20 = vrot.slane %v9974_v50, 2  ;;  %v14299_v1 = vld [vmem:[#allocation42_spill] sm:$0xff] }
 0x3c7   :  { %14292 = vst [vmem:[#allocation78_spill] sm:$0xff] %v12739_v32 }
 0x3c8   :  { %14294 = vst [vmem:[#allocation79_spill] sm:$0xff] %v12742_v23 }
 0x3ca   :  { %v3273_v61 = vpop.f32.mrb[160].mxu1 }
 0x3cb   :  { %v12746_v18 = vadd.f32 %v14295_v6, %v3273_v61  ;;  %v3275_v8 = vpop.f32.mrb[161].mxu1 }
 0x3cc   :  { %8078 = vmatmul.mubr.msk.bf16.gmra.mrb[124].mxu0 %vm1250_vm1, %v4947_v25  ;;  %v12750_v15 = vadd.f32 %v14297_v62, %v3275_v8  ;;  %v3277_v14 = vpop.f32.mrb[162].mxu1  ;;  %v4953_v25 = vsel %vm1314_vm0, %v4946_v33, %v4952_v20  ;;  %v14302_v8 = vld [vmem:[#allocation43_spill] sm:$0xff] }
 0x3cd   :  { %14296 = vst [vmem:[#allocation14_spill] sm:$0xff] %v12746_v18  ;;  %5692 = vmatprep.mubr.bf16.mxu0 %v14234_v17  ;;  %v12757_v57 = vadd.f32 %v14299_v1, %v3277_v14  ;;  %v3279_v28 = vpop.f32.mrb[163].mxu1  ;;  %v14304_v18 = vld [vmem:[#allocation44_spill] sm:$0xff] }
 0x3ce   :  { %14298 = vst [vmem:[#allocation80_spill] sm:$0xff] %v12750_v15  ;;  %v12760_v61 = vadd.f32 %v12366_v3, %v3279_v28  ;;  %v9975_v3 = vld [vmem:[%s13671_s0 + $0x140] ss:$12 sps:$4 sm:$0xff]  }
 0x3cf   :  { %14300 = vst [vmem:[#allocation81_spill] sm:$0xff] %v12757_v57  ;;  %v4958_v14 = vrot.slane %v9975_v3, 2 }
 0x3d0   :  { %14301 = vst [vmem:[#allocation82_spill] sm:$0xff] %v12760_v61 }
 0x3d2   :  { %v3283_v6 = vpop.f32.mrb[164].mxu1 }
 0x3d3   :  { %v12764_v62 = vadd.f32 %v14302_v8, %v3283_v6  ;;  %v3285_v15 = vpop.f32.mrb[165].mxu1  ;;  %v9978_v8 = vld [vmem:[%s13671_s0 + $0x188] ss:$12 sps:$4 sm:$0xff]  }
 0x3d4   :  { %8079 = vmatmul.mubr.msk.bf16.gmra.mrb[128].mxu0 %vm1250_vm1, %v4953_v25  ;;  %v12768_v23 = vadd.f32 %v14304_v18, %v3285_v15  ;;  %v3287_v50 = vpop.f32.mrb[166].mxu1  ;;  %v4959_v25 = vsel %vm1314_vm0, %v4952_v20, %v4958_v14  ;;  %v9976_v15 = vld [vmem:[%s13671_s0 + $0x158] ss:$12 sps:$4 sm:$0xff]  }
 0x3d5   :  { %14303 = vst [vmem:[#allocation83_spill] sm:$0xff] %v12764_v62  ;;  %5702 = vmatprep.mubr.bf16.mxu0 %v14234_v17  ;;  %v12775_v33 = vadd.f32 %v12380_v7, %v3287_v50  ;;  %v3289_v1 = vpop.f32.mrb[167].mxu1  ;;  %v4964_v18 = vrot.slane %v9976_v15, 2  ;;  %v4976_v50 = vrot.slane %v9978_v8, 2  ;;  %v9980_v15 = vld [vmem:[%s13671_s0 + $0x1b8] ss:$12 sps:$4 sm:$0xff]  }
 0x3d6   :  { %14305 = vst [vmem:[#allocation21_spill] sm:$0xff] %v12768_v23  ;;  %v12778_v28 = vadd.f32 %v12386_v37, %v3289_v1  ;;  %v9977_v37 = vld [vmem:[%s13671_s0 + $0x170] ss:$12 sps:$4 sm:$0xff]   ;;  %v9982_v8 = vld [vmem:[%s13671_s0 + $0x1e8] ss:$12 sps:$4 sm:$0xff]  }
 0x3d7   :  { %14306 = vst [vmem:[#allocation85_spill] sm:$0xff] %v12775_v33  ;;  %v4965_v6 = vsel %vm1314_vm0, %v4958_v14, %v4964_v18  ;;  %v4970_v7 = vrot.slane %v9977_v37, 2  ;;  %v9979_v14 = vld [vmem:[%s13671_s0 + $0x1a0] ss:$12 sps:$4 sm:$0xff]   ;;  %v9981_v37 = vld [vmem:[%s13671_s0 + $0x1d0] ss:$12 sps:$4 sm:$0xff]  }
 0x3d8   :  { %14307 = vst [vmem:[#allocation86_spill] sm:$0xff] %v12778_v28  ;;  %v4982_v1 = vrot.slane %v9979_v14, 2  ;;  %v9983_v14 = vld [vmem:[%s13671_s0 + $0x200] ss:$0 sps:$4 sm:$0x33]  }
 0x3d9   :  { %v4971_v20 = vsel %vm1314_vm0, %v4964_v18, %v4970_v7  ;;  %v4977_v3 = vsel %vm1314_vm0, %v4970_v7, %v4976_v50  ;;  %v4988_v18 = vrot.slane %v9980_v15, 2  ;;  %v4994_v7 = vrot.slane %v9981_v37, 2  ;;  %v5877_v37 = vld [vmem:[%s13673_s2] sm:$0x3]  ;;  %s10063_s2 = smov [#allocation7]  }
 0x3da   :  { %v5879_v15 = vlaneseq }
 0x3dc   :  { %8080 = vmatmul.mubr.msk.bf16.gmra.mrb[132].mxu0 %vm1250_vm1, %v4959_v25  ;;  %v4983_v25 = vsel %vm1314_vm0, %v4976_v50, %v4982_v1  ;;  %v5000_v50 = vrot.slane %v9982_v8, 2 }
 0x3dd   :  { %5712 = vmatprep.mubr.bf16.mxu0 %v14234_v17 }
 0x3e4   :  { %8081 = vmatmul.mubr.msk.bf16.gmra.mrb[136].mxu0 %vm1250_vm1, %v4965_v6  ;;  %v4989_v6 = vsel %vm1314_vm0, %v4982_v1, %v4988_v18  ;;  %v5006_v1 = vrot.slane %v9983_v14, 2 }
 0x3e5   :  { %5722 = vmatprep.mubr.bf16.mxu0 %v14234_v17 }
 0x3ec   :  { %8082 = vmatmul.mubr.msk.bf16.gmra.mrb[140].mxu0 %vm1250_vm1, %v4971_v20  ;;  %v4995_v20 = vsel %vm1314_vm0, %v4988_v18, %v4994_v7  ;;  %v5880_v18 = vshrl.u32 %v5879_v15, 7 }
 0x3ed   :  { %5732 = vmatprep.mubr.bf16.mxu0 %v14234_v17 }
 0x3f4   :  { %8083 = vmatmul.mubr.msk.bf16.gmra.mrb[144].mxu0 %vm1250_vm1, %v4977_v3  ;;  %v5001_v3 = vsel %vm1314_vm0, %v4994_v7, %v5000_v50  ;;  %v5885_v7 = vsub.s32 1, %v5880_v18 }
 0x3f5   :  { %5742 = vmatprep.mubr.bf16.mxu0 %v14234_v17 }
 0x3f6   :  { %v12838_v14 = vrot.slane %v5877_v37, %v5885_v7 }
 0x3fc   :  { %8084 = vmatmul.mubr.msk.bf16.gmra.mrb[148].mxu0 %vm1250_vm1, %v4983_v25  ;;  %v5007_v25 = vsel %vm1314_vm0, %v5000_v50, %v5006_v1 }
 0x3fd   :  { %5752 = vmatprep.mubr.bf16.mxu0 %v14234_v17 }
 0x404   :  { %8085 = vmatmul.mubr.msk.bf16.gmra.mrb[152].mxu0 %vm1250_vm1, %v4989_v6  ;;  %v5881_v6 = vsub.s32 0, %v5880_v18 }
 0x405   :  { %5762 = vmatprep.mubr.bf16.mxu0 %v14234_v17 }
 0x406   :  { %v12836_v8 = vrot.slane %v5877_v37, %v5881_v6 }
 0x40c   :  { %8086 = vmatmul.mubr.msk.bf16.gmra.mrb[156].mxu0 %vm1250_vm1, %v4995_v20  ;;  %v5973_v20 = vld [vmem:[%s13674_s3] sm:$0x3]  ;;  %s7701_s3 = sshll.u32 %s10063_s2, 4  ;;  %s7702_s3 = int_to_ptr.vmem [resolvable:$true] %s7701_s3 }
 0x40d   :  { %5772 = vmatprep.mubr.bf16.mxu0 %v14234_v17  ;;  %v12841_v1 = vrot.slane %v5973_v20, %v5881_v6  ;;  %v12844_v28 = vrot.slane %v5973_v20, %v5885_v7  ;;  %s10030_s9 = scalar_lea.vmem %s7702_s3, 256  ;;  %p10035_p3 = scmp.lt.s32.totalorder %s7702_s3, %s7702_s3 }
 0x40e   :  { %p10031_p2 = scmp.ne.s32.totalorder %s7702_s3, %s10030_s9  ;;  %p10036_p4 = scmp.lt.s32.totalorder %s10030_s9, %s10030_s9 }
 0x410   :  { %p10037_p5 = por %p10036_p4, %p10035_p3 }
 0x412   :  { %p10038_p6 = pnand %p10037_p5, %p10031_p2 }
 0x414   :  { %8087 = vmatmul.mubr.msk.bf16.gmra.mrb[160].mxu0 %vm1250_vm1, %v5001_v3 }
 0x415   :  { %5782 = vmatprep.mubr.bf16.mxu0 %v14234_v17 }
 0x41c   :  { %8088 = vmatmul.mubr.msk.bf16.gmra.mrb[164].mxu0 %vm1250_vm1, %v5007_v25 }
 0x44f   :  { %v5584_v3 = vpop.f32.mrb[84].mxu0 }
 0x450   :  { %v8514_v50 = vadd.f32 %v12391_v58, %v5584_v3  ;;  %v5586_v25 = vpop.f32.mrb[85].mxu0 }
 0x451   :  { %v8517_v15 = vadd.f32 %v12394_v39, %v5586_v25  ;;  %v5588_v33 = vpop.f32.mrb[86].mxu0 }
 0x452   :  { %v5889_v18 = vmul.f32 %v8514_v50, %v12836_v8  ;;  %v8520_v23 = vadd.f32 %v12400_v48, %v5588_v33  ;;  %v5590_v62 = vpop.f32.mrb[87].mxu0 }
 0x453   :  { %v5890_v61 = vmul.f32 %v8517_v15, %v12838_v14  ;;  %v8523_v37 = vadd.f32 %v12406_v60, %v5590_v62 }
 0x454   :  { %v5985_v57 = vadd.f32 %v12841_v1, %v5889_v18  ;;  %v5891_v58 = vmul.f32 %v8520_v23, %v12836_v8  ;;  %v9668_v23 = vld [vmem:[#allocation5 + $0x4] ss:$8 sps:$4 sm:$0xff]  }
 0x455   :  { %v5986_v6 = vadd.f32 %v12844_v28, %v5890_v61  ;;  %v5892_v39 = vmul.f32 %v8523_v37, %v12838_v14 }
 0x456   :  { %v5987_v7 = vadd.f32 %v12841_v1, %v5891_v58  ;;  %v6069_v50 = vmax.f32 %v5985_v57, 0.0 }
 0x457   :  { %v5988_v20 = vadd.f32 %v12844_v28, %v5892_v39  ;;  %v5594_v3 = vpop.f32.mrb[88].mxu0  ;;  %v6070_v15 = vmax.f32 %v5986_v6, 0.0  ;;  %v9666_v39 = vld [vmem:[#allocation5] ss:$8 sps:$4 sm:$0xff]  }
 0x458   :  { %v6071_v48 = vmax.f32 %v5987_v7, 0.0  ;;  %v8526_v33 = vadd.f32 %v12411_v59, %v5594_v3  ;;  %v5596_v25 = vpop.f32.mrb[89].mxu0 }
 0x459   :  { %v6072_v60 = vmax.f32 %v5988_v20, 0.0  ;;  %v8529_v62 = vadd.f32 %v12414_v5, %v5596_v25  ;;  %v5598_v18 = vpop.f32.mrb[90].mxu0 }
 0x45a   :  { %v12858_v32 = vpack.c.bf16 %v6071_v48, %v6069_v50  ;;  %v5893_v61 = vmul.f32 %v8526_v33, %v12836_v8  ;;  %v8532_v37 = vadd.f32 %v12420_v21, %v5598_v18  ;;  %v5600_v58 = vpop.f32.mrb[91].mxu0  ;;  %v9716_v21 = vld [vmem:[%s13676_s5 + $0x4] ss:$12 sps:$4 sm:$0xff]  }
 0x45b   :  { %v12862_v17 = vpack.c.bf16 %v6072_v60, %v6070_v15  ;;  %v5894_v57 = vmul.f32 %v8529_v62, %v12838_v14  ;;  %v8535_v59 = vadd.f32 %v12426_v27, %v5600_v58  ;;  %6544 = vmatprep.mubr.bf16.mxu1 %v9716_v21  ;;  %v9671_v58 = vld [vmem:[#allocation5 + $0x14] ss:$8 sps:$4 sm:$0xff]  }
 0x45c   :  { %v5989_v6 = vadd.f32 %v12841_v1, %v5893_v61  ;;  %v5895_v5 = vmul.f32 %v8532_v37, %v12836_v8  ;;  %v6451_v48 = vmul.bf16 %v9666_v39, %v12858_v32 }
 0x45d   :  { %v5990_v7 = vadd.f32 %v12844_v28, %v5894_v57  ;;  %v5896_v20 = vmul.f32 %v8535_v59, %v12838_v14  ;;  %v6452_v3 = vmul.bf16 %v9668_v23, %v12862_v17 }
 0x45e   :  { %v5991_v50 = vadd.f32 %v12841_v1, %v5895_v5  ;;  %v6073_v25 = vmax.f32 %v5989_v6, 0.0 }
 0x45f   :  { %v5992_v27 = vadd.f32 %v12844_v28, %v5896_v20  ;;  %v5604_v33 = vpop.f32.mrb[92].mxu0  ;;  %6512 = vmatprep.subr.bf16.mxu1 %v6452_v3  ;;  %v6074_v18 = vmax.f32 %v5990_v7, 0.0  ;;  %v9669_v20 = vld [vmem:[#allocation5 + $0x10] ss:$8 sps:$4 sm:$0xff]  }
 0x460   :  { %v6075_v15 = vmax.f32 %v5991_v50, 0.0  ;;  %v8538_v60 = vadd.f32 %v12431_v31, %v5604_v33  ;;  %v5606_v62 = vpop.f32.mrb[93].mxu0  ;;  %6513 = vmatpush1.bf16.msra.mxu1 %v6451_v48 }
 0x461   :  { %v6076_v23 = vmax.f32 %v5992_v27, 0.0  ;;  %v8541_v61 = vadd.f32 %v12434_v10, %v5606_v62  ;;  %v5608_v37 = vpop.f32.mrb[94].mxu0 }
 0x462   :  { %v12879_v57 = vpack.c.bf16 %v6075_v15, %v6073_v25  ;;  %v5897_v39 = vmul.f32 %v8538_v60, %v12836_v8  ;;  %v8544_v59 = vadd.f32 %v12440_v34, %v5608_v37  ;;  %v5610_v5 = vpop.f32.mrb[95].mxu0 }
 0x463   :  { %v12883_v6 = vpack.c.bf16 %v6076_v23, %v6074_v18  ;;  %v5898_v31 = vmul.f32 %v8541_v61, %v12838_v14  ;;  %v8547_v3 = vadd.f32 %v12446_v45, %v5610_v5 }
 0x464   :  { %v5993_v7 = vadd.f32 %v12841_v1, %v5897_v39  ;;  %v5899_v10 = vmul.f32 %v8544_v59, %v12836_v8  ;;  %v6453_v27 = vmul.bf16 %v9669_v20, %v12879_v57 }
 0x465   :  { %v5994_v21 = vadd.f32 %v12844_v28, %v5898_v31  ;;  %v5900_v50 = vmul.f32 %v8547_v3, %v12838_v14  ;;  %v6454_v48 = vmul.bf16 %v9671_v58, %v12883_v6  ;;  %v9674_v58 = vld [vmem:[#allocation5 + $0x24] ss:$8 sps:$4 sm:$0xff]   ;;  %v9672_v31 = vld [vmem:[#allocation5 + $0x20] ss:$8 sps:$4 sm:$0xff]  }
 0x466   :  { %v5995_v34 = vadd.f32 %v12841_v1, %v5899_v10  ;;  %v6077_v15 = vmax.f32 %v5993_v7, 0.0 }
 0x467   :  { %v5996_v33 = vadd.f32 %v12844_v28, %v5900_v50  ;;  %v5614_v25 = vpop.f32.mrb[96].mxu0  ;;  %6514 = vmatprep.subr.bf16.mxu1 %v6454_v48  ;;  %v6078_v18 = vmax.f32 %v5994_v21, 0.0 }
 0x468   :  { %v6079_v45 = vmax.f32 %v5995_v34, 0.0  ;;  %v8550_v60 = vadd.f32 %v12451_v53, %v5614_v25  ;;  %v5616_v62 = vpop.f32.mrb[97].mxu0  ;;  %6515 = vmatpush1.bf16.msra.mxu1 %v6453_v27 }
 0x469   :  { %v6080_v23 = vmax.f32 %v5996_v33, 0.0  ;;  %v8553_v61 = vadd.f32 %v12454_v29, %v5616_v62  ;;  %v5618_v37 = vpop.f32.mrb[98].mxu0 }
 0x46a   :  { %v12897_v39 = vpack.c.bf16 %v6079_v45, %v6077_v15  ;;  %v5901_v59 = vmul.f32 %v8550_v60, %v12836_v8  ;;  %v8556_v5 = vadd.f32 %v12460_v30, %v5618_v37  ;;  %v5620_v20 = vpop.f32.mrb[99].mxu0 }
 0x46b   :  { %v12901_v3 = vpack.c.bf16 %v6080_v23, %v6078_v18  ;;  %v5902_v53 = vmul.f32 %v8553_v61, %v12838_v14  ;;  %v8559_v7 = vadd.f32 %v12466_v40, %v5620_v20  ;;  %v9677_v61 = vld [vmem:[#allocation5 + $0x34] ss:$8 sps:$4 sm:$0xff]   ;;  %v9675_v20 = vld [vmem:[#allocation5 + $0x30] ss:$8 sps:$4 sm:$0xff]  }
 0x46c   :  { %v5997_v10 = vadd.f32 %v12841_v1, %v5901_v59  ;;  %v5903_v29 = vmul.f32 %v8556_v5, %v12836_v8  ;;  %v6455_v34 = vmul.bf16 %v9672_v31, %v12897_v39 }
 0x46d   :  { %v5998_v21 = vadd.f32 %v12844_v28, %v5902_v53  ;;  %v5904_v50 = vmul.f32 %v8559_v7, %v12838_v14  ;;  %v6456_v48 = vmul.bf16 %v9674_v58, %v12901_v3 }
 0x46e   :  { %v5999_v30 = vadd.f32 %v12841_v1, %v5903_v29  ;;  %v6081_v25 = vmax.f32 %v5997_v10, 0.0 }
 0x46f   :  { %v6000_v27 = vadd.f32 %v12844_v28, %v5904_v50  ;;  %v5624_v33 = vpop.f32.mrb[100].mxu0  ;;  %6516 = vmatprep.subr.bf16.mxu1 %v6456_v48  ;;  %v6082_v60 = vmax.f32 %v5998_v21, 0.0 }
 0x470   :  { %v6083_v40 = vmax.f32 %v5999_v30, 0.0  ;;  %v8562_v15 = vadd.f32 %v12471_v13, %v5624_v33  ;;  %v5626_v45 = vpop.f32.mrb[101].mxu0  ;;  %6517 = vmatpush1.bf16.msra.mxu1 %v6455_v34 }
 0x471   :  { %v6084_v62 = vmax.f32 %v6000_v27, 0.0  ;;  %v8565_v18 = vadd.f32 %v12474_v16, %v5626_v45  ;;  %v5628_v23 = vpop.f32.mrb[102].mxu0 }
 0x472   :  { %v12915_v37 = vpack.c.bf16 %v6083_v40, %v6081_v25  ;;  %v5905_v58 = vmul.f32 %v8562_v15, %v12836_v8  ;;  %v8568_v59 = vadd.f32 %v12480_v43, %v5628_v23  ;;  %v5630_v5 = vpop.f32.mrb[103].mxu0 }
 0x473   :  { %v12919_v31 = vpack.c.bf16 %v6084_v62, %v6082_v60  ;;  %v5906_v13 = vmul.f32 %v8565_v18, %v12838_v14  ;;  %v8571_v53 = vadd.f32 %v12486_v12, %v5630_v5  ;;  %v9680_v60 = vld [vmem:[#allocation5 + $0x44] ss:$8 sps:$4 sm:$0xff]   ;;  %v14308_v5 = vld [vmem:[#allocation46_spill] sm:$0xff] }
 0x474   :  { %v6001_v7 = vadd.f32 %v12841_v1, %v5905_v58  ;;  %v5907_v16 = vmul.f32 %v8568_v59, %v12836_v8  ;;  %v6457_v50 = vmul.bf16 %v9675_v20, %v12915_v37  ;;  %v9678_v58 = vld [vmem:[#allocation5 + $0x40] ss:$8 sps:$4 sm:$0xff]  }
 0x475   :  { %v6002_v10 = vadd.f32 %v12844_v28, %v5906_v13  ;;  %v5908_v29 = vmul.f32 %v8571_v53, %v12838_v14  ;;  %v6458_v21 = vmul.bf16 %v9677_v61, %v12919_v31 }
 0x476   :  { %v6003_v43 = vadd.f32 %v12841_v1, %v5907_v16  ;;  %v6085_v34 = vmax.f32 %v6001_v7, 0.0 }
 0x477   :  { %v6004_v48 = vadd.f32 %v12844_v28, %v5908_v29  ;;  %v5634_v30 = vpop.f32.mrb[104].mxu0  ;;  %6518 = vmatprep.subr.bf16.mxu1 %v6458_v21  ;;  %v6086_v25 = vmax.f32 %v6002_v10, 0.0 }
 0x478   :  { %v6087_v12 = vmax.f32 %v6003_v43, 0.0  ;;  %v8574_v27 = vadd.f32 %v12491_v9, %v5634_v30  ;;  %v5636_v33 = vpop.f32.mrb[105].mxu0  ;;  %6519 = vmatpush1.bf16.msra.mxu1 %v6457_v50 }
 0x479   :  { %v6088_v40 = vmax.f32 %v6004_v48, 0.0  ;;  %v8577_v15 = vadd.f32 %v12494_v56, %v5636_v33  ;;  %v5638_v45 = vpop.f32.mrb[106].mxu0 }
 0x47a   :  { %v12933_v62 = vpack.c.bf16 %v6087_v12, %v6085_v34  ;;  %v5909_v18 = vmul.f32 %v8574_v27, %v12836_v8  ;;  %v8580_v23 = vadd.f32 %v12500_v47, %v5638_v45  ;;  %v5640_v61 = vpop.f32.mrb[107].mxu0 }
 0x47b   :  { %v12937_v59 = vpack.c.bf16 %v6088_v40, %v6086_v25  ;;  %v5910_v9 = vmul.f32 %v8577_v15, %v12838_v14  ;;  %v8583_v20 = vadd.f32 %v14308_v5, %v5640_v61  ;;  %v9683_v25 = vld [vmem:[#allocation5 + $0x54] ss:$8 sps:$4 sm:$0xff]  }
 0x47c   :  { %v6005_v13 = vadd.f32 %v12841_v1, %v5909_v18  ;;  %v5911_v56 = vmul.f32 %v8580_v23, %v12836_v8  ;;  %v6459_v10 = vmul.bf16 %v9678_v58, %v12933_v62  ;;  %v9681_v18 = vld [vmem:[#allocation5 + $0x50] ss:$8 sps:$4 sm:$0xff]  }
 0x47d   :  { %v6006_v53 = vadd.f32 %v12844_v28, %v5910_v9  ;;  %v5912_v7 = vmul.f32 %v8583_v20, %v12838_v14  ;;  %v6460_v16 = vmul.bf16 %v9680_v60, %v12937_v59 }
 0x47e   :  { %v6007_v47 = vadd.f32 %v12841_v1, %v5911_v56  ;;  %v6089_v43 = vmax.f32 %v6005_v13, 0.0 }
 0x47f   :  { %v6008_v29 = vadd.f32 %v12844_v28, %v5912_v7  ;;  %v5644_v21 = vpop.f32.mrb[108].mxu0  ;;  %6520 = vmatprep.subr.bf16.mxu1 %v6460_v16  ;;  %v6090_v34 = vmax.f32 %v6006_v53, 0.0 }
 0x480   :  { %v6091_v50 = vmax.f32 %v6007_v47, 0.0  ;;  %v8586_v48 = vadd.f32 %v12511_v41, %v5644_v21  ;;  %v5646_v30 = vpop.f32.mrb[109].mxu0  ;;  %6521 = vmatpush1.bf16.msra.mxu1 %v6459_v10 }
 0x481   :  { %v6092_v12 = vmax.f32 %v6008_v29, 0.0  ;;  %v8589_v27 = vadd.f32 %v12514_v52, %v5646_v30  ;;  %v5648_v33 = vpop.f32.mrb[110].mxu0 }
 0x482   :  { %v12951_v40 = vpack.c.bf16 %v6091_v50, %v6089_v43  ;;  %v5913_v15 = vmul.f32 %v8586_v48, %v12836_v8  ;;  %v8592_v45 = vadd.f32 %v12520_v35, %v5648_v33  ;;  %v5650_v60 = vpop.f32.mrb[111].mxu0  ;;  %v9686_v50 = vld [vmem:[#allocation5 + $0x64] ss:$8 sps:$4 sm:$0xff]  }
 0x483   :  { %v12955_v23 = vpack.c.bf16 %v6092_v12, %v6090_v34  ;;  %v5914_v41 = vmul.f32 %v8589_v27, %v12838_v14  ;;  %v8595_v61 = vadd.f32 %v12524_v26, %v5650_v60  ;;  %v9684_v27 = vld [vmem:[#allocation5 + $0x60] ss:$8 sps:$4 sm:$0xff]  }
 0x484   :  { %v6009_v58 = vadd.f32 %v12841_v1, %v5913_v15  ;;  %v5915_v52 = vmul.f32 %v8592_v45, %v12836_v8  ;;  %v6461_v13 = vmul.bf16 %v9681_v18, %v12951_v40 }
 0x485   :  { %v6010_v9 = vadd.f32 %v12844_v28, %v5914_v41  ;;  %v5916_v5 = vmul.f32 %v8595_v61, %v12838_v14  ;;  %v6462_v20 = vmul.bf16 %v9683_v25, %v12955_v23 }
 0x486   :  { %v6011_v35 = vadd.f32 %v12841_v1, %v5915_v52  ;;  %v6093_v7 = vmax.f32 %v6009_v58, 0.0 }
 0x487   :  { %v6012_v56 = vadd.f32 %v12844_v28, %v5916_v5  ;;  %v5654_v53 = vpop.f32.mrb[112].mxu0  ;;  %6522 = vmatprep.subr.bf16.mxu1 %v6462_v20  ;;  %v6094_v10 = vmax.f32 %v6010_v9, 0.0 }
 0x488   :  { %v6095_v26 = vmax.f32 %v6011_v35, 0.0  ;;  %v8598_v16 = vadd.f32 %v12529_v44, %v5654_v53  ;;  %v5656_v47 = vpop.f32.mrb[113].mxu0  ;;  %6523 = vmatpush1.bf16.msra.mxu1 %v6461_v13  ;;  %v9689_v53 = vld [vmem:[#allocation5 + $0x74] ss:$8 sps:$4 sm:$0xff]  }
 0x489   :  { %v6096_v29 = vmax.f32 %v6012_v56, 0.0  ;;  %v8601_v21 = vadd.f32 %v12532_v19, %v5656_v47  ;;  %v5658_v43 = vpop.f32.mrb[114].mxu0 }
 0x48a   :  { %v12969_v48 = vpack.c.bf16 %v6095_v26, %v6093_v7  ;;  %v5917_v30 = vmul.f32 %v8598_v16, %v12836_v8  ;;  %v8604_v34 = vadd.f32 %v12539_v46, %v5658_v43  ;;  %v5660_v12 = vpop.f32.mrb[115].mxu0 }
 0x48b   :  { %v12973_v33 = vpack.c.bf16 %v6096_v29, %v6094_v10  ;;  %v5918_v44 = vmul.f32 %v8601_v21, %v12838_v14  ;;  %v8607_v25 = vadd.f32 %v12542_v55, %v5660_v12  ;;  %v9687_v10 = vld [vmem:[#allocation5 + $0x70] ss:$8 sps:$4 sm:$0xff]  }
 0x48c   :  { %v6013_v15 = vadd.f32 %v12841_v1, %v5917_v30  ;;  %v5919_v19 = vmul.f32 %v8604_v34, %v12836_v8  ;;  %v6463_v41 = vmul.bf16 %v9684_v27, %v12969_v48 }
 0x48d   :  { %v6014_v45 = vadd.f32 %v12844_v28, %v5918_v44  ;;  %v5920_v60 = vmul.f32 %v8607_v25, %v12838_v14  ;;  %v6464_v18 = vmul.bf16 %v9686_v50, %v12973_v33 }
 0x48e   :  { %v6015_v46 = vadd.f32 %v12841_v1, %v5919_v19  ;;  %v6097_v52 = vmax.f32 %v6013_v15, 0.0 }
 0x48f   :  { %v6016_v61 = vadd.f32 %v12844_v28, %v5920_v60  ;;  %v5664_v58 = vpop.f32.mrb[116].mxu0  ;;  %6524 = vmatprep.subr.bf16.mxu1 %v6464_v18  ;;  %v6098_v20 = vmax.f32 %v6014_v45, 0.0  ;;  %v14309_v18 = vld [vmem:[#allocation47_spill] sm:$0xff] }
 0x490   :  { %v6099_v55 = vmax.f32 %v6015_v46, 0.0  ;;  %v8610_v9 = vadd.f32 %v12549_v36, %v5664_v58  ;;  %v5666_v5 = vpop.f32.mrb[117].mxu0  ;;  %6525 = vmatpush1.bf16.msra.mxu1 %v6463_v41 }
 0x491   :  { %v6100_v35 = vmax.f32 %v6016_v61, 0.0  ;;  %v8613_v13 = vadd.f32 %v12552_v4, %v5666_v5  ;;  %v5668_v56 = vpop.f32.mrb[118].mxu0  ;;  %v9692_v61 = vld [vmem:[#allocation5 + $0x84] ss:$8 sps:$4 sm:$0xff]   ;;  %v9690_v5 = vld [vmem:[#allocation5 + $0x80] ss:$8 sps:$4 sm:$0xff]  }
 0x492   :  { %v12987_v7 = vpack.c.bf16 %v6099_v55, %v6097_v52  ;;  %v5921_v26 = vmul.f32 %v8610_v9, %v12836_v8  ;;  %v8616_v16 = vadd.f32 %v12559_v0, %v5668_v56  ;;  %v5670_v47 = vpop.f32.mrb[119].mxu0 }
 0x493   :  { %v12991_v29 = vpack.c.bf16 %v6100_v35, %v6098_v20  ;;  %v5922_v36 = vmul.f32 %v8613_v13, %v12838_v14  ;;  %v8619_v21 = vadd.f32 %v12562_v42, %v5670_v47  ;;  %v14310_v35 = vld [vmem:[#allocation48_spill] sm:$0xff] }
 0x494   :  { %v6017_v43 = vadd.f32 %v12841_v1, %v5921_v26  ;;  %v5923_v4 = vmul.f32 %v8616_v16, %v12836_v8  ;;  %v6465_v12 = vmul.bf16 %v9687_v10, %v12987_v7 }
 0x495   :  { %v6018_v50 = vadd.f32 %v12844_v28, %v5922_v36  ;;  %v5924_v30 = vmul.f32 %v8619_v21, %v12838_v14  ;;  %v6466_v34 = vmul.bf16 %v9689_v53, %v12991_v29 }
 0x496   :  { %v6019_v0 = vadd.f32 %v12841_v1, %v5923_v4  ;;  %v6101_v25 = vmax.f32 %v6017_v43, 0.0 }
 0x497   :  { %v6020_v27 = vadd.f32 %v12844_v28, %v5924_v30  ;;  %v5674_v44 = vpop.f32.mrb[120].mxu0  ;;  %6526 = vmatprep.subr.bf16.mxu1 %v6466_v34  ;;  %v6102_v45 = vmax.f32 %v6018_v50, 0.0  ;;  %v14311_v50 = vld [vmem:[#allocation49_spill] sm:$0xff] }
 0x498   :  { %v6103_v42 = vmax.f32 %v6019_v0, 0.0  ;;  %v8622_v15 = vadd.f32 %v12566_v49, %v5674_v44  ;;  %v5676_v19 = vpop.f32.mrb[121].mxu0  ;;  %6527 = vmatpush1.bf16.msra.mxu1 %v6465_v12 }
 0x499   :  { %v6104_v60 = vmax.f32 %v6020_v27, 0.0  ;;  %v8625_v46 = vadd.f32 %v14309_v18, %v5676_v19  ;;  %v5678_v41 = vpop.f32.mrb[122].mxu0  ;;  %v14312_v27 = vld [vmem:[#allocation51_spill] sm:$0xff]  ;;  %v9693_v18 = vld [vmem:[#allocation5 + $0x90] ss:$8 sps:$4 sm:$0xff]  }
 0x49a   :  { %v13005_v58 = vpack.c.bf16 %v6103_v42, %v6101_v25  ;;  %v5925_v52 = vmul.f32 %v8622_v15, %v12836_v8  ;;  %v8628_v55 = vadd.f32 %v12577_v54, %v5678_v41  ;;  %v5680_v9 = vpop.f32.mrb[123].mxu0  ;;  %v9695_v42 = vld [vmem:[#allocation5 + $0x94] ss:$8 sps:$4 sm:$0xff]  }
 0x49b   :  { %v13009_v20 = vpack.c.bf16 %v6104_v60, %v6102_v45  ;;  %v5926_v49 = vmul.f32 %v8625_v46, %v12838_v14  ;;  %v8631_v13 = vadd.f32 %v14310_v35, %v5680_v9 }
 0x49c   :  { %v6021_v56 = vadd.f32 %v12841_v1, %v5925_v52  ;;  %v5927_v53 = vmul.f32 %v8628_v55, %v12836_v8  ;;  %v6467_v10 = vmul.bf16 %v9690_v5, %v13005_v58 }
 0x49d   :  { %v6022_v26 = vadd.f32 %v12844_v28, %v5926_v49  ;;  %v5928_v16 = vmul.f32 %v8631_v13, %v12838_v14  ;;  %v6468_v47 = vmul.bf16 %v9692_v61, %v13009_v20  ;;  %v14313_v61 = vld [vmem:[#allocation52_spill] sm:$0xff] }
 0x49e   :  { %v6023_v54 = vadd.f32 %v12841_v1, %v5927_v53  ;;  %v6105_v43 = vmax.f32 %v6021_v56, 0.0 }
 0x49f   :  { %v6024_v36 = vadd.f32 %v12844_v28, %v5928_v16  ;;  %v5684_v21 = vpop.f32.mrb[124].mxu0  ;;  %6528 = vmatprep.subr.bf16.mxu1 %v6468_v47  ;;  %v6106_v0 = vmax.f32 %v6022_v26, 0.0  ;;  %v14314_v47 = vld [vmem:[#allocation53_spill] sm:$0xff] }
 0x4a0   :  { %v6107_v4 = vmax.f32 %v6023_v54, 0.0  ;;  %v8634_v30 = vadd.f32 %v14311_v50, %v5684_v21  ;;  %v5686_v34 = vpop.f32.mrb[125].mxu0  ;;  %6529 = vmatpush1.bf16.msra.mxu1 %v6467_v10 }
 0x4a1   :  { %v6108_v12 = vmax.f32 %v6024_v36, 0.0  ;;  %v8637_v44 = vadd.f32 %v14312_v27, %v5686_v34  ;;  %v5688_v25 = vpop.f32.mrb[126].mxu0 }
 0x4a2   :  { %v13023_v15 = vpack.c.bf16 %v6107_v4, %v6105_v43  ;;  %v5929_v19 = vmul.f32 %v8634_v30, %v12836_v8  ;;  %v8640_v45 = vadd.f32 %v12595_v51, %v5688_v25  ;;  %v5690_v60 = vpop.f32.mrb[127].mxu0  ;;  %v14315_v43 = vld [vmem:[#allocation54_spill] sm:$0xff]  ;;  %v9698_v30 = vld [vmem:[#allocation5 + $0xa4] ss:$8 sps:$4 sm:$0xff]  }
 0x4a3   :  { %v13027_v46 = vpack.c.bf16 %v6108_v12, %v6106_v0  ;;  %v5930_v41 = vmul.f32 %v8637_v44, %v12838_v14  ;;  %v8643_v52 = vadd.f32 %v14313_v61, %v5690_v60  ;;  %v9696_v44 = vld [vmem:[#allocation5 + $0xa0] ss:$8 sps:$4 sm:$0xff]  }
 0x4a4   :  { %v6025_v55 = vadd.f32 %v12841_v1, %v5929_v19  ;;  %v5931_v9 = vmul.f32 %v8640_v45, %v12836_v8  ;;  %v6469_v13 = vmul.bf16 %v9693_v18, %v13023_v15 }
 0x4a5   :  { %v6026_v5 = vadd.f32 %v12844_v28, %v5930_v41  ;;  %v5932_v49 = vmul.f32 %v8643_v52, %v12838_v14  ;;  %v6470_v35 = vmul.bf16 %v9695_v42, %v13027_v46 }
 0x4a6   :  { %v6027_v51 = vadd.f32 %v12841_v1, %v5931_v9  ;;  %v6109_v26 = vmax.f32 %v6025_v55, 0.0 }
 0x4a7   :  { %v6028_v56 = vadd.f32 %v12844_v28, %v5932_v49  ;;  %v5694_v53 = vpop.f32.mrb[128].mxu0  ;;  %6530 = vmatprep.subr.bf16.mxu1 %v6470_v35  ;;  %v6110_v36 = vmax.f32 %v6026_v5, 0.0  ;;  %v14316_v49 = vld [vmem:[#allocation56_spill] sm:$0xff] }
 0x4a8   :  { %v6111_v16 = vmax.f32 %v6027_v51, 0.0  ;;  %v8646_v54 = vadd.f32 %v14314_v47, %v5694_v53  ;;  %v5696_v10 = vpop.f32.mrb[129].mxu0  ;;  %6531 = vmatpush1.bf16.msra.mxu1 %v6469_v13  ;;  %v14317_v53 = vld [vmem:[#allocation57_spill] sm:$0xff] }
 0x4a9   :  { %v6112_v21 = vmax.f32 %v6028_v56, 0.0  ;;  %v8649_v4 = vadd.f32 %v14315_v43, %v5696_v10  ;;  %v5698_v50 = vpop.f32.mrb[130].mxu0  ;;  %v9701_v47 = vld [vmem:[#allocation5 + $0xb4] ss:$8 sps:$4 sm:$0xff]   ;;  %v9699_v43 = vld [vmem:[#allocation5 + $0xb0] ss:$8 sps:$4 sm:$0xff]  }
 0x4aa   :  { %v13041_v34 = vpack.c.bf16 %v6111_v16, %v6109_v26  ;;  %v5933_v0 = vmul.f32 %v8646_v54, %v12836_v8  ;;  %v8652_v12 = vadd.f32 %v12613_v22, %v5698_v50  ;;  %v5700_v27 = vpop.f32.mrb[131].mxu0 }
 0x4ab   :  { %v13045_v25 = vpack.c.bf16 %v6112_v21, %v6110_v36  ;;  %v5934_v42 = vmul.f32 %v8649_v4, %v12838_v14  ;;  %v8655_v19 = vadd.f32 %v12616_v63, %v5700_v27 }
 0x4ac   :  { %v6029_v45 = vadd.f32 %v12841_v1, %v5933_v0  ;;  %v5935_v60 = vmul.f32 %v8652_v12, %v12836_v8  ;;  %v6471_v52 = vmul.bf16 %v9696_v44, %v13041_v34 }
 0x4ad   :  { %v6030_v18 = vadd.f32 %v12844_v28, %v5934_v42  ;;  %v5936_v41 = vmul.f32 %v8655_v19, %v12838_v14  ;;  %v6472_v61 = vmul.bf16 %v9698_v30, %v13045_v25 }
 0x4ae   :  { %v6031_v22 = vadd.f32 %v12841_v1, %v5935_v60  ;;  %v6113_v5 = vmax.f32 %v6029_v45, 0.0 }
 0x4af   :  { %v6032_v55 = vadd.f32 %v12844_v28, %v5936_v41  ;;  %v5704_v9 = vpop.f32.mrb[132].mxu0  ;;  %6532 = vmatprep.subr.bf16.mxu1 %v6472_v61  ;;  %v6114_v13 = vmax.f32 %v6030_v18, 0.0 }
 0x4b0   :  { %v6115_v63 = vmax.f32 %v6031_v22, 0.0  ;;  %v8658_v35 = vadd.f32 %v14316_v49, %v5704_v9  ;;  %v5706_v51 = vpop.f32.mrb[133].mxu0  ;;  %6533 = vmatpush1.bf16.msra.mxu1 %v6471_v52 }
 0x4b1   :  { %v6116_v56 = vmax.f32 %v6032_v55, 0.0  ;;  %v8661_v26 = vadd.f32 %v14317_v53, %v5706_v51  ;;  %v5708_v16 = vpop.f32.mrb[134].mxu0  ;;  %v14318_v55 = vld [vmem:[#allocation58_spill] sm:$0xff] }
 0x4b2   :  { %v13059_v54 = vpack.c.bf16 %v6115_v63, %v6113_v5  ;;  %v5937_v10 = vmul.f32 %v8658_v35, %v12836_v8  ;;  %v8664_v36 = vadd.f32 %v12631_v11, %v5708_v16  ;;  %v5710_v21 = vpop.f32.mrb[135].mxu0  ;;  %v9704_v63 = vld [vmem:[#allocation5 + $0xc4] ss:$8 sps:$4 sm:$0xff]  }
 0x4b3   :  { %v13063_v4 = vpack.c.bf16 %v6116_v56, %v6114_v13  ;;  %v5938_v50 = vmul.f32 %v8661_v26, %v12838_v14  ;;  %v8667_v30 = vadd.f32 %v12634_v2, %v5710_v21  ;;  %v9702_v56 = vld [vmem:[#allocation5 + $0xc0] ss:$8 sps:$4 sm:$0xff]  }
 0x4b4   :  { %v6033_v0 = vadd.f32 %v12841_v1, %v5937_v10  ;;  %v5939_v12 = vmul.f32 %v8664_v36, %v12836_v8  ;;  %v6473_v19 = vmul.bf16 %v9699_v43, %v13059_v54  ;;  %v14319_v26 = vld [vmem:[#allocation59_spill] sm:$0xff] }
 0x4b5   :  { %v6034_v27 = vadd.f32 %v12844_v28, %v5938_v50  ;;  %v5940_v44 = vmul.f32 %v8667_v30, %v12838_v14  ;;  %v6474_v42 = vmul.bf16 %v9701_v47, %v13063_v4 }
 0x4b6   :  { %v6035_v11 = vadd.f32 %v12841_v1, %v5939_v12  ;;  %v6117_v18 = vmax.f32 %v6033_v0, 0.0 }
 0x4b7   :  { %v6036_v45 = vadd.f32 %v12844_v28, %v5940_v44  ;;  %v5714_v60 = vpop.f32.mrb[136].mxu0  ;;  %6534 = vmatprep.subr.bf16.mxu1 %v6474_v42  ;;  %v6118_v22 = vmax.f32 %v6034_v27, 0.0  ;;  %v14320_v44 = vld [vmem:[#allocation60_spill] sm:$0xff] }
 0x4b8   :  { %v6119_v2 = vmax.f32 %v6035_v11, 0.0  ;;  %v8670_v41 = vadd.f32 %v12638_v24, %v5714_v60  ;;  %v5716_v61 = vpop.f32.mrb[137].mxu0  ;;  %6535 = vmatpush1.bf16.msra.mxu1 %v6473_v19  ;;  %v14321_v60 = vld [vmem:[#allocation61_spill] sm:$0xff] }
 0x4b9   :  { %v6120_v52 = vmax.f32 %v6036_v45, 0.0  ;;  %v8673_v9 = vadd.f32 %v14318_v55, %v5716_v61  ;;  %v5718_v5 = vpop.f32.mrb[138].mxu0 }
 0x4ba   :  { %v13077_v49 = vpack.c.bf16 %v6119_v2, %v6117_v18  ;;  %v5941_v35 = vmul.f32 %v8670_v41, %v12836_v8  ;;  %v8676_v51 = vadd.f32 %v12649_v38, %v5718_v5  ;;  %v5720_v13 = vpop.f32.mrb[139].mxu0  ;;  %v9707_v41 = vld [vmem:[#allocation5 + $0xd4] ss:$8 sps:$4 sm:$0xff]   ;;  %v9705_v5 = vld [vmem:[#allocation5 + $0xd0] ss:$8 sps:$4 sm:$0xff]  }
 0x4bb   :  { %v13081_v53 = vpack.c.bf16 %v6120_v52, %v6118_v22  ;;  %v5942_v24 = vmul.f32 %v8673_v9, %v12838_v14  ;;  %v8679_v16 = vadd.f32 %v14319_v26, %v5720_v13  ;;  %v14322_v52 = vld [vmem:[#allocation62_spill] sm:$0xff] }
 0x4bc   :  { %v6037_v47 = vadd.f32 %v12841_v1, %v5941_v35  ;;  %v5943_v10 = vmul.f32 %v8676_v51, %v12836_v8  ;;  %v6475_v50 = vmul.bf16 %v9702_v56, %v13077_v49  ;;  %v14323_v51 = vld [vmem:[#allocation63_spill] sm:$0xff] }
 0x4bd   :  { %v6038_v36 = vadd.f32 %v12844_v28, %v5942_v24  ;;  %v5944_v21 = vmul.f32 %v8679_v16, %v12838_v14  ;;  %v6476_v43 = vmul.bf16 %v9704_v63, %v13081_v53 }
 0x4be   :  { %v6039_v38 = vadd.f32 %v12841_v1, %v5943_v10  ;;  %v6121_v12 = vmax.f32 %v6037_v47, 0.0 }
 0x4bf   :  { %v6040_v30 = vadd.f32 %v12844_v28, %v5944_v21  ;;  %v5724_v0 = vpop.f32.mrb[140].mxu0  ;;  %6536 = vmatprep.subr.bf16.mxu1 %v6476_v43  ;;  %v6122_v19 = vmax.f32 %v6038_v36, 0.0 }
 0x4c0   :  { %v6123_v27 = vmax.f32 %v6039_v38, 0.0  ;;  %v8682_v42 = vadd.f32 %v14320_v44, %v5724_v0  ;;  %v5726_v11 = vpop.f32.mrb[141].mxu0  ;;  %6537 = vmatpush1.bf16.msra.mxu1 %v6475_v50 }
 0x4c1   :  { %v6124_v45 = vmax.f32 %v6040_v30, 0.0  ;;  %v8685_v18 = vadd.f32 %v14321_v60, %v5726_v11  ;;  %v5728_v2 = vpop.f32.mrb[142].mxu0  ;;  %v14324_v30 = vld [vmem:[#allocation64_spill] sm:$0xff] }
 0x4c2   :  { %v13095_v61 = vpack.c.bf16 %v6123_v27, %v6121_v12  ;;  %v5945_v22 = vmul.f32 %v8682_v42, %v12836_v8  ;;  %v8688_v55 = vadd.f32 %v14322_v52, %v5728_v2  ;;  %v5730_v9 = vpop.f32.mrb[143].mxu0  ;;  %v14325_v42 = vld [vmem:[#allocation65_spill] sm:$0xff]  ;;  %v14326_v2 = vld [vmem:[#allocation66_spill] sm:$0xff]  ;;  %v9708_v52 = vld [vmem:[#allocation5 + $0xe0] ss:$8 sps:$4 sm:$0xff]  }
 0x4c3   :  { %v13099_v63 = vpack.c.bf16 %v6124_v45, %v6122_v19  ;;  %v5946_v35 = vmul.f32 %v8685_v18, %v12838_v14  ;;  %v8691_v13 = vadd.f32 %v14323_v51, %v5730_v9  ;;  %v9710_v45 = vld [vmem:[#allocation5 + $0xe4] ss:$8 sps:$4 sm:$0xff]  }
 0x4c4   :  { %v6041_v56 = vadd.f32 %v12841_v1, %v5945_v22  ;;  %v5947_v24 = vmul.f32 %v8688_v55, %v12836_v8  ;;  %v6477_v36 = vmul.bf16 %v9705_v5, %v13095_v61  ;;  %v14327_v5 = vld [vmem:[#allocation67_spill] sm:$0xff] }
 0x4c5   :  { %v6042_v26 = vadd.f32 %v12844_v28, %v5946_v35  ;;  %v5948_v16 = vmul.f32 %v8691_v13, %v12838_v14  ;;  %v6478_v47 = vmul.bf16 %v9707_v41, %v13099_v63 }
 0x4c6   :  { %v6043_v10 = vadd.f32 %v12841_v1, %v5947_v24  ;;  %v6125_v38 = vmax.f32 %v6041_v56, 0.0 }
 0x4c7   :  { %v6044_v21 = vadd.f32 %v12844_v28, %v5948_v16  ;;  %v5734_v43 = vpop.f32.mrb[144].mxu0  ;;  %6538 = vmatprep.subr.bf16.mxu1 %v6478_v47  ;;  %v6126_v27 = vmax.f32 %v6042_v26, 0.0 }
 0x4c8   :  { %v6127_v50 = vmax.f32 %v6043_v10, 0.0  ;;  %v8694_v0 = vadd.f32 %v14324_v30, %v5734_v43  ;;  %v5736_v12 = vpop.f32.mrb[145].mxu0  ;;  %6539 = vmatpush1.bf16.msra.mxu1 %v6477_v36 }
 0x4c9   :  { %v6128_v44 = vmax.f32 %v6044_v21, 0.0  ;;  %v8697_v11 = vadd.f32 %v14325_v42, %v5736_v12  ;;  %v5738_v19 = vpop.f32.mrb[146].mxu0 }
 0x4ca   :  { %v13113_v60 = vpack.c.bf16 %v6127_v50, %v6125_v38  ;;  %v5949_v18 = vmul.f32 %v8694_v0, %v12836_v8  ;;  %v8700_v41 = vadd.f32 %v14326_v2, %v5738_v19  ;;  %v5740_v22 = vpop.f32.mrb[147].mxu0  ;;  %v14328_v38 = vld [vmem:[#allocation68_spill] sm:$0xff] }
 0x4cb   :  { %v13117_v55 = vpack.c.bf16 %v6128_v44, %v6126_v27  ;;  %v5950_v9 = vmul.f32 %v8697_v11, %v12838_v14  ;;  %v8703_v35 = vadd.f32 %v14327_v5, %v5740_v22  ;;  %v14329_v27 = vld [vmem:[#allocation69_spill] sm:$0xff]  ;;  %v14331_v5 = vld [vmem:[#allocation71_spill] sm:$0xff] }
 0x4cc   :  { %v6045_v51 = vadd.f32 %v12841_v1, %v5949_v18  ;;  %v5951_v13 = vmul.f32 %v8700_v41, %v12836_v8  ;;  %v6479_v47 = vmul.bf16 %v9708_v52, %v13113_v60  ;;  %v9713_v11 = vld [vmem:[#allocation5 + $0xf4] ss:$8 sps:$4 sm:$0xff]   ;;  %v9711_v22 = vld [vmem:[#allocation5 + $0xf0] ss:$8 sps:$4 sm:$0xff]  }
 0x4cd   :  { %v6046_v56 = vadd.f32 %v12844_v28, %v5950_v9  ;;  %v5952_v24 = vmul.f32 %v8703_v35, %v12838_v14  ;;  %v6480_v26 = vmul.bf16 %v9710_v45, %v13117_v55  ;;  %v14330_v18 = vld [vmem:[#allocation70_spill] sm:$0xff] }
 0x4ce   :  { %v6047_v16 = vadd.f32 %v12841_v1, %v5951_v13  ;;  %v6129_v21 = vmax.f32 %v6045_v51, 0.0 }
 0x4cf   :  { %v6048_v10 = vadd.f32 %v12844_v28, %v5952_v24  ;;  %v5744_v36 = vpop.f32.mrb[148].mxu0  ;;  %6540 = vmatprep.subr.bf16.mxu1 %v6480_v26  ;;  %v6130_v0 = vmax.f32 %v6046_v56, 0.0 }
 0x4d0   :  { %v6131_v43 = vmax.f32 %v6047_v16, 0.0  ;;  %v8706_v50 = vadd.f32 %v14328_v38, %v5744_v36  ;;  %v5746_v30 = vpop.f32.mrb[149].mxu0  ;;  %6541 = vmatpush1.bf16.msra.mxu1 %v6479_v47 }
 0x4d1   :  { %v6132_v12 = vmax.f32 %v6048_v10, 0.0  ;;  %v8709_v44 = vadd.f32 %v14329_v27, %v5746_v30  ;;  %v5748_v42 = vpop.f32.mrb[150].mxu0 }
 0x4d2   :  { %v13131_v19 = vpack.c.bf16 %v6131_v43, %v6129_v21  ;;  %v5953_v45 = vmul.f32 %v8706_v50, %v12836_v8  ;;  %v8712_v2 = vadd.f32 %v14330_v18, %v5748_v42  ;;  %v5750_v41 = vpop.f32.mrb[151].mxu0  ;;  %v13150_v21 = vld [vmem:[%s13676_s5] ss:$12 sps:$4 sm:$0xff]   ;;  %v14332_v50 = vld [vmem:[#allocation72_spill] sm:$0xff] }
 0x4d3   :  { %v13135_v52 = vpack.c.bf16 %v6132_v12, %v6130_v0  ;;  %v5954_v9 = vmul.f32 %v8709_v44, %v12838_v14  ;;  %v8715_v35 = vadd.f32 %v14331_v5, %v5750_v41  ;;  %v14333_v44 = vld [vmem:[#allocation73_spill] sm:$0xff]  ;;  %v14334_v41 = vld [vmem:[#allocation74_spill] sm:$0xff]  ;;  %v9717_v5 = vld [vmem:[#allocation5 + $0x100] ss:$8 sps:$4 sm:$0xff]  }
 0x4d4   :  { %v6049_v51 = vadd.f32 %v12841_v1, %v5953_v45  ;;  %v5955_v13 = vmul.f32 %v8712_v2, %v12836_v8  ;;  %v6481_v47 = vmul.bf16 %v9711_v22, %v13131_v19  ;;  %v9719_v45 = vld [vmem:[#allocation5 + $0x104] ss:$8 sps:$4 sm:$0xff]  }
 0x4d5   :  { %v6050_v56 = vadd.f32 %v12844_v28, %v5954_v9  ;;  %v5956_v24 = vmul.f32 %v8715_v35, %v12838_v14  ;;  %v6482_v26 = vmul.bf16 %v9713_v11, %v13135_v52 }
 0x4d6   :  { %v6051_v16 = vadd.f32 %v12841_v1, %v5955_v13  ;;  %v6133_v43 = vmax.f32 %v6049_v51, 0.0  ;;  %v14335_v13 = vld [vmem:[#allocation75_spill] sm:$0xff] }
 0x4d7   :  { %v6052_v10 = vadd.f32 %v12844_v28, %v5956_v24  ;;  %v5754_v36 = vpop.f32.mrb[152].mxu0  ;;  %6542 = vmatprep.subr.bf16.mxu1 %v6482_v26  ;;  %v6134_v12 = vmax.f32 %v6050_v56, 0.0 }
 0x4d8   :  { %v6135_v38 = vmax.f32 %v6051_v16, 0.0  ;;  %v8718_v30 = vadd.f32 %v14332_v50, %v5754_v36  ;;  %v5756_v0 = vpop.f32.mrb[153].mxu0  ;;  %6543 = vmatpush1.bf16.msra.mxu1 %v6481_v47  ;;  %v14336_v16 = vmov 0  }
 0x4d9   :  { %v6136_v27 = vmax.f32 %v6052_v10, 0.0  ;;  %v8721_v42 = vadd.f32 %v14333_v44, %v5756_v0  ;;  %v5758_v11 = vpop.f32.mrb[154].mxu0 }
 0x4da   :  { %v13154_v18 = vpack.c.bf16 %v6135_v38, %v6133_v43  ;;  %v5957_v2 = vmul.f32 %v8718_v30, %v12836_v8  ;;  %v8724_v22 = vadd.f32 %v14334_v41, %v5758_v11  ;;  %v5760_v9 = vpop.f32.mrb[155].mxu0  ;;  %v14338_v41 = vld [vmem:[#allocation77_spill] sm:$0xff] }
 0x4db   :  { %v13158_v35 = vpack.c.bf16 %v6136_v27, %v6134_v12  ;;  %v5958_v51 = vmul.f32 %v8721_v42, %v12838_v14  ;;  %v8727_v24 = vadd.f32 %v14335_v13, %v5760_v9  ;;  %6545 = vmatmul.mubr.bf16.vlgmr.msra.gmra.mrb[168].mxu1 %v13150_v21  ;;  %v14337_v27 = vld [vmem:[#allocation76_spill] sm:$0xff]  ;;  %v14340_v13 = vld [vmem:[#allocation78_spill] sm:$0xff] }
 0x4dc   :  { %v6053_v56 = vadd.f32 %v12841_v1, %v5957_v2  ;;  %v5959_v26 = vmul.f32 %v8724_v22, %v12836_v8  ;;  %6587 = vmatprep.mubr.bf16.mxu1 %v14336_v16  ;;  %v6483_v38 = vmul.bf16 %v9717_v5, %v13154_v18 }
 0x4dd   :  { %v6054_v47 = vadd.f32 %v12844_v28, %v5958_v51  ;;  %v5960_v10 = vmul.f32 %v8727_v24, %v12838_v14  ;;  %v6484_v36 = vmul.bf16 %v9719_v45, %v13158_v35  ;;  %v9722_v45 = vld [vmem:[#allocation5 + $0x114] ss:$8 sps:$4 sm:$0xff]  }
 0x4de   :  { %v6055_v43 = vadd.f32 %v12841_v1, %v5959_v26  ;;  %v6137_v0 = vmax.f32 %v6053_v56, 0.0 }
 0x4df   :  { %v6056_v50 = vadd.f32 %v12844_v28, %v5960_v10  ;;  %v5764_v30 = vpop.f32.mrb[156].mxu0  ;;  %6555 = vmatprep.subr.bf16.mxu1 %v6484_v36  ;;  %v6138_v11 = vmax.f32 %v6054_v47, 0.0  ;;  %v9720_v10 = vld [vmem:[#allocation5 + $0x110] ss:$8 sps:$4 sm:$0xff]  }
 0x4e0   :  { %v6139_v12 = vmax.f32 %v6055_v43, 0.0  ;;  %v8730_v44 = vadd.f32 %v14337_v27, %v5764_v30  ;;  %v5766_v42 = vpop.f32.mrb[157].mxu0  ;;  %6556 = vmatpush1.bf16.msra.mxu1 %v6483_v38  ;;  %v14341_v43 = vld [vmem:[#allocation79_spill] sm:$0xff] }
 0x4e1   :  { %v6140_v2 = vmax.f32 %v6056_v50, 0.0  ;;  %v8733_v22 = vadd.f32 %v14338_v41, %v5766_v42  ;;  %v5768_v9 = vpop.f32.mrb[158].mxu0 }
 0x4e2   :  { %v13174_v51 = vpack.c.bf16 %v6139_v12, %v6137_v0  ;;  %v5961_v5 = vmul.f32 %v8730_v44, %v12836_v8  ;;  %v8736_v24 = vadd.f32 %v14340_v13, %v5768_v9  ;;  %v5770_v26 = vpop.f32.mrb[159].mxu0 }
 0x4e3   :  { %v13178_v56 = vpack.c.bf16 %v6140_v2, %v6138_v11  ;;  %v5962_v36 = vmul.f32 %v8733_v22, %v12838_v14  ;;  %v8739_v38 = vadd.f32 %v14341_v43, %v5770_v26  ;;  %v14342_v22 = vld [vmem:[#allocation14_spill] sm:$0xff]  ;;  %v14343_v26 = vld [vmem:[#allocation80_spill] sm:$0xff] }
 0x4e4   :  { %14339 = vst [vmem:[#allocation87_spill] sm:$0xff] %v13174_v51  ;;  %v6057_v47 = vadd.f32 %v12841_v1, %v5961_v5  ;;  %v5963_v50 = vmul.f32 %v8736_v24, %v12836_v8  ;;  %v6485_v44 = vmul.bf16 %v9720_v10, %v13174_v51 }
 0x4e5   :  { %v6058_v30 = vadd.f32 %v12844_v28, %v5962_v36  ;;  %v5964_v0 = vmul.f32 %v8739_v38, %v12838_v14  ;;  %v6486_v12 = vmul.bf16 %v9722_v45, %v13178_v56  ;;  %v9725_v45 = vld [vmem:[#allocation5 + $0x124] ss:$8 sps:$4 sm:$0xff]  }
 0x4e6   :  { %v6059_v27 = vadd.f32 %v12841_v1, %v5963_v50  ;;  %v6141_v2 = vmax.f32 %v6057_v47, 0.0  ;;  %v14345_v50 = vld [vmem:[#allocation81_spill] sm:$0xff] }
 0x4e7   :  { %v6060_v42 = vadd.f32 %v12844_v28, %v5964_v0  ;;  %v5774_v11 = vpop.f32.mrb[160].mxu0  ;;  %6557 = vmatprep.subr.bf16.mxu1 %v6486_v12  ;;  %v6142_v13 = vmax.f32 %v6058_v30, 0.0  ;;  %v9723_v12 = vld [vmem:[#allocation5 + $0x120] ss:$8 sps:$4 sm:$0xff]  }
 0x4e8   :  { %v6143_v41 = vmax.f32 %v6059_v27, 0.0  ;;  %v8742_v9 = vadd.f32 %v14342_v22, %v5774_v11  ;;  %v5776_v5 = vpop.f32.mrb[161].mxu0  ;;  %6558 = vmatpush1.bf16.msra.mxu1 %v6485_v44  ;;  %v14347_v11 = vld [vmem:[#allocation82_spill] sm:$0xff] }
 0x4e9   :  { %v6144_v24 = vmax.f32 %v6060_v42, 0.0  ;;  %v8745_v36 = vadd.f32 %v14343_v26, %v5776_v5  ;;  %v5778_v43 = vpop.f32.mrb[162].mxu0 }
 0x4ea   :  { %v13192_v38 = vpack.c.bf16 %v6143_v41, %v6141_v2  ;;  %v5965_v10 = vmul.f32 %v8742_v9, %v12836_v8  ;;  %v8748_v0 = vadd.f32 %v14345_v50, %v5778_v43  ;;  %v5780_v51 = vpop.f32.mrb[163].mxu0 }
 0x4eb   :  { %v13196_v47 = vpack.c.bf16 %v6144_v24, %v6142_v13  ;;  %v5966_v27 = vmul.f32 %v8745_v36, %v12838_v14  ;;  %v8751_v44 = vadd.f32 %v14347_v11, %v5780_v51  ;;  %v14348_v36 = vld [vmem:[#allocation83_spill] sm:$0xff] }
 0x4ec   :  { %14344 = vst [vmem:[#allocation89_spill] sm:$0xff] %v13192_v38  ;;  %v6061_v30 = vadd.f32 %v12841_v1, %v5965_v10  ;;  %v5967_v42 = vmul.f32 %v8748_v0, %v12836_v8  ;;  %v6487_v5 = vmul.bf16 %v9723_v12, %v13192_v38 }
 0x4ed   :  { %14346 = vst [vmem:[#allocation23_spill] sm:$0xff] %v13196_v47  ;;  %v6062_v22 = vadd.f32 %v12844_v28, %v5966_v27  ;;  %v5968_v2 = vmul.f32 %v8751_v44, %v12838_v14  ;;  %v6488_v41 = vmul.bf16 %v9725_v45, %v13196_v47  ;;  %v14349_v27 = vld [vmem:[#allocation21_spill] sm:$0xff] }
 0x4ee   :  { %v6063_v9 = vadd.f32 %v12841_v1, %v5967_v42  ;;  %v6145_v26 = vmax.f32 %v6061_v30, 0.0  ;;  %v9728_v45 = vld [vmem:[#allocation5 + $0x134] ss:$8 sps:$4 sm:$0xff]  }
 0x4ef   :  { %v6064_v13 = vadd.f32 %v12844_v28, %v5968_v2  ;;  %v5784_v24 = vpop.f32.mrb[164].mxu0  ;;  %6559 = vmatprep.subr.bf16.mxu1 %v6488_v41  ;;  %v6146_v50 = vmax.f32 %v6062_v22, 0.0  ;;  %v14350_v42 = vld [vmem:[#allocation85_spill] sm:$0xff] }
 0x4f0   :  { %v6147_v51 = vmax.f32 %v6063_v9, 0.0  ;;  %v8754_v43 = vadd.f32 %v14348_v36, %v5784_v24  ;;  %v5786_v10 = vpop.f32.mrb[165].mxu0  ;;  %6560 = vmatpush1.bf16.msra.mxu1 %v6487_v5  ;;  %v9726_v41 = vld [vmem:[#allocation5 + $0x130] ss:$8 sps:$4 sm:$0xff]  }
 0x4f1   :  { %v6148_v0 = vmax.f32 %v6064_v13, 0.0  ;;  %v8757_v11 = vadd.f32 %v14349_v27, %v5786_v10  ;;  %v5788_v44 = vpop.f32.mrb[166].mxu0  ;;  %v14351_v24 = vld [vmem:[#allocation86_spill] sm:$0xff] }
 0x4f2   :  { %v13210_v47 = vpack.c.bf16 %v6147_v51, %v6145_v26  ;;  %v5969_v12 = vmul.f32 %v8754_v43, %v12836_v8  ;;  %v8760_v2 = vadd.f32 %v14350_v42, %v5788_v44  ;;  %v5790_v38 = vpop.f32.mrb[167].mxu0  ;;  %v9731_v44 = vld [vmem:[#allocation5 + $0x144] ss:$8 sps:$4 sm:$0xff]  }
 0x4f3   :  { %v13214_v30 = vpack.c.bf16 %v6148_v0, %v6146_v50  ;;  %v5970_v9 = vmul.f32 %v8757_v11, %v12838_v14  ;;  %v8763_v5 = vadd.f32 %v14351_v24, %v5790_v38 }
 0x4f4   :  { %v6065_v22 = vadd.f32 %v12841_v1, %v5969_v12  ;;  %v5971_v13 = vmul.f32 %v8760_v2, %v12836_v8  ;;  %v6489_v10 = vmul.bf16 %v9726_v41, %v13210_v47  ;;  %v9729_v12 = vld [vmem:[#allocation5 + $0x140] ss:$8 sps:$4 sm:$0xff]   ;;  %v9732_v2 = vld [vmem:[#allocation5 + $0x150] ss:$8 sps:$4 sm:$0xff]  }
 0x4f5   :  { %v6066_v36 = vadd.f32 %v12844_v28, %v5970_v9  ;;  %v5972_v26 = vmul.f32 %v8763_v5, %v12838_v14  ;;  %v6490_v51 = vmul.bf16 %v9728_v45, %v13214_v30  ;;  %v9734_v14 = vld [vmem:[#allocation5 + $0x154] ss:$8 sps:$4 sm:$0xff]   ;;  %v13236_v41 = vld [vmem:[%s13676_s5 + $0x8] ss:$12 sps:$4 sm:$0xff]   ;;  %v6883_v24 = vmul.bf16 %v9732_v2, %v12858_v32  ;;  %v9736_v5 = vld [vmem:[#allocation5 + $0x160] ss:$8 sps:$4 sm:$0xff]  }
 0x4f6   :  { %v6067_v43 = vadd.f32 %v12841_v1, %v5971_v13  ;;  %v6149_v0 = vmax.f32 %v6065_v22, 0.0  ;;  %v9738_v9 = vld [vmem:[#allocation5 + $0x164] ss:$8 sps:$4 sm:$0xff]   ;;  %v9741_v13 = vld [vmem:[#allocation5 + $0x174] ss:$8 sps:$4 sm:$0xff]  }
 0x4f7   :  { %v6068_v50 = vadd.f32 %v12844_v28, %v5972_v26  ;;  %6561 = vmatprep.subr.bf16.mxu1 %v6490_v51  ;;  %v6150_v38 = vmax.f32 %v6066_v36, 0.0  ;;  %v6884_v28 = vmul.bf16 %v9734_v14, %v12862_v17  ;;  %v6886_v22 = vmul.bf16 %v9738_v9, %v12883_v6  ;;  %v13245_v36 = vld [vmem:[%s13676_s5 + $0x4] ss:$12 sps:$4 sm:$0xff]   ;;  %v9739_v51 = vld [vmem:[#allocation5 + $0x170] ss:$8 sps:$4 sm:$0xff]  }
 0x4f8   :  { %v6151_v27 = vmax.f32 %v6067_v43, 0.0  ;;  %6562 = vmatpush1.bf16.msra.mxu1 %v6489_v10  ;;  %v6885_v26 = vmul.bf16 %v9736_v5, %v12879_v57  ;;  %v6888_v43 = vmul.bf16 %v9741_v13, %v12901_v3  ;;  %v9744_v10 = vld [vmem:[#allocation5 + $0x184] ss:$8 sps:$4 sm:$0xff]  }
 0x4f9   :  { %v6152_v11 = vmax.f32 %v6068_v50, 0.0  ;;  %v6887_v50 = vmul.bf16 %v9739_v51, %v12897_v39  ;;  %v9750_v14 = vld [vmem:[#allocation5 + $0x1a4] ss:$8 sps:$4 sm:$0xff]  }
 0x4fa   :  { %v13226_v8 = vpack.c.bf16 %v6151_v27, %v6149_v0  ;;  %v9742_v0 = vld [vmem:[#allocation5 + $0x180] ss:$8 sps:$4 sm:$0xff]   ;;  %v6890_v27 = vmul.bf16 %v9744_v10, %v12919_v31  ;;  %v6894_v2 = vmul.bf16 %v9750_v14, %v12955_v23 }
 0x4fb   :  { %v13228_v42 = vpack.c.bf16 %v6152_v11, %v6150_v38  ;;  %v9747_v38 = vld [vmem:[#allocation5 + $0x194] ss:$8 sps:$4 sm:$0xff]   ;;  %v6889_v11 = vmul.bf16 %v9742_v0, %v12915_v37 }
 0x4fc   :  { %v6491_v1 = vmul.bf16 %v9729_v12, %v13226_v8  ;;  %v6892_v12 = vmul.bf16 %v9747_v38, %v12937_v59 }
 0x4fd   :  { %v6492_v45 = vmul.bf16 %v9731_v44, %v13228_v42  ;;  %v9745_v44 = vld [vmem:[#allocation5 + $0x190] ss:$8 sps:$4 sm:$0xff]  }
 0x4ff   :  { %6563 = vmatprep.subr.bf16.mxu1 %v6492_v45  ;;  %v6891_v45 = vmul.bf16 %v9745_v44, %v12933_v62 }
 0x500   :  { %6564 = vmatpush1.bf16.msra.mxu1 %v6491_v1  ;;  %v9748_v1 = vld [vmem:[#allocation5 + $0x1a0] ss:$8 sps:$4 sm:$0xff]  }
 0x501   :  { %6925 = vmatprep.subr.bf16.mxu1 %v6884_v28  ;;  %v9753_v28 = vld [vmem:[#allocation5 + $0x1b4] ss:$8 sps:$4 sm:$0xff]   ;;  %v6893_v9 = vmul.bf16 %v9748_v1, %v12951_v40 }
 0x502   :  { %v6896_v5 = vmul.bf16 %v9753_v28, %v12973_v33 }
 0x503   :  { %8134 = vmatmul.mubr.msk.bf16.vlgmr.msra.gmra.mrb[168].mxu1 %vm6508_vm5, %v13236_v41 }
 0x504   :  { %6926 = vmatpush1.bf16.msra.mxu1 %v6883_v24  ;;  %6957 = vmatprep.mubr.bf16.mxu1 %v13245_v36  ;;  %v9751_v24 = vld [vmem:[#allocation5 + $0x1b0] ss:$8 sps:$4 sm:$0xff]  }
 0x505   :  { %6927 = vmatprep.subr.bf16.mxu1 %v6886_v22  ;;  %v9756_v22 = vld [vmem:[#allocation5 + $0x1c4] ss:$8 sps:$4 sm:$0xff]   ;;  %v6895_v13 = vmul.bf16 %v9751_v24, %v12969_v48 }
 0x506   :  { %v6898_v51 = vmul.bf16 %v9756_v22, %v12991_v29 }
 0x508   :  { %6928 = vmatpush1.bf16.msra.mxu1 %v6885_v26  ;;  %v9754_v26 = vld [vmem:[#allocation5 + $0x1c0] ss:$8 sps:$4 sm:$0xff]  }
 0x509   :  { %6929 = vmatprep.subr.bf16.mxu1 %v6888_v43  ;;  %v9759_v43 = vld [vmem:[#allocation5 + $0x1d4] ss:$8 sps:$4 sm:$0xff]   ;;  %v6897_v10 = vmul.bf16 %v9754_v26, %v12987_v7 }
 0x50a   :  { %v6900_v0 = vmul.bf16 %v9759_v43, %v13009_v20 }
 0x50c   :  { %6930 = vmatpush1.bf16.msra.mxu1 %v6887_v50  ;;  %v9757_v50 = vld [vmem:[#allocation5 + $0x1d0] ss:$8 sps:$4 sm:$0xff]  }
 0x50d   :  { %6931 = vmatprep.subr.bf16.mxu1 %v6890_v27  ;;  %v9762_v27 = vld [vmem:[#allocation5 + $0x1e4] ss:$8 sps:$4 sm:$0xff]   ;;  %v6899_v38 = vmul.bf16 %v9757_v50, %v13005_v58 }
 0x50e   :  { %v6902_v44 = vmul.bf16 %v9762_v27, %v13027_v46 }
 0x510   :  { %6932 = vmatpush1.bf16.msra.mxu1 %v6889_v11  ;;  %v9760_v11 = vld [vmem:[#allocation5 + $0x1e0] ss:$8 sps:$4 sm:$0xff]  }
 0x511   :  { %6933 = vmatprep.subr.bf16.mxu1 %v6892_v12  ;;  %v9765_v12 = vld [vmem:[#allocation5 + $0x1f4] ss:$8 sps:$4 sm:$0xff]   ;;  %v6901_v14 = vmul.bf16 %v9760_v11, %v13023_v15 }
 0x512   :  { %v6904_v1 = vmul.bf16 %v9765_v12, %v13045_v25 }
 0x514   :  { %6934 = vmatpush1.bf16.msra.mxu1 %v6891_v45  ;;  %v9763_v45 = vld [vmem:[#allocation5 + $0x1f0] ss:$8 sps:$4 sm:$0xff]  }
 0x515   :  { %6935 = vmatprep.subr.bf16.mxu1 %v6894_v2  ;;  %v9768_v2 = vld [vmem:[#allocation5 + $0x204] ss:$8 sps:$4 sm:$0xff]   ;;  %v6903_v28 = vmul.bf16 %v9763_v45, %v13041_v34 }
 0x516   :  { %v6906_v24 = vmul.bf16 %v9768_v2, %v13063_v4 }
 0x518   :  { %6936 = vmatpush1.bf16.msra.mxu1 %v6893_v9  ;;  %v9766_v9 = vld [vmem:[#allocation5 + $0x200] ss:$8 sps:$4 sm:$0xff]  }
 0x519   :  { %6937 = vmatprep.subr.bf16.mxu1 %v6896_v5  ;;  %v9771_v5 = vld [vmem:[#allocation5 + $0x214] ss:$8 sps:$4 sm:$0xff]   ;;  %v6905_v22 = vmul.bf16 %v9766_v9, %v13059_v54 }
 0x51a   :  { %v6908_v26 = vmul.bf16 %v9771_v5, %v13081_v53 }
 0x51c   :  { %6938 = vmatpush1.bf16.msra.mxu1 %v6895_v13  ;;  %v9769_v13 = vld [vmem:[#allocation5 + $0x210] ss:$8 sps:$4 sm:$0xff]  }
 0x51d   :  { %6939 = vmatprep.subr.bf16.mxu1 %v6898_v51  ;;  %v9774_v51 = vld [vmem:[#allocation5 + $0x224] ss:$8 sps:$4 sm:$0xff]   ;;  %v6907_v43 = vmul.bf16 %v9769_v13, %v13077_v49 }
 0x51e   :  { %v6910_v50 = vmul.bf16 %v9774_v51, %v13099_v63  ;;  %v14352_v51 = vld [vmem:[#allocation87_spill] sm:$0xff] }
 0x520   :  { %6940 = vmatpush1.bf16.msra.mxu1 %v6897_v10  ;;  %v9772_v10 = vld [vmem:[#allocation5 + $0x220] ss:$8 sps:$4 sm:$0xff]  }
 0x521   :  { %6941 = vmatprep.subr.bf16.mxu1 %v6900_v0  ;;  %v9777_v0 = vld [vmem:[#allocation5 + $0x234] ss:$8 sps:$4 sm:$0xff]   ;;  %v6909_v27 = vmul.bf16 %v9772_v10, %v13095_v61  ;;  %v9787_v10 = vld [vmem:[#allocation5 + $0x270] ss:$8 sps:$4 sm:$0xff]  }
 0x522   :  { %v6912_v11 = vmul.bf16 %v9777_v0, %v13117_v55 }
 0x524   :  { %6942 = vmatpush1.bf16.msra.mxu1 %v6899_v38  ;;  %v9775_v38 = vld [vmem:[#allocation5 + $0x230] ss:$8 sps:$4 sm:$0xff]  }
 0x525   :  { %6943 = vmatprep.subr.bf16.mxu1 %v6902_v44  ;;  %v9780_v44 = vld [vmem:[#allocation5 + $0x244] ss:$8 sps:$4 sm:$0xff]   ;;  %v6911_v12 = vmul.bf16 %v9775_v38, %v13113_v60  ;;  %v14354_v38 = vld [vmem:[#allocation89_spill] sm:$0xff] }
 0x526   :  { %v6914_v45 = vmul.bf16 %v9780_v44, %v13135_v52  ;;  %v9790_v44 = vld [vmem:[#allocation5 + $0x280] ss:$8 sps:$4 sm:$0xff]  }
 0x528   :  { %6944 = vmatpush1.bf16.msra.mxu1 %v6901_v14  ;;  %v9778_v14 = vld [vmem:[#allocation5 + $0x240] ss:$8 sps:$4 sm:$0xff]  }
 0x529   :  { %6945 = vmatprep.subr.bf16.mxu1 %v6904_v1  ;;  %v9783_v1 = vld [vmem:[#allocation5 + $0x254] ss:$8 sps:$4 sm:$0xff]   ;;  %v6913_v2 = vmul.bf16 %v9778_v14, %v13131_v19  ;;  %v6921_v14 = vmul.bf16 %v9790_v44, %v13210_v47 }
 0x52a   :  { %v6916_v9 = vmul.bf16 %v9783_v1, %v13158_v35  ;;  %v8199_v44 = vld [vmem:[%s13677_s6 + $0x1a8] sm:$0xff] }
 0x52c   :  { %6946 = vmatpush1.bf16.msra.mxu1 %v6903_v28  ;;  %v9781_v28 = vld [vmem:[#allocation5 + $0x250] ss:$8 sps:$4 sm:$0xff]  }
 0x52d   :  { %6947 = vmatprep.subr.bf16.mxu1 %v6906_v24  ;;  %v9786_v24 = vld [vmem:[#allocation5 + $0x264] ss:$8 sps:$4 sm:$0xff]   ;;  %v6915_v5 = vmul.bf16 %v9781_v28, %v13154_v18  ;;  %v8194_v28 = vld [vmem:[%s13677_s6 + $0x180] sm:$0xff] }
 0x52e   :  { %v6918_v13 = vmul.bf16 %v9786_v24, %v13178_v56  ;;  %v8178_v24 = vld [vmem:[%s13677_s6 + $0x100] sm:$0xff] }
 0x530   :  { %6948 = vmatpush1.bf16.msra.mxu1 %v6905_v22  ;;  %v9784_v22 = vld [vmem:[#allocation5 + $0x260] ss:$8 sps:$4 sm:$0xff]  }
 0x531   :  { %6949 = vmatprep.subr.bf16.mxu1 %v6908_v26  ;;  %v9789_v26 = vld [vmem:[#allocation5 + $0x274] ss:$8 sps:$4 sm:$0xff]  }
 0x534   :  { %6950 = vmatpush1.bf16.msra.mxu1 %v6907_v43  ;;  %v6917_v43 = vmul.bf16 %v9784_v22, %v14352_v51  ;;  %v8179_v22 = vld [vmem:[%s13677_s6 + $0x108] sm:$0xff] }
 0x535   :  { %6951 = vmatprep.subr.bf16.mxu1 %v6910_v50  ;;  %v14353_v50 = vld [vmem:[#allocation23_spill] sm:$0xff] }
 0x536   :  { %v6920_v0 = vmul.bf16 %v9789_v26, %v14353_v50  ;;  %v8197_v26 = vld [vmem:[%s13677_s6 + $0x198] sm:$0xff] }
 0x538   :  { %6952 = vmatpush1.bf16.msra.mxu1 %v6909_v27  ;;  %v9792_v27 = vld [vmem:[#allocation5 + $0x284] ss:$8 sps:$4 sm:$0xff]  }
 0x539   :  { %6953 = vmatprep.subr.bf16.mxu1 %v6912_v11  ;;  %v6919_v11 = vmul.bf16 %v9787_v10, %v14354_v38 }
 0x53c   :  { %6954 = vmatpush1.bf16.msra.mxu1 %v6911_v12  ;;  %v9795_v12 = vld [vmem:[#allocation5 + $0x294] ss:$8 sps:$4 sm:$0xff]  }
 0x53d   :  { %6955 = vmatprep.subr.bf16.mxu1 %v6914_v45  ;;  %v9793_v45 = vld [vmem:[#allocation5 + $0x290] ss:$8 sps:$4 sm:$0xff]   ;;  %v6924_v1 = vmul.bf16 %v9795_v12, %v13228_v42 }
 0x540   :  { %6956 = vmatpush1.bf16.msra.mxu1 %v6913_v2  ;;  %v6923_v2 = vmul.bf16 %v9793_v45, %v13226_v8  ;;  %v8183_v45 = vld [vmem:[%s13677_s6 + $0x128] sm:$0xff] }
 0x541   :  { %6968 = vmatprep.subr.bf16.mxu1 %v6916_v9  ;;  %v8195_v9 = vld [vmem:[%s13677_s6 + $0x188] sm:$0xff] }
 0x543   :  { %6958 = vmatmul.mubr.bf16.vlgmr.msra.gmra.mrb[172].mxu1 %v13150_v21  ;;  %v6922_v21 = vmul.bf16 %v9792_v27, %v13214_v30  ;;  %v8181_v27 = vld [vmem:[%s13677_s6 + $0x118] sm:$0xff] }
 0x544   :  { %6969 = vmatpush1.bf16.msra.mxu1 %v6915_v5  ;;  %7000 = vmatprep.mubr.bf16.mxu1 %v14336_v16  ;;  %v8400_v5 = vpack.c.bf16 %v8195_v9, %v8194_v28 }
 0x545   :  { %6970 = vmatprep.subr.bf16.mxu1 %v6918_v13  ;;  %v8196_v13 = vld [vmem:[%s13677_s6 + $0x190] sm:$0xff] }
 0x546   :  { %v8404_v10 = vpack.c.bf16 %v8197_v26, %v8196_v13  ;;  %v8203_v13 = vld [vmem:[%s13677_s6 + $0x1c8] sm:$0xff] }
 0x548   :  { %6971 = vmatpush1.bf16.msra.mxu1 %v6917_v43  ;;  %v8402_v43 = vpack.c.bf16 %v8179_v22, %v8178_v24  ;;  %v8184_v24 = vld [vmem:[%s13677_s6 + $0x130] sm:$0xff]  ;;  %v8202_v22 = vld [vmem:[%s13677_s6 + $0x1c0] sm:$0xff] }
 0x549   :  { %6972 = vmatprep.subr.bf16.mxu1 %v6920_v0  ;;  %v8180_v0 = vld [vmem:[%s13677_s6 + $0x110] sm:$0xff] }
 0x54c   :  { %6973 = vmatpush1.bf16.msra.mxu1 %v6919_v11  ;;  %v8198_v11 = vld [vmem:[%s13677_s6 + $0x1a0] sm:$0xff] }
 0x54d   :  { %6974 = vmatprep.subr.bf16.mxu1 %v6922_v21  ;;  %v8406_v21 = vpack.c.bf16 %v8181_v27, %v8180_v0  ;;  %v8408_v12 = vpack.c.bf16 %v8199_v44, %v8198_v11  ;;  %v8187_v0 = vld [vmem:[%s13677_s6 + $0x148] sm:$0xff]  ;;  %v8204_v27 = vld [vmem:[%s13677_s6 + $0x1d0] sm:$0xff]  ;;  %v8205_v11 = vld [vmem:[%s13677_s6 + $0x1d8] sm:$0xff] }
 0x550   :  { %6975 = vmatpush1.bf16.msra.mxu1 %v6921_v14  ;;  %v8182_v14 = vld [vmem:[%s13677_s6 + $0x120] sm:$0xff] }
 0x551   :  { %6976 = vmatprep.subr.bf16.mxu1 %v6924_v1  ;;  %v8200_v1 = vld [vmem:[%s13677_s6 + $0x1b0] sm:$0xff]  ;;  %v8410_v28 = vpack.c.bf16 %v8183_v45, %v8182_v14  ;;  %v8189_v14 = vld [vmem:[%s13677_s6 + $0x158] sm:$0xff]  ;;  %v8206_v45 = vld [vmem:[%s13677_s6 + $0x1e0] sm:$0xff] }
 0x554   :  { %6977 = vmatpush1.bf16.msra.mxu1 %v6923_v2  ;;  %v8201_v2 = vld [vmem:[%s13677_s6 + $0x1b8] sm:$0xff] }
 0x555   :  { %8401 = vmatprep.subr.bf16.mxu1 %v8400_v5  ;;  %v8412_v9 = vpack.c.bf16 %v8201_v2, %v8200_v1  ;;  %v8185_v5 = vld [vmem:[%s13677_s6 + $0x138] sm:$0xff]  ;;  %v8207_v1 = vld [vmem:[%s13677_s6 + $0x1e8] sm:$0xff] }
 0x556   :  { %v8414_v26 = vpack.c.bf16 %v8185_v5, %v8184_v24  ;;  %v8191_v24 = vld [vmem:[%s13677_s6 + $0x168] sm:$0xff]  ;;  %v8208_v5 = vld [vmem:[%s13677_s6 + $0x1f0] sm:$0xff] }
 0x557   :  { %8177 = vmatmul.mubr.msk.bf16.vlgmr.msra.gmra.mrb[172].mxu1 %vm6508_vm5, %v13236_v41 }
 0x558   :  { %8403 = vmatpush3.bf16.msra.mxu1 %v8402_v43  ;;  %v8416_v43 = vpack.c.bf16 %v8203_v13, %v8202_v22  ;;  %v8209_v22 = vld [vmem:[%s13677_s6 + $0x1f8] sm:$0xff] }
 0x559   :  { %8405 = vmatprep.subr.bf16.mxu1 %v8404_v10  ;;  %v8186_v10 = vld [vmem:[%s13677_s6 + $0x140] sm:$0xff] }
 0x55a   :  { %v8418_v44 = vpack.c.bf16 %v8187_v0, %v8186_v10  ;;  %v8193_v10 = vld [vmem:[%s13677_s6 + $0x178] sm:$0xff] }
 0x55c   :  { %8407 = vmatpush3.bf16.msra.mxu1 %v8406_v21  ;;  %v8420_v21 = vpack.c.bf16 %v8205_v11, %v8204_v27  ;;  %v6614_v27 = vld [vmem:[%s13677_s6 + $0x80] sm:$0xff]  ;;  %v6615_v11 = vld [vmem:[%s13677_s6 + $0x88] sm:$0xff] }
 0x55d   :  { %8409 = vmatprep.subr.bf16.mxu1 %v8408_v12  ;;  %v8188_v12 = vld [vmem:[%s13677_s6 + $0x150] sm:$0xff] }
 0x55e   :  { %v8422_v2 = vpack.c.bf16 %v8189_v14, %v8188_v12 }
 0x560   :  { %8411 = vmatpush3.bf16.msra.mxu1 %v8410_v28  ;;  %v8424_v28 = vpack.c.bf16 %v8207_v1, %v8206_v45  ;;  %v8269_v1 = vld [vmem:[%s13677_s6 + $0x280] sm:$0xff] }
 0x561   :  { %8413 = vmatprep.subr.bf16.mxu1 %v8412_v9  ;;  %v8190_v9 = vld [vmem:[%s13677_s6 + $0x160] sm:$0xff] }
 0x562   :  { %v8426_v13 = vpack.c.bf16 %v8191_v24, %v8190_v9  ;;  %v8254_v24 = vld [vmem:[%s13677_s6 + $0x208] sm:$0xff] }
 0x564   :  { %8415 = vmatpush3.bf16.msra.mxu1 %v8414_v26  ;;  %v8428_v26 = vpack.c.bf16 %v8209_v22, %v8208_v5  ;;  %v8271_v5 = vld [vmem:[%s13677_s6 + $0x290] sm:$0xff]  ;;  %v8272_v22 = vld [vmem:[%s13677_s6 + $0x298] sm:$0xff] }
 0x565   :  { %8417 = vmatprep.subr.bf16.mxu1 %v8416_v43  ;;  %v8192_v43 = vld [vmem:[%s13677_s6 + $0x170] sm:$0xff] }
 0x566   :  { %v8430_v0 = vpack.c.bf16 %v8193_v10, %v8192_v43  ;;  %v8255_v43 = vld [vmem:[%s13677_s6 + $0x210] sm:$0xff]  ;;  %v8256_v10 = vld [vmem:[%s13677_s6 + $0x218] sm:$0xff] }
 0x568   :  { %8419 = vmatpush3.bf16.msra.mxu1 %v8418_v44  ;;  %v8432_v44 = vpack.c.bf16 %v6615_v11, %v6614_v27  ;;  %v6598_v27 = vld [vmem:[%s13677_s6] sm:$0xff]  ;;  %v6599_v11 = vld [vmem:[%s13677_s6 + $0x8] sm:$0xff] }
 0x569   :  { %8421 = vmatprep.subr.bf16.mxu1 %v8420_v21 }
 0x56c   :  { %8423 = vmatpush3.bf16.msra.mxu1 %v8422_v2  ;;  %v8270_v2 = vld [vmem:[%s13677_s6 + $0x288] sm:$0xff] }
 0x56d   :  { %8425 = vmatprep.subr.bf16.mxu1 %v8424_v28  ;;  %v8253_v28 = vld [vmem:[%s13677_s6 + $0x200] sm:$0xff]  ;;  %v13408_v9 = vpack.c.bf16 %v8270_v2, %v8269_v1  ;;  %v6617_v1 = vld [vmem:[%s13677_s6 + $0x98] sm:$0xff] }
 0x56f   :  { %8465 = vmatprep.subr.bf16.mxu0 %v13408_v9 }
 0x570   :  { %8427 = vmatpush3.bf16.msra.mxu1 %v8426_v13  ;;  %v13419_v13 = vpack.c.bf16 %v8254_v24, %v8253_v28  ;;  %v8434_v28 = vpack.c.bf16 %v6599_v11, %v6598_v27  ;;  %v6619_v27 = vld [vmem:[%s13677_s6 + $0xa8] sm:$0xff] }
 0x571   :  { %8429 = vmatprep.subr.bf16.mxu1 %v8428_v26  ;;  %v13421_v26 = vpack.c.bf16 %v8272_v22, %v8271_v5  ;;  %v6600_v22 = vld [vmem:[%s13677_s6 + $0x10] sm:$0xff] }
 0x572   :  { %14355 = vst [vmem:[#allocation90_spill] sm:$0xff] %v13419_v13  ;;  %8467 = vmatpush3.bf16.msra.mxu0 %v13419_v13  ;;  %v6620_v13 = vld [vmem:[%s13677_s6 + $0xb0] sm:$0xff] }
 0x573   :  { %14356 = vst [vmem:[#allocation91_spill] sm:$0xff] %v13421_v26  ;;  %8469 = vmatprep.subr.bf16.mxu0 %v13421_v26  ;;  %v6618_v26 = vld [vmem:[%s13677_s6 + $0xa0] sm:$0xff] }
 0x574   :  { %8431 = vmatpush3.bf16.msra.mxu1 %v8430_v0  ;;  %v13431_v0 = vpack.c.bf16 %v8256_v10, %v8255_v43  ;;  %v6601_v43 = vld [vmem:[%s13677_s6 + $0x18] sm:$0xff] }
 0x575   :  { %8433 = vmatprep.subr.bf16.mxu1 %v8432_v44  ;;  %v6616_v44 = vld [vmem:[%s13677_s6 + $0x90] sm:$0xff] }
 0x576   :  { %14357 = vst [vmem:[#allocation92_spill] sm:$0xff] %v13431_v0  ;;  %8471 = vmatpush3.bf16.msra.mxu0 %v13431_v0  ;;  %v8436_v5 = vpack.c.bf16 %v6617_v1, %v6616_v44  ;;  %v8438_v44 = vpack.c.bf16 %v6601_v43, %v6600_v22  ;;  %v8440_v1 = vpack.c.bf16 %v6619_v27, %v6618_v26  ;;  %v6603_v0 = vld [vmem:[%s13677_s6 + $0x28] sm:$0xff]  ;;  %v6605_v22 = vld [vmem:[%s13677_s6 + $0x38] sm:$0xff]  ;;  %v6622_v43 = vld [vmem:[%s13677_s6 + $0xc0] sm:$0xff] }
 0x577   :  { %v6607_v27 = vld [vmem:[%s13677_s6 + $0x48] sm:$0xff] }
 0x5d6   :  { %v13393_v21 = vpop.f32.mrb[168].mxu1 }
 0x5d7   :  { %v6591_v12 = vpop.f32.mrb[169].mxu1 }
 0x5d8   :  { %v13395_v14 = vpop.f32.mrb[170].mxu1 }
 0x5d9   :  { %v13397_v45 = vpop.f32.mrb[171].mxu1 }
 0x62a   :  { %v7002_v2 = vpop.f32.mrb[172].mxu1 }
 0x62b   :  { %v7004_v24 = vpop.f32.mrb[173].mxu1 }
 0x62c   :  { %7108 = vmatprep.mubr.f32.mxu1 %v7004_v24  ;;  %v7006_v10 = vpop.f32.mrb[174].mxu1  ;;  %v6602_v24 = vld [vmem:[%s13677_s6 + $0x20] sm:$0xff] }
 0x62d   :  { %7109 = vmatmul.mubr.f32.vlgmr.msra.gmra.mrb[176].mxu1 %v7002_v2  ;;  %v7008_v11 = vpop.f32.mrb[175].mxu1  ;;  %v6621_v2 = vld [vmem:[%s13677_s6 + $0xb8] sm:$0xff]  ;;  %v8442_v26 = vpack.c.bf16 %v6603_v0, %v6602_v24  ;;  %v6606_v0 = vld [vmem:[%s13677_s6 + $0x40] sm:$0xff] }
 0x62e   :  { %8435 = vmatpush3.bf16.msra.mxu1 %v8434_v28  ;;  %7113 = vmatprep.mubr.f32.mxu1 %v7008_v11  ;;  %v8444_v28 = vpack.c.bf16 %v6621_v2, %v6620_v13  ;;  %v6624_v11 = vld [vmem:[%s13677_s6 + $0xd0] sm:$0xff] }
 0x62f   :  { %8437 = vmatprep.subr.bf16.mxu1 %v8436_v5  ;;  %v6604_v5 = vld [vmem:[%s13677_s6 + $0x30] sm:$0xff] }
 0x630   :  { %v6608_v2 = vld [vmem:[%s13677_s6 + $0x50] sm:$0xff] }
 0x631   :  { %7114 = vmatmul.mubr.f32.gmra.mrb[178].mxu1 %v7006_v10  ;;  %v6623_v10 = vld [vmem:[%s13677_s6 + $0xc8] sm:$0xff] }
 0x632   :  { %8439 = vmatpush3.bf16.msra.mxu1 %v8438_v44  ;;  %7183 = vmatprep.mubr.f32.mxu1 %v6591_v12  ;;  %v8446_v12 = vpack.c.bf16 %v6605_v22, %v6604_v5  ;;  %v8448_v13 = vpack.c.bf16 %v6623_v10, %v6622_v43  ;;  %v6625_v44 = vld [vmem:[%s13677_s6 + $0xd8] sm:$0xff]  ;;  %v6627_v5 = vld [vmem:[%s13677_s6 + $0xe8] sm:$0xff]  ;;  %v6610_v10 = vld [vmem:[%s13677_s6 + $0x60] sm:$0xff] }
 0x633   :  { %8441 = vmatprep.subr.bf16.mxu1 %v8440_v1  ;;  %v8450_v1 = vpack.c.bf16 %v6607_v27, %v6606_v0  ;;  %v8452_v24 = vpack.c.bf16 %v6625_v44, %v6624_v11  ;;  %v6629_v0 = vld [vmem:[%s13677_s6 + $0xf8] sm:$0xff]  ;;  %v6612_v44 = vld [vmem:[%s13677_s6 + $0x70] sm:$0xff] }
 0x636   :  { %8443 = vmatpush3.bf16.msra.mxu1 %v8442_v26  ;;  %v6609_v26 = vld [vmem:[%s13677_s6 + $0x58] sm:$0xff] }
 0x637   :  { %8445 = vmatprep.subr.bf16.mxu1 %v8444_v28  ;;  %v6626_v28 = vld [vmem:[%s13677_s6 + $0xe0] sm:$0xff]  ;;  %v8454_v22 = vpack.c.bf16 %v6609_v26, %v6608_v2  ;;  %v9796_v26 = vld [vmem:[#allocation5 + $0x2a0] ss:$8 sps:$4 sm:$0xff]  }
 0x638   :  { %v8456_v43 = vpack.c.bf16 %v6627_v5, %v6626_v28  ;;  %v9801_v5 = vld [vmem:[#allocation5 + $0x2b4] ss:$8 sps:$4 sm:$0xff]  }
 0x63a   :  { %8447 = vmatpush3.bf16.msra.mxu1 %v8446_v12  ;;  %v6611_v12 = vld [vmem:[%s13677_s6 + $0x68] sm:$0xff] }
 0x63b   :  { %8449 = vmatprep.subr.bf16.mxu1 %v8448_v13  ;;  %v6628_v13 = vld [vmem:[%s13677_s6 + $0xf0] sm:$0xff]  ;;  %v8458_v27 = vpack.c.bf16 %v6611_v12, %v6610_v10  ;;  %v7450_v10 = vmul.bf16 %v9801_v5, %v12883_v6  ;;  %v9805_v6 = vld [vmem:[#allocation5 + $0x2d0] ss:$8 sps:$4 sm:$0xff]  }
 0x63c   :  { %v8460_v11 = vpack.c.bf16 %v6629_v0, %v6628_v13  ;;  %v9804_v12 = vld [vmem:[#allocation5 + $0x2c4] ss:$8 sps:$4 sm:$0xff]   ;;  %v9802_v0 = vld [vmem:[#allocation5 + $0x2c0] ss:$8 sps:$4 sm:$0xff]  }
 0x63d   :  { %v9820_v5 = vld [vmem:[#allocation5 + $0x320] ss:$8 sps:$4 sm:$0xff]  }
 0x63e   :  { %8451 = vmatpush3.bf16.msra.mxu1 %v8450_v1  ;;  %v6613_v1 = vld [vmem:[%s13677_s6 + $0x78] sm:$0xff] }
 0x63f   :  { %8453 = vmatprep.subr.bf16.mxu1 %v8452_v24  ;;  %v9798_v24 = vld [vmem:[#allocation5 + $0x2a4] ss:$8 sps:$4 sm:$0xff]   ;;  %v8462_v2 = vpack.c.bf16 %v6613_v1, %v6612_v44  ;;  %v9813_v44 = vld [vmem:[#allocation5 + $0x2f4] ss:$8 sps:$4 sm:$0xff]  }
 0x640   :  { %v7448_v28 = vmul.bf16 %v9798_v24, %v12862_v17  ;;  %v7452_v17 = vmul.bf16 %v9804_v12, %v12901_v3  ;;  %v7458_v1 = vmul.bf16 %v9813_v44, %v12955_v23  ;;  %v9814_v24 = vld [vmem:[#allocation5 + $0x300] ss:$8 sps:$4 sm:$0xff]  }
 0x641   :  { %v9826_v12 = vld [vmem:[#allocation5 + $0x340] ss:$8 sps:$4 sm:$0xff]  }
 0x642   :  { %8455 = vmatpush3.bf16.msra.mxu1 %v8454_v22  ;;  %v7447_v22 = vmul.bf16 %v9796_v26, %v12858_v32  ;;  %v7451_v32 = vmul.bf16 %v9802_v0, %v12897_v39  ;;  %v9816_v39 = vld [vmem:[#allocation5 + $0x304] ss:$8 sps:$4 sm:$0xff]   ;;  %v9817_v26 = vld [vmem:[#allocation5 + $0x310] ss:$8 sps:$4 sm:$0xff]  }
 0x643   :  { %8457 = vmatprep.subr.bf16.mxu1 %v8456_v43  ;;  %v9799_v43 = vld [vmem:[#allocation5 + $0x2b0] ss:$8 sps:$4 sm:$0xff]   ;;  %v7461_v23 = vmul.bf16 %v9817_v26, %v12987_v7  ;;  %v9831_v7 = vld [vmem:[#allocation5 + $0x354] ss:$8 sps:$4 sm:$0xff]  }
 0x644   :  { %v7449_v13 = vmul.bf16 %v9799_v43, %v12879_v57  ;;  %v7453_v57 = vmul.bf16 %v9805_v6, %v12915_v37  ;;  %v9819_v37 = vld [vmem:[#allocation5 + $0x314] ss:$8 sps:$4 sm:$0xff]   ;;  %v9823_v43 = vld [vmem:[#allocation5 + $0x330] ss:$8 sps:$4 sm:$0xff]  }
 0x645   :  { %v9829_v0 = vld [vmem:[#allocation5 + $0x350] ss:$8 sps:$4 sm:$0xff]  }
 0x646   :  { %8459 = vmatpush3.bf16.msra.mxu1 %v8458_v27  ;;  %v9807_v27 = vld [vmem:[#allocation5 + $0x2d4] ss:$8 sps:$4 sm:$0xff]   ;;  %v9835_v6 = vld [vmem:[#allocation5 + $0x370] ss:$8 sps:$4 sm:$0xff]  }
 0x647   :  { %8461 = vmatprep.subr.bf16.mxu1 %v8460_v11  ;;  %v9808_v11 = vld [vmem:[#allocation5 + $0x2e0] ss:$8 sps:$4 sm:$0xff]  }
 0x648   :  { %v7455_v3 = vmul.bf16 %v9808_v11, %v12933_v62  ;;  %v9822_v62 = vld [vmem:[#allocation5 + $0x324] ss:$8 sps:$4 sm:$0xff]   ;;  %v9841_v11 = vld [vmem:[#allocation5 + $0x390] ss:$8 sps:$4 sm:$0xff]  }
 0x64a   :  { %8463 = vmatpush3.bf16.msra.mxu1 %v8462_v2  ;;  %v7460_v2 = vmul.bf16 %v9816_v39, %v12973_v33  ;;  %v7463_v33 = vmul.bf16 %v9820_v5, %v13005_v58  ;;  %v9834_v58 = vld [vmem:[#allocation5 + $0x364] ss:$8 sps:$4 sm:$0xff]   ;;  %v9849_v39 = vld [vmem:[#allocation5 + $0x3b4] ss:$8 sps:$4 sm:$0xff]  }
 0x64b   :  { %7489 = vmatprep.subr.bf16.mxu1 %v7448_v28  ;;  %v7462_v28 = vmul.bf16 %v9819_v37, %v12991_v29  ;;  %v7465_v29 = vmul.bf16 %v9823_v43, %v13023_v15  ;;  %v9837_v15 = vld [vmem:[#allocation5 + $0x374] ss:$8 sps:$4 sm:$0xff]   ;;  %v7482_v37 = vmul.bf16 %v9849_v39, %v13178_v56  ;;  %v9858_v5 = vld [vmem:[#allocation5 + $0x3e4] ss:$8 sps:$4 sm:$0xff]  }
 0x64d   :  { %7184 = vmatmul.mubr.f32.vlgmr.msra.gmra.mrb[180].mxu1 %v13393_v21  ;;  %v7454_v21 = vmul.bf16 %v9807_v27, %v12919_v31  ;;  %v9832_v27 = vld [vmem:[#allocation5 + $0x360] ss:$8 sps:$4 sm:$0xff]  }
 0x64e   :  { %7188 = vmatprep.mubr.f32.mxu1 %v13397_v45  ;;  %7490 = vmatpush1.bf16.msra.mxu1 %v7447_v22  ;;  %v9810_v45 = vld [vmem:[#allocation5 + $0x2e4] ss:$8 sps:$4 sm:$0xff]   ;;  %v7464_v22 = vmul.bf16 %v9822_v62, %v13009_v20  ;;  %v7467_v20 = vmul.bf16 %v9826_v12, %v13041_v34  ;;  %v9853_v62 = vld [vmem:[#allocation5 + $0x3d0] ss:$8 sps:$4 sm:$0xff]  }
 0x64f   :  { %7491 = vmatprep.subr.bf16.mxu1 %v7450_v10  ;;  %v9840_v34 = vld [vmem:[#allocation5 + $0x384] ss:$8 sps:$4 sm:$0xff]   ;;  %v7485_v56 = vmul.bf16 %v9853_v62, %v13210_v47 }
 0x650   :  { %v8275_v47 = vld [vmem:[%s13677_s6 + $0x2b0] sm:$0xff] }
 0x651   :  { %7189 = vmatmul.mubr.f32.gmra.mrb[182].mxu1 %v13395_v14  ;;  %v7456_v14 = vmul.bf16 %v9810_v45, %v12937_v59  ;;  %v7459_v59 = vmul.bf16 %v9814_v24, %v12969_v48  ;;  %v9828_v48 = vld [vmem:[#allocation5 + $0x344] ss:$8 sps:$4 sm:$0xff]   ;;  %v9838_v45 = vld [vmem:[#allocation5 + $0x380] ss:$8 sps:$4 sm:$0xff]   ;;  %v9847_v24 = vld [vmem:[#allocation5 + $0x3b0] ss:$8 sps:$4 sm:$0xff]  }
 0x652   :  { %7492 = vmatpush1.bf16.msra.mxu1 %v7449_v13  ;;  %7521 = vmatprep.mubr.bf16.mxu1 %v13245_v36  ;;  %v9811_v36 = vld [vmem:[#allocation5 + $0x2f0] ss:$8 sps:$4 sm:$0xff]   ;;  %v7468_v13 = vmul.bf16 %v9828_v48, %v13045_v25  ;;  %v7471_v25 = vmul.bf16 %v9832_v27, %v13077_v49  ;;  %v9846_v49 = vld [vmem:[#allocation5 + $0x3a4] ss:$8 sps:$4 sm:$0xff]  }
 0x653   :  { %7493 = vmatprep.subr.bf16.mxu1 %v7452_v17  ;;  %v7457_v31 = vmul.bf16 %v9811_v36, %v12951_v40  ;;  %v9825_v40 = vld [vmem:[#allocation5 + $0x334] ss:$8 sps:$4 sm:$0xff]   ;;  %v7470_v17 = vmul.bf16 %v9831_v7, %v13063_v4  ;;  %v7473_v4 = vmul.bf16 %v9835_v6, %v13095_v61  ;;  %v8279_v12 = vld [vmem:[%s13677_s6 + $0x2d0] sm:$0xff] }
 0x654   :  { %v7466_v10 = vmul.bf16 %v9825_v40, %v13027_v46  ;;  %v7469_v46 = vmul.bf16 %v9829_v0, %v13059_v54  ;;  %v9843_v54 = vld [vmem:[#allocation5 + $0x394] ss:$8 sps:$4 sm:$0xff]   ;;  %v8263_v0 = vld [vmem:[%s13677_s6 + $0x250] sm:$0xff] }
 0x655   :  { %v8274_v61 = vld [vmem:[%s13677_s6 + $0x2a8] sm:$0xff]  ;;  %v8277_v40 = vld [vmem:[%s13677_s6 + $0x2c0] sm:$0xff]  ;;  %v8283_v6 = vld [vmem:[%s13677_s6 + $0x2f0] sm:$0xff] }
 0x656   :  { %7494 = vmatpush1.bf16.msra.mxu1 %v7451_v32  ;;  %v7472_v32 = vmul.bf16 %v9834_v58, %v13081_v53  ;;  %v7475_v53 = vmul.bf16 %v9838_v45, %v13113_v60  ;;  %v8258_v60 = vld [vmem:[%s13677_s6 + $0x228] sm:$0xff]  ;;  %v8261_v48 = vld [vmem:[%s13677_s6 + $0x240] sm:$0xff]  ;;  %v8267_v45 = vld [vmem:[%s13677_s6 + $0x270] sm:$0xff] }
 0x657   :  { %7495 = vmatprep.subr.bf16.mxu1 %v7454_v21  ;;  %v7474_v21 = vmul.bf16 %v9837_v15, %v13099_v63  ;;  %v8273_v63 = vld [vmem:[%s13677_s6 + $0x2a0] sm:$0xff] }
 0x658   :  { %v8472_v44 = vpack.c.bf16 %v8274_v61, %v8273_v63  ;;  %v8281_v58 = vld [vmem:[%s13677_s6 + $0x2e0] sm:$0xff] }
 0x659   :  { %v8265_v15 = vld [vmem:[%s13677_s6 + $0x260] sm:$0xff] }
 0x65a   :  { %7496 = vmatpush1.bf16.msra.mxu1 %v7453_v57  ;;  %v7476_v57 = vmul.bf16 %v9840_v34, %v13117_v55  ;;  %v8257_v55 = vld [vmem:[%s13677_s6 + $0x220] sm:$0xff]  ;;  %8473 = vmatprep.subr.bf16.mxu0 %v8472_v44 }
 0x65b   :  { %7497 = vmatprep.subr.bf16.mxu1 %v7456_v14  ;;  %v7478_v14 = vmul.bf16 %v9843_v54, %v13135_v52  ;;  %v7477_v52 = vmul.bf16 %v9841_v11, %v13131_v19  ;;  %v8474_v36 = vpack.c.bf16 %v8258_v60, %v8257_v55  ;;  %v9852_v19 = vld [vmem:[#allocation5 + $0x3c4] ss:$8 sps:$4 sm:$0xff]  }
 0x65c   :  { %v7484_v26 = vmul.bf16 %v9852_v19, %v14353_v50  ;;  %v14358_v50 = vld [vmem:[#allocation90_spill] sm:$0xff] }
 0x65d   :  { %8475 = vmatpush3.bf16.msra.mxu0 %v8474_v36 }
 0x65e   :  { %7498 = vmatpush1.bf16.msra.mxu1 %v7455_v3  ;;  %v9844_v3 = vld [vmem:[#allocation5 + $0x3a0] ss:$8 sps:$4 sm:$0xff]  }
 0x65f   :  { %7499 = vmatprep.subr.bf16.mxu1 %v7458_v1  ;;  %v7480_v1 = vmul.bf16 %v9846_v49, %v13158_v35  ;;  %v7481_v35 = vmul.bf16 %v9847_v24, %v14352_v51 }
 0x662   :  { %7500 = vmatpush1.bf16.msra.mxu1 %v7457_v31  ;;  %v7479_v31 = vmul.bf16 %v9844_v3, %v13154_v18 }
 0x663   :  { %7501 = vmatprep.subr.bf16.mxu1 %v7460_v2  ;;  %v9985_v2 = vld [vmem:[%s13676_s5] ss:$12 sps:$4 sm:$0xff]  }
 0x666   :  { %7502 = vmatpush1.bf16.msra.mxu1 %v7459_v59  ;;  %v9850_v59 = vld [vmem:[#allocation5 + $0x3c0] ss:$8 sps:$4 sm:$0xff]  }
 0x667   :  { %7503 = vmatprep.subr.bf16.mxu1 %v7462_v28  ;;  %v9855_v28 = vld [vmem:[#allocation5 + $0x3d4] ss:$8 sps:$4 sm:$0xff]   ;;  %v7483_v18 = vmul.bf16 %v9850_v59, %v14354_v38  ;;  %v14360_v38 = vld [vmem:[#allocation92_spill] sm:$0xff] }
 0x66a   :  { %7504 = vmatpush1.bf16.msra.mxu1 %v7461_v23  ;;  %v7486_v23 = vmul.bf16 %v9855_v28, %v13214_v30  ;;  %v14359_v30 = vld [vmem:[#allocation91_spill] sm:$0xff]  ;;  %v8285_v28 = vld [vmem:[%s13678_s7] ss:$0 sm:$0xff] }
 0x66b   :  { %7505 = vmatprep.subr.bf16.mxu1 %v7464_v22  ;;  %v7488_v22 = vmul.bf16 %v9858_v5, %v13228_v42  ;;  %v8259_v42 = vld [vmem:[%s13677_s6 + $0x230] sm:$0xff] }
 0x66e   :  { %7506 = vmatpush1.bf16.msra.mxu1 %v7463_v33  ;;  %v8278_v33 = vld [vmem:[%s13677_s6 + $0x2c8] sm:$0xff] }
 0x66f   :  { %7507 = vmatprep.subr.bf16.mxu1 %v7466_v10  ;;  %v8480_v10 = vpack.c.bf16 %v8278_v33, %v8277_v40 }
 0x672   :  { %7508 = vmatpush1.bf16.msra.mxu1 %v7465_v29  ;;  %v8262_v29 = vld [vmem:[%s13677_s6 + $0x248] sm:$0xff] }
 0x673   :  { %7509 = vmatprep.subr.bf16.mxu1 %v7468_v13  ;;  %v8280_v13 = vld [vmem:[%s13677_s6 + $0x2d8] sm:$0xff]  ;;  %v8482_v7 = vpack.c.bf16 %v8262_v29, %v8261_v48 }
 0x676   :  { %7510 = vmatpush1.bf16.msra.mxu1 %v7467_v20  ;;  %v8484_v20 = vpack.c.bf16 %v8280_v13, %v8279_v12 }
 0x677   :  { %7511 = vmatprep.subr.bf16.mxu1 %v7470_v17  ;;  %v8264_v17 = vld [vmem:[%s13677_s6 + $0x258] sm:$0xff] }
 0x678   :  { %v8486_v27 = vpack.c.bf16 %v8264_v17, %v8263_v0 }
 0x67a   :  { %7512 = vmatpush1.bf16.msra.mxu1 %v7469_v46  ;;  %v8282_v46 = vld [vmem:[%s13677_s6 + $0x2e8] sm:$0xff] }
 0x67b   :  { %7513 = vmatprep.subr.bf16.mxu1 %v7472_v32  ;;  %v8488_v32 = vpack.c.bf16 %v8282_v46, %v8281_v58 }
 0x67e   :  { %7514 = vmatpush1.bf16.msra.mxu1 %v7471_v25  ;;  %v8266_v25 = vld [vmem:[%s13677_s6 + $0x268] sm:$0xff] }
 0x67f   :  { %7515 = vmatprep.subr.bf16.mxu1 %v7474_v21  ;;  %v8284_v21 = vld [vmem:[%s13677_s6 + $0x2f8] sm:$0xff]  ;;  %v8490_v34 = vpack.c.bf16 %v8266_v25, %v8265_v15 }
 0x682   :  { %7516 = vmatpush1.bf16.msra.mxu1 %v7473_v4  ;;  %v8492_v4 = vpack.c.bf16 %v8284_v21, %v8283_v6 }
 0x683   :  { %7517 = vmatprep.subr.bf16.mxu1 %v7476_v57  ;;  %v8268_v57 = vld [vmem:[%s13677_s6 + $0x278] sm:$0xff] }
 0x684   :  { %v8494_v54 = vpack.c.bf16 %v8268_v57, %v8267_v45 }
 0x686   :  { %7518 = vmatpush1.bf16.msra.mxu1 %v7475_v53 }
 0x687   :  { %7519 = vmatprep.subr.bf16.mxu1 %v7478_v14 }
 0x68a   :  { %7520 = vmatpush1.bf16.msra.mxu1 %v7477_v52 }
 0x68b   :  { %7532 = vmatprep.subr.bf16.mxu1 %v7480_v1 }
 0x68d   :  { %7522 = vmatmul.mubr.bf16.vlgmr.msra.gmra.mrb[184].mxu1 %v9985_v2 }
 0x68e   :  { %7533 = vmatpush1.bf16.msra.mxu1 %v7479_v31  ;;  %7564 = vmatprep.mubr.bf16.mxu1 %v14336_v16  ;;  %v9856_v16 = vld [vmem:[#allocation5 + $0x3e0] ss:$8 sps:$4 sm:$0xff]  }
 0x68f   :  { %7534 = vmatprep.subr.bf16.mxu1 %v7482_v37  ;;  %v7487_v51 = vmul.bf16 %v9856_v16, %v13226_v8  ;;  %v8276_v8 = vld [vmem:[%s13677_s6 + $0x2b8] sm:$0xff] }
 0x692   :  { %7535 = vmatpush1.bf16.msra.mxu1 %v7481_v35 }
 0x693   :  { %7536 = vmatprep.subr.bf16.mxu1 %v7484_v26 }
 0x696   :  { %7537 = vmatpush1.bf16.msra.mxu1 %v7483_v18 }
 0x697   :  { %7538 = vmatprep.subr.bf16.mxu1 %v7486_v23 }
 0x69a   :  { %7539 = vmatpush1.bf16.msra.mxu1 %v7485_v56 }
 0x69b   :  { %7540 = vmatprep.subr.bf16.mxu1 %v7488_v22 }
 0x69e   :  { %7541 = vmatpush1.bf16.msra.mxu1 %v7487_v51 }
 0x69f   :  { %8496 = vmatprep.subr.bf16.mxu1 %v13408_v9  ;;  %v8260_v9 = vld [vmem:[%s13677_s6 + $0x238] sm:$0xff] }
 0x6a0   :  { %v8478_v43 = vpack.c.bf16 %v8260_v9, %v8259_v42 }
 0x6a1   :  { %8252 = vmatmul.mubr.msk.bf16.vlgmr.msra.gmra.mrb[184].mxu1 %vm6508_vm5, %v13236_v41  ;;  %v8476_v41 = vpack.c.bf16 %v8276_v8, %v8275_v47 }
 0x6a2   :  { %8504 = vmatpush3.bf16.msra.mxu1 %v14358_v50 }
 0x6a3   :  { %8497 = vmatprep.subr.bf16.mxu1 %v14359_v30  ;;  %8477 = vmatprep.subr.bf16.mxu0 %v8476_v41 }
 0x6a4   :  { %8479 = vmatpush3.bf16.msra.mxu0 %v8478_v43 }
 0x6a5   :  { %8481 = vmatprep.subr.bf16.mxu0 %v8480_v10 }
 0x6a6   :  { %8505 = vmatpush3.bf16.msra.mxu1 %v14360_v38 }
 0x6a7   :  { %8498 = vmatprep.subr.bf16.mxu1 %v8472_v44 }
 0x6a8   :  { %8483 = vmatpush3.bf16.msra.mxu0 %v8482_v7 }
 0x6a9   :  { %8485 = vmatprep.subr.bf16.mxu0 %v8484_v20 }
 0x6aa   :  { %8506 = vmatpush3.bf16.msra.mxu1 %v8474_v36 }
 0x6ab   :  { %8499 = vmatprep.subr.bf16.mxu1 %v8476_v41 }
 0x6ac   :  { %8487 = vmatpush3.bf16.msra.mxu0 %v8486_v27 }
 0x6ad   :  { %8489 = vmatprep.subr.bf16.mxu0 %v8488_v32 }
 0x6ae   :  { %8507 = vmatpush3.bf16.msra.mxu1 %v8478_v43 }
 0x6af   :  { %8500 = vmatprep.subr.bf16.mxu1 %v8480_v10 }
 0x6b0   :  { %8491 = vmatpush3.bf16.msra.mxu0 %v8490_v34 }
 0x6b1   :  { %8493 = vmatprep.subr.bf16.mxu0 %v8492_v4 }
 0x6b2   :  { %8508 = vmatpush3.bf16.msra.mxu1 %v8482_v7 }
 0x6b3   :  { %8501 = vmatprep.subr.bf16.mxu1 %v8484_v20 }
 0x6b4   :  { %8495 = vmatpush3.bf16.msra.mxu0 %v8494_v54 }
 0x6b6   :  { %8509 = vmatpush3.bf16.msra.mxu1 %v8486_v27 }
 0x6b7   :  { %8502 = vmatprep.subr.bf16.mxu1 %v8488_v32 }
 0x6ba   :  { %8510 = vmatpush3.bf16.msra.mxu1 %v8490_v34 }
 0x6bb   :  { %8503 = vmatprep.subr.bf16.mxu1 %v8492_v4 }
 0x6be   :  { %8511 = vmatpush3.bf16.msra.mxu1 %v8494_v54 }
 0x700   :  { %v8318_v53 = vpop.f32.mrb[176].mxu1 }
 0x701   :  { %v8319_v11 = vpop.f32.mrb[177].mxu1 }
 0x702   :  { %v8320_v14 = vadd.f32 %v8319_v11, %v8318_v53 }
 0x704   :  { %v8321_v49 = vpop.f32.mrb[178].mxu1 }
 0x705   :  { %v8322_v63 = vpop.f32.mrb[179].mxu1 }
 0x706   :  { %v8323_v61 = vadd.f32 %v8322_v63, %v8321_v49 }
 0x720   :  { %v8356_v55 = vpop.f32.mrb[180].mxu1 }
 0x721   :  { %v8357_v44 = vpop.f32.mrb[181].mxu1 }
 0x722   :  { %v8358_v60 = vadd.f32 %v8357_v44, %v8356_v55 }
 0x724   :  { %v7186_v52 = vadd.f32 %v8358_v60, %v8320_v14  ;;  %v8359_v3 = vpop.f32.mrb[182].mxu1 }
 0x725   :  { %v8360_v36 = vpop.f32.mrb[183].mxu1 }
 0x726   :  { %v8361_v1 = vadd.f32 %v8360_v36, %v8359_v3 }
 0x728   :  { %v7191_v39 = vadd.f32 %v8361_v1, %v8323_v61 }
 0x774   :  { %v7566_v31 = vpop.f32.mrb[184].mxu1 }
 0x775   :  { %v7568_v24 = vpop.f32.mrb[185].mxu1 }
 0x776   :  { %v7570_v2 = vpop.f32.mrb[186].mxu1  ;;  %7672 = vmatprep.mubr.f32.mxu0 %v7568_v24 }
 0x777   :  { %v7572_v37 = vpop.f32.mrb[187].mxu1  ;;  %7673 = vmatmul.mubr.f32.vlgmr.msra.gmra.mrb[168].mxu0 %v7566_v31 }
 0x778   :  { %7677 = vmatprep.mubr.f32.mxu1 %v7572_v37 }
 0x779   :  { %7678 = vmatmul.mubr.f32.vlgmr.msra.gmra.mrb[188].mxu1 %v7570_v2 }
 0x84a   :  { %v8394_v19 = vpop.f32.mrb[168].mxu0 }
 0x84b   :  { %v8395_v35 = vpop.f32.mrb[169].mxu0 }
 0x84c   :  { %v8396_v59 = vadd.f32 %v8395_v35, %v8394_v19  ;;  %v8397_v26 = vpop.f32.mrb[188].mxu1 }
 0x84d   :  { %v8398_v18 = vpop.f32.mrb[189].mxu1 }
 0x84e   :  { %v7683_v62 = vadd.f32 %v8396_v59, %v7186_v52  ;;  %v8399_v23 = vadd.f32 %v8398_v18, %v8397_v26 }
 0x850   :  { %v7692_v5 = vadd.f32 %v8285_v28, %v7683_v62  ;;  %v7684_v56 = vadd.f32 %v8399_v23, %v7191_v39 }
 0x852   :  { %7694 = vst [vmem:[#allocation7] sm:$0xff] %v7692_v5  ;;  %v7693_v16 = vadd.f32 %v8285_v28, %v7684_v56 }
 0x854   :  { %7695 = vst [vmem:[#allocation7 + $0x8] sm:$0xff] %v7693_v16 }
 0x855   :  { %10041 = shalt.err (!%p10038_p6)
}
 0x856   :  { %s10042_s11 = scalar_lea.hbm %s13679_s8, 256 }
 0x857   :  { %p10043_p7 = scmp.ne.s32.totalorder %s13679_s8, %s10042_s11  ;;  %p10046_p8 = scmp.lt.u32.totalorder %s10042_s11, %s13679_s8 }
 0x859   :  { %p10048_p9 = pnand %p10046_p8, %p10043_p7 }
 0x85b   :  { %10051 = shalt.err (!%p10048_p9)
}
 0x85c   :  { %7707 = dma.vmem_to_hbm [thread:$0]  %s7702_s3, 256, %s13679_s8, [#allocation4], %s10059_s15, %s10059_s15, %s10060_s16  }
 0x85d   :  { %10056 = dma.done.wait [#allocation4], 256  }
 0x85e   :  { %10057 = vsyncadd [#allocation4], 4294967040 }
 0x85f   :  { %7711 = vsyncpa [#allocation3], 1 }
 0x860   :  { %7712 = vsyncpa [#allocation6], 1 }
 0x861   :  { %7713 = vsyncpa [#allocation4], 1 }

</bundles_post_ra>
